<compile_context>
chip_gen: v7x
topology: tpu7x:2x2x1
jax: 0.10.0
libtpu: 0.0.40
codegen_flags: <defaults>
</compile_context>

<pallas_src>
import jax
import jax.numpy as jnp
from jax.experimental import pallas as pl
from jax.experimental.pallas import tpu as pltpu

NEF = 100
NZF = 100
LRELU_SLOPE = 0.2
BN_EPS = 1e-5
KSIZE = 4
LANE = 128
MAX_TM = 1024          # matmul M-tile cap
MAX_TM_ELEM = 8192     # elementwise (affine+lrelu) M-tile cap


def _tpu_vmem_bytes():
    try:
        return int(pltpu.get_tpu_info().vmem_capacity_bytes)
    except Exception:              # conservative (v7x-sized) fallback
        return 64 * 1024 * 1024


_VMEM_BYTES = _tpu_vmem_bytes()
# v7x (64 MiB):   48 MiB scoped limit,  4 /  8 MiB tile budgets.
# v5e/v6e (128):  96 MiB scoped limit,  8 / 16 MiB tile budgets.
VMEM_LIMIT = int(min(_VMEM_BYTES * 3 // 4, _VMEM_BYTES - (16 << 20)))
_BIG_VMEM = _VMEM_BYTES >= (96 << 20)
A_TILE_BUDGET = (8 << 20) if _BIG_VMEM else (4 << 20)
B_TILE_BUDGET = (16 << 20) if _BIG_VMEM else (8 << 20)
ELEM_TILE_BUDGET = (16 << 20) if _BIG_VMEM else (8 << 20)


# ------------------------------- helpers -----------------------------------

def _round_up(x, m):
    return ((x + m - 1) // m) * m


def _compiler_params(n_axes):
    return pltpu.CompilerParams(dimension_semantics=("parallel",) * n_axes,
                                vmem_limit_bytes=VMEM_LIMIT)


def _pick_tm(m, row_bytes, budget, max_tm):
    """Largest divisor of m (power-of-two preferred, sublane-aligned or the
    full dim) whose per-tile footprint fits `budget`, preferring >= 2 tiles so
    both v7x TensorCores get work.  Never returns a non-divisor and only
    exceeds the budget if the smallest layout-legal tile already does."""
    divs = [t for t in range(1, min(m, max_tm) + 1)
            if m % t == 0 and (t % 8 == 0 or t == m)]
    if not divs:                       # m > max_tm with no aligned divisor
        divs = [m]
    fit = [t for t in divs if t * row_bytes <= budget] or divs[:1]
    pow2 = [t for t in fit if t & (t - 1) == 0]
    pool = pow2 or fit
    multi = [t for t in pool if t < m]
    return max(multi) if multi else max(pool)


def _matmul_tiles(p, m, k, cp):
    """(tm, tn) for a (p, m, k) @ (p, k, cp) call.  tn keeps the (k, tn)
    weight block within budget; tm budgets the bf16 A row plus the f32
    matmul / stats temporaries; a final split guarantees >= 2 grid tiles."""
    tn = cp
    while k * tn * 2 > B_TILE_BUDGET and tn % 256 == 0:
        tn //= 2
    tm = _pick_tm(m, 2 * k + 10 * tn, A_TILE_BUDGET, MAX_TM)
    if p * (m // tm) * (cp // tn) == 1 and tn % 256 == 0:
        tn //= 2   # tiny-M layers: split columns so both v7x TCs stay busy
    return tm, tn


# ----------------------------- Pallas kernels -------------------------------

def _matmul_stats_kernel(a_ref, b_ref, y_ref, s_ref, ss_ref):
    """One (phase, M-tile, col-tile) block of Y = A @ B (bf16 in, f32 MXU
    accumulate, bf16 out) plus partial column sum / sum-of-squares for
    training-mode BatchNorm.  The f32 y / y*y temporaries are covered by the
    A-tile budget (10 B per row*col), bounding vreg / VMEM pressure."""
    y = jnp.dot(a_ref[...], b_ref[...], preferred_element_type=jnp.float32)
    y_ref[...] = y.astype(y_ref.dtype)
    s_ref[...] = jnp.sum(y, axis=0, keepdims=True)
    ss_ref[...] = jnp.sum(y * y, axis=0, keepdims=True)


def _matmul_bias_tanh_kernel(a_ref, b_ref, bias_ref, o_ref):
    y = jnp.dot(a_ref[...], b_ref[...], preferred_element_type=jnp.float32)
    o_ref[...] = jnp.tanh(y + bias_ref[...]).astype(o_ref.dtype)


def _affine_lrelu_kernel(y_ref, scale_ref, shift_ref, o_ref):
    z = y_ref[...].astype(jnp.float32) * scale_ref[...] + shift_ref[...]
    o_ref[...] = jnp.where(z >= 0.0, z, LRELU_SLOPE * z).astype(o_ref.dtype)


# ----------------------------- Pallas wrappers ------------------------------

def matmul_stats(a, b):
    """a: (P, M, K) bf16, b: (P, K, CP) bf16 -> (y bf16 (P, M, CP),
    partial column sums f32 (P, gm, 1, CP), partial column sumsq f32)."""
    p, m, k = a.shape
    cp = b.shape[2]
    tm, tn = _matmul_tiles(p, m, k, cp)
    gm, gn = m // tm, cp // tn
    cost = pl.CostEstimate(
        flops=int(2 * p * m * k * cp + 3 * p * m * cp),
        transcendentals=0,
        bytes_accessed=int(p * (m * k + gm * k * cp + m * cp) * 2
                           + 2 * p * gm * cp * 4))
    return pl.pallas_call(
        _matmul_stats_kernel,
        out_shape=(jax.ShapeDtypeStruct((p, m, cp), jnp.bfloat16),
                   jax.ShapeDtypeStruct((p, gm, 1, cp), jnp.float32),
                   jax.ShapeDtypeStruct((p, gm, 1, cp), jnp.float32)),
        grid=(p, gm, gn),
        in_specs=[pl.BlockSpec((None, tm, k), lambda pp, i, j: (pp, i, 0)),
                  # Per-phase / per-column-tile weight blocks are small after
                  # the sub-pixel split, so default double-buffering no longer
                  # threatens the v7x VMEM limit (old 16 MiB-B concern).
                  pl.BlockSpec((None, k, tn), lambda pp, i, j: (pp, 0, j))],
        out_specs=(pl.BlockSpec((None, tm, tn), lambda pp, i, j: (pp, i, j)),
                   pl.BlockSpec((None, None, 1, tn),
                                lambda pp, i, j: (pp, i, 0, j)),
                   pl.BlockSpec((None, None, 1, tn),
                                lambda pp, i, j: (pp, i, 0, j))),
        compiler_params=_compiler_params(3),
        cost_estimate=cost,
    )(a, b)


def matmul_bias_tanh(a, b, bias):
    """Final layer: Y = tanh(A @ B + bias), bf16 out (the 3 real channels are
    sliced / cast to f32 in the wrapper, halving the padded-lane store)."""
    p, m, k = a.shape
    cp = b.shape[2]
    tm, tn = _matmul_tiles(p, m, k, cp)
    gm, gn = m // tm, cp // tn
    cost = pl.CostEstimate(
        flops=int(2 * p * m * k * cp + p * m * cp),
        transcendentals=int(p * m * cp),
        bytes_accessed=int(p * (m * k + gm * k * cp + m * cp) * 2 + cp * 4))
    return pl.pallas_call(
        _matmul_bias_tanh_kernel,
        out_shape=jax.ShapeDtypeStruct((p, m, cp), jnp.bfloat16),
        grid=(p, gm, gn),
        in_specs=[pl.BlockSpec((None, tm, k), lambda pp, i, j: (pp, i, 0)),
                  pl.BlockSpec((None, k, tn), lambda pp, i, j: (pp, 0, j)),
                  pl.BlockSpec((1, tn), lambda pp, i, j: (0, j))],
        out_specs=pl.BlockSpec((None, tm, tn), lambda pp, i, j: (pp, i, j)),
        compiler_params=_compiler_params(3),
        cost_estimate=cost,
    )(a, b, bias)


def affine_lrelu(y, scale, shift):
    """Row-tiled y * scale + shift -> LeakyReLU(0.2); bf16 in / bf16 out with
    a larger tile budget than the matmuls (memory-bound kernel)."""
    m, c = y.shape
    tm = _pick_tm(m, 8 * c, ELEM_TILE_BUDGET, MAX_TM_ELEM)
    cost = pl.CostEstimate(flops=int(3 * m * c), transcendentals=0,
                           bytes_accessed=int(4 * m * c + 8 * c))
    return pl.pallas_call(
        _affine_lrelu_kernel,
        out_shape=jax.ShapeDtypeStruct((m, c), jnp.bfloat16),
        grid=(m // tm,),
        in_specs=[pl.BlockSpec((tm, c), lambda i: (i, 0)),
                  pl.BlockSpec((1, c), lambda i: (0, 0)),
                  pl.BlockSpec((1, c), lambda i: (0, 0))],
        out_specs=pl.BlockSpec((tm, c), lambda i: (i, 0)),
        compiler_params=_compiler_params(1),
        cost_estimate=cost,
    )(y, scale, shift)


# ------------------------------- XLA glue -----------------------------------

def _bn_affine(col_sum, col_sumsq, count, gamma, beta, cout_p):
    """Training-mode BatchNorm folded into a per-channel (scale, shift)."""
    cout = gamma.shape[0]
    mean = col_sum / count
    var = jnp.maximum(col_sumsq / count - mean * mean, 0.0)
    g = jnp.pad(gamma, (0, cout_p - cout))
    b = jnp.pad(beta, (0, cout_p - cout))
    scale = g * jax.lax.rsqrt(var + BN_EPS)
    shift = b - mean * scale
    return (scale.reshape(1, -1).astype(jnp.float32),
            shift.reshape(1, -1).astype(jnp.float32))


def _subpixel_patches(x):
    """x: (N, H, W, Cin) NHWC -> A: (4, N*H*W, 4*Cin) bf16.
    Phase p = ry*2 + rx holds the output pixels (2i+ry, 2j+rx) of a
    ConvTranspose2d(k=4, s=2, p=1); each phase is a plain 2x2 conv over a
    1-pixel-padded input, so K = 4*Cin with no stride-2 zero rows.
    Column order is (dy, dx, cin), matching `_subpixel_weights`."""
    n, h, w, c = x.shape
    phases = []
    for ry in (0, 1):
        for rx in (0, 1):
            xp = jnp.pad(x, ((0, 0), (1 - ry, ry), (1 - rx, rx), (0, 0)))
            taps = [xp[:, dy:dy + h, dx:dx + w, :]
                    for dy in (0, 1) for dx in (0, 1)]
            phases.append(jnp.concatenate(taps, axis=-1)
                          .reshape(n * h * w, 4 * c))
    # TODO(synk): stream these 4 taps per phase from the padded input inside
    # the matmul kernel instead of materializing the patch matrices in HBM.
    return jnp.stack(phases, axis=0)


def _subpixel_weights(wt, cout_p):
    """PyTorch ConvTranspose2d weight (Cin, Cout, 4, 4) -> B: (4, 4*Cin,
    Cout_padded) bf16.  Phase p = ry*2 + rx keeps only its 2x2 sub-kernel:
    tap (dy, dx) uses W[:, :, (3-ry)-2*dy, (3-rx)-2*dx]."""
    cin, cout = wt.shape[0], wt.shape[1]
    mats = []
    for ry in (0, 1):
        for rx in (0, 1):
            sub = wt[:, :, [3 - ry, 1 - ry], :][:, :, :, [3 - rx, 1 - rx]]
            bmat = sub.transpose(2, 3, 0, 1).reshape(4 * cin, cout)
            mats.append(jnp.pad(bmat, ((0, 0), (0, cout_p - cout))))
    return jnp.stack(mats, axis=0).astype(jnp.bfloat16)


def _interleave_phases(yp, n, h, w, cout):
    """(4, N*H*W, Cp) phase outputs -> (N, 2H, 2W, cout) NHWC image."""
    cp = yp.shape[-1]
    z = yp.reshape(2, 2, n, h, w, cp).transpose(2, 3, 0, 4, 1, 5)
    return z.reshape(n, 2 * h, 2 * w, cp)[..., :cout]


# ------------------------------ layer builders ------------------------------

def deconv1x1_bn_lrelu(x2d, wt, gamma, beta):
    """deconv1_1: ConvTranspose2d(k=4, s=1, p=0) on a 1x1 input is exactly
    out[n, ky, kx, co] = sum_ci x[n, ci] * W[ci, co, ky, kx], i.e. a single
    (N, Cin) @ (Cin, 16*Cout) matmul -- no padded-patch im2col (16x K cut).
    The conv bias cancels under batch-stat BN and is omitted."""
    n, cin = x2d.shape
    cout = wt.shape[1]
    cout_p = _round_up(cout, LANE)
    bmat = jnp.pad(wt.transpose(0, 2, 3, 1),              # (Cin, 4, 4, Cout)
                   ((0, 0), (0, 0), (0, 0), (0, cout_p - cout)))
    bmat = bmat.reshape(1, cin, 16 * cout_p).astype(jnp.bfloat16)
    a = x2d.reshape(1, n, cin).astype(jnp.bfloat16)
    y, s, ss = matmul_stats(a, bmat)                       # (1, N, 16*Cout_p)
    count = float(n * 16)
    col_sum = jnp.sum(s.reshape(-1, 16, cout_p), axis=(0, 1))
    col_sumsq = jnp.sum(ss.reshape(-1, 16, cout_p), axis=(0, 1))
    scale, shift = _bn_affine(col_sum, col_sumsq, count, gamma, beta, cout_p)
    out = affine_lrelu(y.reshape(n * 16, cout_p), scale, shift)
    return out.reshape(n, KSIZE, KSIZE, cout_p)[..., :cout]


def deconv_s2_bn_lrelu(x, wt, gamma, beta):
    """ConvTranspose2d(k=4, s=2, p=1) -> training-mode BatchNorm ->
    LeakyReLU(0.2), via the 4-phase sub-pixel decomposition."""
    n, h, w, _ = x.shape
    cout = wt.shape[1]
    cout_p = _round_up(cout, LANE)
    a = _subpixel_patches(x)                               # (4, N*H*W, 4*Cin)
    b = _subpixel_weights(wt, cout_p)                      # (4, 4*Cin, Cout_p)
    y, s, ss = matmul_stats(a, b)                          # (4, M, Cout_p)
    count = float(4 * n * h * w)
    scale, shift = _bn_affine(jnp.sum(s, axis=(0, 1, 2)),
                              jnp.sum(ss, axis=(0, 1, 2)),
                              count, gamma, beta, cout_p)
    act = affine_lrelu(y.reshape(4 * n * h * w, cout_p), scale, shift)
    return _interleave_phases(act.reshape(4, n * h * w, cout_p),
                              n, h, w, cout)


def deconv_s2_tanh(x, wt, bias):
    """Final ConvTranspose2d(k=4, s=2, p=1) -> tanh (bias kept, no BN)."""
    n, h, w, _ = x.shape
    cout = wt.shape[1]
    cout_p = _round_up(cout, LANE)
    a = _subpixel_patches(x)
    b = _subpixel_weights(wt, cout_p)
    bias_p = jnp.pad(bias, (0, cout_p - cout)).reshape(1, -1)
    y = matmul_bias_tanh(a, b, bias_p.astype(jnp.float32))  # bf16 (4, M, Cp)
    return _interleave_phases(y, n, h, w, cout)


# --------------------------- generator module -------------------------------

def generator_config(d=128, in_ch=NEF + NZF):
    return (
        dict(cin=in_ch, cout=d * 8, bn=True),    # deconv1_1 (k=4, s=1, p=0)
        dict(cin=d * 8, cout=d * 4, bn=True),    # deconv2   (k=4, s=2, p=1)
        dict(cin=d * 4, cout=d * 2, bn=True),    # deconv3
        dict(cin=d * 2, cout=d,     bn=True),    # deconv4
        dict(cin=d,     cout=3,     bn=False),   # deconv5
    )


def init_generator_params(key, cfg):
    """weight_init(0, 0.02): ConvTranspose2d weights ~ N(0, 0.02), biases 0;
    BatchNorm gamma=1, beta=0 (PyTorch defaults).  Arrays only (jit-safe)."""
    params = []
    for c, kk in zip(cfg, jax.random.split(key, len(cfg))):
        layer = {
            "w": 0.02 * jax.random.normal(
                kk, (c["cin"], c["cout"], KSIZE, KSIZE), jnp.float32),
            "b": jnp.zeros((c["cout"],), jnp.float32),
        }
        if c["bn"]:
            layer["gamma"] = jnp.ones((c["cout"],), jnp.float32)
            layer["beta"] = jnp.zeros((c["cout"],), jnp.float32)
        params.append(layer)
    return params


def generator_forward(params, z):
    """z: (N, nef+nzf, 1, 1) NCHW -> image (N, 3, 64, 64) NCHW f32, matching
    the PyTorch generator.forward (training-mode BatchNorm statistics)."""
    n = z.shape[0]
    p1, p2, p3, p4, p5 = params
    x = deconv1x1_bn_lrelu(z.reshape(n, -1), p1["w"], p1["gamma"], p1["beta"])
    x = deconv_s2_bn_lrelu(x, p2["w"], p2["gamma"], p2["beta"])
    x = deconv_s2_bn_lrelu(x, p3["w"], p3["gamma"], p3["beta"])
    x = deconv_s2_bn_lrelu(x, p4["w"], p4["gamma"], p4["beta"])
    x = deconv_s2_tanh(x, p5["w"], p5["b"])                # (N, 64, 64, 3)
    return jnp.transpose(x, (0, 3, 1, 2)).astype(jnp.float32)


if __name__ == "__main__":
    key = jax.random.PRNGKey(0)
    kp, kz = jax.random.split(key)

    d = 32        # generator width (module default is 128; small for the test)
    batch = 2
    cfg = generator_config(d=d)
    params = init_generator_params(kp, cfg)
    z = jax.random.normal(kz, (batch, NEF + NZF, 1, 1), jnp.float32)

    fwd = jax.jit(generator_forward)
    out = jax.block_until_ready(fwd(params, z))

    assert out.shape == (batch, 3, 64, 64), out.shape
    assert out.dtype == jnp.float32
    assert bool(jnp.all(jnp.isfinite(out)))
    assert bool(jnp.all(jnp.abs(out) <= 1.0))   # tanh output range
    print("KERNEL_OK")
</pallas_src>

<mosaic_0001>
module attributes {stable_mosaic.version = 11 : i64} {
  func.func @_matmul_stats_kernel(%arg0: i32, %arg1: i32, %arg2: i32, %arg3: memref<1x2x200xbf16, #tpu.memory_space<vmem>>, %arg4: memref<1x200x2048xbf16, #tpu.memory_space<vmem>>, %arg5: memref<1x2x2048xbf16, #tpu.memory_space<vmem>>, %arg6: memref<1x1x1x2048xf32, #tpu.memory_space<vmem>>, %arg7: memref<1x1x1x2048xf32, #tpu.memory_space<vmem>>) attributes {dimension_semantics = [#tpu.dimension_semantics<parallel>, #tpu.dimension_semantics<parallel>, #tpu.dimension_semantics<parallel>], iteration_bounds = array<i64: 1, 1, 2>, scalar_prefetch = 0 : i64, scratch_operands = 0 : i64, tpu.core_type = #tpu.core_type<tc>, window_params = [{transform_indices = @transform_0, window_bounds = array<i64: 1, 2, 200>}, {transform_indices = @transform_1, window_bounds = array<i64: 1, 200, 2048>}, {transform_indices = @transform_2, window_bounds = array<i64: 1, 2, 2048>}, {transform_indices = @transform_3, window_bounds = array<i64: 1, 1, 1, 2048>}, {transform_indices = @transform_4, window_bounds = array<i64: 1, 1, 1, 2048>}]} {
    %c0 = arith.constant 0 : index
    %c0_0 = arith.constant 0 : index
    %c0_1 = arith.constant 0 : index
    %0 = vector.load %arg3[%c0, %c0_0, %c0_1] : memref<1x2x200xbf16, #tpu.memory_space<vmem>>, vector<1x2x200xbf16>
    %1 = vector.shape_cast %0 : vector<1x2x200xbf16> to vector<2x200xbf16>
    %c0_2 = arith.constant 0 : index
    %c0_3 = arith.constant 0 : index
    %c0_4 = arith.constant 0 : index
    %2 = vector.load %arg4[%c0_2, %c0_3, %c0_4] : memref<1x200x2048xbf16, #tpu.memory_space<vmem>>, vector<1x200x2048xbf16>
    %3 = vector.shape_cast %2 : vector<1x200x2048xbf16> to vector<200x2048xbf16>
    %cst = arith.constant dense<0.000000e+00> : vector<2x2048xf32>
    %4 = tpu.matmul %1, %3, %cst {dimension_numbers = #tpu.dot_dimension_numbers<[1], [0], [0], [1], [0, 0, 1, 1], [], []>} : vector<2x200xbf16>, vector<200x2048xbf16>, vector<2x2048xf32> -> vector<2x2048xf32>
    %5 = arith.truncf %4 : vector<2x2048xf32> to vector<2x2048xbf16>
    %c0_5 = arith.constant 0 : index
    %c0_6 = arith.constant 0 : index
    %c0_7 = arith.constant 0 : index
    %6 = vector.load %arg5[%c0_5, %c0_6, %c0_7] : memref<1x2x2048xbf16, #tpu.memory_space<vmem>>, vector<1x2x2048xbf16>
    %7 = vector.shape_cast %6 : vector<1x2x2048xbf16> to vector<2x2048xbf16>
    %8 = vector.shape_cast %5 : vector<2x2048xbf16> to vector<1x2x2048xbf16>
    tpu.vector_store %arg5[%c0_5, %c0_6, %c0_7], %8 {strides = array<i32>} : memref<1x2x2048xbf16, #tpu.memory_space<vmem>>, vector<1x2x2048xbf16>,
    %cst_8 = arith.constant dense<0.000000e+00> : vector<2048xf32>
    %9 = vector.multi_reduction <add>, %4, %cst_8 [0] : vector<2x2048xf32> to vector<2048xf32>
    %10 = vector.shape_cast %9 : vector<2048xf32> to vector<1x2048xf32>
    %c0_9 = arith.constant 0 : index
    %c0_10 = arith.constant 0 : index
    %c0_11 = arith.constant 0 : index
    %c0_12 = arith.constant 0 : index
    %11 = vector.load %arg6[%c0_9, %c0_10, %c0_11, %c0_12] : memref<1x1x1x2048xf32, #tpu.memory_space<vmem>>, vector<1x1x1x2048xf32>
    %12 = vector.shape_cast %11 : vector<1x1x1x2048xf32> to vector<1x2048xf32>
    %13 = vector.shape_cast %10 : vector<1x2048xf32> to vector<1x1x1x2048xf32>
    tpu.vector_store %arg6[%c0_9, %c0_10, %c0_11, %c0_12], %13 {strides = array<i32>} : memref<1x1x1x2048xf32, #tpu.memory_space<vmem>>, vector<1x1x1x2048xf32>,
    %14 = arith.mulf %4, %4 : vector<2x2048xf32>
    %cst_13 = arith.constant dense<0.000000e+00> : vector<2048xf32>
    %15 = vector.multi_reduction <add>, %14, %cst_13 [0] : vector<2x2048xf32> to vector<2048xf32>
    %16 = vector.shape_cast %15 : vector<2048xf32> to vector<1x2048xf32>
    %c0_14 = arith.constant 0 : index
    %c0_15 = arith.constant 0 : index
    %c0_16 = arith.constant 0 : index
    %c0_17 = arith.constant 0 : index
    %17 = vector.load %arg7[%c0_14, %c0_15, %c0_16, %c0_17] : memref<1x1x1x2048xf32, #tpu.memory_space<vmem>>, vector<1x1x1x2048xf32>
    %18 = vector.shape_cast %17 : vector<1x1x1x2048xf32> to vector<1x2048xf32>
    %19 = vector.shape_cast %16 : vector<1x2048xf32> to vector<1x1x1x2048xf32>
    tpu.vector_store %arg7[%c0_14, %c0_15, %c0_16, %c0_17], %19 {strides = array<i32>} : memref<1x1x1x2048xf32, #tpu.memory_space<vmem>>, vector<1x1x1x2048xf32>,
    return
  }
  func.func @transform_0(%arg0: i32, %arg1: i32, %arg2: i32) -> (i32, i32, i32) {
    %c0_i32 = arith.constant 0 : i32
    %c0_i32_0 = arith.constant 0 : i32
    return %arg0, %arg1, %c0_i32 : i32, i32, i32
  }
  func.func @transform_1(%arg0: i32, %arg1: i32, %arg2: i32) -> (i32, i32, i32) {
    %c0_i32 = arith.constant 0 : i32
    %c0_i32_0 = arith.constant 0 : i32
    return %arg0, %c0_i32, %arg2 : i32, i32, i32
  }
  func.func @transform_2(%arg0: i32, %arg1: i32, %arg2: i32) -> (i32, i32, i32) {
    %c0_i32 = arith.constant 0 : i32
    return %arg0, %arg1, %arg2 : i32, i32, i32
  }
  func.func @transform_3(%arg0: i32, %arg1: i32, %arg2: i32) -> (i32, i32, i32, i32) {
    %c0_i32 = arith.constant 0 : i32
    %c0_i32_0 = arith.constant 0 : i32
    return %arg0, %arg1, %c0_i32, %arg2 : i32, i32, i32, i32
  }
  func.func @transform_4(%arg0: i32, %arg1: i32, %arg2: i32) -> (i32, i32, i32, i32) {
    %c0_i32 = arith.constant 0 : i32
    %c0_i32_0 = arith.constant 0 : i32
    return %arg0, %arg1, %c0_i32, %arg2 : i32, i32, i32, i32
  }
}

module attributes {stable_mosaic.version = 11 : i64} {
  func.func @_affine_lrelu_kernel(%arg0: i32, %arg1: memref<16x256xbf16, #tpu.memory_space<vmem>>, %arg2: memref<1x256xf32, #tpu.memory_space<vmem>>, %arg3: memref<1x256xf32, #tpu.memory_space<vmem>>, %arg4: memref<16x256xbf16, #tpu.memory_space<vmem>>) attributes {dimension_semantics = [#tpu.dimension_semantics<parallel>], iteration_bounds = array<i64: 2>, scalar_prefetch = 0 : i64, scratch_operands = 0 : i64, tpu.core_type = #tpu.core_type<tc>, window_params = [{transform_indices = @transform_0, window_bounds = array<i64: 16, 256>}, {pipeline_mode = #tpu.pipeline_mode<synchronous>, transform_indices = @transform_1, window_bounds = array<i64: 1, 256>}, {pipeline_mode = #tpu.pipeline_mode<synchronous>, transform_indices = @transform_2, window_bounds = array<i64: 1, 256>}, {transform_indices = @transform_3, window_bounds = array<i64: 16, 256>}]} {
    %c0 = arith.constant 0 : index
    %c0_0 = arith.constant 0 : index
    %0 = vector.load %arg1[%c0, %c0_0] : memref<16x256xbf16, #tpu.memory_space<vmem>>, vector<16x256xbf16>
    %1 = arith.extf %0 : vector<16x256xbf16> to vector<16x256xf32>
    %c0_1 = arith.constant 0 : index
    %c0_2 = arith.constant 0 : index
    %2 = vector.load %arg2[%c0_1, %c0_2] : memref<1x256xf32, #tpu.memory_space<vmem>>, vector<1x256xf32>
    %3 = vector.broadcast %2 : vector<1x256xf32> to vector<16x256xf32>
    %4 = arith.mulf %1, %3 : vector<16x256xf32>
    %c0_3 = arith.constant 0 : index
    %c0_4 = arith.constant 0 : index
    %5 = vector.load %arg3[%c0_3, %c0_4] : memref<1x256xf32, #tpu.memory_space<vmem>>, vector<1x256xf32>
    %6 = vector.broadcast %5 : vector<1x256xf32> to vector<16x256xf32>
    %7 = arith.addf %4, %6 : vector<16x256xf32>
    %cst = arith.constant 0.000000e+00 : f32
    %8 = vector.broadcast %cst : f32 to vector<16x256xf32>
    %9 = arith.cmpf oge, %7, %8 : vector<16x256xf32>
    %cst_5 = arith.constant 2.000000e-01 : f32
    %10 = vector.broadcast %cst_5 : f32 to vector<16x256xf32>
    %11 = arith.mulf %10, %7 : vector<16x256xf32>
    %12 = arith.select %9, %7, %11 : vector<16x256xi1>, vector<16x256xf32>
    %13 = arith.truncf %12 : vector<16x256xf32> to vector<16x256xbf16>
    %c0_6 = arith.constant 0 : index
    %c0_7 = arith.constant 0 : index
    %14 = vector.load %arg4[%c0_6, %c0_7] : memref<16x256xbf16, #tpu.memory_space<vmem>>, vector<16x256xbf16>
    tpu.vector_store %arg4[%c0_6, %c0_7], %13 {strides = array<i32>} : memref<16x256xbf16, #tpu.memory_space<vmem>>, vector<16x256xbf16>,
    return
  }
  func.func @transform_0(%arg0: i32) -> (i32, i32) {
    %c0_i32 = arith.constant 0 : i32
    %c0_i32_0 = arith.constant 0 : i32
    return %arg0, %c0_i32 : i32, i32
  }
  func.func @transform_1(%arg0: i32) -> (i32, i32) {
    %c0_i32 = arith.constant 0 : i32
    %c0_i32_0 = arith.constant 0 : i32
    %c0_i32_1 = arith.constant 0 : i32
    return %c0_i32, %c0_i32_0 : i32, i32
  }
  func.func @transform_2(%arg0: i32) -> (i32, i32) {
    %c0_i32 = arith.constant 0 : i32
    %c0_i32_0 = arith.constant 0 : i32
    %c0_i32_1 = arith.constant 0 : i32
    return %c0_i32, %c0_i32_0 : i32, i32
  }
  func.func @transform_3(%arg0: i32) -> (i32, i32) {
    %c0_i32 = arith.constant 0 : i32
    %c0_i32_0 = arith.constant 0 : i32
    return %arg0, %c0_i32 : i32, i32
  }
}

module attributes {stable_mosaic.version = 11 : i64} {
  func.func @_matmul_stats_kernel(%arg0: i32, %arg1: i32, %arg2: i32, %arg3: memref<1x16x1024xbf16, #tpu.memory_space<vmem>>, %arg4: memref<1x1024x128xbf16, #tpu.memory_space<vmem>>, %arg5: memref<1x16x128xbf16, #tpu.memory_space<vmem>>, %arg6: memref<1x1x1x128xf32, #tpu.memory_space<vmem>>, %arg7: memref<1x1x1x128xf32, #tpu.memory_space<vmem>>) attributes {dimension_semantics = [#tpu.dimension_semantics<parallel>, #tpu.dimension_semantics<parallel>, #tpu.dimension_semantics<parallel>], iteration_bounds = array<i64: 4, 2, 1>, scalar_prefetch = 0 : i64, scratch_operands = 0 : i64, tpu.core_type = #tpu.core_type<tc>, window_params = [{transform_indices = @transform_0, window_bounds = array<i64: 1, 16, 1024>}, {transform_indices = @transform_1, window_bounds = array<i64: 1, 1024, 128>}, {transform_indices = @transform_2, window_bounds = array<i64: 1, 16, 128>}, {transform_indices = @transform_3, window_bounds = array<i64: 1, 1, 1, 128>}, {transform_indices = @transform_4, window_bounds = array<i64: 1, 1, 1, 128>}]} {
    %c0 = arith.constant 0 : index
    %c0_0 = arith.constant 0 : index
    %c0_1 = arith.constant 0 : index
    %0 = vector.load %arg3[%c0, %c0_0, %c0_1] : memref<1x16x1024xbf16, #tpu.memory_space<vmem>>, vector<1x16x1024xbf16>
    %1 = vector.shape_cast %0 : vector<1x16x1024xbf16> to vector<16x1024xbf16>
    %c0_2 = arith.constant 0 : index
    %c0_3 = arith.constant 0 : index
    %c0_4 = arith.constant 0 : index
    %2 = vector.load %arg4[%c0_2, %c0_3, %c0_4] : memref<1x1024x128xbf16, #tpu.memory_space<vmem>>, vector<1x1024x128xbf16>
    %3 = vector.shape_cast %2 : vector<1x1024x128xbf16> to vector<1024x128xbf16>
    %cst = arith.constant dense<0.000000e+00> : vector<16x128xf32>
    %4 = tpu.matmul %1, %3, %cst {dimension_numbers = #tpu.dot_dimension_numbers<[1], [0], [0], [1], [0, 0, 1, 1], [], []>} : vector<16x1024xbf16>, vector<1024x128xbf16>, vector<16x128xf32> -> vector<16x128xf32>
    %5 = arith.truncf %4 : vector<16x128xf32> to vector<16x128xbf16>
    %c0_5 = arith.constant 0 : index
    %c0_6 = arith.constant 0 : index
    %c0_7 = arith.constant 0 : index
    %6 = vector.load %arg5[%c0_5, %c0_6, %c0_7] : memref<1x16x128xbf16, #tpu.memory_space<vmem>>, vector<1x16x128xbf16>
    %7 = vector.shape_cast %6 : vector<1x16x128xbf16> to vector<16x128xbf16>
    %8 = vector.shape_cast %5 : vector<16x128xbf16> to vector<1x16x128xbf16>
    tpu.vector_store %arg5[%c0_5, %c0_6, %c0_7], %8 {strides = array<i32>} : memref<1x16x128xbf16, #tpu.memory_space<vmem>>, vector<1x16x128xbf16>,
    %cst_8 = arith.constant dense<0.000000e+00> : vector<128xf32>
    %9 = vector.multi_reduction <add>, %4, %cst_8 [0] : vector<16x128xf32> to vector<128xf32>
    %10 = vector.shape_cast %9 : vector<128xf32> to vector<1x128xf32>
    %c0_9 = arith.constant 0 : index
    %c0_10 = arith.constant 0 : index
    %c0_11 = arith.constant 0 : index
    %c0_12 = arith.constant 0 : index
    %11 = vector.load %arg6[%c0_9, %c0_10, %c0_11, %c0_12] : memref<1x1x1x128xf32, #tpu.memory_space<vmem>>, vector<1x1x1x128xf32>
    %12 = vector.shape_cast %11 : vector<1x1x1x128xf32> to vector<1x128xf32>
    %13 = vector.shape_cast %10 : vector<1x128xf32> to vector<1x1x1x128xf32>
    tpu.vector_store %arg6[%c0_9, %c0_10, %c0_11, %c0_12], %13 {strides = array<i32>} : memref<1x1x1x128xf32, #tpu.memory_space<vmem>>, vector<1x1x1x128xf32>,
    %14 = arith.mulf %4, %4 : vector<16x128xf32>
    %cst_13 = arith.constant dense<0.000000e+00> : vector<128xf32>
    %15 = vector.multi_reduction <add>, %14, %cst_13 [0] : vector<16x128xf32> to vector<128xf32>
    %16 = vector.shape_cast %15 : vector<128xf32> to vector<1x128xf32>
    %c0_14 = arith.constant 0 : index
    %c0_15 = arith.constant 0 : index
    %c0_16 = arith.constant 0 : index
    %c0_17 = arith.constant 0 : index
    %17 = vector.load %arg7[%c0_14, %c0_15, %c0_16, %c0_17] : memref<1x1x1x128xf32, #tpu.memory_space<vmem>>, vector<1x1x1x128xf32>
    %18 = vector.shape_cast %17 : vector<1x1x1x128xf32> to vector<1x128xf32>
    %19 = vector.shape_cast %16 : vector<1x128xf32> to vector<1x1x1x128xf32>
    tpu.vector_store %arg7[%c0_14, %c0_15, %c0_16, %c0_17], %19 {strides = array<i32>} : memref<1x1x1x128xf32, #tpu.memory_space<vmem>>, vector<1x1x1x128xf32>,
    return
  }
  func.func @transform_0(%arg0: i32, %arg1: i32, %arg2: i32) -> (i32, i32, i32) {
    %c0_i32 = arith.constant 0 : i32
    %c0_i32_0 = arith.constant 0 : i32
    return %arg0, %arg1, %c0_i32 : i32, i32, i32
  }
  func.func @transform_1(%arg0: i32, %arg1: i32, %arg2: i32) -> (i32, i32, i32) {
    %c0_i32 = arith.constant 0 : i32
    %c0_i32_0 = arith.constant 0 : i32
    return %arg0, %c0_i32, %arg2 : i32, i32, i32
  }
  func.func @transform_2(%arg0: i32, %arg1: i32, %arg2: i32) -> (i32, i32, i32) {
    %c0_i32 = arith.constant 0 : i32
    return %arg0, %arg1, %arg2 : i32, i32, i32
  }
  func.func @transform_3(%arg0: i32, %arg1: i32, %arg2: i32) -> (i32, i32, i32, i32) {
    %c0_i32 = arith.constant 0 : i32
    %c0_i32_0 = arith.constant 0 : i32
    return %arg0, %arg1, %c0_i32, %arg2 : i32, i32, i32, i32
  }
  func.func @transform_4(%arg0: i32, %arg1: i32, %arg2: i32) -> (i32, i32, i32, i32) {
    %c0_i32 = arith.constant 0 : i32
    %c0_i32_0 = arith.constant 0 : i32
    return %arg0, %arg1, %c0_i32, %arg2 : i32, i32, i32, i32
  }
}

module attributes {stable_mosaic.version = 11 : i64} {
  func.func @_affine_lrelu_kernel(%arg0: i32, %arg1: memref<64x128xbf16, #tpu.memory_space<vmem>>, %arg2: memref<1x128xf32, #tpu.memory_space<vmem>>, %arg3: memref<1x128xf32, #tpu.memory_space<vmem>>, %arg4: memref<64x128xbf16, #tpu.memory_space<vmem>>) attributes {dimension_semantics = [#tpu.dimension_semantics<parallel>], iteration_bounds = array<i64: 2>, scalar_prefetch = 0 : i64, scratch_operands = 0 : i64, tpu.core_type = #tpu.core_type<tc>, window_params = [{transform_indices = @transform_0, window_bounds = array<i64: 64, 128>}, {pipeline_mode = #tpu.pipeline_mode<synchronous>, transform_indices = @transform_1, window_bounds = array<i64: 1, 128>}, {pipeline_mode = #tpu.pipeline_mode<synchronous>, transform_indices = @transform_2, window_bounds = array<i64: 1, 128>}, {transform_indices = @transform_3, window_bounds = array<i64: 64, 128>}]} {
    %c0 = arith.constant 0 : index
    %c0_0 = arith.constant 0 : index
    %0 = vector.load %arg1[%c0, %c0_0] : memref<64x128xbf16, #tpu.memory_space<vmem>>, vector<64x128xbf16>
    %1 = arith.extf %0 : vector<64x128xbf16> to vector<64x128xf32>
    %c0_1 = arith.constant 0 : index
    %c0_2 = arith.constant 0 : index
    %2 = vector.load %arg2[%c0_1, %c0_2] : memref<1x128xf32, #tpu.memory_space<vmem>>, vector<1x128xf32>
    %3 = vector.broadcast %2 : vector<1x128xf32> to vector<64x128xf32>
    %4 = arith.mulf %1, %3 : vector<64x128xf32>
    %c0_3 = arith.constant 0 : index
    %c0_4 = arith.constant 0 : index
    %5 = vector.load %arg3[%c0_3, %c0_4] : memref<1x128xf32, #tpu.memory_space<vmem>>, vector<1x128xf32>
    %6 = vector.broadcast %5 : vector<1x128xf32> to vector<64x128xf32>
    %7 = arith.addf %4, %6 : vector<64x128xf32>
    %cst = arith.constant 0.000000e+00 : f32
    %8 = vector.broadcast %cst : f32 to vector<64x128xf32>
    %9 = arith.cmpf oge, %7, %8 : vector<64x128xf32>
    %cst_5 = arith.constant 2.000000e-01 : f32
    %10 = vector.broadcast %cst_5 : f32 to vector<64x128xf32>
    %11 = arith.mulf %10, %7 : vector<64x128xf32>
    %12 = arith.select %9, %7, %11 : vector<64x128xi1>, vector<64x128xf32>
    %13 = arith.truncf %12 : vector<64x128xf32> to vector<64x128xbf16>
    %c0_6 = arith.constant 0 : index
    %c0_7 = arith.constant 0 : index
    %14 = vector.load %arg4[%c0_6, %c0_7] : memref<64x128xbf16, #tpu.memory_space<vmem>>, vector<64x128xbf16>
    tpu.vector_store %arg4[%c0_6, %c0_7], %13 {strides = array<i32>} : memref<64x128xbf16, #tpu.memory_space<vmem>>, vector<64x128xbf16>,
    return
  }
  func.func @transform_0(%arg0: i32) -> (i32, i32) {
    %c0_i32 = arith.constant 0 : i32
    %c0_i32_0 = arith.constant 0 : i32
    return %arg0, %c0_i32 : i32, i32
  }
  func.func @transform_1(%arg0: i32) -> (i32, i32) {
    %c0_i32 = arith.constant 0 : i32
    %c0_i32_0 = arith.constant 0 : i32
    %c0_i32_1 = arith.constant 0 : i32
    return %c0_i32, %c0_i32_0 : i32, i32
  }
  func.func @transform_2(%arg0: i32) -> (i32, i32) {
    %c0_i32 = arith.constant 0 : i32
    %c0_i32_0 = arith.constant 0 : i32
    %c0_i32_1 = arith.constant 0 : i32
    return %c0_i32, %c0_i32_0 : i32, i32
  }
  func.func @transform_3(%arg0: i32) -> (i32, i32) {
    %c0_i32 = arith.constant 0 : i32
    %c0_i32_0 = arith.constant 0 : i32
    return %arg0, %c0_i32 : i32, i32
  }
}

module attributes {stable_mosaic.version = 11 : i64} {
  func.func @_matmul_stats_kernel(%arg0: i32, %arg1: i32, %arg2: i32, %arg3: memref<1x64x512xbf16, #tpu.memory_space<vmem>>, %arg4: memref<1x512x128xbf16, #tpu.memory_space<vmem>>, %arg5: memref<1x64x128xbf16, #tpu.memory_space<vmem>>, %arg6: memref<1x1x1x128xf32, #tpu.memory_space<vmem>>, %arg7: memref<1x1x1x128xf32, #tpu.memory_space<vmem>>) attributes {dimension_semantics = [#tpu.dimension_semantics<parallel>, #tpu.dimension_semantics<parallel>, #tpu.dimension_semantics<parallel>], iteration_bounds = array<i64: 4, 2, 1>, scalar_prefetch = 0 : i64, scratch_operands = 0 : i64, tpu.core_type = #tpu.core_type<tc>, window_params = [{transform_indices = @transform_0, window_bounds = array<i64: 1, 64, 512>}, {transform_indices = @transform_1, window_bounds = array<i64: 1, 512, 128>}, {transform_indices = @transform_2, window_bounds = array<i64: 1, 64, 128>}, {transform_indices = @transform_3, window_bounds = array<i64: 1, 1, 1, 128>}, {transform_indices = @transform_4, window_bounds = array<i64: 1, 1, 1, 128>}]} {
    %c0 = arith.constant 0 : index
    %c0_0 = arith.constant 0 : index
    %c0_1 = arith.constant 0 : index
    %0 = vector.load %arg3[%c0, %c0_0, %c0_1] : memref<1x64x512xbf16, #tpu.memory_space<vmem>>, vector<1x64x512xbf16>
    %1 = vector.shape_cast %0 : vector<1x64x512xbf16> to vector<64x512xbf16>
    %c0_2 = arith.constant 0 : index
    %c0_3 = arith.constant 0 : index
    %c0_4 = arith.constant 0 : index
    %2 = vector.load %arg4[%c0_2, %c0_3, %c0_4] : memref<1x512x128xbf16, #tpu.memory_space<vmem>>, vector<1x512x128xbf16>
    %3 = vector.shape_cast %2 : vector<1x512x128xbf16> to vector<512x128xbf16>
    %cst = arith.constant dense<0.000000e+00> : vector<64x128xf32>
    %4 = tpu.matmul %1, %3, %cst {dimension_numbers = #tpu.dot_dimension_numbers<[1], [0], [0], [1], [0, 0, 1, 1], [], []>} : vector<64x512xbf16>, vector<512x128xbf16>, vector<64x128xf32> -> vector<64x128xf32>
    %5 = arith.truncf %4 : vector<64x128xf32> to vector<64x128xbf16>
    %c0_5 = arith.constant 0 : index
    %c0_6 = arith.constant 0 : index
    %c0_7 = arith.constant 0 : index
    %6 = vector.load %arg5[%c0_5, %c0_6, %c0_7] : memref<1x64x128xbf16, #tpu.memory_space<vmem>>, vector<1x64x128xbf16>
    %7 = vector.shape_cast %6 : vector<1x64x128xbf16> to vector<64x128xbf16>
    %8 = vector.shape_cast %5 : vector<64x128xbf16> to vector<1x64x128xbf16>
    tpu.vector_store %arg5[%c0_5, %c0_6, %c0_7], %8 {strides = array<i32>} : memref<1x64x128xbf16, #tpu.memory_space<vmem>>, vector<1x64x128xbf16>,
    %cst_8 = arith.constant dense<0.000000e+00> : vector<128xf32>
    %9 = vector.multi_reduction <add>, %4, %cst_8 [0] : vector<64x128xf32> to vector<128xf32>
    %10 = vector.shape_cast %9 : vector<128xf32> to vector<1x128xf32>
    %c0_9 = arith.constant 0 : index
    %c0_10 = arith.constant 0 : index
    %c0_11 = arith.constant 0 : index
    %c0_12 = arith.constant 0 : index
    %11 = vector.load %arg6[%c0_9, %c0_10, %c0_11, %c0_12] : memref<1x1x1x128xf32, #tpu.memory_space<vmem>>, vector<1x1x1x128xf32>
    %12 = vector.shape_cast %11 : vector<1x1x1x128xf32> to vector<1x128xf32>
    %13 = vector.shape_cast %10 : vector<1x128xf32> to vector<1x1x1x128xf32>
    tpu.vector_store %arg6[%c0_9, %c0_10, %c0_11, %c0_12], %13 {strides = array<i32>} : memref<1x1x1x128xf32, #tpu.memory_space<vmem>>, vector<1x1x1x128xf32>,
    %14 = arith.mulf %4, %4 : vector<64x128xf32>
    %cst_13 = arith.constant dense<0.000000e+00> : vector<128xf32>
    %15 = vector.multi_reduction <add>, %14, %cst_13 [0] : vector<64x128xf32> to vector<128xf32>
    %16 = vector.shape_cast %15 : vector<128xf32> to vector<1x128xf32>
    %c0_14 = arith.constant 0 : index
    %c0_15 = arith.constant 0 : index
    %c0_16 = arith.constant 0 : index
    %c0_17 = arith.constant 0 : index
    %17 = vector.load %arg7[%c0_14, %c0_15, %c0_16, %c0_17] : memref<1x1x1x128xf32, #tpu.memory_space<vmem>>, vector<1x1x1x128xf32>
    %18 = vector.shape_cast %17 : vector<1x1x1x128xf32> to vector<1x128xf32>
    %19 = vector.shape_cast %16 : vector<1x128xf32> to vector<1x1x1x128xf32>
    tpu.vector_store %arg7[%c0_14, %c0_15, %c0_16, %c0_17], %19 {strides = array<i32>} : memref<1x1x1x128xf32, #tpu.memory_space<vmem>>, vector<1x1x1x128xf32>,
    return
  }
  func.func @transform_0(%arg0: i32, %arg1: i32, %arg2: i32) -> (i32, i32, i32) {
    %c0_i32 = arith.constant 0 : i32
    %c0_i32_0 = arith.constant 0 : i32
    return %arg0, %arg1, %c0_i32 : i32, i32, i32
  }
  func.func @transform_1(%arg0: i32, %arg1: i32, %arg2: i32) -> (i32, i32, i32) {
    %c0_i32 = arith.constant 0 : i32
    %c0_i32_0 = arith.constant 0 : i32
    return %arg0, %c0_i32, %arg2 : i32, i32, i32
  }
  func.func @transform_2(%arg0: i32, %arg1: i32, %arg2: i32) -> (i32, i32, i32) {
    %c0_i32 = arith.constant 0 : i32
    return %arg0, %arg1, %arg2 : i32, i32, i32
  }
  func.func @transform_3(%arg0: i32, %arg1: i32, %arg2: i32) -> (i32, i32, i32, i32) {
    %c0_i32 = arith.constant 0 : i32
    %c0_i32_0 = arith.constant 0 : i32
    return %arg0, %arg1, %c0_i32, %arg2 : i32, i32, i32, i32
  }
  func.func @transform_4(%arg0: i32, %arg1: i32, %arg2: i32) -> (i32, i32, i32, i32) {
    %c0_i32 = arith.constant 0 : i32
    %c0_i32_0 = arith.constant 0 : i32
    return %arg0, %arg1, %c0_i32, %arg2 : i32, i32, i32, i32
  }
}

module attributes {stable_mosaic.version = 11 : i64} {
  func.func @_affine_lrelu_kernel(%arg0: i32, %arg1: memref<256x128xbf16, #tpu.memory_space<vmem>>, %arg2: memref<1x128xf32, #tpu.memory_space<vmem>>, %arg3: memref<1x128xf32, #tpu.memory_space<vmem>>, %arg4: memref<256x128xbf16, #tpu.memory_space<vmem>>) attributes {dimension_semantics = [#tpu.dimension_semantics<parallel>], iteration_bounds = array<i64: 2>, scalar_prefetch = 0 : i64, scratch_operands = 0 : i64, tpu.core_type = #tpu.core_type<tc>, window_params = [{transform_indices = @transform_0, window_bounds = array<i64: 256, 128>}, {pipeline_mode = #tpu.pipeline_mode<synchronous>, transform_indices = @transform_1, window_bounds = array<i64: 1, 128>}, {pipeline_mode = #tpu.pipeline_mode<synchronous>, transform_indices = @transform_2, window_bounds = array<i64: 1, 128>}, {transform_indices = @transform_3, window_bounds = array<i64: 256, 128>}]} {
    %c0 = arith.constant 0 : index
    %c0_0 = arith.constant 0 : index
    %0 = vector.load %arg1[%c0, %c0_0] : memref<256x128xbf16, #tpu.memory_space<vmem>>, vector<256x128xbf16>
    %1 = arith.extf %0 : vector<256x128xbf16> to vector<256x128xf32>
    %c0_1 = arith.constant 0 : index
    %c0_2 = arith.constant 0 : index
    %2 = vector.load %arg2[%c0_1, %c0_2] : memref<1x128xf32, #tpu.memory_space<vmem>>, vector<1x128xf32>
    %3 = vector.broadcast %2 : vector<1x128xf32> to vector<256x128xf32>
    %4 = arith.mulf %1, %3 : vector<256x128xf32>
    %c0_3 = arith.constant 0 : index
    %c0_4 = arith.constant 0 : index
    %5 = vector.load %arg3[%c0_3, %c0_4] : memref<1x128xf32, #tpu.memory_space<vmem>>, vector<1x128xf32>
    %6 = vector.broadcast %5 : vector<1x128xf32> to vector<256x128xf32>
    %7 = arith.addf %4, %6 : vector<256x128xf32>
    %cst = arith.constant 0.000000e+00 : f32
    %8 = vector.broadcast %cst : f32 to vector<256x128xf32>
    %9 = arith.cmpf oge, %7, %8 : vector<256x128xf32>
    %cst_5 = arith.constant 2.000000e-01 : f32
    %10 = vector.broadcast %cst_5 : f32 to vector<256x128xf32>
    %11 = arith.mulf %10, %7 : vector<256x128xf32>
    %12 = arith.select %9, %7, %11 : vector<256x128xi1>, vector<256x128xf32>
    %13 = arith.truncf %12 : vector<256x128xf32> to vector<256x128xbf16>
    %c0_6 = arith.constant 0 : index
    %c0_7 = arith.constant 0 : index
    %14 = vector.load %arg4[%c0_6, %c0_7] : memref<256x128xbf16, #tpu.memory_space<vmem>>, vector<256x128xbf16>
    tpu.vector_store %arg4[%c0_6, %c0_7], %13 {strides = array<i32>} : memref<256x128xbf16, #tpu.memory_space<vmem>>, vector<256x128xbf16>,
    return
  }
  func.func @transform_0(%arg0: i32) -> (i32, i32) {
    %c0_i32 = arith.constant 0 : i32
    %c0_i32_0 = arith.constant 0 : i32
    return %arg0, %c0_i32 : i32, i32
  }
  func.func @transform_1(%arg0: i32) -> (i32, i32) {
    %c0_i32 = arith.constant 0 : i32
    %c0_i32_0 = arith.constant 0 : i32
    %c0_i32_1 = arith.constant 0 : i32
    return %c0_i32, %c0_i32_0 : i32, i32
  }
  func.func @transform_2(%arg0: i32) -> (i32, i32) {
    %c0_i32 = arith.constant 0 : i32
    %c0_i32_0 = arith.constant 0 : i32
    %c0_i32_1 = arith.constant 0 : i32
    return %c0_i32, %c0_i32_0 : i32, i32
  }
  func.func @transform_3(%arg0: i32) -> (i32, i32) {
    %c0_i32 = arith.constant 0 : i32
    %c0_i32_0 = arith.constant 0 : i32
    return %arg0, %c0_i32 : i32, i32
  }
}

module attributes {stable_mosaic.version = 11 : i64} {
  func.func @_matmul_stats_kernel(%arg0: i32, %arg1: i32, %arg2: i32, %arg3: memref<1x256x256xbf16, #tpu.memory_space<vmem>>, %arg4: memref<1x256x128xbf16, #tpu.memory_space<vmem>>, %arg5: memref<1x256x128xbf16, #tpu.memory_space<vmem>>, %arg6: memref<1x1x1x128xf32, #tpu.memory_space<vmem>>, %arg7: memref<1x1x1x128xf32, #tpu.memory_space<vmem>>) attributes {dimension_semantics = [#tpu.dimension_semantics<parallel>, #tpu.dimension_semantics<parallel>, #tpu.dimension_semantics<parallel>], iteration_bounds = array<i64: 4, 2, 1>, scalar_prefetch = 0 : i64, scratch_operands = 0 : i64, tpu.core_type = #tpu.core_type<tc>, window_params = [{transform_indices = @transform_0, window_bounds = array<i64: 1, 256, 256>}, {transform_indices = @transform_1, window_bounds = array<i64: 1, 256, 128>}, {transform_indices = @transform_2, window_bounds = array<i64: 1, 256, 128>}, {transform_indices = @transform_3, window_bounds = array<i64: 1, 1, 1, 128>}, {transform_indices = @transform_4, window_bounds = array<i64: 1, 1, 1, 128>}]} {
    %c0 = arith.constant 0 : index
    %c0_0 = arith.constant 0 : index
    %c0_1 = arith.constant 0 : index
    %0 = vector.load %arg3[%c0, %c0_0, %c0_1] : memref<1x256x256xbf16, #tpu.memory_space<vmem>>, vector<1x256x256xbf16>
    %1 = vector.shape_cast %0 : vector<1x256x256xbf16> to vector<256x256xbf16>
    %c0_2 = arith.constant 0 : index
    %c0_3 = arith.constant 0 : index
    %c0_4 = arith.constant 0 : index
    %2 = vector.load %arg4[%c0_2, %c0_3, %c0_4] : memref<1x256x128xbf16, #tpu.memory_space<vmem>>, vector<1x256x128xbf16>
    %3 = vector.shape_cast %2 : vector<1x256x128xbf16> to vector<256x128xbf16>
    %cst = arith.constant dense<0.000000e+00> : vector<256x128xf32>
    %4 = tpu.matmul %1, %3, %cst {dimension_numbers = #tpu.dot_dimension_numbers<[1], [0], [0], [1], [0, 0, 1, 1], [], []>} : vector<256x256xbf16>, vector<256x128xbf16>, vector<256x128xf32> -> vector<256x128xf32>
    %5 = arith.truncf %4 : vector<256x128xf32> to vector<256x128xbf16>
    %c0_5 = arith.constant 0 : index
    %c0_6 = arith.constant 0 : index
    %c0_7 = arith.constant 0 : index
    %6 = vector.load %arg5[%c0_5, %c0_6, %c0_7] : memref<1x256x128xbf16, #tpu.memory_space<vmem>>, vector<1x256x128xbf16>
    %7 = vector.shape_cast %6 : vector<1x256x128xbf16> to vector<256x128xbf16>
    %8 = vector.shape_cast %5 : vector<256x128xbf16> to vector<1x256x128xbf16>
    tpu.vector_store %arg5[%c0_5, %c0_6, %c0_7], %8 {strides = array<i32>} : memref<1x256x128xbf16, #tpu.memory_space<vmem>>, vector<1x256x128xbf16>,
    %cst_8 = arith.constant dense<0.000000e+00> : vector<128xf32>
    %9 = vector.multi_reduction <add>, %4, %cst_8 [0] : vector<256x128xf32> to vector<128xf32>
    %10 = vector.shape_cast %9 : vector<128xf32> to vector<1x128xf32>
    %c0_9 = arith.constant 0 : index
    %c0_10 = arith.constant 0 : index
    %c0_11 = arith.constant 0 : index
    %c0_12 = arith.constant 0 : index
    %11 = vector.load %arg6[%c0_9, %c0_10, %c0_11, %c0_12] : memref<1x1x1x128xf32, #tpu.memory_space<vmem>>, vector<1x1x1x128xf32>
    %12 = vector.shape_cast %11 : vector<1x1x1x128xf32> to vector<1x128xf32>
    %13 = vector.shape_cast %10 : vector<1x128xf32> to vector<1x1x1x128xf32>
    tpu.vector_store %arg6[%c0_9, %c0_10, %c0_11, %c0_12], %13 {strides = array<i32>} : memref<1x1x1x128xf32, #tpu.memory_space<vmem>>, vector<1x1x1x128xf32>,
    %14 = arith.mulf %4, %4 : vector<256x128xf32>
    %cst_13 = arith.constant dense<0.000000e+00> : vector<128xf32>
    %15 = vector.multi_reduction <add>, %14, %cst_13 [0] : vector<256x128xf32> to vector<128xf32>
    %16 = vector.shape_cast %15 : vector<128xf32> to vector<1x128xf32>
    %c0_14 = arith.constant 0 : index
    %c0_15 = arith.constant 0 : index
    %c0_16 = arith.constant 0 : index
    %c0_17 = arith.constant 0 : index
    %17 = vector.load %arg7[%c0_14, %c0_15, %c0_16, %c0_17] : memref<1x1x1x128xf32, #tpu.memory_space<vmem>>, vector<1x1x1x128xf32>
    %18 = vector.shape_cast %17 : vector<1x1x1x128xf32> to vector<1x128xf32>
    %19 = vector.shape_cast %16 : vector<1x128xf32> to vector<1x1x1x128xf32>
    tpu.vector_store %arg7[%c0_14, %c0_15, %c0_16, %c0_17], %19 {strides = array<i32>} : memref<1x1x1x128xf32, #tpu.memory_space<vmem>>, vector<1x1x1x128xf32>,
    return
  }
  func.func @transform_0(%arg0: i32, %arg1: i32, %arg2: i32) -> (i32, i32, i32) {
    %c0_i32 = arith.constant 0 : i32
    %c0_i32_0 = arith.constant 0 : i32
    return %arg0, %arg1, %c0_i32 : i32, i32, i32
  }
  func.func @transform_1(%arg0: i32, %arg1: i32, %arg2: i32) -> (i32, i32, i32) {
    %c0_i32 = arith.constant 0 : i32
    %c0_i32_0 = arith.constant 0 : i32
    return %arg0, %c0_i32, %arg2 : i32, i32, i32
  }
  func.func @transform_2(%arg0: i32, %arg1: i32, %arg2: i32) -> (i32, i32, i32) {
    %c0_i32 = arith.constant 0 : i32
    return %arg0, %arg1, %arg2 : i32, i32, i32
  }
  func.func @transform_3(%arg0: i32, %arg1: i32, %arg2: i32) -> (i32, i32, i32, i32) {
    %c0_i32 = arith.constant 0 : i32
    %c0_i32_0 = arith.constant 0 : i32
    return %arg0, %arg1, %c0_i32, %arg2 : i32, i32, i32, i32
  }
  func.func @transform_4(%arg0: i32, %arg1: i32, %arg2: i32) -> (i32, i32, i32, i32) {
    %c0_i32 = arith.constant 0 : i32
    %c0_i32_0 = arith.constant 0 : i32
    return %arg0, %arg1, %c0_i32, %arg2 : i32, i32, i32, i32
  }
}

module attributes {stable_mosaic.version = 11 : i64} {
  func.func @_affine_lrelu_kernel(%arg0: i32, %arg1: memref<1024x128xbf16, #tpu.memory_space<vmem>>, %arg2: memref<1x128xf32, #tpu.memory_space<vmem>>, %arg3: memref<1x128xf32, #tpu.memory_space<vmem>>, %arg4: memref<1024x128xbf16, #tpu.memory_space<vmem>>) attributes {dimension_semantics = [#tpu.dimension_semantics<parallel>], iteration_bounds = array<i64: 2>, scalar_prefetch = 0 : i64, scratch_operands = 0 : i64, tpu.core_type = #tpu.core_type<tc>, window_params = [{transform_indices = @transform_0, window_bounds = array<i64: 1024, 128>}, {pipeline_mode = #tpu.pipeline_mode<synchronous>, transform_indices = @transform_1, window_bounds = array<i64: 1, 128>}, {pipeline_mode = #tpu.pipeline_mode<synchronous>, transform_indices = @transform_2, window_bounds = array<i64: 1, 128>}, {transform_indices = @transform_3, window_bounds = array<i64: 1024, 128>}]} {
    %c0 = arith.constant 0 : index
    %c0_0 = arith.constant 0 : index
    %0 = vector.load %arg1[%c0, %c0_0] : memref<1024x128xbf16, #tpu.memory_space<vmem>>, vector<1024x128xbf16>
    %1 = arith.extf %0 : vector<1024x128xbf16> to vector<1024x128xf32>
    %c0_1 = arith.constant 0 : index
    %c0_2 = arith.constant 0 : index
    %2 = vector.load %arg2[%c0_1, %c0_2] : memref<1x128xf32, #tpu.memory_space<vmem>>, vector<1x128xf32>
    %3 = vector.broadcast %2 : vector<1x128xf32> to vector<1024x128xf32>
    %4 = arith.mulf %1, %3 : vector<1024x128xf32>
    %c0_3 = arith.constant 0 : index
    %c0_4 = arith.constant 0 : index
    %5 = vector.load %arg3[%c0_3, %c0_4] : memref<1x128xf32, #tpu.memory_space<vmem>>, vector<1x128xf32>
    %6 = vector.broadcast %5 : vector<1x128xf32> to vector<1024x128xf32>
    %7 = arith.addf %4, %6 : vector<1024x128xf32>
    %cst = arith.constant 0.000000e+00 : f32
    %8 = vector.broadcast %cst : f32 to vector<1024x128xf32>
    %9 = arith.cmpf oge, %7, %8 : vector<1024x128xf32>
    %cst_5 = arith.constant 2.000000e-01 : f32
    %10 = vector.broadcast %cst_5 : f32 to vector<1024x128xf32>
    %11 = arith.mulf %10, %7 : vector<1024x128xf32>
    %12 = arith.select %9, %7, %11 : vector<1024x128xi1>, vector<1024x128xf32>
    %13 = arith.truncf %12 : vector<1024x128xf32> to vector<1024x128xbf16>
    %c0_6 = arith.constant 0 : index
    %c0_7 = arith.constant 0 : index
    %14 = vector.load %arg4[%c0_6, %c0_7] : memref<1024x128xbf16, #tpu.memory_space<vmem>>, vector<1024x128xbf16>
    tpu.vector_store %arg4[%c0_6, %c0_7], %13 {strides = array<i32>} : memref<1024x128xbf16, #tpu.memory_space<vmem>>, vector<1024x128xbf16>,
    return
  }
  func.func @transform_0(%arg0: i32) -> (i32, i32) {
    %c0_i32 = arith.constant 0 : i32
    %c0_i32_0 = arith.constant 0 : i32
    return %arg0, %c0_i32 : i32, i32
  }
  func.func @transform_1(%arg0: i32) -> (i32, i32) {
    %c0_i32 = arith.constant 0 : i32
    %c0_i32_0 = arith.constant 0 : i32
    %c0_i32_1 = arith.constant 0 : i32
    return %c0_i32, %c0_i32_0 : i32, i32
  }
  func.func @transform_2(%arg0: i32) -> (i32, i32) {
    %c0_i32 = arith.constant 0 : i32
    %c0_i32_0 = arith.constant 0 : i32
    %c0_i32_1 = arith.constant 0 : i32
    return %c0_i32, %c0_i32_0 : i32, i32
  }
  func.func @transform_3(%arg0: i32) -> (i32, i32) {
    %c0_i32 = arith.constant 0 : i32
    %c0_i32_0 = arith.constant 0 : i32
    return %arg0, %c0_i32 : i32, i32
  }
}

module attributes {stable_mosaic.version = 11 : i64} {
  func.func @_matmul_bias_tanh_kernel(%arg0: i32, %arg1: i32, %arg2: i32, %arg3: memref<1x1024x128xbf16, #tpu.memory_space<vmem>>, %arg4: memref<1x128x128xbf16, #tpu.memory_space<vmem>>, %arg5: memref<1x128xf32, #tpu.memory_space<vmem>>, %arg6: memref<1x1024x128xbf16, #tpu.memory_space<vmem>>) attributes {dimension_semantics = [#tpu.dimension_semantics<parallel>, #tpu.dimension_semantics<parallel>, #tpu.dimension_semantics<parallel>], iteration_bounds = array<i64: 4, 2, 1>, scalar_prefetch = 0 : i64, scratch_operands = 0 : i64, tpu.core_type = #tpu.core_type<tc>, window_params = [{transform_indices = @transform_0, window_bounds = array<i64: 1, 1024, 128>}, {transform_indices = @transform_1, window_bounds = array<i64: 1, 128, 128>}, {transform_indices = @transform_2, window_bounds = array<i64: 1, 128>}, {transform_indices = @transform_3, window_bounds = array<i64: 1, 1024, 128>}]} {
    %c0 = arith.constant 0 : index
    %c0_0 = arith.constant 0 : index
    %c0_1 = arith.constant 0 : index
    %0 = vector.load %arg3[%c0, %c0_0, %c0_1] : memref<1x1024x128xbf16, #tpu.memory_space<vmem>>, vector<1x1024x128xbf16>
    %1 = vector.shape_cast %0 : vector<1x1024x128xbf16> to vector<1024x128xbf16>
    %c0_2 = arith.constant 0 : index
    %c0_3 = arith.constant 0 : index
    %c0_4 = arith.constant 0 : index
    %2 = vector.load %arg4[%c0_2, %c0_3, %c0_4] : memref<1x128x128xbf16, #tpu.memory_space<vmem>>, vector<1x128x128xbf16>
    %3 = vector.shape_cast %2 : vector<1x128x128xbf16> to vector<128x128xbf16>
    %cst = arith.constant dense<0.000000e+00> : vector<1024x128xf32>
    %4 = tpu.matmul %1, %3, %cst {dimension_numbers = #tpu.dot_dimension_numbers<[1], [0], [0], [1], [0, 0, 1, 1], [], []>} : vector<1024x128xbf16>, vector<128x128xbf16>, vector<1024x128xf32> -> vector<1024x128xf32>
    %c0_5 = arith.constant 0 : index
    %c0_6 = arith.constant 0 : index
    %5 = vector.load %arg5[%c0_5, %c0_6] : memref<1x128xf32, #tpu.memory_space<vmem>>, vector<1x128xf32>
    %6 = vector.broadcast %5 : vector<1x128xf32> to vector<1024x128xf32>
    %7 = arith.addf %4, %6 : vector<1024x128xf32>
    %8 = math.tanh %7 : vector<1024x128xf32>
    %9 = arith.truncf %8 : vector<1024x128xf32> to vector<1024x128xbf16>
    %c0_7 = arith.constant 0 : index
    %c0_8 = arith.constant 0 : index
    %c0_9 = arith.constant 0 : index
    %10 = vector.load %arg6[%c0_7, %c0_8, %c0_9] : memref<1x1024x128xbf16, #tpu.memory_space<vmem>>, vector<1x1024x128xbf16>
    %11 = vector.shape_cast %10 : vector<1x1024x128xbf16> to vector<1024x128xbf16>
    %12 = vector.shape_cast %9 : vector<1024x128xbf16> to vector<1x1024x128xbf16>
    tpu.vector_store %arg6[%c0_7, %c0_8, %c0_9], %12 {strides = array<i32>} : memref<1x1024x128xbf16, #tpu.memory_space<vmem>>, vector<1x1024x128xbf16>,
    return
  }
  func.func @transform_0(%arg0: i32, %arg1: i32, %arg2: i32) -> (i32, i32, i32) {
    %c0_i32 = arith.constant 0 : i32
    %c0_i32_0 = arith.constant 0 : i32
    return %arg0, %arg1, %c0_i32 : i32, i32, i32
  }
  func.func @transform_1(%arg0: i32, %arg1: i32, %arg2: i32) -> (i32, i32, i32) {
    %c0_i32 = arith.constant 0 : i32
    %c0_i32_0 = arith.constant 0 : i32
    return %arg0, %c0_i32, %arg2 : i32, i32, i32
  }
  func.func @transform_2(%arg0: i32, %arg1: i32, %arg2: i32) -> (i32, i32) {
    %c0_i32 = arith.constant 0 : i32
    %c0_i32_0 = arith.constant 0 : i32
    return %c0_i32, %arg2 : i32, i32
  }
  func.func @transform_3(%arg0: i32, %arg1: i32, %arg2: i32) -> (i32, i32, i32) {
    %c0_i32 = arith.constant 0 : i32
    return %arg0, %arg1, %arg2 : i32, i32, i32
  }
}

</mosaic_0001>

<bundles_post_ra>
// kernel: generator_forward.10
= control target key start
LH: loop header
LB: loop body
LE: loop exit
PB: predicated region body
PF: predicated region fallthrough
CT: control target
= control target key end

     0   :  { %s356_s12 = smov 0   ;;  %s382_s0 = inlined_call_operand.vmem [shape: bf16[32,256], index: 0, kind: input, shape index: {}]   ;;  %s383_s1 = inlined_call_operand.vmem [shape: f32[1,256], index: 1, kind: input, shape index: {}]   ;;  %s384_s2 = inlined_call_operand.vmem [shape: f32[1,256], index: 2, kind: input, shape index: {}]   ;;  %s385_s3 = inlined_call_operand.vmem [shape: bf16[32,256], index: 3, kind: output, shape index: {}]  }
   0x1 LB: > { %s301_s13 = sadd.s32 4294967295, %s334_s12   ;;  %p305_p0 = scmp.ge.s32.totalorder %s334_s12, 1  ;;  %s334_s12 = sphi %s356_s12, %s13_s12  }
   0x2   : > { %p139_p1 = scmp.lt.s32.totalorder %s334_s12, 3 }
   0x4   : > { %p140_p2 = pnand %p305_p0, %p139_p1 }
   0x5   : > { %s306_s14 = sshll.u32 (!%p140_p2), %s301_s13, 1  ;;  %v187_v0 = vlaneseq (!%p140_p2)  ;;  %v185_v2 = vld [vmem:[%s383_s1] sm:$0x3] (!%p140_p2) }
   0x6   : > { %143 = sbr.rel (%p140_p2) target bundleno = 30 (0x1e), region = 32  ;;  %p166_p3 = scmp.lt.s32.totalorder (!%p140_p2), %s306_s14, 3  ;;  %v201_v5 = vld [vmem:[%s384_s2] sm:$0x3] (!%p140_p2) }
   0x7   : > { %v188_v1 = vshrl.u32 (!%p140_p2), %v187_v0, 7 }
   0x9   : > { %v189_v3 = vsub.s32 (!%p140_p2), 0, %v188_v1  ;;  %v193_v4 = vsub.s32 (!%p140_p2), 1, %v188_v1 }
   0xb   : > { %v190_v6 = vrot.slane (!%p140_p2), %v185_v2, %v189_v3  ;;  %v194_v7 = vrot.slane (!%p140_p2), %v185_v2, %v193_v4  ;;  %v206_v10 = vrot.slane (!%p140_p2), %v201_v5, %v189_v3  ;;  %v210_v11 = vrot.slane (!%p140_p2), %v201_v5, %v193_v4 }
   0xd   : > { %s387_s14 = smov (!%p166_p3, %s306_s14), 3 }
   0xe   : > { %s316_s19 = sshll.u32 %s387_s14, 3 }
   0xf   : > { %s170_s22 = scalar_lea.vmem %s382_s0, %s316_s19  ;;  %s177_s25 = scalar_lea.vmem %s385_s3, %s316_s19 }
  0x10   : > { %v179_v8 = vld [vmem:[%s170_s22] sm:$0xff]  ;;  %v180_v9 = vld [vmem:[%s170_s22 + $0x8] sm:$0xff] }
  0x11   : > { %v181_v12 = vunpack.c.l.bf16 %v179_v8  ;;  %v182_v13 = vunpack.c.h.bf16 %v179_v8  ;;  %v183_v14 = vunpack.c.l.bf16 %v180_v9  ;;  %v184_v15 = vunpack.c.h.bf16 %v180_v9 }
  0x13   : > { %v197_v16 = vmul.f32 %v190_v6, %v181_v12  ;;  %v198_v17 = vmul.f32 %v194_v7, %v182_v13  ;;  %v199_v18 = vmul.f32 %v190_v6, %v183_v14  ;;  %v200_v19 = vmul.f32 %v194_v7, %v184_v15 }
  0x15   : > { %v213_v20 = vadd.f32 %v206_v10, %v197_v16  ;;  %v214_v21 = vadd.f32 %v210_v11, %v198_v17  ;;  %v215_v22 = vadd.f32 %v206_v10, %v199_v18  ;;  %v216_v23 = vadd.f32 %v210_v11, %v200_v19 }
  0x17   : > { %vm217_vm0 = vcmp.ge.f32.partialorder %v213_v20, 0.0  ;;  %vm218_vm1 = vcmp.ge.f32.partialorder %v214_v21, 0.0  ;;  %v221_v24 = vmul.f32 0.2, %v213_v20  ;;  %v222_v25 = vmul.f32 0.2, %v214_v21 }
  0x18   : > { %vm219_vm2 = vcmp.ge.f32.partialorder %v215_v22, 0.0  ;;  %vm220_vm3 = vcmp.ge.f32.partialorder %v216_v23, 0.0  ;;  %v223_v26 = vmul.f32 0.2, %v215_v22  ;;  %v224_v27 = vmul.f32 0.2, %v216_v23 }
  0x19   : > { %v225_v28 = vsel %vm217_vm0, %v213_v20, %v221_v24  ;;  %v226_v29 = vsel %vm218_vm1, %v214_v21, %v222_v25 }
  0x1a   : > { %v318_v30 = vpack.c.bf16 %v226_v29, %v225_v28  ;;  %v227_v31 = vsel %vm219_vm2, %v215_v22, %v223_v26  ;;  %v228_v32 = vsel %vm220_vm3, %v216_v23, %v224_v27 }
  0x1b   : > { %v319_v33 = vpack.c.bf16 %v228_v32, %v227_v31 }
  0x1c   : > { %241 = vst [vmem:[%s177_s25] sm:$0xff] %v318_v30 }
  0x1d   : > { %242 = vst [vmem:[%s177_s25 + $0x8] sm:$0xff] %v319_v33 }
  0x1e PF: > { %s13_s12 = sadd.s32 1, %s334_s12  }
  0x1f   : > { %p10_p4 = scmp.ge.s32.totalorder %s13_s12, 4  }
  0x21   :  { %12 = sbr.rel (!%p10_p4) target bundleno = 1 (0x1), region = 62 }

// kernel: generator_forward.9
= control target key start
LH: loop header
LB: loop body
LE: loop exit
PB: predicated region body
PF: predicated region fallthrough
CT: control target
= control target key end

     0   :  { %s3587_s15 = smov 0   ;;  %s3589_s16 = smov 0   ;;  %s4469_s0 = inlined_call_operand.vmem [shape: bf16[1,2,200], index: 0, kind: input, shape index: {}]   ;;  %s4470_s1 = inlined_call_operand.vmem [shape: bf16[1,200,4096], index: 1, kind: input, shape index: {}]   ;;  %s4471_s2 = inlined_call_operand.vmem [shape: bf16[1,2,4096], index: 2, kind: output, shape index: {0}]   ;;  %s4472_s3 = inlined_call_operand.vmem [shape: f32[1,1,1,4096], index: 3, kind: output, shape index: {1}]   ;;  %s4473_s4 = inlined_call_operand.vmem [shape: f32[1,1,1,4096], index: 4, kind: output, shape index: {2}]  }
   0x1   :  { %s3591_s17 = smov 0   ;;  %s3593_s18 = smov 0  }
   0x2   :  { %s3595_s19 = smov 0  }
   0x3 LB: > { %s27_s20 = sadd.s32 1, %s3555_s18  ;;  %p78_p1 = scmp.ne.s32.totalorder %s3547_s16, %s3543_s15  ;;  %s3559_s19 = sphi %s3595_s19, %s15_s19   ;;  %s3555_s18 = sphi %s3593_s18, %s4478_s18   ;;  %s3551_s17 = sphi %s3591_s17, %s4477_s17   ;;  %s3547_s16 = sphi %s3589_s16, %s4476_s16   ;;  %s3543_s15 = sphi %s3587_s15, %s4475_s15  }
   0x4   : > { %p28_p0 = scmp.ge.s32.totalorder %s27_s20, 2  ;;  %p79_p2 = scmp.eq.s32.totalorder %s3559_s19, 0 }
   0x5   : > { %s71_s22 = sadd.s32 1, %s3547_s16  ;;  %p3219_p5 = scmp.ge.s32.totalorder %s3559_s19, 2 }
   0x6   : > { %s4480_s20 = smov (%p28_p0, %s27_s20), 0  ;;  %p80_p3 = por %p79_p2, %p78_p1 }
   0x7   : > { %s67_s21 = ssub.s32 %s3555_s18, %s4480_s20  ;;  %205 = sbr.rel (%p3219_p5) target bundleno = 119 (0x77), region = 20 }
   0x8   : > { %p69_p4 = scmp.eq.s32.totalorder %s67_s21, 0 }
   0xa   : > { %s3622_s23 = scalar_select %p69_p4, %s3547_s16, %s71_s22  }
   0xe   : > { %208 = sbr.rel (!%p80_p3) target bundleno = 119 (0x77), region = 24  ;;  %s210_s24 = sand.u32 (%p80_p3), 1, %s3547_s16  }
   0xf   : > { %s3461_s25 = sshll.u32 (%p80_p3), %s3555_s18, 6  ;;  %s3462_s26 = smul.u32 (%p80_p3), 1600, %s210_s24 }
  0x10   : > { %s3630_s29 = scalar_lea.vmem (%p80_p3), %s4470_s1, %s3461_s25 }
  0x11   : > { %v230_v0 = vld [vmem:[%s3630_s29] sm:$0xff] (%p80_p3)  ;;  %v232_v1 = vld [vmem:[%s3630_s29 + $0x8] sm:$0xff] (%p80_p3)  ;;  %v234_v2 = vld [vmem:[%s3630_s29 + $0x10] sm:$0xff] (%p80_p3)  ;;  %s3638_s30 = scalar_lea.vmem (%p80_p3), [#allocation2], %s3462_s26 }
  0x12   : > { %v236_v3 = vld [vmem:[%s3630_s29 + $0x18] sm:$0xff] (%p80_p3)  ;;  %v238_v4 = vld [vmem:[%s3630_s29 + $0x20] sm:$0xff] (%p80_p3)  ;;  %v240_v5 = vld [vmem:[%s3630_s29 + $0x28] sm:$0xff] (%p80_p3)  ;;  %231 = vst [vmem:[%s3638_s30] sm:$0xff] (%p80_p3), %v230_v0 }
  0x13   : > { %233 = vst [vmem:[%s3638_s30 + $0x8] sm:$0xff] (%p80_p3), %v232_v1  ;;  %235 = vst [vmem:[%s3638_s30 + $0x10] sm:$0xff] (%p80_p3), %v234_v2  ;;  %v242_v6 = vld [vmem:[%s3630_s29 + $0x30] sm:$0xff] (%p80_p3)  ;;  %v244_v7 = vld [vmem:[%s3630_s29 + $0x38] sm:$0xff] (%p80_p3) }
  0x14   : > { %237 = vst [vmem:[%s3638_s30 + $0x18] sm:$0xff] (%p80_p3), %v236_v3  ;;  %239 = vst [vmem:[%s3638_s30 + $0x20] sm:$0xff] (%p80_p3), %v238_v4  ;;  %v246_v8 = vld [vmem:[%s3630_s29 + $0x80] sm:$0xff] (%p80_p3)  ;;  %v248_v9 = vld [vmem:[%s3630_s29 + $0x88] sm:$0xff] (%p80_p3) }
  0x15   : > { %241 = vst [vmem:[%s3638_s30 + $0x28] sm:$0xff] %v240_v5  ;;  %243 = vst [vmem:[%s3638_s30 + $0x30] sm:$0xff] %v242_v6  ;;  %v250_v10 = vld [vmem:[%s3630_s29 + $0x90] sm:$0xff]  ;;  %v252_v11 = vld [vmem:[%s3630_s29 + $0x98] sm:$0xff] }
  0x16   : > { %245 = vst [vmem:[%s3638_s30 + $0x38] sm:$0xff] %v244_v7  ;;  %247 = vst [vmem:[%s3638_s30 + $0x40] sm:$0xff] %v246_v8  ;;  %v254_v12 = vld [vmem:[%s3630_s29 + $0xa0] sm:$0xff]  ;;  %v256_v13 = vld [vmem:[%s3630_s29 + $0xa8] sm:$0xff] }
  0x17   : > { %249 = vst [vmem:[%s3638_s30 + $0x48] sm:$0xff] %v248_v9  ;;  %251 = vst [vmem:[%s3638_s30 + $0x50] sm:$0xff] %v250_v10  ;;  %v258_v14 = vld [vmem:[%s3630_s29 + $0xb0] sm:$0xff]  ;;  %v260_v15 = vld [vmem:[%s3630_s29 + $0xb8] sm:$0xff] }
  0x18   : > { %253 = vst [vmem:[%s3638_s30 + $0x58] sm:$0xff] %v252_v11  ;;  %255 = vst [vmem:[%s3638_s30 + $0x60] sm:$0xff] %v254_v12  ;;  %v262_v16 = vld [vmem:[%s3630_s29 + $0x100] sm:$0xff]  ;;  %v264_v17 = vld [vmem:[%s3630_s29 + $0x108] sm:$0xff] }
  0x19   : > { %257 = vst [vmem:[%s3638_s30 + $0x68] sm:$0xff] %v256_v13  ;;  %259 = vst [vmem:[%s3638_s30 + $0x70] sm:$0xff] %v258_v14  ;;  %v266_v18 = vld [vmem:[%s3630_s29 + $0x110] sm:$0xff]  ;;  %v268_v19 = vld [vmem:[%s3630_s29 + $0x118] sm:$0xff] }
  0x1a   : > { %261 = vst [vmem:[%s3638_s30 + $0x78] sm:$0xff] %v260_v15  ;;  %263 = vst [vmem:[%s3638_s30 + $0x80] sm:$0xff] %v262_v16  ;;  %v270_v20 = vld [vmem:[%s3630_s29 + $0x120] sm:$0xff]  ;;  %v272_v21 = vld [vmem:[%s3630_s29 + $0x128] sm:$0xff] }
  0x1b   : > { %265 = vst [vmem:[%s3638_s30 + $0x88] sm:$0xff] %v264_v17  ;;  %267 = vst [vmem:[%s3638_s30 + $0x90] sm:$0xff] %v266_v18  ;;  %v274_v22 = vld [vmem:[%s3630_s29 + $0x130] sm:$0xff]  ;;  %v276_v23 = vld [vmem:[%s3630_s29 + $0x138] sm:$0xff] }
  0x1c   : > { %269 = vst [vmem:[%s3638_s30 + $0x98] sm:$0xff] %v268_v19  ;;  %271 = vst [vmem:[%s3638_s30 + $0xa0] sm:$0xff] %v270_v20  ;;  %v278_v24 = vld [vmem:[%s3630_s29 + $0x180] sm:$0xff]  ;;  %v280_v25 = vld [vmem:[%s3630_s29 + $0x188] sm:$0xff] }
  0x1d   : > { %273 = vst [vmem:[%s3638_s30 + $0xa8] sm:$0xff] %v272_v21  ;;  %275 = vst [vmem:[%s3638_s30 + $0xb0] sm:$0xff] %v274_v22  ;;  %v282_v26 = vld [vmem:[%s3630_s29 + $0x190] sm:$0xff]  ;;  %v284_v27 = vld [vmem:[%s3630_s29 + $0x198] sm:$0xff] }
  0x1e   : > { %277 = vst [vmem:[%s3638_s30 + $0xb8] sm:$0xff] %v276_v23  ;;  %279 = vst [vmem:[%s3638_s30 + $0xc0] sm:$0xff] %v278_v24  ;;  %v286_v28 = vld [vmem:[%s3630_s29 + $0x1a0] sm:$0xff]  ;;  %v288_v29 = vld [vmem:[%s3630_s29 + $0x1a8] sm:$0xff] }
  0x1f   : > { %281 = vst [vmem:[%s3638_s30 + $0xc8] sm:$0xff] %v280_v25  ;;  %283 = vst [vmem:[%s3638_s30 + $0xd0] sm:$0xff] %v282_v26  ;;  %v290_v30 = vld [vmem:[%s3630_s29 + $0x1b0] sm:$0xff]  ;;  %v292_v31 = vld [vmem:[%s3630_s29 + $0x1b8] sm:$0xff] }
  0x20   : > { %285 = vst [vmem:[%s3638_s30 + $0xd8] sm:$0xff] %v284_v27  ;;  %287 = vst [vmem:[%s3638_s30 + $0xe0] sm:$0xff] %v286_v28  ;;  %v294_v32 = vld [vmem:[%s3630_s29 + $0x200] sm:$0xff]  ;;  %v296_v33 = vld [vmem:[%s3630_s29 + $0x208] sm:$0xff] }
  0x21   : > { %289 = vst [vmem:[%s3638_s30 + $0xe8] sm:$0xff] %v288_v29  ;;  %291 = vst [vmem:[%s3638_s30 + $0xf0] sm:$0xff] %v290_v30  ;;  %v298_v34 = vld [vmem:[%s3630_s29 + $0x210] sm:$0xff]  ;;  %v300_v35 = vld [vmem:[%s3630_s29 + $0x218] sm:$0xff] }
  0x22   : > { %293 = vst [vmem:[%s3638_s30 + $0xf8] sm:$0xff] %v292_v31  ;;  %295 = vst [vmem:[%s3638_s30 + $0x100] sm:$0xff] %v294_v32  ;;  %v302_v36 = vld [vmem:[%s3630_s29 + $0x220] sm:$0xff]  ;;  %v304_v37 = vld [vmem:[%s3630_s29 + $0x228] sm:$0xff] }
  0x23   : > { %297 = vst [vmem:[%s3638_s30 + $0x108] sm:$0xff] %v296_v33  ;;  %299 = vst [vmem:[%s3638_s30 + $0x110] sm:$0xff] %v298_v34  ;;  %v306_v38 = vld [vmem:[%s3630_s29 + $0x230] sm:$0xff]  ;;  %v308_v39 = vld [vmem:[%s3630_s29 + $0x238] sm:$0xff] }
  0x24   : > { %301 = vst [vmem:[%s3638_s30 + $0x118] sm:$0xff] %v300_v35  ;;  %303 = vst [vmem:[%s3638_s30 + $0x120] sm:$0xff] %v302_v36  ;;  %v310_v40 = vld [vmem:[%s3630_s29 + $0x280] sm:$0xff]  ;;  %v312_v41 = vld [vmem:[%s3630_s29 + $0x288] sm:$0xff] }
  0x25   : > { %305 = vst [vmem:[%s3638_s30 + $0x128] sm:$0xff] %v304_v37  ;;  %307 = vst [vmem:[%s3638_s30 + $0x130] sm:$0xff] %v306_v38  ;;  %v314_v42 = vld [vmem:[%s3630_s29 + $0x290] sm:$0xff]  ;;  %v316_v43 = vld [vmem:[%s3630_s29 + $0x298] sm:$0xff] }
  0x26   : > { %309 = vst [vmem:[%s3638_s30 + $0x138] sm:$0xff] %v308_v39  ;;  %311 = vst [vmem:[%s3638_s30 + $0x140] sm:$0xff] %v310_v40  ;;  %v318_v44 = vld [vmem:[%s3630_s29 + $0x2a0] sm:$0xff]  ;;  %v320_v45 = vld [vmem:[%s3630_s29 + $0x2a8] sm:$0xff] }
  0x27   : > { %313 = vst [vmem:[%s3638_s30 + $0x148] sm:$0xff] %v312_v41  ;;  %315 = vst [vmem:[%s3638_s30 + $0x150] sm:$0xff] %v314_v42  ;;  %v322_v46 = vld [vmem:[%s3630_s29 + $0x2b0] sm:$0xff]  ;;  %v324_v47 = vld [vmem:[%s3630_s29 + $0x2b8] sm:$0xff] }
  0x28   : > { %317 = vst [vmem:[%s3638_s30 + $0x158] sm:$0xff] %v316_v43  ;;  %319 = vst [vmem:[%s3638_s30 + $0x160] sm:$0xff] %v318_v44  ;;  %v326_v48 = vld [vmem:[%s3630_s29 + $0x300] sm:$0xff]  ;;  %v328_v49 = vld [vmem:[%s3630_s29 + $0x308] sm:$0xff] }
  0x29   : > { %321 = vst [vmem:[%s3638_s30 + $0x168] sm:$0xff] %v320_v45  ;;  %323 = vst [vmem:[%s3638_s30 + $0x170] sm:$0xff] %v322_v46  ;;  %v330_v50 = vld [vmem:[%s3630_s29 + $0x310] sm:$0xff]  ;;  %v332_v51 = vld [vmem:[%s3630_s29 + $0x318] sm:$0xff] }
  0x2a   : > { %325 = vst [vmem:[%s3638_s30 + $0x178] sm:$0xff] %v324_v47  ;;  %327 = vst [vmem:[%s3638_s30 + $0x180] sm:$0xff] %v326_v48  ;;  %v334_v52 = vld [vmem:[%s3630_s29 + $0x320] sm:$0xff]  ;;  %v336_v53 = vld [vmem:[%s3630_s29 + $0x328] sm:$0xff] }
  0x2b   : > { %329 = vst [vmem:[%s3638_s30 + $0x188] sm:$0xff] %v328_v49  ;;  %331 = vst [vmem:[%s3638_s30 + $0x190] sm:$0xff] %v330_v50  ;;  %v338_v54 = vld [vmem:[%s3630_s29 + $0x330] sm:$0xff]  ;;  %v340_v55 = vld [vmem:[%s3630_s29 + $0x338] sm:$0xff] }
  0x2c   : > { %333 = vst [vmem:[%s3638_s30 + $0x198] sm:$0xff] %v332_v51  ;;  %335 = vst [vmem:[%s3638_s30 + $0x1a0] sm:$0xff] %v334_v52  ;;  %v342_v56 = vld [vmem:[%s3630_s29 + $0x380] sm:$0xff]  ;;  %v344_v57 = vld [vmem:[%s3630_s29 + $0x388] sm:$0xff] }
  0x2d   : > { %337 = vst [vmem:[%s3638_s30 + $0x1a8] sm:$0xff] %v336_v53  ;;  %339 = vst [vmem:[%s3638_s30 + $0x1b0] sm:$0xff] %v338_v54  ;;  %v346_v58 = vld [vmem:[%s3630_s29 + $0x390] sm:$0xff]  ;;  %v348_v59 = vld [vmem:[%s3630_s29 + $0x398] sm:$0xff] }
  0x2e   : > { %341 = vst [vmem:[%s3638_s30 + $0x1b8] sm:$0xff] %v340_v55  ;;  %343 = vst [vmem:[%s3638_s30 + $0x1c0] sm:$0xff] %v342_v56  ;;  %v350_v60 = vld [vmem:[%s3630_s29 + $0x3a0] sm:$0xff]  ;;  %v352_v61 = vld [vmem:[%s3630_s29 + $0x3a8] sm:$0xff] }
  0x2f   : > { %345 = vst [vmem:[%s3638_s30 + $0x1c8] sm:$0xff] %v344_v57  ;;  %347 = vst [vmem:[%s3638_s30 + $0x1d0] sm:$0xff] %v346_v58  ;;  %v354_v62 = vld [vmem:[%s3630_s29 + $0x3b0] sm:$0xff]  ;;  %v356_v63 = vld [vmem:[%s3630_s29 + $0x3b8] sm:$0xff] }
  0x30   : > { %349 = vst [vmem:[%s3638_s30 + $0x1d8] sm:$0xff] %v348_v59  ;;  %351 = vst [vmem:[%s3638_s30 + $0x1e0] sm:$0xff] %v350_v60  ;;  %v358_v0 = vld [vmem:[%s3630_s29 + $0x400] sm:$0xff]  ;;  %v360_v1 = vld [vmem:[%s3630_s29 + $0x408] sm:$0xff] }
  0x31   : > { %353 = vst [vmem:[%s3638_s30 + $0x1e8] sm:$0xff] %v352_v61  ;;  %355 = vst [vmem:[%s3638_s30 + $0x1f0] sm:$0xff] %v354_v62  ;;  %v362_v2 = vld [vmem:[%s3630_s29 + $0x410] sm:$0xff]  ;;  %v364_v3 = vld [vmem:[%s3630_s29 + $0x418] sm:$0xff] }
  0x32   : > { %357 = vst [vmem:[%s3638_s30 + $0x1f8] sm:$0xff] %v356_v63  ;;  %359 = vst [vmem:[%s3638_s30 + $0x200] sm:$0xff] %v358_v0  ;;  %v366_v4 = vld [vmem:[%s3630_s29 + $0x420] sm:$0xff]  ;;  %v368_v5 = vld [vmem:[%s3630_s29 + $0x428] sm:$0xff] }
  0x33   : > { %361 = vst [vmem:[%s3638_s30 + $0x208] sm:$0xff] %v360_v1  ;;  %363 = vst [vmem:[%s3638_s30 + $0x210] sm:$0xff] %v362_v2  ;;  %v370_v6 = vld [vmem:[%s3630_s29 + $0x430] sm:$0xff]  ;;  %v372_v7 = vld [vmem:[%s3630_s29 + $0x438] sm:$0xff] }
  0x34   : > { %365 = vst [vmem:[%s3638_s30 + $0x218] sm:$0xff] %v364_v3  ;;  %367 = vst [vmem:[%s3638_s30 + $0x220] sm:$0xff] %v366_v4  ;;  %v374_v8 = vld [vmem:[%s3630_s29 + $0x480] sm:$0xff]  ;;  %v376_v9 = vld [vmem:[%s3630_s29 + $0x488] sm:$0xff] }
  0x35   : > { %369 = vst [vmem:[%s3638_s30 + $0x228] sm:$0xff] %v368_v5  ;;  %371 = vst [vmem:[%s3638_s30 + $0x230] sm:$0xff] %v370_v6  ;;  %v378_v10 = vld [vmem:[%s3630_s29 + $0x490] sm:$0xff]  ;;  %v380_v11 = vld [vmem:[%s3630_s29 + $0x498] sm:$0xff] }
  0x36   : > { %373 = vst [vmem:[%s3638_s30 + $0x238] sm:$0xff] %v372_v7  ;;  %375 = vst [vmem:[%s3638_s30 + $0x240] sm:$0xff] %v374_v8  ;;  %v382_v12 = vld [vmem:[%s3630_s29 + $0x4a0] sm:$0xff]  ;;  %v384_v13 = vld [vmem:[%s3630_s29 + $0x4a8] sm:$0xff] }
  0x37   : > { %377 = vst [vmem:[%s3638_s30 + $0x248] sm:$0xff] %v376_v9  ;;  %379 = vst [vmem:[%s3638_s30 + $0x250] sm:$0xff] %v378_v10  ;;  %v386_v14 = vld [vmem:[%s3630_s29 + $0x4b0] sm:$0xff]  ;;  %v388_v15 = vld [vmem:[%s3630_s29 + $0x4b8] sm:$0xff] }
  0x38   : > { %381 = vst [vmem:[%s3638_s30 + $0x258] sm:$0xff] %v380_v11  ;;  %383 = vst [vmem:[%s3638_s30 + $0x260] sm:$0xff] %v382_v12  ;;  %v390_v16 = vld [vmem:[%s3630_s29 + $0x500] sm:$0xff]  ;;  %v392_v17 = vld [vmem:[%s3630_s29 + $0x508] sm:$0xff] }
  0x39   : > { %385 = vst [vmem:[%s3638_s30 + $0x268] sm:$0xff] %v384_v13  ;;  %387 = vst [vmem:[%s3638_s30 + $0x270] sm:$0xff] %v386_v14  ;;  %v394_v18 = vld [vmem:[%s3630_s29 + $0x510] sm:$0xff]  ;;  %v396_v19 = vld [vmem:[%s3630_s29 + $0x518] sm:$0xff] }
  0x3a   : > { %389 = vst [vmem:[%s3638_s30 + $0x278] sm:$0xff] %v388_v15  ;;  %391 = vst [vmem:[%s3638_s30 + $0x280] sm:$0xff] %v390_v16  ;;  %v398_v20 = vld [vmem:[%s3630_s29 + $0x520] sm:$0xff]  ;;  %v400_v21 = vld [vmem:[%s3630_s29 + $0x528] sm:$0xff] }
  0x3b   : > { %393 = vst [vmem:[%s3638_s30 + $0x288] sm:$0xff] %v392_v17  ;;  %395 = vst [vmem:[%s3638_s30 + $0x290] sm:$0xff] %v394_v18  ;;  %v402_v22 = vld [vmem:[%s3630_s29 + $0x530] sm:$0xff]  ;;  %v404_v23 = vld [vmem:[%s3630_s29 + $0x538] sm:$0xff] }
  0x3c   : > { %397 = vst [vmem:[%s3638_s30 + $0x298] sm:$0xff] %v396_v19  ;;  %399 = vst [vmem:[%s3638_s30 + $0x2a0] sm:$0xff] %v398_v20  ;;  %v406_v24 = vld [vmem:[%s3630_s29 + $0x580] sm:$0xff]  ;;  %v408_v25 = vld [vmem:[%s3630_s29 + $0x588] sm:$0xff] }
  0x3d   : > { %401 = vst [vmem:[%s3638_s30 + $0x2a8] sm:$0xff] %v400_v21  ;;  %403 = vst [vmem:[%s3638_s30 + $0x2b0] sm:$0xff] %v402_v22  ;;  %v410_v26 = vld [vmem:[%s3630_s29 + $0x590] sm:$0xff]  ;;  %v412_v27 = vld [vmem:[%s3630_s29 + $0x598] sm:$0xff] }
  0x3e   : > { %405 = vst [vmem:[%s3638_s30 + $0x2b8] sm:$0xff] %v404_v23  ;;  %407 = vst [vmem:[%s3638_s30 + $0x2c0] sm:$0xff] %v406_v24  ;;  %v414_v28 = vld [vmem:[%s3630_s29 + $0x5a0] sm:$0xff]  ;;  %v416_v29 = vld [vmem:[%s3630_s29 + $0x5a8] sm:$0xff] }
  0x3f   : > { %409 = vst [vmem:[%s3638_s30 + $0x2c8] sm:$0xff] %v408_v25  ;;  %411 = vst [vmem:[%s3638_s30 + $0x2d0] sm:$0xff] %v410_v26  ;;  %v418_v30 = vld [vmem:[%s3630_s29 + $0x5b0] sm:$0xff]  ;;  %v420_v31 = vld [vmem:[%s3630_s29 + $0x5b8] sm:$0xff] }
  0x40   : > { %413 = vst [vmem:[%s3638_s30 + $0x2d8] sm:$0xff] %v412_v27  ;;  %415 = vst [vmem:[%s3638_s30 + $0x2e0] sm:$0xff] %v414_v28  ;;  %v422_v32 = vld [vmem:[%s3630_s29 + $0x600] sm:$0xff]  ;;  %v424_v33 = vld [vmem:[%s3630_s29 + $0x608] sm:$0xff] }
  0x41   : > { %417 = vst [vmem:[%s3638_s30 + $0x2e8] sm:$0xff] %v416_v29  ;;  %419 = vst [vmem:[%s3638_s30 + $0x2f0] sm:$0xff] %v418_v30  ;;  %v426_v34 = vld [vmem:[%s3630_s29 + $0x610] sm:$0xff]  ;;  %v428_v35 = vld [vmem:[%s3630_s29 + $0x618] sm:$0xff] }
  0x42   : > { %421 = vst [vmem:[%s3638_s30 + $0x2f8] sm:$0xff] %v420_v31  ;;  %423 = vst [vmem:[%s3638_s30 + $0x300] sm:$0xff] %v422_v32  ;;  %v430_v36 = vld [vmem:[%s3630_s29 + $0x620] sm:$0xff]  ;;  %v432_v37 = vld [vmem:[%s3630_s29 + $0x628] sm:$0xff] }
  0x43   : > { %425 = vst [vmem:[%s3638_s30 + $0x308] sm:$0xff] %v424_v33  ;;  %427 = vst [vmem:[%s3638_s30 + $0x310] sm:$0xff] %v426_v34  ;;  %v434_v38 = vld [vmem:[%s3630_s29 + $0x630] sm:$0xff]  ;;  %v436_v39 = vld [vmem:[%s3630_s29 + $0x638] sm:$0xff] }
  0x44   : > { %429 = vst [vmem:[%s3638_s30 + $0x318] sm:$0xff] %v428_v35  ;;  %431 = vst [vmem:[%s3638_s30 + $0x320] sm:$0xff] %v430_v36  ;;  %v438_v40 = vld [vmem:[%s3630_s29 + $0x680] sm:$0xff]  ;;  %v440_v41 = vld [vmem:[%s3630_s29 + $0x688] sm:$0xff] }
  0x45   : > { %433 = vst [vmem:[%s3638_s30 + $0x328] sm:$0xff] %v432_v37  ;;  %435 = vst [vmem:[%s3638_s30 + $0x330] sm:$0xff] %v434_v38  ;;  %v442_v42 = vld [vmem:[%s3630_s29 + $0x690] sm:$0xff]  ;;  %v444_v43 = vld [vmem:[%s3630_s29 + $0x698] sm:$0xff] }
  0x46   : > { %437 = vst [vmem:[%s3638_s30 + $0x338] sm:$0xff] %v436_v39  ;;  %439 = vst [vmem:[%s3638_s30 + $0x340] sm:$0xff] %v438_v40  ;;  %v446_v44 = vld [vmem:[%s3630_s29 + $0x6a0] sm:$0xff]  ;;  %v448_v45 = vld [vmem:[%s3630_s29 + $0x6a8] sm:$0xff] }
  0x47   : > { %441 = vst [vmem:[%s3638_s30 + $0x348] sm:$0xff] %v440_v41  ;;  %443 = vst [vmem:[%s3638_s30 + $0x350] sm:$0xff] %v442_v42  ;;  %v450_v46 = vld [vmem:[%s3630_s29 + $0x6b0] sm:$0xff]  ;;  %v452_v47 = vld [vmem:[%s3630_s29 + $0x6b8] sm:$0xff] }
  0x48   : > { %445 = vst [vmem:[%s3638_s30 + $0x358] sm:$0xff] %v444_v43  ;;  %447 = vst [vmem:[%s3638_s30 + $0x360] sm:$0xff] %v446_v44  ;;  %v454_v48 = vld [vmem:[%s3630_s29 + $0x700] sm:$0xff]  ;;  %v456_v49 = vld [vmem:[%s3630_s29 + $0x708] sm:$0xff] }
  0x49   : > { %449 = vst [vmem:[%s3638_s30 + $0x368] sm:$0xff] %v448_v45  ;;  %451 = vst [vmem:[%s3638_s30 + $0x370] sm:$0xff] %v450_v46  ;;  %v458_v50 = vld [vmem:[%s3630_s29 + $0x710] sm:$0xff]  ;;  %v460_v51 = vld [vmem:[%s3630_s29 + $0x718] sm:$0xff] }
  0x4a   : > { %453 = vst [vmem:[%s3638_s30 + $0x378] sm:$0xff] %v452_v47  ;;  %455 = vst [vmem:[%s3638_s30 + $0x380] sm:$0xff] %v454_v48  ;;  %v462_v52 = vld [vmem:[%s3630_s29 + $0x720] sm:$0xff]  ;;  %v464_v53 = vld [vmem:[%s3630_s29 + $0x728] sm:$0xff] }
  0x4b   : > { %457 = vst [vmem:[%s3638_s30 + $0x388] sm:$0xff] %v456_v49  ;;  %459 = vst [vmem:[%s3638_s30 + $0x390] sm:$0xff] %v458_v50  ;;  %v466_v54 = vld [vmem:[%s3630_s29 + $0x730] sm:$0xff]  ;;  %v468_v55 = vld [vmem:[%s3630_s29 + $0x738] sm:$0xff] }
  0x4c   : > { %461 = vst [vmem:[%s3638_s30 + $0x398] sm:$0xff] %v460_v51  ;;  %463 = vst [vmem:[%s3638_s30 + $0x3a0] sm:$0xff] %v462_v52  ;;  %v470_v56 = vld [vmem:[%s3630_s29 + $0x780] sm:$0xff]  ;;  %v472_v57 = vld [vmem:[%s3630_s29 + $0x788] sm:$0xff] }
  0x4d   : > { %465 = vst [vmem:[%s3638_s30 + $0x3a8] sm:$0xff] %v464_v53  ;;  %467 = vst [vmem:[%s3638_s30 + $0x3b0] sm:$0xff] %v466_v54  ;;  %v474_v58 = vld [vmem:[%s3630_s29 + $0x790] sm:$0xff]  ;;  %v476_v59 = vld [vmem:[%s3630_s29 + $0x798] sm:$0xff] }
  0x4e   : > { %469 = vst [vmem:[%s3638_s30 + $0x3b8] sm:$0xff] %v468_v55  ;;  %471 = vst [vmem:[%s3638_s30 + $0x3c0] sm:$0xff] %v470_v56  ;;  %v478_v60 = vld [vmem:[%s3630_s29 + $0x7a0] sm:$0xff]  ;;  %v480_v61 = vld [vmem:[%s3630_s29 + $0x7a8] sm:$0xff] }
  0x4f   : > { %473 = vst [vmem:[%s3638_s30 + $0x3c8] sm:$0xff] %v472_v57  ;;  %475 = vst [vmem:[%s3638_s30 + $0x3d0] sm:$0xff] %v474_v58  ;;  %v482_v62 = vld [vmem:[%s3630_s29 + $0x7b0] sm:$0xff]  ;;  %v484_v63 = vld [vmem:[%s3630_s29 + $0x7b8] sm:$0xff] }
  0x50   : > { %477 = vst [vmem:[%s3638_s30 + $0x3d8] sm:$0xff] %v476_v59  ;;  %479 = vst [vmem:[%s3638_s30 + $0x3e0] sm:$0xff] %v478_v60  ;;  %v486_v0 = vld [vmem:[%s3630_s29 + $0x800] sm:$0xff]  ;;  %v488_v1 = vld [vmem:[%s3630_s29 + $0x808] sm:$0xff] }
  0x51   : > { %481 = vst [vmem:[%s3638_s30 + $0x3e8] sm:$0xff] %v480_v61  ;;  %483 = vst [vmem:[%s3638_s30 + $0x3f0] sm:$0xff] %v482_v62  ;;  %v490_v2 = vld [vmem:[%s3630_s29 + $0x810] sm:$0xff]  ;;  %v492_v3 = vld [vmem:[%s3630_s29 + $0x818] sm:$0xff] }
  0x52   : > { %485 = vst [vmem:[%s3638_s30 + $0x3f8] sm:$0xff] %v484_v63  ;;  %487 = vst [vmem:[%s3638_s30 + $0x400] sm:$0xff] %v486_v0  ;;  %v494_v4 = vld [vmem:[%s3630_s29 + $0x820] sm:$0xff]  ;;  %v496_v5 = vld [vmem:[%s3630_s29 + $0x828] sm:$0xff] }
  0x53   : > { %489 = vst [vmem:[%s3638_s30 + $0x408] sm:$0xff] %v488_v1  ;;  %491 = vst [vmem:[%s3638_s30 + $0x410] sm:$0xff] %v490_v2  ;;  %v498_v6 = vld [vmem:[%s3630_s29 + $0x830] sm:$0xff]  ;;  %v500_v7 = vld [vmem:[%s3630_s29 + $0x838] sm:$0xff] }
  0x54   : > { %493 = vst [vmem:[%s3638_s30 + $0x418] sm:$0xff] %v492_v3  ;;  %495 = vst [vmem:[%s3638_s30 + $0x420] sm:$0xff] %v494_v4  ;;  %v502_v8 = vld [vmem:[%s3630_s29 + $0x880] sm:$0xff]  ;;  %v504_v9 = vld [vmem:[%s3630_s29 + $0x888] sm:$0xff] }
  0x55   : > { %497 = vst [vmem:[%s3638_s30 + $0x428] sm:$0xff] %v496_v5  ;;  %499 = vst [vmem:[%s3638_s30 + $0x430] sm:$0xff] %v498_v6  ;;  %v506_v10 = vld [vmem:[%s3630_s29 + $0x890] sm:$0xff]  ;;  %v508_v11 = vld [vmem:[%s3630_s29 + $0x898] sm:$0xff] }
  0x56   : > { %501 = vst [vmem:[%s3638_s30 + $0x438] sm:$0xff] %v500_v7  ;;  %503 = vst [vmem:[%s3638_s30 + $0x440] sm:$0xff] %v502_v8  ;;  %v510_v12 = vld [vmem:[%s3630_s29 + $0x8a0] sm:$0xff]  ;;  %v512_v13 = vld [vmem:[%s3630_s29 + $0x8a8] sm:$0xff] }
  0x57   : > { %505 = vst [vmem:[%s3638_s30 + $0x448] sm:$0xff] %v504_v9  ;;  %507 = vst [vmem:[%s3638_s30 + $0x450] sm:$0xff] %v506_v10  ;;  %v514_v14 = vld [vmem:[%s3630_s29 + $0x8b0] sm:$0xff]  ;;  %v516_v15 = vld [vmem:[%s3630_s29 + $0x8b8] sm:$0xff] }
  0x58   : > { %509 = vst [vmem:[%s3638_s30 + $0x458] sm:$0xff] %v508_v11  ;;  %511 = vst [vmem:[%s3638_s30 + $0x460] sm:$0xff] %v510_v12  ;;  %v518_v16 = vld [vmem:[%s3630_s29 + $0x900] sm:$0xff]  ;;  %v520_v17 = vld [vmem:[%s3630_s29 + $0x908] sm:$0xff] }
  0x59   : > { %513 = vst [vmem:[%s3638_s30 + $0x468] sm:$0xff] %v512_v13  ;;  %515 = vst [vmem:[%s3638_s30 + $0x470] sm:$0xff] %v514_v14  ;;  %v522_v18 = vld [vmem:[%s3630_s29 + $0x910] sm:$0xff]  ;;  %v524_v19 = vld [vmem:[%s3630_s29 + $0x918] sm:$0xff] }
  0x5a   : > { %517 = vst [vmem:[%s3638_s30 + $0x478] sm:$0xff] %v516_v15  ;;  %519 = vst [vmem:[%s3638_s30 + $0x480] sm:$0xff] %v518_v16  ;;  %v526_v20 = vld [vmem:[%s3630_s29 + $0x920] sm:$0xff]  ;;  %v528_v21 = vld [vmem:[%s3630_s29 + $0x928] sm:$0xff] }
  0x5b   : > { %521 = vst [vmem:[%s3638_s30 + $0x488] sm:$0xff] %v520_v17  ;;  %523 = vst [vmem:[%s3638_s30 + $0x490] sm:$0xff] %v522_v18  ;;  %v530_v22 = vld [vmem:[%s3630_s29 + $0x930] sm:$0xff]  ;;  %v532_v23 = vld [vmem:[%s3630_s29 + $0x938] sm:$0xff] }
  0x5c   : > { %525 = vst [vmem:[%s3638_s30 + $0x498] sm:$0xff] %v524_v19  ;;  %527 = vst [vmem:[%s3638_s30 + $0x4a0] sm:$0xff] %v526_v20  ;;  %v534_v24 = vld [vmem:[%s3630_s29 + $0x980] sm:$0xff]  ;;  %v536_v25 = vld [vmem:[%s3630_s29 + $0x988] sm:$0xff] }
  0x5d   : > { %529 = vst [vmem:[%s3638_s30 + $0x4a8] sm:$0xff] %v528_v21  ;;  %531 = vst [vmem:[%s3638_s30 + $0x4b0] sm:$0xff] %v530_v22  ;;  %v538_v26 = vld [vmem:[%s3630_s29 + $0x990] sm:$0xff]  ;;  %v540_v27 = vld [vmem:[%s3630_s29 + $0x998] sm:$0xff] }
  0x5e   : > { %533 = vst [vmem:[%s3638_s30 + $0x4b8] sm:$0xff] %v532_v23  ;;  %535 = vst [vmem:[%s3638_s30 + $0x4c0] sm:$0xff] %v534_v24  ;;  %v542_v28 = vld [vmem:[%s3630_s29 + $0x9a0] sm:$0xff]  ;;  %v544_v29 = vld [vmem:[%s3630_s29 + $0x9a8] sm:$0xff] }
  0x5f   : > { %537 = vst [vmem:[%s3638_s30 + $0x4c8] sm:$0xff] %v536_v25  ;;  %539 = vst [vmem:[%s3638_s30 + $0x4d0] sm:$0xff] %v538_v26  ;;  %v546_v30 = vld [vmem:[%s3630_s29 + $0x9b0] sm:$0xff]  ;;  %v548_v31 = vld [vmem:[%s3630_s29 + $0x9b8] sm:$0xff] }
  0x60   : > { %541 = vst [vmem:[%s3638_s30 + $0x4d8] sm:$0xff] %v540_v27  ;;  %543 = vst [vmem:[%s3638_s30 + $0x4e0] sm:$0xff] %v542_v28  ;;  %v550_v32 = vld [vmem:[%s3630_s29 + $0xa00] sm:$0xff]  ;;  %v552_v33 = vld [vmem:[%s3630_s29 + $0xa08] sm:$0xff] }
  0x61   : > { %545 = vst [vmem:[%s3638_s30 + $0x4e8] sm:$0xff] %v544_v29  ;;  %547 = vst [vmem:[%s3638_s30 + $0x4f0] sm:$0xff] %v546_v30  ;;  %v554_v34 = vld [vmem:[%s3630_s29 + $0xa10] sm:$0xff]  ;;  %v556_v35 = vld [vmem:[%s3630_s29 + $0xa18] sm:$0xff] }
  0x62   : > { %549 = vst [vmem:[%s3638_s30 + $0x4f8] sm:$0xff] %v548_v31  ;;  %551 = vst [vmem:[%s3638_s30 + $0x500] sm:$0xff] %v550_v32  ;;  %v558_v36 = vld [vmem:[%s3630_s29 + $0xa20] sm:$0xff]  ;;  %v560_v37 = vld [vmem:[%s3630_s29 + $0xa28] sm:$0xff] }
  0x63   : > { %553 = vst [vmem:[%s3638_s30 + $0x508] sm:$0xff] %v552_v33  ;;  %555 = vst [vmem:[%s3638_s30 + $0x510] sm:$0xff] %v554_v34  ;;  %v562_v38 = vld [vmem:[%s3630_s29 + $0xa30] sm:$0xff]  ;;  %v564_v39 = vld [vmem:[%s3630_s29 + $0xa38] sm:$0xff] }
  0x64   : > { %557 = vst [vmem:[%s3638_s30 + $0x518] sm:$0xff] %v556_v35  ;;  %559 = vst [vmem:[%s3638_s30 + $0x520] sm:$0xff] %v558_v36  ;;  %v566_v40 = vld [vmem:[%s3630_s29 + $0xa80] sm:$0xff]  ;;  %v568_v41 = vld [vmem:[%s3630_s29 + $0xa88] sm:$0xff] }
  0x65   : > { %561 = vst [vmem:[%s3638_s30 + $0x528] sm:$0xff] %v560_v37  ;;  %563 = vst [vmem:[%s3638_s30 + $0x530] sm:$0xff] %v562_v38  ;;  %v570_v42 = vld [vmem:[%s3630_s29 + $0xa90] sm:$0xff]  ;;  %v572_v43 = vld [vmem:[%s3630_s29 + $0xa98] sm:$0xff] }
  0x66   : > { %565 = vst [vmem:[%s3638_s30 + $0x538] sm:$0xff] %v564_v39  ;;  %567 = vst [vmem:[%s3638_s30 + $0x540] sm:$0xff] %v566_v40  ;;  %v574_v44 = vld [vmem:[%s3630_s29 + $0xaa0] sm:$0xff]  ;;  %v576_v45 = vld [vmem:[%s3630_s29 + $0xaa8] sm:$0xff] }
  0x67   : > { %569 = vst [vmem:[%s3638_s30 + $0x548] sm:$0xff] %v568_v41  ;;  %571 = vst [vmem:[%s3638_s30 + $0x550] sm:$0xff] %v570_v42  ;;  %v578_v46 = vld [vmem:[%s3630_s29 + $0xab0] sm:$0xff]  ;;  %v580_v47 = vld [vmem:[%s3630_s29 + $0xab8] sm:$0xff] }
  0x68   : > { %573 = vst [vmem:[%s3638_s30 + $0x558] sm:$0xff] %v572_v43  ;;  %575 = vst [vmem:[%s3638_s30 + $0x560] sm:$0xff] %v574_v44  ;;  %v582_v48 = vld [vmem:[%s3630_s29 + $0xb00] sm:$0xff]  ;;  %v584_v49 = vld [vmem:[%s3630_s29 + $0xb08] sm:$0xff] }
  0x69   : > { %577 = vst [vmem:[%s3638_s30 + $0x568] sm:$0xff] %v576_v45  ;;  %579 = vst [vmem:[%s3638_s30 + $0x570] sm:$0xff] %v578_v46  ;;  %v586_v50 = vld [vmem:[%s3630_s29 + $0xb10] sm:$0xff]  ;;  %v588_v51 = vld [vmem:[%s3630_s29 + $0xb18] sm:$0xff] }
  0x6a   : > { %581 = vst [vmem:[%s3638_s30 + $0x578] sm:$0xff] %v580_v47  ;;  %583 = vst [vmem:[%s3638_s30 + $0x580] sm:$0xff] %v582_v48  ;;  %v590_v52 = vld [vmem:[%s3630_s29 + $0xb20] sm:$0xff]  ;;  %v592_v53 = vld [vmem:[%s3630_s29 + $0xb28] sm:$0xff] }
  0x6b   : > { %585 = vst [vmem:[%s3638_s30 + $0x588] sm:$0xff] %v584_v49  ;;  %587 = vst [vmem:[%s3638_s30 + $0x590] sm:$0xff] %v586_v50  ;;  %v594_v54 = vld [vmem:[%s3630_s29 + $0xb30] sm:$0xff]  ;;  %v596_v55 = vld [vmem:[%s3630_s29 + $0xb38] sm:$0xff] }
  0x6c   : > { %589 = vst [vmem:[%s3638_s30 + $0x598] sm:$0xff] %v588_v51  ;;  %591 = vst [vmem:[%s3638_s30 + $0x5a0] sm:$0xff] %v590_v52  ;;  %v598_v56 = vld [vmem:[%s3630_s29 + $0xb80] sm:$0xff]  ;;  %v600_v57 = vld [vmem:[%s3630_s29 + $0xb88] sm:$0xff] }
  0x6d   : > { %593 = vst [vmem:[%s3638_s30 + $0x5a8] sm:$0xff] %v592_v53  ;;  %595 = vst [vmem:[%s3638_s30 + $0x5b0] sm:$0xff] %v594_v54  ;;  %v602_v58 = vld [vmem:[%s3630_s29 + $0xb90] sm:$0xff]  ;;  %v604_v59 = vld [vmem:[%s3630_s29 + $0xb98] sm:$0xff] }
  0x6e   : > { %597 = vst [vmem:[%s3638_s30 + $0x5b8] sm:$0xff] %v596_v55  ;;  %599 = vst [vmem:[%s3638_s30 + $0x5c0] sm:$0xff] %v598_v56  ;;  %v606_v60 = vld [vmem:[%s3630_s29 + $0xba0] sm:$0xff]  ;;  %v608_v61 = vld [vmem:[%s3630_s29 + $0xba8] sm:$0xff] }
  0x6f   : > { %601 = vst [vmem:[%s3638_s30 + $0x5c8] sm:$0xff] %v600_v57  ;;  %603 = vst [vmem:[%s3638_s30 + $0x5d0] sm:$0xff] %v602_v58  ;;  %v610_v62 = vld [vmem:[%s3630_s29 + $0xbb0] sm:$0xff]  ;;  %v612_v63 = vld [vmem:[%s3630_s29 + $0xbb8] sm:$0xff] }
  0x70   : > { %605 = vst [vmem:[%s3638_s30 + $0x5d8] sm:$0xff] %v604_v59  ;;  %607 = vst [vmem:[%s3638_s30 + $0x5e0] sm:$0xff] %v606_v60  ;;  %v614_v0 = vld [vmem:[%s3630_s29 + $0xc00] sm:$0xff]  ;;  %v616_v1 = vld [vmem:[%s3630_s29 + $0xc08] sm:$0xff] }
  0x71   : > { %609 = vst [vmem:[%s3638_s30 + $0x5e8] sm:$0xff] %v608_v61  ;;  %611 = vst [vmem:[%s3638_s30 + $0x5f0] sm:$0xff] %v610_v62  ;;  %v618_v2 = vld [vmem:[%s3630_s29 + $0xc10] sm:$0xff]  ;;  %v620_v3 = vld [vmem:[%s3630_s29 + $0xc18] sm:$0xff] }
  0x72   : > { %613 = vst [vmem:[%s3638_s30 + $0x5f8] sm:$0xff] %v612_v63  ;;  %615 = vst [vmem:[%s3638_s30 + $0x600] sm:$0xff] %v614_v0  ;;  %v622_v4 = vld [vmem:[%s3630_s29 + $0xc20] sm:$0xff]  ;;  %v624_v5 = vld [vmem:[%s3630_s29 + $0xc28] sm:$0xff] }
  0x73   : > { %617 = vst [vmem:[%s3638_s30 + $0x608] sm:$0xff] %v616_v1  ;;  %619 = vst [vmem:[%s3638_s30 + $0x610] sm:$0xff] %v618_v2  ;;  %v626_v6 = vld [vmem:[%s3630_s29 + $0xc30] sm:$0xff]  ;;  %v628_v7 = vld [vmem:[%s3630_s29 + $0xc38] sm:$0xff] }
  0x74   : > { %621 = vst [vmem:[%s3638_s30 + $0x618] sm:$0xff] %v620_v3  ;;  %623 = vst [vmem:[%s3638_s30 + $0x620] sm:$0xff] %v622_v4 }
  0x75   : > { %625 = vst [vmem:[%s3638_s30 + $0x628] sm:$0xff] %v624_v5  ;;  %627 = vst [vmem:[%s3638_s30 + $0x630] sm:$0xff] %v626_v6 }
  0x76   : > { %629 = vst [vmem:[%s3638_s30 + $0x638] sm:$0xff] %v628_v7 }
  0x77 PF: > { %p3222_p6 = scmp.ge.s32.totalorder %s3559_s19, 1  ;;  %p634_p7 = scmp.lt.s32.totalorder %s3559_s19, 3 }
  0x79   : > { %p635_p8 = pnand %p3222_p6, %p634_p7 }
  0x7a   : > { %s641_s5 = sand.u32 (!%p635_p8), 1, %s3543_s15   ;;  %v967_v8 = vlaneseq (!%p635_p8)  ;;  %v3561_v9 = vmov (!%p635_p8), 1966171168   ;;  %vm1979_vm0 = vcmask (!%p635_p8), 588800   ;;  %vm1983_vm1 = vcmask (!%p635_p8), 1043456   ;;  %s3223_s10 = sshll.u32 (!%p635_p8), %s3551_s17, 4 }
  0x7b   : > { %638 = sbr.rel (%p635_p8) target bundleno = 587 (0x24b), region = 47  ;;  %v965_v10 = vunpack.c.l.s4 (!%p635_p8), %v3561_v9  ;;  %v4040_v11 = vld.sshfl [vmem:[%s4469_s0] sm:$0x11 pattern:$0x75316420] (!%p635_p8)  ;;  %vm2494_vm2 = vcmask (!%p635_p8), 1041408  }
  0x7c   : > { %s3463_s6 = smul.u32 (!%p635_p8), 1600, %s641_s5  ;;  %v968_v12 = vshrl.u32 (!%p635_p8), %v967_v8, 7  ;;  %v963_v32 = vcombine.high (!%p635_p8), %v4040_v11, %v4040_v11  ;;  %p4337_p9 = scmp.lt.s32.totalorder (!%p635_p8), %s3223_s10, 31 }
  0x7d   : > { %v966_v16 = vunpack.c.0.s8 (!%p635_p8), %v965_v10 }
  0x7e   : > { %s4042_s9 = scalar_lea.vmem (!%p635_p8), [#allocation2], %s3463_s6 }
  0x7f   : > { %v755_v13 = vld [vmem:[%s4042_s9] sm:$0xff] (!%p635_p8)  ;;  %v756_v15 = vld [vmem:[%s4042_s9 + $0x8] sm:$0xff] (!%p635_p8)  ;;  %v4058_v33 = vsub.s32 (!%p635_p8), %v966_v16, %v968_v12 }
  0x80   : > { %v763_v14 = vld [vmem:[%s4042_s9 + $0x40] sm:$0xff] (!%p635_p8)  ;;  %v764_v18 = vld [vmem:[%s4042_s9 + $0x48] sm:$0xff] (!%p635_p8) }
  0x81   : > { %v3228_v17 = vcombine.high (!%p635_p8), %v755_v13, %v763_v14  ;;  %v3227_v19 = vcombine.low (!%p635_p8), %v755_v13, %v763_v14  ;;  %v771_v20 = vld [vmem:[%s4042_s9 + $0x80] sm:$0xff] (!%p635_p8)  ;;  %v3230_v22 = vcombine.high (!%p635_p8), %v756_v15, %v764_v18  ;;  %v3229_v23 = vcombine.low (!%p635_p8), %v756_v15, %v764_v18  ;;  %v772_v25 = vld [vmem:[%s4042_s9 + $0x88] sm:$0xff] (!%p635_p8) }
  0x82   : > { %v779_v21 = vld [vmem:[%s4042_s9 + $0xc0] sm:$0xff]  ;;  %v780_v26 = vld [vmem:[%s4042_s9 + $0xc8] sm:$0xff]  ;;  %v4065_v42 = vrot.slane %v963_v32, %v4058_v33  ;;  %s4482_s10 = smov (!%p4337_p9, %s3223_s10), 31 }
  0x83   : > { %v3244_v24 = vcombine.high %v771_v20, %v779_v21  ;;  %v787_v27 = vld [vmem:[%s4042_s9 + $0x100] sm:$0xff]  ;;  %2032 = vmatprep.subr.bf16.mxu0 %v3228_v17  ;;  %v3246_v28 = vcombine.high %v772_v25, %v780_v26  ;;  %v788_v30 = vld [vmem:[%s4042_s9 + $0x108] sm:$0xff]  ;;  %2073 = vmatprep.subr.bf16.mxu1 %v3230_v22  ;;  %v3243_v34 = vcombine.low %v771_v20, %v779_v21  ;;  %s4358_s14 = scalar_lea.vmem %s4471_s2, %s4482_s10  ;;  %s4373_s21 = scalar_lea.vmem %s4472_s3, %s4482_s10 }
  0x84   : > { %v795_v29 = vld [vmem:[%s4042_s9 + $0x140] sm:$0xff]  ;;  %v796_v31 = vld [vmem:[%s4042_s9 + $0x148] sm:$0xff]  ;;  %2033 = vmatpush1.bf16.msra.mxu0 %v3227_v19  ;;  %2074 = vmatpush1.bf16.msra.mxu1 %v3229_v23  ;;  %v3245_v35 = vcombine.low %v772_v25, %v780_v26  ;;  %s4387_s25 = scalar_lea.vmem %s4473_s4, %s4482_s10 }
  0x85   : > { %2034 = vmatprep.subr.bf16.mxu0 %v3244_v24  ;;  %v3260_v36 = vcombine.high %v787_v27, %v795_v29  ;;  %2075 = vmatprep.subr.bf16.mxu1 %v3246_v28  ;;  %v3262_v37 = vcombine.high %v788_v30, %v796_v31  ;;  %v803_v38 = vld [vmem:[%s4042_s9 + $0x180] sm:$0xff]  ;;  %v804_v40 = vld [vmem:[%s4042_s9 + $0x188] sm:$0xff]  ;;  %v3259_v43 = vcombine.low %v787_v27, %v795_v29 }
  0x86   : > { %v811_v39 = vld [vmem:[%s4042_s9 + $0x1c0] sm:$0xff]  ;;  %v812_v41 = vld [vmem:[%s4042_s9 + $0x1c8] sm:$0xff]  ;;  %v3261_v44 = vcombine.low %v788_v30, %v796_v31  ;;  %3436 = vmatprep.mubr.msk.bf16.mxu0 %vm1979_vm0, %v4065_v42  ;;  %3438 = vmatprep.mubr.msk.bf16.mxu1 %vm1979_vm0, %v4065_v42 }
  0x87   : > { %v3276_v45 = vcombine.high %v803_v38, %v811_v39  ;;  %v3278_v46 = vcombine.high %v804_v40, %v812_v41  ;;  %v819_v47 = vld [vmem:[%s4042_s9 + $0x200] sm:$0xff]  ;;  %v820_v49 = vld [vmem:[%s4042_s9 + $0x208] sm:$0xff]  ;;  %v3275_v51 = vcombine.low %v803_v38, %v811_v39  ;;  %v3277_v52 = vcombine.low %v804_v40, %v812_v41 }
  0x88   : > { %2035 = vmatpush1.bf16.msra.mxu0 %v3243_v34  ;;  %2076 = vmatpush1.bf16.msra.mxu1 %v3245_v35  ;;  %v827_v48 = vld [vmem:[%s4042_s9 + $0x240] sm:$0xff]  ;;  %v828_v50 = vld [vmem:[%s4042_s9 + $0x248] sm:$0xff] }
  0x89   : > { %2036 = vmatprep.subr.bf16.mxu0 %v3260_v36  ;;  %2077 = vmatprep.subr.bf16.mxu1 %v3262_v37  ;;  %v3292_v53 = vcombine.high %v819_v47, %v827_v48  ;;  %v3294_v54 = vcombine.high %v820_v49, %v828_v50  ;;  %v835_v55 = vld [vmem:[%s4042_s9 + $0x280] sm:$0xff]  ;;  %v836_v57 = vld [vmem:[%s4042_s9 + $0x288] sm:$0xff]  ;;  %v3291_v59 = vcombine.low %v819_v47, %v827_v48 }
  0x8a   : > { %v843_v56 = vld [vmem:[%s4042_s9 + $0x2c0] sm:$0xff]  ;;  %v844_v58 = vld [vmem:[%s4042_s9 + $0x2c8] sm:$0xff]  ;;  %v3293_v60 = vcombine.low %v820_v49, %v828_v50 }
  0x8b   : > { %v3308_v61 = vcombine.high %v835_v55, %v843_v56  ;;  %v3310_v62 = vcombine.high %v836_v57, %v844_v58  ;;  %v851_v63 = vld [vmem:[%s4042_s9 + $0x300] sm:$0xff]  ;;  %v852_v1 = vld [vmem:[%s4042_s9 + $0x308] sm:$0xff]  ;;  %v3307_v3 = vcombine.low %v835_v55, %v843_v56  ;;  %v3309_v4 = vcombine.low %v836_v57, %v844_v58  ;;  %v757_v58 = vld [vmem:[%s4042_s9 + $0x10] sm:$0xff] }
  0x8c   : > { %2037 = vmatpush1.bf16.msra.mxu0 %v3259_v43  ;;  %2078 = vmatpush1.bf16.msra.mxu1 %v3261_v44  ;;  %v859_v0 = vld [vmem:[%s4042_s9 + $0x340] sm:$0xff]  ;;  %v860_v2 = vld [vmem:[%s4042_s9 + $0x348] sm:$0xff] }
  0x8d   : > { %2038 = vmatprep.subr.bf16.mxu0 %v3276_v45  ;;  %2079 = vmatprep.subr.bf16.mxu1 %v3278_v46  ;;  %v3324_v5 = vcombine.high %v851_v63, %v859_v0  ;;  %v3326_v6 = vcombine.high %v852_v1, %v860_v2  ;;  %v867_v7 = vld [vmem:[%s4042_s9 + $0x380] sm:$0xff]  ;;  %v868_v9 = vld [vmem:[%s4042_s9 + $0x388] sm:$0xff]  ;;  %v3323_v12 = vcombine.low %v851_v63, %v859_v0 }
  0x8e   : > { %v875_v8 = vld [vmem:[%s4042_s9 + $0x3c0] sm:$0xff]  ;;  %v876_v10 = vld [vmem:[%s4042_s9 + $0x3c8] sm:$0xff]  ;;  %v3325_v13 = vcombine.low %v852_v1, %v860_v2  ;;  %v773_v2 = vld [vmem:[%s4042_s9 + $0x90] sm:$0xff] }
  0x8f   : > { %v3340_v14 = vcombine.high %v867_v7, %v875_v8  ;;  %v3342_v15 = vcombine.high %v868_v9, %v876_v10  ;;  %v883_v16 = vld [vmem:[%s4042_s9 + $0x400] sm:$0xff]  ;;  %v884_v18 = vld [vmem:[%s4042_s9 + $0x408] sm:$0xff]  ;;  %v3339_v20 = vcombine.low %v867_v7, %v875_v8  ;;  %v3341_v21 = vcombine.low %v868_v9, %v876_v10 }
  0x90   : > { %2039 = vmatpush1.bf16.msra.mxu0 %v3275_v51  ;;  %2080 = vmatpush1.bf16.msra.mxu1 %v3277_v52  ;;  %v891_v17 = vld [vmem:[%s4042_s9 + $0x440] sm:$0xff]  ;;  %v892_v19 = vld [vmem:[%s4042_s9 + $0x448] sm:$0xff] }
  0x91   : > { %2040 = vmatprep.subr.bf16.mxu0 %v3292_v53  ;;  %2081 = vmatprep.subr.bf16.mxu1 %v3294_v54  ;;  %v3356_v22 = vcombine.high %v883_v16, %v891_v17  ;;  %v3358_v23 = vcombine.high %v884_v18, %v892_v19  ;;  %v899_v24 = vld [vmem:[%s4042_s9 + $0x480] sm:$0xff]  ;;  %v900_v26 = vld [vmem:[%s4042_s9 + $0x488] sm:$0xff]  ;;  %v3355_v28 = vcombine.low %v883_v16, %v891_v17 }
  0x92   : > { %v907_v25 = vld [vmem:[%s4042_s9 + $0x4c0] sm:$0xff]  ;;  %v908_v27 = vld [vmem:[%s4042_s9 + $0x4c8] sm:$0xff]  ;;  %v3357_v29 = vcombine.low %v884_v18, %v892_v19  ;;  %v805_v19 = vld [vmem:[%s4042_s9 + $0x190] sm:$0xff] }
  0x93   : > { %v3372_v30 = vcombine.high %v899_v24, %v907_v25  ;;  %v3374_v31 = vcombine.high %v900_v26, %v908_v27  ;;  %v915_v32 = vld [vmem:[%s4042_s9 + $0x500] sm:$0xff]  ;;  %v916_v35 = vld [vmem:[%s4042_s9 + $0x508] sm:$0xff]  ;;  %v3371_v37 = vcombine.low %v899_v24, %v907_v25  ;;  %v3373_v38 = vcombine.low %v900_v26, %v908_v27  ;;  %v821_v27 = vld [vmem:[%s4042_s9 + $0x210] sm:$0xff] }
  0x94   : > { %2041 = vmatpush1.bf16.msra.mxu0 %v3291_v59  ;;  %2082 = vmatpush1.bf16.msra.mxu1 %v3293_v60  ;;  %v923_v34 = vld [vmem:[%s4042_s9 + $0x540] sm:$0xff]  ;;  %v924_v36 = vld [vmem:[%s4042_s9 + $0x548] sm:$0xff]  ;;  %v765_v59 = vld [vmem:[%s4042_s9 + $0x50] sm:$0xff] }
  0x95   : > { %2042 = vmatprep.subr.bf16.mxu0 %v3308_v61  ;;  %2083 = vmatprep.subr.bf16.mxu1 %v3310_v62  ;;  %v3388_v39 = vcombine.high %v915_v32, %v923_v34  ;;  %v3390_v40 = vcombine.high %v916_v35, %v924_v36  ;;  %v931_v41 = vld [vmem:[%s4042_s9 + $0x580] sm:$0xff]  ;;  %v932_v44 = vld [vmem:[%s4042_s9 + $0x588] sm:$0xff]  ;;  %v3387_v46 = vcombine.low %v915_v32, %v923_v34  ;;  %v758_v60 = vld [vmem:[%s4042_s9 + $0x18] sm:$0xff] }
  0x96   : > { %v939_v43 = vld [vmem:[%s4042_s9 + $0x5c0] sm:$0xff]  ;;  %v940_v45 = vld [vmem:[%s4042_s9 + $0x5c8] sm:$0xff]  ;;  %v3389_v47 = vcombine.low %v916_v35, %v924_v36  ;;  %v766_v61 = vld [vmem:[%s4042_s9 + $0x58] sm:$0xff]  ;;  %v3232_v63 = vcombine.high %v757_v58, %v765_v59  ;;  %v3231_v7 = vcombine.low %v757_v58, %v765_v59 }
  0x97   : > { %v3404_v48 = vcombine.high %v931_v41, %v939_v43  ;;  %v3406_v49 = vcombine.high %v932_v44, %v940_v45  ;;  %v947_v50 = vld [vmem:[%s4042_s9 + $0x600] sm:$0xff]  ;;  %v948_v51 = vld [vmem:[%s4042_s9 + $0x608] sm:$0xff]  ;;  %v3403_v52 = vcombine.low %v931_v41, %v939_v43  ;;  %v3405_v53 = vcombine.low %v932_v44, %v940_v45  ;;  %v837_v36 = vld [vmem:[%s4042_s9 + $0x290] sm:$0xff] }
  0x98   : > { %2043 = vmatpush1.bf16.msra.mxu0 %v3307_v3  ;;  %2084 = vmatpush1.bf16.msra.mxu1 %v3309_v4  ;;  %v3420_v54 = vcombine.high %v947_v50, %v947_v50  ;;  %v3419_v55 = vcombine.low %v947_v50, %v947_v50  ;;  %v3422_v56 = vcombine.high %v948_v51, %v948_v51  ;;  %v781_v3 = vld [vmem:[%s4042_s9 + $0xd0] sm:$0xff] }
  0x99   : > { %2044 = vmatprep.subr.bf16.mxu0 %v3324_v5  ;;  %2085 = vmatprep.subr.bf16.mxu1 %v3326_v6  ;;  %v3421_v57 = vcombine.low %v948_v51, %v948_v51  ;;  %v3234_v1 = vcombine.high %v758_v60, %v766_v61  ;;  %v4117_v4 = vrot.slane %v4040_v11, %v4058_v33  ;;  %v774_v5 = vld [vmem:[%s4042_s9 + $0x98] sm:$0xff]  ;;  %v853_v45 = vld [vmem:[%s4042_s9 + $0x310] sm:$0xff] }
  0x9a   : > { %v1985_v62 = vsel %vm1983_vm1, %v3419_v55, 0  ;;  %v782_v6 = vld [vmem:[%s4042_s9 + $0xd8] sm:$0xff]  ;;  %v3233_v8 = vcombine.low %v758_v60, %v766_v61  ;;  %v3248_v9 = vcombine.high %v773_v2, %v781_v3  ;;  %v885_v61 = vld [vmem:[%s4042_s9 + $0x410] sm:$0xff] }
  0x9b   : > { %v1991_v0 = vsel %vm1983_vm1, %v3421_v57, 0  ;;  %v3250_v10 = vcombine.high %v774_v5, %v782_v6  ;;  %v790_v11 = vld [vmem:[%s4042_s9 + $0x118] sm:$0xff]  ;;  %v3249_v16 = vcombine.low %v774_v5, %v782_v6  ;;  %v901_v6 = vld [vmem:[%s4042_s9 + $0x490] sm:$0xff] }
  0x9c   : > { %2045 = vmatpush1.bf16.msra.mxu0 %v3323_v12  ;;  %2086 = vmatpush1.bf16.msra.mxu1 %v3325_v13  ;;  %v789_v12 = vld [vmem:[%s4042_s9 + $0x110] sm:$0xff]  ;;  %v870_v55 = vld [vmem:[%s4042_s9 + $0x398] sm:$0xff] }
  0x9d   : > { %2046 = vmatprep.subr.bf16.mxu0 %v3340_v14  ;;  %2087 = vmatprep.subr.bf16.mxu1 %v3342_v15  ;;  %v797_v13 = vld [vmem:[%s4042_s9 + $0x150] sm:$0xff]  ;;  %v798_v14 = vld [vmem:[%s4042_s9 + $0x158] sm:$0xff]  ;;  %v3247_v15 = vcombine.low %v773_v2, %v781_v3 }
  0x9e   : > { %v3264_v17 = vcombine.high %v789_v12, %v797_v13  ;;  %v3266_v18 = vcombine.high %v790_v11, %v798_v14  ;;  %v3265_v24 = vcombine.low %v790_v11, %v798_v14  ;;  %v917_v14 = vld [vmem:[%s4042_s9 + $0x510] sm:$0xff] }
  0xa0   : > { %2047 = vmatpush1.bf16.msra.mxu0 %v3339_v20  ;;  %2088 = vmatpush1.bf16.msra.mxu1 %v3341_v21  ;;  %v813_v20 = vld [vmem:[%s4042_s9 + $0x1d0] sm:$0xff]  ;;  %v806_v21 = vld [vmem:[%s4042_s9 + $0x198] sm:$0xff] }
  0xa1   : > { %2048 = vmatprep.subr.bf16.mxu0 %v3356_v22  ;;  %2089 = vmatprep.subr.bf16.mxu1 %v3358_v23  ;;  %v814_v22 = vld [vmem:[%s4042_s9 + $0x1d8] sm:$0xff]  ;;  %v3263_v23 = vcombine.low %v789_v12, %v797_v13  ;;  %v3280_v25 = vcombine.high %v805_v19, %v813_v20 }
  0xa2   : > { %v3282_v26 = vcombine.high %v806_v21, %v814_v22  ;;  %v3281_v32 = vcombine.low %v806_v21, %v814_v22  ;;  %v933_v22 = vld [vmem:[%s4042_s9 + $0x590] sm:$0xff] }
  0xa4   : > { %2049 = vmatpush1.bf16.msra.mxu0 %v3355_v28  ;;  %2090 = vmatpush1.bf16.msra.mxu1 %v3357_v29  ;;  %v829_v28 = vld [vmem:[%s4042_s9 + $0x250] sm:$0xff]  ;;  %v822_v29 = vld [vmem:[%s4042_s9 + $0x218] sm:$0xff] }
  0xa5   : > { %2050 = vmatprep.subr.bf16.mxu0 %v3372_v30  ;;  %2091 = vmatprep.subr.bf16.mxu1 %v3374_v31  ;;  %v830_v30 = vld [vmem:[%s4042_s9 + $0x258] sm:$0xff]  ;;  %v3279_v31 = vcombine.low %v805_v19, %v813_v20  ;;  %v3296_v34 = vcombine.high %v821_v27, %v829_v28 }
  0xa6   : > { %v3298_v35 = vcombine.high %v822_v29, %v830_v30  ;;  %v3297_v41 = vcombine.low %v822_v29, %v830_v30  ;;  %v949_v30 = vld [vmem:[%s4042_s9 + $0x610] sm:$0xff] }
  0xa8   : > { %2051 = vmatpush1.bf16.msra.mxu0 %v3371_v37  ;;  %2092 = vmatpush1.bf16.msra.mxu1 %v3373_v38  ;;  %v845_v37 = vld [vmem:[%s4042_s9 + $0x2d0] sm:$0xff]  ;;  %v838_v38 = vld [vmem:[%s4042_s9 + $0x298] sm:$0xff] }
  0xa9   : > { %2052 = vmatprep.subr.bf16.mxu0 %v3388_v39  ;;  %2093 = vmatprep.subr.bf16.mxu1 %v3390_v40  ;;  %v846_v39 = vld [vmem:[%s4042_s9 + $0x2d8] sm:$0xff]  ;;  %v3295_v40 = vcombine.low %v821_v27, %v829_v28  ;;  %v3312_v43 = vcombine.high %v837_v36, %v845_v37 }
  0xaa   : > { %v3314_v44 = vcombine.high %v838_v38, %v846_v39  ;;  %v3313_v50 = vcombine.low %v838_v38, %v846_v39  ;;  %v759_v39 = vld [vmem:[%s4042_s9 + $0x20] sm:$0xff] }
  0xac   : > { %2053 = vmatpush1.bf16.msra.mxu0 %v3387_v46  ;;  %2094 = vmatpush1.bf16.msra.mxu1 %v3389_v47  ;;  %v861_v46 = vld [vmem:[%s4042_s9 + $0x350] sm:$0xff]  ;;  %v854_v47 = vld [vmem:[%s4042_s9 + $0x318] sm:$0xff] }
  0xad   : > { %2054 = vmatprep.subr.bf16.mxu0 %v3404_v48  ;;  %2095 = vmatprep.subr.bf16.mxu1 %v3406_v49  ;;  %v862_v48 = vld [vmem:[%s4042_s9 + $0x358] sm:$0xff]  ;;  %v3311_v49 = vcombine.low %v837_v36, %v845_v37  ;;  %v3328_v51 = vcombine.high %v853_v45, %v861_v46  ;;  %v3327_v57 = vcombine.low %v853_v45, %v861_v46 }
  0xae   : > { %v3329_v58 = vcombine.low %v854_v47, %v862_v48  ;;  %v3423_v36 = vcombine.low %v949_v30, %v949_v30 }
  0xb0   : > { %2055 = vmatpush1.bf16.msra.mxu0 %v3403_v52  ;;  %2096 = vmatpush1.bf16.msra.mxu1 %v3405_v53  ;;  %v3330_v52 = vcombine.high %v854_v47, %v862_v48  ;;  %v869_v53 = vld [vmem:[%s4042_s9 + $0x390] sm:$0xff]  ;;  %v775_v48 = vld [vmem:[%s4042_s9 + $0xa0] sm:$0xff] }
  0xb1   : > { %3435 = vmatprep.subr.msk.bf16.mxu0 %vm1983_vm1, %v3420_v54  ;;  %3437 = vmatprep.subr.msk.bf16.mxu1 %vm1983_vm1, %v3422_v56  ;;  %v877_v54 = vld [vmem:[%s4042_s9 + $0x3d0] sm:$0xff]  ;;  %v878_v56 = vld [vmem:[%s4042_s9 + $0x3d8] sm:$0xff] }
  0xb2   : > { %v3344_v59 = vcombine.high %v869_v53, %v877_v54  ;;  %v3346_v60 = vcombine.high %v870_v55, %v878_v56  ;;  %v3345_v2 = vcombine.low %v870_v55, %v878_v56  ;;  %v791_v56 = vld [vmem:[%s4042_s9 + $0x120] sm:$0xff] }
  0xb4   : > { %2057 = vmatpush1.bf16.msra.mxu0 %v1985_v62  ;;  %2098 = vmatpush1.bf16.msra.mxu1 %v1991_v0  ;;  %v893_v62 = vld [vmem:[%s4042_s9 + $0x450] sm:$0xff]  ;;  %v894_v0 = vld [vmem:[%s4042_s9 + $0x458] sm:$0xff] }
  0xb5   : > { %2114 = vmatprep.subr.bf16.mxu0 %v3232_v63  ;;  %2155 = vmatprep.subr.bf16.mxu1 %v3234_v1  ;;  %v886_v63 = vld [vmem:[%s4042_s9 + $0x418] sm:$0xff]  ;;  %v3343_v1 = vcombine.low %v869_v53, %v877_v54  ;;  %v3360_v3 = vcombine.high %v885_v61, %v893_v62 }
  0xb6   : > { %v3362_v5 = vcombine.high %v886_v63, %v894_v0  ;;  %v3361_v12 = vcombine.low %v886_v63, %v894_v0  ;;  %v807_v0 = vld [vmem:[%s4042_s9 + $0x1a0] sm:$0xff] }
  0xb7   : > { %2065 = vmatmul.mubr.bf16.vlgmr.msra.gmra.mrb[0].mxu0 %v4117_v4  ;;  %2106 = vmatmul.mubr.bf16.vlgmr.msra.gmra.mrb[0].mxu1 %v4117_v4 }
  0xb8   : > { %2115 = vmatpush1.bf16.msra.mxu0 %v3231_v7  ;;  %2156 = vmatpush1.bf16.msra.mxu1 %v3233_v8  ;;  %v909_v7 = vld [vmem:[%s4042_s9 + $0x4d0] sm:$0xff]  ;;  %v902_v8 = vld [vmem:[%s4042_s9 + $0x498] sm:$0xff] }
  0xb9   : > { %2116 = vmatprep.subr.bf16.mxu0 %v3248_v9  ;;  %2157 = vmatprep.subr.bf16.mxu1 %v3250_v10  ;;  %v910_v9 = vld [vmem:[%s4042_s9 + $0x4d8] sm:$0xff]  ;;  %v3359_v10 = vcombine.low %v885_v61, %v893_v62  ;;  %v3376_v13 = vcombine.high %v901_v6, %v909_v7 }
  0xba   : > { %3440 = vmatprep.mubr.msk.bf16.mxu0 %vm1979_vm0, %v4065_v42  ;;  %3442 = vmatprep.mubr.msk.bf16.mxu1 %vm1979_vm0, %v4065_v42  ;;  %v3378_v11 = vcombine.high %v902_v8, %v910_v9  ;;  %v3377_v19 = vcombine.low %v902_v8, %v910_v9  ;;  %v823_v9 = vld [vmem:[%s4042_s9 + $0x220] sm:$0xff] }
  0xbc   : > { %2117 = vmatpush1.bf16.msra.mxu0 %v3247_v15  ;;  %2158 = vmatpush1.bf16.msra.mxu1 %v3249_v16  ;;  %v925_v15 = vld [vmem:[%s4042_s9 + $0x550] sm:$0xff]  ;;  %v918_v16 = vld [vmem:[%s4042_s9 + $0x518] sm:$0xff] }
  0xbd   : > { %2118 = vmatprep.subr.bf16.mxu0 %v3264_v17  ;;  %2159 = vmatprep.subr.bf16.mxu1 %v3266_v18  ;;  %v926_v17 = vld [vmem:[%s4042_s9 + $0x558] sm:$0xff]  ;;  %v3375_v18 = vcombine.low %v901_v6, %v909_v7  ;;  %v3392_v20 = vcombine.high %v917_v14, %v925_v15 }
  0xbe   : > { %v3394_v21 = vcombine.high %v918_v16, %v926_v17  ;;  %v3393_v27 = vcombine.low %v918_v16, %v926_v17  ;;  %v839_v17 = vld [vmem:[%s4042_s9 + $0x2a0] sm:$0xff] }
  0xc0   : > { %2119 = vmatpush1.bf16.msra.mxu0 %v3263_v23  ;;  %2160 = vmatpush1.bf16.msra.mxu1 %v3265_v24  ;;  %v941_v23 = vld [vmem:[%s4042_s9 + $0x5d0] sm:$0xff]  ;;  %v934_v24 = vld [vmem:[%s4042_s9 + $0x598] sm:$0xff] }
  0xc1   : > { %2120 = vmatprep.subr.bf16.mxu0 %v3280_v25  ;;  %2161 = vmatprep.subr.bf16.mxu1 %v3282_v26  ;;  %v942_v25 = vld [vmem:[%s4042_s9 + $0x5d8] sm:$0xff]  ;;  %v3391_v26 = vcombine.low %v917_v14, %v925_v15  ;;  %v3408_v28 = vcombine.high %v933_v22, %v941_v23 }
  0xc2   : > { %v3410_v29 = vcombine.high %v934_v24, %v942_v25 }
  0xc4   : > { %2121 = vmatpush1.bf16.msra.mxu0 %v3279_v31  ;;  %2162 = vmatpush1.bf16.msra.mxu1 %v3281_v32  ;;  %v950_v31 = vld [vmem:[%s4042_s9 + $0x618] sm:$0xff]  ;;  %v3407_v32 = vcombine.low %v933_v22, %v941_v23 }
  0xc5   : > { %2122 = vmatprep.subr.bf16.mxu0 %v3296_v34  ;;  %2163 = vmatprep.subr.bf16.mxu1 %v3298_v35  ;;  %v3409_v34 = vcombine.low %v934_v24, %v942_v25  ;;  %v3424_v35 = vcombine.high %v949_v30, %v949_v30  ;;  %v3426_v37 = vcombine.high %v950_v31, %v950_v31  ;;  %v855_v25 = vld [vmem:[%s4042_s9 + $0x320] sm:$0xff] }
  0xc6   : > { %v3425_v38 = vcombine.low %v950_v31, %v950_v31 }
  0xc8   : > { %2123 = vmatpush1.bf16.msra.mxu0 %v3295_v40  ;;  %2164 = vmatpush1.bf16.msra.mxu1 %v3297_v41  ;;  %v767_v40 = vld [vmem:[%s4042_s9 + $0x60] sm:$0xff]  ;;  %v760_v41 = vld [vmem:[%s4042_s9 + $0x28] sm:$0xff]  ;;  %v2003_v46 = vsel %vm1983_vm1, %v3425_v38, 0 }
  0xc9   : > { %2124 = vmatprep.subr.bf16.mxu0 %v3312_v43  ;;  %2165 = vmatprep.subr.bf16.mxu1 %v3314_v44  ;;  %v768_v43 = vld [vmem:[%s4042_s9 + $0x68] sm:$0xff]  ;;  %v1997_v44 = vsel %vm1983_vm1, %v3423_v36, 0  ;;  %v3236_v45 = vcombine.high %v759_v39, %v767_v40 }
  0xca   : > { %v3238_v47 = vcombine.high %v760_v41, %v768_v43  ;;  %v3237_v53 = vcombine.low %v760_v41, %v768_v43  ;;  %v872_v36 = vld [vmem:[%s4042_s9 + $0x3a8] sm:$0xff]  ;;  %v887_v43 = vld [vmem:[%s4042_s9 + $0x420] sm:$0xff] }
  0xcc   : > { %2125 = vmatpush1.bf16.msra.mxu0 %v3311_v49  ;;  %2166 = vmatpush1.bf16.msra.mxu1 %v3313_v50  ;;  %v783_v49 = vld [vmem:[%s4042_s9 + $0xe0] sm:$0xff]  ;;  %v776_v50 = vld [vmem:[%s4042_s9 + $0xa8] sm:$0xff] }
  0xcd   : > { %2126 = vmatprep.subr.bf16.mxu0 %v3328_v51  ;;  %2167 = vmatprep.subr.bf16.mxu1 %v3330_v52  ;;  %v784_v51 = vld [vmem:[%s4042_s9 + $0xe8] sm:$0xff]  ;;  %v3235_v52 = vcombine.low %v759_v39, %v767_v40  ;;  %v3252_v54 = vcombine.high %v775_v48, %v783_v49 }
  0xce   : > { %v3254_v55 = vcombine.high %v776_v50, %v784_v51  ;;  %v3253_v61 = vcombine.low %v776_v50, %v784_v51  ;;  %v903_v51 = vld [vmem:[%s4042_s9 + $0x4a0] sm:$0xff] }
  0xd0   : > { %2127 = vmatpush1.bf16.msra.mxu0 %v3327_v57  ;;  %2168 = vmatpush1.bf16.msra.mxu1 %v3329_v58  ;;  %v799_v57 = vld [vmem:[%s4042_s9 + $0x160] sm:$0xff]  ;;  %v792_v58 = vld [vmem:[%s4042_s9 + $0x128] sm:$0xff] }
  0xd1   : > { %2128 = vmatprep.subr.bf16.mxu0 %v3344_v59  ;;  %2169 = vmatprep.subr.bf16.mxu1 %v3346_v60  ;;  %v800_v59 = vld [vmem:[%s4042_s9 + $0x168] sm:$0xff]  ;;  %v3251_v60 = vcombine.low %v775_v48, %v783_v49  ;;  %v3268_v62 = vcombine.high %v791_v56, %v799_v57 }
  0xd2   : > { %v3270_v63 = vcombine.high %v792_v58, %v800_v59  ;;  %v3269_v6 = vcombine.low %v792_v58, %v800_v59  ;;  %v919_v59 = vld [vmem:[%s4042_s9 + $0x520] sm:$0xff] }
  0xd4   : > { %2129 = vmatpush1.bf16.msra.mxu0 %v3343_v1  ;;  %2170 = vmatpush1.bf16.msra.mxu1 %v3345_v2  ;;  %v815_v1 = vld [vmem:[%s4042_s9 + $0x1e0] sm:$0xff]  ;;  %v808_v2 = vld [vmem:[%s4042_s9 + $0x1a8] sm:$0xff] }
  0xd5   : > { %2130 = vmatprep.subr.bf16.mxu0 %v3360_v3  ;;  %2171 = vmatprep.subr.bf16.mxu1 %v3362_v5  ;;  %v816_v3 = vld [vmem:[%s4042_s9 + $0x1e8] sm:$0xff]  ;;  %v3267_v5 = vcombine.low %v791_v56, %v799_v57  ;;  %v3284_v7 = vcombine.high %v807_v0, %v815_v1 }
  0xd6   : > { %v3286_v8 = vcombine.high %v808_v2, %v816_v3  ;;  %v3285_v14 = vcombine.low %v808_v2, %v816_v3  ;;  %v935_v3 = vld [vmem:[%s4042_s9 + $0x5a0] sm:$0xff] }
  0xd8   : > { %2131 = vmatpush1.bf16.msra.mxu0 %v3359_v10  ;;  %2172 = vmatpush1.bf16.msra.mxu1 %v3361_v12  ;;  %v831_v10 = vld [vmem:[%s4042_s9 + $0x260] sm:$0xff]  ;;  %v824_v12 = vld [vmem:[%s4042_s9 + $0x228] sm:$0xff] }
  0xd9   : > { %2132 = vmatprep.subr.bf16.mxu0 %v3376_v13  ;;  %2173 = vmatprep.subr.bf16.mxu1 %v3378_v11  ;;  %v832_v13 = vld [vmem:[%s4042_s9 + $0x268] sm:$0xff]  ;;  %v3283_v11 = vcombine.low %v807_v0, %v815_v1  ;;  %v3300_v15 = vcombine.high %v823_v9, %v831_v10 }
  0xda   : > { %v3302_v16 = vcombine.high %v824_v12, %v832_v13  ;;  %v3301_v22 = vcombine.low %v824_v12, %v832_v13  ;;  %v951_v13 = vld [vmem:[%s4042_s9 + $0x620] sm:$0xff] }
  0xdc   : > { %2133 = vmatpush1.bf16.msra.mxu0 %v3375_v18  ;;  %2174 = vmatpush1.bf16.msra.mxu1 %v3377_v19  ;;  %v847_v18 = vld [vmem:[%s4042_s9 + $0x2e0] sm:$0xff]  ;;  %v840_v19 = vld [vmem:[%s4042_s9 + $0x2a8] sm:$0xff] }
  0xdd   : > { %2134 = vmatprep.subr.bf16.mxu0 %v3392_v20  ;;  %2175 = vmatprep.subr.bf16.mxu1 %v3394_v21  ;;  %v848_v20 = vld [vmem:[%s4042_s9 + $0x2e8] sm:$0xff]  ;;  %v3299_v21 = vcombine.low %v823_v9, %v831_v10  ;;  %v3316_v23 = vcombine.high %v839_v17, %v847_v18 }
  0xde   : > { %v3318_v24 = vcombine.high %v840_v19, %v848_v20  ;;  %v3317_v30 = vcombine.low %v840_v19, %v848_v20  ;;  %v761_v20 = vld [vmem:[%s4042_s9 + $0x30] sm:$0xff] }
  0xe0   : > { %2135 = vmatpush1.bf16.msra.mxu0 %v3391_v26  ;;  %2176 = vmatpush1.bf16.msra.mxu1 %v3393_v27  ;;  %v863_v26 = vld [vmem:[%s4042_s9 + $0x360] sm:$0xff]  ;;  %v856_v27 = vld [vmem:[%s4042_s9 + $0x328] sm:$0xff] }
  0xe1   : > { %2136 = vmatprep.subr.bf16.mxu0 %v3408_v28  ;;  %2177 = vmatprep.subr.bf16.mxu1 %v3410_v29  ;;  %v864_v28 = vld [vmem:[%s4042_s9 + $0x368] sm:$0xff]  ;;  %v3315_v29 = vcombine.low %v839_v17, %v847_v18  ;;  %v3332_v31 = vcombine.high %v855_v25, %v863_v26  ;;  %v3331_v38 = vcombine.low %v855_v25, %v863_v26 }
  0xe2   : > { %v3333_v39 = vcombine.low %v856_v27, %v864_v28  ;;  %v3427_v17 = vcombine.low %v951_v13, %v951_v13 }
  0xe4   : > { %2137 = vmatpush1.bf16.msra.mxu0 %v3407_v32  ;;  %2178 = vmatpush1.bf16.msra.mxu1 %v3409_v34  ;;  %v3334_v32 = vcombine.high %v856_v27, %v864_v28  ;;  %v871_v34 = vld [vmem:[%s4042_s9 + $0x3a0] sm:$0xff]  ;;  %v777_v28 = vld [vmem:[%s4042_s9 + $0xb0] sm:$0xff] }
  0xe5   : > { %3439 = vmatprep.subr.msk.bf16.mxu0 %vm1983_vm1, %v3424_v35  ;;  %3441 = vmatprep.subr.msk.bf16.mxu1 %vm1983_vm1, %v3426_v37  ;;  %v879_v35 = vld [vmem:[%s4042_s9 + $0x3e0] sm:$0xff]  ;;  %v880_v37 = vld [vmem:[%s4042_s9 + $0x3e8] sm:$0xff] }
  0xe6   : > { %v3348_v40 = vcombine.high %v871_v34, %v879_v35  ;;  %v3350_v41 = vcombine.high %v872_v36, %v880_v37  ;;  %v3349_v48 = vcombine.low %v872_v36, %v880_v37  ;;  %v793_v37 = vld [vmem:[%s4042_s9 + $0x130] sm:$0xff] }
  0xe8   : > { %2139 = vmatpush1.bf16.msra.mxu0 %v1997_v44  ;;  %2180 = vmatpush1.bf16.msra.mxu1 %v2003_v46  ;;  %v895_v44 = vld [vmem:[%s4042_s9 + $0x460] sm:$0xff]  ;;  %v896_v46 = vld [vmem:[%s4042_s9 + $0x468] sm:$0xff] }
  0xe9   : > { %2196 = vmatprep.subr.bf16.mxu0 %v3236_v45  ;;  %2237 = vmatprep.subr.bf16.mxu1 %v3238_v47  ;;  %v888_v45 = vld [vmem:[%s4042_s9 + $0x428] sm:$0xff]  ;;  %v3347_v47 = vcombine.low %v871_v34, %v879_v35  ;;  %v3364_v49 = vcombine.high %v887_v43, %v895_v44 }
  0xea   : > { %v3366_v50 = vcombine.high %v888_v45, %v896_v46  ;;  %v3365_v56 = vcombine.low %v888_v45, %v896_v46  ;;  %v809_v46 = vld [vmem:[%s4042_s9 + $0x1b0] sm:$0xff] }
  0xeb   : > { %2147 = vmatmul.mubr.bf16.vlgmr.msra.gmra.mrb[4].mxu0 %v4117_v4  ;;  %2188 = vmatmul.mubr.bf16.vlgmr.msra.gmra.mrb[4].mxu1 %v4117_v4 }
  0xec   : > { %2197 = vmatpush1.bf16.msra.mxu0 %v3235_v52  ;;  %2238 = vmatpush1.bf16.msra.mxu1 %v3237_v53  ;;  %v911_v52 = vld [vmem:[%s4042_s9 + $0x4e0] sm:$0xff]  ;;  %v904_v53 = vld [vmem:[%s4042_s9 + $0x4a8] sm:$0xff] }
  0xed   : > { %2198 = vmatprep.subr.bf16.mxu0 %v3252_v54  ;;  %2239 = vmatprep.subr.bf16.mxu1 %v3254_v55  ;;  %v912_v54 = vld [vmem:[%s4042_s9 + $0x4e8] sm:$0xff]  ;;  %v3363_v55 = vcombine.low %v887_v43, %v895_v44  ;;  %v3380_v57 = vcombine.high %v903_v51, %v911_v52 }
  0xee   : > { %3444 = vmatprep.mubr.msk.bf16.mxu0 %vm1979_vm0, %v4065_v42  ;;  %3446 = vmatprep.mubr.msk.bf16.mxu1 %vm1979_vm0, %v4065_v42  ;;  %v3382_v58 = vcombine.high %v904_v53, %v912_v54  ;;  %v3381_v0 = vcombine.low %v904_v53, %v912_v54  ;;  %v825_v54 = vld [vmem:[%s4042_s9 + $0x230] sm:$0xff] }
  0xf0   : > { %2199 = vmatpush1.bf16.msra.mxu0 %v3251_v60  ;;  %2240 = vmatpush1.bf16.msra.mxu1 %v3253_v61  ;;  %v927_v60 = vld [vmem:[%s4042_s9 + $0x560] sm:$0xff]  ;;  %v920_v61 = vld [vmem:[%s4042_s9 + $0x528] sm:$0xff] }
  0xf1   : > { %2200 = vmatprep.subr.bf16.mxu0 %v3268_v62  ;;  %2241 = vmatprep.subr.bf16.mxu1 %v3270_v63  ;;  %v928_v62 = vld [vmem:[%s4042_s9 + $0x568] sm:$0xff]  ;;  %v3379_v63 = vcombine.low %v903_v51, %v911_v52  ;;  %v3396_v1 = vcombine.high %v919_v59, %v927_v60 }
  0xf2   : > { %v3398_v2 = vcombine.high %v920_v61, %v928_v62  ;;  %v3397_v9 = vcombine.low %v920_v61, %v928_v62  ;;  %v841_v61 = vld [vmem:[%s4042_s9 + $0x2b0] sm:$0xff] }
  0xf3   : > { %v849_v62 = vld [vmem:[%s4042_s9 + $0x2f0] sm:$0xff] }
  0xf4   : > { %2201 = vmatpush1.bf16.msra.mxu0 %v3267_v5  ;;  %2242 = vmatpush1.bf16.msra.mxu1 %v3269_v6  ;;  %v943_v5 = vld [vmem:[%s4042_s9 + $0x5e0] sm:$0xff]  ;;  %v936_v6 = vld [vmem:[%s4042_s9 + $0x5a8] sm:$0xff] }
  0xf5   : > { %2202 = vmatprep.subr.bf16.mxu0 %v3284_v7  ;;  %2243 = vmatprep.subr.bf16.mxu1 %v3286_v8  ;;  %v944_v7 = vld [vmem:[%s4042_s9 + $0x5e8] sm:$0xff]  ;;  %v3395_v8 = vcombine.low %v919_v59, %v927_v60  ;;  %v3412_v10 = vcombine.high %v935_v3, %v943_v5 }
  0xf6   : > { %v3414_v12 = vcombine.high %v936_v6, %v944_v7 }
  0xf8   : > { %2203 = vmatpush1.bf16.msra.mxu0 %v3283_v11  ;;  %2244 = vmatpush1.bf16.msra.mxu1 %v3285_v14  ;;  %v952_v11 = vld [vmem:[%s4042_s9 + $0x628] sm:$0xff]  ;;  %v3411_v14 = vcombine.low %v935_v3, %v943_v5  ;;  %v3320_v3 = vcombine.high %v841_v61, %v849_v62 }
  0xf9   : > { %2204 = vmatprep.subr.bf16.mxu0 %v3300_v15  ;;  %2245 = vmatprep.subr.bf16.mxu1 %v3302_v16  ;;  %v3413_v15 = vcombine.low %v936_v6, %v944_v7  ;;  %v3428_v16 = vcombine.high %v951_v13, %v951_v13  ;;  %v3430_v18 = vcombine.high %v952_v11, %v952_v11  ;;  %v857_v6 = vld [vmem:[%s4042_s9 + $0x330] sm:$0xff] }
  0xfa   : > { %v3429_v19 = vcombine.low %v952_v11, %v952_v11  ;;  %v865_v7 = vld [vmem:[%s4042_s9 + $0x370] sm:$0xff] }
  0xfb   : > { %v3336_v13 = vcombine.high %v857_v6, %v865_v7 }
  0xfc   : > { %2205 = vmatpush1.bf16.msra.mxu0 %v3299_v21  ;;  %2246 = vmatpush1.bf16.msra.mxu1 %v3301_v22  ;;  %v769_v21 = vld [vmem:[%s4042_s9 + $0x70] sm:$0xff]  ;;  %v762_v22 = vld [vmem:[%s4042_s9 + $0x38] sm:$0xff]  ;;  %v2015_v26 = vsel %vm1983_vm1, %v3429_v19, 0 }
  0xfd   : > { %2206 = vmatprep.subr.bf16.mxu0 %v3316_v23  ;;  %2247 = vmatprep.subr.bf16.mxu1 %v3318_v24  ;;  %v770_v23 = vld [vmem:[%s4042_s9 + $0x78] sm:$0xff]  ;;  %v2009_v24 = vsel %vm1983_vm1, %v3427_v17, 0  ;;  %v3240_v25 = vcombine.high %v761_v20, %v769_v21 }
  0xfe   : > { %v3242_v27 = vcombine.high %v762_v22, %v770_v23  ;;  %v3241_v34 = vcombine.low %v762_v22, %v770_v23  ;;  %v882_v17 = vld [vmem:[%s4042_s9 + $0x3f8] sm:$0xff]  ;;  %v889_v22 = vld [vmem:[%s4042_s9 + $0x430] sm:$0xff] }
  0xff   : > { %v897_v23 = vld [vmem:[%s4042_s9 + $0x470] sm:$0xff] }
 0x100   : > { %2207 = vmatpush1.bf16.msra.mxu0 %v3315_v29  ;;  %2248 = vmatpush1.bf16.msra.mxu1 %v3317_v30  ;;  %v785_v29 = vld [vmem:[%s4042_s9 + $0xf0] sm:$0xff]  ;;  %v778_v30 = vld [vmem:[%s4042_s9 + $0xb8] sm:$0xff] }
 0x101   : > { %2208 = vmatprep.subr.bf16.mxu0 %v3332_v31  ;;  %2249 = vmatprep.subr.bf16.mxu1 %v3334_v32  ;;  %v786_v31 = vld [vmem:[%s4042_s9 + $0xf8] sm:$0xff]  ;;  %v3239_v32 = vcombine.low %v761_v20, %v769_v21  ;;  %v3256_v35 = vcombine.high %v777_v28, %v785_v29 }
 0x102   : > { %v3258_v36 = vcombine.high %v778_v30, %v786_v31  ;;  %v3257_v43 = vcombine.low %v778_v30, %v786_v31  ;;  %v905_v30 = vld [vmem:[%s4042_s9 + $0x4b0] sm:$0xff] }
 0x103   : > { %v913_v31 = vld [vmem:[%s4042_s9 + $0x4f0] sm:$0xff] }
 0x104   : > { %2209 = vmatpush1.bf16.msra.mxu0 %v3331_v38  ;;  %2250 = vmatpush1.bf16.msra.mxu1 %v3333_v39  ;;  %v801_v38 = vld [vmem:[%s4042_s9 + $0x170] sm:$0xff]  ;;  %v794_v39 = vld [vmem:[%s4042_s9 + $0x138] sm:$0xff] }
 0x105   : > { %2210 = vmatprep.subr.bf16.mxu0 %v3348_v40  ;;  %2251 = vmatprep.subr.bf16.mxu1 %v3350_v41  ;;  %v802_v40 = vld [vmem:[%s4042_s9 + $0x178] sm:$0xff]  ;;  %v3255_v41 = vcombine.low %v777_v28, %v785_v29  ;;  %v3272_v44 = vcombine.high %v793_v37, %v801_v38  ;;  %v3368_v28 = vcombine.high %v889_v22, %v897_v23 }
 0x106   : > { %v3274_v45 = vcombine.high %v794_v39, %v802_v40  ;;  %v3273_v51 = vcombine.low %v794_v39, %v802_v40  ;;  %v921_v39 = vld [vmem:[%s4042_s9 + $0x530] sm:$0xff] }
 0x107   : > { %v929_v40 = vld [vmem:[%s4042_s9 + $0x570] sm:$0xff] }
 0x108   : > { %2211 = vmatpush1.bf16.msra.mxu0 %v3347_v47  ;;  %2252 = vmatpush1.bf16.msra.mxu1 %v3349_v48  ;;  %v817_v47 = vld [vmem:[%s4042_s9 + $0x1f0] sm:$0xff]  ;;  %v810_v48 = vld [vmem:[%s4042_s9 + $0x1b8] sm:$0xff] }
 0x109   : > { %2212 = vmatprep.subr.bf16.mxu0 %v3364_v49  ;;  %2253 = vmatprep.subr.bf16.mxu1 %v3366_v50  ;;  %v818_v49 = vld [vmem:[%s4042_s9 + $0x1f8] sm:$0xff]  ;;  %v3271_v50 = vcombine.low %v793_v37, %v801_v38  ;;  %v3288_v52 = vcombine.high %v809_v46, %v817_v47  ;;  %v3384_v37 = vcombine.high %v905_v30, %v913_v31 }
 0x10a   : > { %v3290_v53 = vcombine.high %v810_v48, %v818_v49 }
 0x10c   : > { %2213 = vmatpush1.bf16.msra.mxu0 %v3363_v55  ;;  %2254 = vmatpush1.bf16.msra.mxu1 %v3365_v56  ;;  %v833_v55 = vld [vmem:[%s4042_s9 + $0x270] sm:$0xff]  ;;  %v826_v56 = vld [vmem:[%s4042_s9 + $0x238] sm:$0xff] }
 0x10d   : > { %2214 = vmatprep.subr.bf16.mxu0 %v3380_v57  ;;  %2255 = vmatprep.subr.bf16.mxu1 %v3382_v58  ;;  %v834_v57 = vld [vmem:[%s4042_s9 + $0x278] sm:$0xff]  ;;  %v3287_v58 = vcombine.low %v809_v46, %v817_v47  ;;  %v3304_v59 = vcombine.high %v825_v54, %v833_v55  ;;  %v3400_v46 = vcombine.high %v921_v39, %v929_v40 }
 0x10e   : > { %v3306_v60 = vcombine.high %v826_v56, %v834_v57 }
 0x110   : > { %2215 = vmatpush1.bf16.msra.mxu0 %v3379_v63  ;;  %2256 = vmatpush1.bf16.msra.mxu1 %v3381_v0  ;;  %v842_v63 = vld [vmem:[%s4042_s9 + $0x2b8] sm:$0xff] }
 0x111   : > { %2216 = vmatprep.subr.bf16.mxu0 %v3396_v1  ;;  %2257 = vmatprep.subr.bf16.mxu1 %v3398_v2  ;;  %v850_v0 = vld [vmem:[%s4042_s9 + $0x2f8] sm:$0xff]  ;;  %v3303_v1 = vcombine.low %v825_v54, %v833_v55  ;;  %v3305_v2 = vcombine.low %v826_v56, %v834_v57  ;;  %v953_v56 = vld [vmem:[%s4042_s9 + $0x630] sm:$0xff] }
 0x112   : > { %v3322_v5 = vcombine.high %v842_v63, %v850_v0  ;;  %v954_v57 = vld [vmem:[%s4042_s9 + $0x638] sm:$0xff] }
 0x114   : > { %2217 = vmatpush1.bf16.msra.mxu0 %v3395_v8  ;;  %2258 = vmatpush1.bf16.msra.mxu1 %v3397_v9  ;;  %v858_v8 = vld [vmem:[%s4042_s9 + $0x338] sm:$0xff] }
 0x115   : > { %2218 = vmatprep.subr.bf16.mxu0 %v3412_v10  ;;  %2259 = vmatprep.subr.bf16.mxu1 %v3414_v12  ;;  %v866_v9 = vld [vmem:[%s4042_s9 + $0x378] sm:$0xff]  ;;  %v3319_v10 = vcombine.low %v841_v61, %v849_v62  ;;  %v3321_v12 = vcombine.low %v842_v63, %v850_v0  ;;  %v3434_v61 = vcombine.high %v954_v57, %v954_v57 }
 0x116   : > { %v3338_v11 = vcombine.high %v858_v8, %v866_v9  ;;  %v3337_v19 = vcombine.low %v858_v8, %v866_v9  ;;  %v3433_v62 = vcombine.low %v954_v57, %v954_v57 }
 0x118   : > { %2219 = vmatpush1.bf16.msra.mxu0 %v3411_v14  ;;  %2260 = vmatpush1.bf16.msra.mxu1 %v3413_v15  ;;  %v873_v14 = vld [vmem:[%s4042_s9 + $0x3b0] sm:$0xff]  ;;  %v2027_v0 = vsel %vm1983_vm1, %v3433_v62, 0 }
 0x119   : > { %3443 = vmatprep.subr.msk.bf16.mxu0 %vm1983_vm1, %v3428_v16  ;;  %3445 = vmatprep.subr.msk.bf16.mxu1 %vm1983_vm1, %v3430_v18  ;;  %v881_v15 = vld [vmem:[%s4042_s9 + $0x3f0] sm:$0xff]  ;;  %v874_v16 = vld [vmem:[%s4042_s9 + $0x3b8] sm:$0xff]  ;;  %v3335_v18 = vcombine.low %v857_v6, %v865_v7 }
 0x11a   : > { %v3352_v20 = vcombine.high %v873_v14, %v881_v15  ;;  %v3354_v21 = vcombine.high %v874_v16, %v882_v17 }
 0x11c   : > { %2221 = vmatpush1.bf16.msra.mxu0 %v2009_v24  ;;  %2262 = vmatpush1.bf16.msra.mxu1 %v2015_v26  ;;  %v890_v24 = vld [vmem:[%s4042_s9 + $0x438] sm:$0xff]  ;;  %v3351_v26 = vcombine.low %v873_v14, %v881_v15 }
 0x11d   : > { %2278 = vmatprep.subr.bf16.mxu0 %v3240_v25  ;;  %2319 = vmatprep.subr.bf16.mxu1 %v3242_v27  ;;  %v898_v25 = vld [vmem:[%s4042_s9 + $0x478] sm:$0xff]  ;;  %v3353_v27 = vcombine.low %v874_v16, %v882_v17 }
 0x11e   : > { %v3370_v29 = vcombine.high %v890_v24, %v898_v25 }
 0x11f   : > { %2229 = vmatmul.mubr.bf16.vlgmr.msra.gmra.mrb[8].mxu0 %v4117_v4  ;;  %2270 = vmatmul.mubr.bf16.vlgmr.msra.gmra.mrb[8].mxu1 %v4117_v4 }
 0x120   : > { %2279 = vmatpush1.bf16.msra.mxu0 %v3239_v32  ;;  %2320 = vmatpush1.bf16.msra.mxu1 %v3241_v34  ;;  %v906_v32 = vld [vmem:[%s4042_s9 + $0x4b8] sm:$0xff] }
 0x121   : > { %2280 = vmatprep.subr.bf16.mxu0 %v3256_v35  ;;  %2321 = vmatprep.subr.bf16.mxu1 %v3258_v36  ;;  %v914_v34 = vld [vmem:[%s4042_s9 + $0x4f8] sm:$0xff]  ;;  %v3367_v35 = vcombine.low %v889_v22, %v897_v23  ;;  %v3369_v36 = vcombine.low %v890_v24, %v898_v25 }
 0x122   : > { %3448 = vmatprep.mubr.msk.bf16.mxu0 %vm1979_vm0, %v4065_v42  ;;  %3450 = vmatprep.mubr.msk.bf16.mxu1 %vm1979_vm0, %v4065_v42  ;;  %v3289_v42 = vcombine.low %v810_v48, %v818_v49  ;;  %v3386_v38 = vcombine.high %v906_v32, %v914_v34  ;;  %v937_v48 = vld [vmem:[%s4042_s9 + $0x5b0] sm:$0xff] }
 0x123   : > { %v945_v49 = vld [vmem:[%s4042_s9 + $0x5f0] sm:$0xff] }
 0x124   : > { %2281 = vmatpush1.bf16.msra.mxu0 %v3255_v41  ;;  %2322 = vmatpush1.bf16.msra.mxu1 %v3257_v43  ;;  %v922_v41 = vld [vmem:[%s4042_s9 + $0x538] sm:$0xff]  ;;  %v3416_v54 = vcombine.high %v937_v48, %v945_v49 }
 0x125   : > { %2282 = vmatprep.subr.bf16.mxu0 %v3272_v44  ;;  %2323 = vmatprep.subr.bf16.mxu1 %v3274_v45  ;;  %v930_v43 = vld [vmem:[%s4042_s9 + $0x578] sm:$0xff]  ;;  %v3383_v44 = vcombine.low %v905_v30, %v913_v31  ;;  %v3385_v45 = vcombine.low %v906_v32, %v914_v34 }
 0x126   : > { %v3402_v47 = vcombine.high %v922_v41, %v930_v43 }
 0x128   : > { %2283 = vmatpush1.bf16.msra.mxu0 %v3271_v50  ;;  %2324 = vmatpush1.bf16.msra.mxu1 %v3273_v51  ;;  %v938_v50 = vld [vmem:[%s4042_s9 + $0x5b8] sm:$0xff] }
 0x129   : > { %2284 = vmatprep.subr.bf16.mxu0 %v3288_v52  ;;  %2325 = vmatprep.subr.bf16.mxu1 %v3290_v53  ;;  %v946_v51 = vld [vmem:[%s4042_s9 + $0x5f8] sm:$0xff]  ;;  %v3399_v52 = vcombine.low %v921_v39, %v929_v40  ;;  %v3401_v53 = vcombine.low %v922_v41, %v930_v43 }
 0x12a   : > { %v3418_v55 = vcombine.high %v938_v50, %v946_v51 }
 0x12c   : > { %2285 = vmatpush1.bf16.msra.mxu0 %v3287_v58  ;;  %2326 = vmatpush1.bf16.msra.mxu1 %v3289_v42  ;;  %v3415_v58 = vcombine.low %v937_v48, %v945_v49  ;;  %v3417_v42 = vcombine.low %v938_v50, %v946_v51 }
 0x12d   : > { %2286 = vmatprep.subr.bf16.mxu0 %v3304_v59  ;;  %2327 = vmatprep.subr.bf16.mxu1 %v3306_v60  ;;  %v3432_v59 = vcombine.high %v953_v56, %v953_v56  ;;  %v3431_v60 = vcombine.low %v953_v56, %v953_v56 }
 0x12f   : > { %v2021_v63 = vsel %vm1983_vm1, %v3431_v60, 0 }
 0x130   : > { %2287 = vmatpush1.bf16.msra.mxu0 %v3303_v1  ;;  %2328 = vmatpush1.bf16.msra.mxu1 %v3305_v2 }
 0x131   : > { %2288 = vmatprep.subr.bf16.mxu0 %v3320_v3  ;;  %2329 = vmatprep.subr.bf16.mxu1 %v3322_v5 }
 0x134   : > { %2289 = vmatpush1.bf16.msra.mxu0 %v3319_v10  ;;  %2330 = vmatpush1.bf16.msra.mxu1 %v3321_v12 }
 0x135   : > { %2290 = vmatprep.subr.bf16.mxu0 %v3336_v13  ;;  %2331 = vmatprep.subr.bf16.mxu1 %v3338_v11 }
 0x138   : > { %2291 = vmatpush1.bf16.msra.mxu0 %v3335_v18  ;;  %2332 = vmatpush1.bf16.msra.mxu1 %v3337_v19 }
 0x139   : > { %2292 = vmatprep.subr.bf16.mxu0 %v3352_v20  ;;  %2333 = vmatprep.subr.bf16.mxu1 %v3354_v21 }
 0x13c   : > { %2293 = vmatpush1.bf16.msra.mxu0 %v3351_v26  ;;  %2334 = vmatpush1.bf16.msra.mxu1 %v3353_v27 }
 0x13d   : > { %2294 = vmatprep.subr.bf16.mxu0 %v3368_v28  ;;  %2335 = vmatprep.subr.bf16.mxu1 %v3370_v29 }
 0x140   : > { %2295 = vmatpush1.bf16.msra.mxu0 %v3367_v35  ;;  %2336 = vmatpush1.bf16.msra.mxu1 %v3369_v36 }
 0x141   : > { %2296 = vmatprep.subr.bf16.mxu0 %v3384_v37  ;;  %2337 = vmatprep.subr.bf16.mxu1 %v3386_v38 }
 0x144   : > { %2297 = vmatpush1.bf16.msra.mxu0 %v3383_v44  ;;  %2338 = vmatpush1.bf16.msra.mxu1 %v3385_v45 }
 0x145   : > { %2298 = vmatprep.subr.bf16.mxu0 %v3400_v46  ;;  %2339 = vmatprep.subr.bf16.mxu1 %v3402_v47 }
 0x148   : > { %2299 = vmatpush1.bf16.msra.mxu0 %v3399_v52  ;;  %2340 = vmatpush1.bf16.msra.mxu1 %v3401_v53 }
 0x149   : > { %2300 = vmatprep.subr.bf16.mxu0 %v3416_v54  ;;  %2341 = vmatprep.subr.bf16.mxu1 %v3418_v55 }
 0x14c   : > { %2301 = vmatpush1.bf16.msra.mxu0 %v3415_v58  ;;  %2342 = vmatpush1.bf16.msra.mxu1 %v3417_v42 }
 0x14d   : > { %3447 = vmatprep.subr.msk.bf16.mxu0 %vm1983_vm1, %v3432_v59  ;;  %3449 = vmatprep.subr.msk.bf16.mxu1 %vm1983_vm1, %v3434_v61 }
 0x150   : > { %2303 = vmatpush1.bf16.msra.mxu0 %v2021_v63  ;;  %2344 = vmatpush1.bf16.msra.mxu1 %v2027_v0 }
 0x153   : > { %2311 = vmatmul.mubr.bf16.vlgmr.msra.gmra.mrb[12].mxu0 %v4117_v4  ;;  %2352 = vmatmul.mubr.bf16.vlgmr.msra.gmra.mrb[12].mxu1 %v4117_v4 }
 0x18a   : > { %v2066_v1 = vpop.f32.mrb[0].mxu0  ;;  %v2107_v5 = vpop.f32.mrb[0].mxu1 }
 0x18b   : > { %v2495_v2 = vsel %vm2494_vm2, %v2066_v1, 0.0  ;;  %v2725_v3 = vmul.f32 %v2066_v1, %v2066_v1  ;;  %v2068_v6 = vpop.f32.mrb[1].mxu0  ;;  %v2509_v8 = vsel %vm2494_vm2, %v2107_v5, 0.0  ;;  %v2727_v9 = vmul.f32 %v2107_v5, %v2107_v5  ;;  %v2109_v12 = vpop.f32.mrb[1].mxu1 }
 0x18c   : > { %v2496_v7 = vrot.slane %v2495_v2, 4  ;;  %v3451_v10 = vpack.c.bf16 %v2068_v6, %v2066_v1  ;;  %v2070_v13 = vpop.f32.mrb[2].mxu0  ;;  %v2510_v14 = vrot.slane %v2509_v8, 4  ;;  %v2502_v15 = vsel %vm2494_vm2, %v2068_v6, 0.0  ;;  %v2111_v16 = vpop.f32.mrb[2].mxu1 }
 0x18d   : > { %v2741_v11 = vsel %vm2494_vm2, %v2725_v3, 0.0  ;;  %v2726_v4 = vmul.f32 %v2068_v6, %v2068_v6  ;;  %v2071_v17 = vpop.f32.mrb[3].mxu0  ;;  %v2755_v20 = vsel %vm2494_vm2, %v2727_v9, 0.0  ;;  %v2112_v22 = vpop.f32.mrb[3].mxu1  ;;  %v2503_v25 = vrot.slane %v2502_v15, 4 }
 0x18e   : > { %v2497_v18 = vadd.f32 %v2496_v7, %v2495_v2  ;;  %v2742_v19 = vrot.slane %v2741_v11, 4  ;;  %v4301_v21 = vrot.slane %v3451_v10, %v4058_v33  ;;  %v2511_v23 = vadd.f32 %v2510_v14, %v2509_v8 }
 0x18f   : > { %v2756_v24 = vrot.slane %v2755_v20, 4  ;;  %v2748_v26 = vsel %vm2494_vm2, %v2726_v4, 0.0  ;;  %v3452_v30 = vpack.c.bf16 %v2109_v12, %v2107_v5  ;;  %v2504_v34 = vadd.f32 %v2503_v25, %v2502_v15 }
 0x190   : > { %v2498_v27 = vrot.slane %v2497_v18, 2  ;;  %v2743_v28 = vadd.f32 %v2742_v19, %v2741_v11  ;;  %v2749_v29 = vrot.slane %v2748_v26, 4  ;;  %v2512_v31 = vrot.slane %v2511_v23, 2 }
 0x191   : > { %v2757_v32 = vadd.f32 %v2756_v24, %v2755_v20  ;;  %v2516_v35 = vsel %vm2494_vm2, %v2109_v12, 0.0  ;;  %v4306_v39 = vrot.slane %v3452_v30, %v4058_v33  ;;  %v2505_v41 = vrot.slane %v2504_v34, 2 }
 0x192   : > { %v2499_v36 = vadd.f32 %v2498_v27, %v2497_v18  ;;  %v2744_v37 = vrot.slane %v2743_v28, 2  ;;  %v2750_v38 = vadd.f32 %v2749_v29, %v2748_v26  ;;  %v2513_v40 = vadd.f32 %v2512_v31, %v2511_v23 }
 0x193   : > { %v2517_v43 = vrot.slane %v2516_v35, 4  ;;  %v2424_v47 = vcombine.low %v4301_v21, %v4306_v39  ;;  %v2506_v48 = vadd.f32 %v2505_v41, %v2504_v34  ;;  %v2758_v51 = vrot.slane %v2757_v32, 2 }
 0x194   : > { %v2500_v44 = vrot.slane %v2499_v36, 1  ;;  %v2745_v45 = vadd.f32 %v2744_v37, %v2743_v28  ;;  %v2751_v46 = vrot.slane %v2750_v38, 2  ;;  %v2514_v54 = vrot.slane %v2513_v40, 1 }
 0x195   : > { %v2518_v49 = vadd.f32 %v2517_v43, %v2516_v35  ;;  %v2507_v55 = vrot.slane %v2506_v48, 1  ;;  %v2728_v42 = vmul.f32 %v2109_v12, %v2109_v12  ;;  %v2759_v61 = vadd.f32 %v2758_v51, %v2757_v32 }
 0x196   : > { %v2746_v50 = vrot.slane %v2745_v45, 1  ;;  %v2752_v52 = vadd.f32 %v2751_v46, %v2750_v38  ;;  %v2501_v53 = vadd.f32 %v2500_v44, %v2499_v36  ;;  %v2515_v0 = vadd.f32 %v2514_v54, %v2513_v40 }
 0x197   : > { %v2519_v56 = vrot.slane %v2518_v49, 2  ;;  %v2508_v59 = vadd.f32 %v2507_v55, %v2506_v48  ;;  %v2762_v63 = vsel %vm2494_vm2, %v2728_v42, 0.0  ;;  %v2760_v8 = vrot.slane %v2759_v61, 1 }
 0x198   : > { %v2747_v57 = vadd.f32 %v2746_v50, %v2745_v45  ;;  %v2753_v58 = vrot.slane %v2752_v52, 1  ;;  %v2763_v3 = vrot.slane %v2762_v63, 4 }
 0x199   : > { %v2520_v60 = vadd.f32 %v2519_v56, %v2518_v49  ;;  %v2623_v1 = vcombine.low %v2501_v53, %v2508_v59  ;;  %v2761_v14 = vadd.f32 %v2760_v8, %v2759_v61 }
 0x19a   : > { %v2754_v62 = vadd.f32 %v2753_v58, %v2752_v52  ;;  %v2764_v7 = vadd.f32 %v2763_v3, %v2762_v63 }
 0x19b   : > { %v2521_v2 = vrot.slane %v2520_v60, 1  ;;  %v4312_v9 = vrot.slane %v2623_v1, %v4058_v33 }
 0x19c   : > { %v2869_v5 = vcombine.low %v2747_v57, %v2754_v62  ;;  %v2765_v13 = vrot.slane %v2764_v7, 2 }
 0x19d   : > { %v2522_v6 = vadd.f32 %v2521_v2, %v2520_v60 }
 0x19e   : > { %v2766_v11 = vadd.f32 %v2765_v13, %v2764_v7  ;;  %v4320_v17 = vrot.slane %v2869_v5, %v4058_v33  ;;  %v2432_v7 = vrot.slane %v2424_v47, %v4058_v33 }
 0x19f   : > { %v2624_v10 = vcombine.low %v2515_v0, %v2522_v6 }
 0x1a0   : > { %v2767_v4 = vrot.slane %v2766_v11, 1 }
 0x1a1   : > { %v4315_v12 = vrot.slane %v2624_v10, %v4058_v33 }
 0x1a2   : > { %v2768_v16 = vadd.f32 %v2767_v4, %v2766_v11 }
 0x1a3   : > { %v2655_v15 = vcombine.low %v4312_v9, %v4315_v12 }
 0x1a4   : > { %v2870_v18 = vcombine.low %v2761_v14, %v2768_v16 }
 0x1a6   : > { %v4323_v19 = vrot.slane %v2870_v18, %v4058_v33 }
 0x1a8   : > { %v2901_v20 = vcombine.low %v4320_v17, %v4323_v19 }
 0x1aa   : > { %v2909_v9 = vrot.slane %v2901_v20, %v4058_v33 }
 0x1be   : > { %v2148_v22 = vpop.f32.mrb[4].mxu0  ;;  %v2189_v25 = vpop.f32.mrb[4].mxu1 }
 0x1bf   : > { %v2523_v23 = vsel %vm2494_vm2, %v2148_v22, 0.0  ;;  %v2729_v24 = vmul.f32 %v2148_v22, %v2148_v22  ;;  %v2150_v26 = vpop.f32.mrb[5].mxu0  ;;  %v2537_v28 = vsel %vm2494_vm2, %v2189_v25, 0.0  ;;  %v2731_v29 = vmul.f32 %v2189_v25, %v2189_v25  ;;  %v2191_v31 = vpop.f32.mrb[5].mxu1 }
 0x1c0   : > { %v2524_v27 = vrot.slane %v2523_v23, 4  ;;  %v3453_v30 = vpack.c.bf16 %v2150_v26, %v2148_v22  ;;  %v2152_v32 = vpop.f32.mrb[6].mxu0  ;;  %v2538_v35 = vrot.slane %v2537_v28, 4  ;;  %v2530_v36 = vsel %vm2494_vm2, %v2150_v26, 0.0  ;;  %v2193_v38 = vpop.f32.mrb[6].mxu1 }
 0x1c1   : > { %v2769_v34 = vsel %vm2494_vm2, %v2729_v24, 0.0  ;;  %v2730_v37 = vmul.f32 %v2150_v26, %v2150_v26  ;;  %v2153_v40 = vpop.f32.mrb[7].mxu0  ;;  %v2783_v44 = vsel %vm2494_vm2, %v2731_v29, 0.0  ;;  %v2194_v46 = vpop.f32.mrb[7].mxu1  ;;  %v2531_v50 = vrot.slane %v2530_v36, 4 }
 0x1c2   : > { %v2525_v41 = vadd.f32 %v2524_v27, %v2523_v23  ;;  %v2770_v43 = vrot.slane %v2769_v34, 4  ;;  %v2416_v45 = vrot.slane %v3453_v30, %v4058_v33  ;;  %v2539_v48 = vadd.f32 %v2538_v35, %v2537_v28 }
 0x1c3   : > { %v2784_v49 = vrot.slane %v2783_v44, 4  ;;  %v2776_v51 = vsel %vm2494_vm2, %v2730_v37, 0.0  ;;  %v3454_v55 = vpack.c.bf16 %v2191_v31, %v2189_v25  ;;  %v2532_v58 = vadd.f32 %v2531_v50, %v2530_v36 }
 0x1c4   : > { %v2526_v52 = vrot.slane %v2525_v41, 2  ;;  %v2771_v53 = vadd.f32 %v2770_v43, %v2769_v34  ;;  %v2777_v54 = vrot.slane %v2776_v51, 4  ;;  %v2540_v56 = vrot.slane %v2539_v48, 2 }
 0x1c5   : > { %v2785_v57 = vadd.f32 %v2784_v49, %v2783_v44  ;;  %v2544_v42 = vsel %vm2494_vm2, %v2191_v31, 0.0  ;;  %v2423_v62 = vrot.slane %v3454_v55, %v4058_v33  ;;  %v2533_v0 = vrot.slane %v2532_v58, 2 }
 0x1c6   : > { %v2527_v59 = vadd.f32 %v2526_v52, %v2525_v41  ;;  %v2772_v60 = vrot.slane %v2771_v53, 2  ;;  %v2778_v61 = vadd.f32 %v2777_v54, %v2776_v51  ;;  %v2541_v63 = vadd.f32 %v2540_v56, %v2539_v48 }
 0x1c7   : > { %v2545_v1 = vrot.slane %v2544_v42, 4  ;;  %v2425_v6 = vcombine.low %v2416_v45, %v2423_v62  ;;  %v2534_v8 = vadd.f32 %v2533_v0, %v2532_v58  ;;  %v2786_v11 = vrot.slane %v2785_v57, 2 }
 0x1c8   : > { %v2528_v2 = vrot.slane %v2527_v59, 1  ;;  %v2773_v3 = vadd.f32 %v2772_v60, %v2771_v53  ;;  %v2779_v5 = vrot.slane %v2778_v61, 2  ;;  %v2542_v18 = vrot.slane %v2541_v63, 1 }
 0x1c9   : > { %v2546_v10 = vadd.f32 %v2545_v1, %v2544_v42  ;;  %v2439_v4 = vrot.slane %v2425_v6, %v4058_v33  ;;  %v2535_v22 = vrot.slane %v2534_v8, 1  ;;  %v2732_v47 = vmul.f32 %v2191_v31, %v2191_v31 }
 0x1ca   : > { %v2774_v13 = vrot.slane %v2773_v3, 1  ;;  %v2780_v14 = vadd.f32 %v2779_v5, %v2778_v61  ;;  %v2529_v16 = vadd.f32 %v2528_v2, %v2527_v59  ;;  %v2787_v27 = vadd.f32 %v2786_v11, %v2785_v57 }
 0x1cb   : > { %v2547_v23 = vrot.slane %v2546_v10, 2  ;;  %v2440_v39 = vcombine.low %v2432_v7, %v2439_v4  ;;  %v2536_v25 = vadd.f32 %v2535_v22, %v2534_v8  ;;  %v2790_v29 = vsel %vm2494_vm2, %v2732_v47, 0.0 }
 0x1cc   : > { %v2775_v24 = vadd.f32 %v2774_v13, %v2773_v3  ;;  %v2781_v21 = vrot.slane %v2780_v14, 1  ;;  %v2543_v30 = vadd.f32 %v2542_v18, %v2541_v63  ;;  %v2791_v35 = vrot.slane %v2790_v29, 4 }
 0x1cd   : > { %v2548_v26 = vadd.f32 %v2547_v23, %v2546_v10  ;;  %2492 = vst [vmem:[%s4358_s14] sm:$0xff] %v2440_v39  ;;  %v2625_v32 = vcombine.low %v2529_v16, %v2536_v25  ;;  %v2788_v40 = vrot.slane %v2787_v27, 1  ;;  %v2663_v50 = vrot.slane %v2655_v15, %v4058_v33 }
 0x1ce   : > { %v2782_v28 = vadd.f32 %v2781_v21, %v2780_v14  ;;  %v2792_v38 = vadd.f32 %v2791_v35, %v2790_v29 }
 0x1cf   : > { %v2549_v34 = vrot.slane %v2548_v26, 1  ;;  %v2647_v41 = vrot.slane %v2625_v32, %v4058_v33  ;;  %v2789_v46 = vadd.f32 %v2788_v40, %v2787_v27 }
 0x1d0   : > { %v2871_v36 = vcombine.low %v2775_v24, %v2782_v28  ;;  %v2793_v31 = vrot.slane %v2792_v38, 2 }
 0x1d1   : > { %v2550_v37 = vadd.f32 %v2549_v34, %v2548_v26 }
 0x1d2   : > { %v2794_v45 = vadd.f32 %v2793_v31, %v2792_v38  ;;  %v2893_v53 = vrot.slane %v2871_v36, %v4058_v33 }
 0x1d3   : > { %v2626_v43 = vcombine.low %v2543_v30, %v2550_v37 }
 0x1d4   : > { %v2795_v49 = vrot.slane %v2794_v45, 1 }
 0x1d5   : > { %v2654_v44 = vrot.slane %v2626_v43, %v4058_v33 }
 0x1d6   : > { %v2796_v52 = vadd.f32 %v2795_v49, %v2794_v45 }
 0x1d7   : > { %v2656_v48 = vcombine.low %v2647_v41, %v2654_v44 }
 0x1d8   : > { %v2872_v55 = vcombine.low %v2789_v46, %v2796_v52 }
 0x1d9   : > { %v2670_v51 = vrot.slane %v2656_v48, %v4058_v33 }
 0x1da   : > { %v2900_v56 = vrot.slane %v2872_v55, %v4058_v33 }
 0x1db   : > { %v2671_v54 = vcombine.low %v2663_v50, %v2670_v51 }
 0x1dc   : > { %v2902_v57 = vcombine.low %v2893_v53, %v2900_v56 }
 0x1dd   : > { %2723 = vst [vmem:[%s4373_s21] sm:$0xff] %v2671_v54 }
 0x1de   : > { %v2916_v12 = vrot.slane %v2902_v57, %v4058_v33 }
 0x1e0   : > { %v2917_v15 = vcombine.low %v2909_v9, %v2916_v12 }
 0x1e2   : > { %2969 = vst [vmem:[%s4387_s25] sm:$0xff] %v2917_v15 }
 0x1f2   : > { %v2230_v58 = vpop.f32.mrb[8].mxu0  ;;  %v2271_v60 = vpop.f32.mrb[8].mxu1 }
 0x1f3   : > { %v2551_v42 = vsel %vm2494_vm2, %v2230_v58, 0.0  ;;  %v2733_v59 = vmul.f32 %v2230_v58, %v2230_v58  ;;  %v2232_v61 = vpop.f32.mrb[9].mxu0  ;;  %v2565_v17 = vsel %vm2494_vm2, %v2271_v60, 0.0  ;;  %v2735_v19 = vmul.f32 %v2271_v60, %v2271_v60  ;;  %v2273_v63 = vpop.f32.mrb[9].mxu1 }
 0x1f4   : > { %v2552_v62 = vrot.slane %v2551_v42, 4  ;;  %v3455_v20 = vpack.c.bf16 %v2232_v61, %v2230_v58  ;;  %v2234_v0 = vpop.f32.mrb[10].mxu0  ;;  %v2566_v2 = vrot.slane %v2565_v17, 4  ;;  %v2558_v3 = vsel %vm2494_vm2, %v2232_v61, 0.0  ;;  %v2275_v6 = vpop.f32.mrb[10].mxu1 }
 0x1f5   : > { %v2797_v1 = vsel %vm2494_vm2, %v2733_v59, 0.0  ;;  %v2734_v5 = vmul.f32 %v2232_v61, %v2232_v61  ;;  %v2235_v7 = vpop.f32.mrb[11].mxu0  ;;  %v2811_v13 = vsel %vm2494_vm2, %v2735_v19, 0.0  ;;  %v2276_v14 = vpop.f32.mrb[11].mxu1  ;;  %v2559_v18 = vrot.slane %v2558_v3, 4 }
 0x1f6   : > { %v2553_v8 = vadd.f32 %v2552_v62, %v2551_v42  ;;  %v2798_v10 = vrot.slane %v2797_v1, 4  ;;  %v4396_v11 = vrot.slane %v3455_v20, %v4058_v33  ;;  %v2567_v4 = vadd.f32 %v2566_v2, %v2565_v17 }
 0x1f7   : > { %v2812_v16 = vrot.slane %v2811_v13, 4  ;;  %v2804_v22 = vsel %vm2494_vm2, %v2734_v5, 0.0  ;;  %v3456_v39 = vpack.c.bf16 %v2273_v63, %v2271_v60  ;;  %v2560_v26 = vadd.f32 %v2559_v18, %v2558_v3 }
 0x1f8   : > { %v2554_v23 = vrot.slane %v2553_v8, 2  ;;  %v2799_v24 = vadd.f32 %v2798_v10, %v2797_v1  ;;  %v2805_v21 = vrot.slane %v2804_v22, 4  ;;  %v2568_v47 = vrot.slane %v2567_v4, 2 }
 0x1f9   : > { %v2813_v25 = vadd.f32 %v2812_v16, %v2811_v13  ;;  %v2572_v27 = vsel %vm2494_vm2, %v2273_v63, 0.0  ;;  %v4401_v32 = vrot.slane %v3456_v39, %v4058_v33  ;;  %v2561_v35 = vrot.slane %v2560_v26, 2 }
 0x1fa   : > { %v2555_v28 = vadd.f32 %v2554_v23, %v2553_v8  ;;  %v2800_v29 = vrot.slane %v2799_v24, 2  ;;  %v2806_v30 = vadd.f32 %v2805_v21, %v2804_v22  ;;  %v2569_v34 = vadd.f32 %v2568_v47, %v2567_v4 }
 0x1fb   : > { %v2573_v36 = vrot.slane %v2572_v27, 4  ;;  %v2473_v41 = vcombine.low %v4396_v11, %v4401_v32  ;;  %v2562_v43 = vadd.f32 %v2561_v35, %v2560_v26  ;;  %v2814_v45 = vrot.slane %v2813_v25, 2 }
 0x1fc   : > { %v2556_v37 = vrot.slane %v2555_v28, 1  ;;  %v2801_v38 = vadd.f32 %v2800_v29, %v2799_v24  ;;  %v2807_v40 = vrot.slane %v2806_v30, 2  ;;  %v2570_v49 = vrot.slane %v2569_v34, 1 }
 0x1fd   : > { %v2574_v31 = vadd.f32 %v2573_v36, %v2572_v27  ;;  %v2563_v50 = vrot.slane %v2562_v43, 1  ;;  %v2736_v54 = vmul.f32 %v2273_v63, %v2273_v63  ;;  %v2815_v57 = vadd.f32 %v2814_v45, %v2813_v25 }
 0x1fe   : > { %v2802_v44 = vrot.slane %v2801_v38, 1  ;;  %v2808_v46 = vadd.f32 %v2807_v40, %v2806_v30  ;;  %v2557_v48 = vadd.f32 %v2556_v37, %v2555_v28  ;;  %v2571_v15 = vadd.f32 %v2570_v49, %v2569_v34 }
 0x1ff   : > { %v2575_v51 = vrot.slane %v2574_v31, 2  ;;  %v2564_v55 = vadd.f32 %v2563_v50, %v2562_v43  ;;  %v2818_v12 = vsel %vm2494_vm2, %v2736_v54, 0.0  ;;  %v2816_v17 = vrot.slane %v2815_v57, 1 }
 0x200   : > { %v2803_v52 = vadd.f32 %v2802_v44, %v2801_v38  ;;  %v2809_v53 = vrot.slane %v2808_v46, 1  ;;  %v2819_v59 = vrot.slane %v2818_v12, 4 }
 0x201   : > { %v2576_v56 = vadd.f32 %v2575_v51, %v2574_v31  ;;  %v2672_v58 = vcombine.low %v2557_v48, %v2564_v55  ;;  %v2817_v2 = vadd.f32 %v2816_v17, %v2815_v57 }
 0x202   : > { %v2810_v9 = vadd.f32 %v2809_v53, %v2808_v46  ;;  %v2820_v62 = vadd.f32 %v2819_v59, %v2818_v12 }
 0x203   : > { %v2577_v42 = vrot.slane %v2576_v56, 1  ;;  %v4407_v19 = vrot.slane %v2672_v58, %v4058_v33 }
 0x204   : > { %v2918_v60 = vcombine.low %v2803_v52, %v2810_v9  ;;  %v2821_v0 = vrot.slane %v2820_v62, 2 }
 0x205   : > { %v2578_v61 = vadd.f32 %v2577_v42, %v2576_v56 }
 0x206   : > { %v2822_v1 = vadd.f32 %v2821_v0, %v2820_v62  ;;  %v4415_v7 = vrot.slane %v2918_v60, %v4058_v33  ;;  %v2481_v62 = vrot.slane %v2473_v41, %v4058_v33 }
 0x207   : > { %v2673_v20 = vcombine.low %v2571_v15, %v2578_v61 }
 0x208   : > { %v2823_v5 = vrot.slane %v2822_v1, 1 }
 0x209   : > { %v4410_v63 = vrot.slane %v2673_v20, %v4058_v33 }
 0x20a   : > { %v2824_v6 = vadd.f32 %v2823_v5, %v2822_v1 }
 0x20b   : > { %v2704_v3 = vcombine.low %v4407_v19, %v4410_v63 }
 0x20c   : > { %v2919_v8 = vcombine.low %v2817_v2, %v2824_v6 }
 0x20e   : > { %v4418_v10 = vrot.slane %v2919_v8, %v4058_v33 }
 0x210   : > { %v2950_v13 = vcombine.low %v4415_v7, %v4418_v10 }
 0x226   : > { %v2312_v14 = vpop.f32.mrb[12].mxu0  ;;  %v2353_v18 = vpop.f32.mrb[12].mxu1 }
 0x227   : > { %v2579_v4 = vsel %vm2494_vm2, %v2312_v14, 0.0  ;;  %v2737_v16 = vmul.f32 %v2312_v14, %v2312_v14  ;;  %v2314_v22 = vpop.f32.mrb[13].mxu0  ;;  %v2593_v24 = vsel %vm2494_vm2, %v2353_v18, 0.0  ;;  %v2739_v21 = vmul.f32 %v2353_v18, %v2353_v18  ;;  %v2355_v47 = vpop.f32.mrb[13].mxu1 }
 0x228   : > { %v2580_v23 = vrot.slane %v2579_v4, 4  ;;  %v3457_v39 = vpack.c.bf16 %v2314_v22, %v2312_v14  ;;  %v2316_v25 = vpop.f32.mrb[14].mxu0  ;;  %v2594_v27 = vrot.slane %v2593_v24, 4  ;;  %v2586_v28 = vsel %vm2494_vm2, %v2314_v22, 0.0  ;;  %v2357_v30 = vpop.f32.mrb[14].mxu1 }
 0x229   : > { %v2825_v26 = vsel %vm2494_vm2, %v2737_v16, 0.0  ;;  %v2738_v29 = vmul.f32 %v2314_v22, %v2314_v22  ;;  %v2317_v34 = vpop.f32.mrb[15].mxu0  ;;  %v2839_v37 = vsel %vm2494_vm2, %v2739_v21, 0.0  ;;  %v2358_v40 = vpop.f32.mrb[15].mxu1  ;;  %v2587_v44 = vrot.slane %v2586_v28, 4 }
 0x22a   : > { %v2581_v35 = vadd.f32 %v2580_v23, %v2579_v4  ;;  %v2826_v36 = vrot.slane %v2825_v26, 4  ;;  %v2465_v38 = vrot.slane %v3457_v39, %v4058_v33  ;;  %v2595_v43 = vadd.f32 %v2594_v27, %v2593_v24 }
 0x22b   : > { %v2840_v31 = vrot.slane %v2839_v37, 4  ;;  %v2832_v45 = vsel %vm2494_vm2, %v2738_v29, 0.0  ;;  %v3458_v50 = vpack.c.bf16 %v2355_v47, %v2353_v18  ;;  %v2588_v53 = vadd.f32 %v2587_v44, %v2586_v28 }
 0x22c   : > { %v2582_v46 = vrot.slane %v2581_v35, 2  ;;  %v2827_v48 = vadd.f32 %v2826_v36, %v2825_v26  ;;  %v2833_v49 = vrot.slane %v2832_v45, 4  ;;  %v2596_v51 = vrot.slane %v2595_v43, 2 }
 0x22d   : > { %v2841_v52 = vadd.f32 %v2840_v31, %v2839_v37  ;;  %v2600_v54 = vsel %vm2494_vm2, %v2355_v47, 0.0  ;;  %v2472_v9 = vrot.slane %v3458_v50, %v4058_v33  ;;  %v2589_v15 = vrot.slane %v2588_v53, 2 }
 0x22e   : > { %v2583_v55 = vadd.f32 %v2582_v46, %v2581_v35  ;;  %v2828_v56 = vrot.slane %v2827_v48, 2  ;;  %v2834_v57 = vadd.f32 %v2833_v49, %v2832_v45  ;;  %v2597_v12 = vadd.f32 %v2596_v51, %v2595_v43 }
 0x22f   : > { %v2601_v58 = vrot.slane %v2600_v54, 4  ;;  %v2474_v61 = vcombine.low %v2465_v38, %v2472_v9  ;;  %v2590_v17 = vadd.f32 %v2589_v15, %v2588_v53  ;;  %v2842_v1 = vrot.slane %v2841_v52, 2 }
 0x230   : > { %v2584_v42 = vrot.slane %v2583_v55, 1  ;;  %v2829_v59 = vadd.f32 %v2828_v56, %v2827_v48  ;;  %v2835_v60 = vrot.slane %v2834_v57, 2  ;;  %v2598_v8 = vrot.slane %v2597_v12, 1 }
 0x231   : > { %v2602_v20 = vadd.f32 %v2601_v58, %v2600_v54  ;;  %v2488_v5 = vrot.slane %v2474_v61, %v4058_v33  ;;  %v2591_v14 = vrot.slane %v2590_v17, 1  ;;  %v2740_v23 = vmul.f32 %v2355_v47, %v2355_v47 }
 0x232   : > { %v2830_v0 = vrot.slane %v2829_v59, 1  ;;  %v2836_v2 = vadd.f32 %v2835_v60, %v2834_v57  ;;  %v2585_v6 = vadd.f32 %v2584_v42, %v2583_v55  ;;  %v2843_v11 = vadd.f32 %v2842_v1, %v2841_v52 }
 0x233   : > { %v2603_v4 = vrot.slane %v2602_v20, 2  ;;  %v2489_v22 = vcombine.low %v2481_v62, %v2488_v5  ;;  %v2592_v24 = vadd.f32 %v2591_v14, %v2590_v17  ;;  %v2846_v41 = vsel %vm2494_vm2, %v2740_v23, 0.0 }
 0x234   : > { %v2831_v16 = vadd.f32 %v2830_v0, %v2829_v59  ;;  %v2837_v18 = vrot.slane %v2836_v2, 1  ;;  %v2599_v39 = vadd.f32 %v2598_v8, %v2597_v12  ;;  %v2847_v27 = vrot.slane %v2846_v41, 4 }
 0x235   : > { %v2604_v21 = vadd.f32 %v2603_v4, %v2602_v20  ;;  %2493 = vst [vmem:[%s4358_s14 + $0x8] sm:$0xff] %v2489_v22  ;;  %v2674_v25 = vcombine.low %v2585_v6, %v2592_v24  ;;  %v2844_v34 = vrot.slane %v2843_v11, 1  ;;  %v2712_v44 = vrot.slane %v2704_v3, %v4058_v33 }
 0x236   : > { %v2838_v32 = vadd.f32 %v2837_v18, %v2836_v2  ;;  %v2848_v30 = vadd.f32 %v2847_v27, %v2846_v41  ;;  %v2958_v53 = vrot.slane %v2950_v13, %v4058_v33 }
 0x237   : > { %v2605_v26 = vrot.slane %v2604_v21, 1  ;;  %v2696_v35 = vrot.slane %v2674_v25, %v4058_v33  ;;  %v2845_v40 = vadd.f32 %v2844_v34, %v2843_v11 }
 0x238   : > { %v2920_v28 = vcombine.low %v2831_v16, %v2838_v32  ;;  %v2849_v47 = vrot.slane %v2848_v30, 2 }
 0x239   : > { %v2606_v29 = vadd.f32 %v2605_v26, %v2604_v21 }
 0x23a   : > { %v2850_v38 = vadd.f32 %v2849_v47, %v2848_v30  ;;  %v2942_v48 = vrot.slane %v2920_v28, %v4058_v33 }
 0x23b   : > { %v2675_v36 = vcombine.low %v2599_v39, %v2606_v29 }
 0x23c   : > { %v2851_v31 = vrot.slane %v2850_v38, 1 }
 0x23d   : > { %v2703_v37 = vrot.slane %v2675_v36, %v4058_v33 }
 0x23e   : > { %v2852_v46 = vadd.f32 %v2851_v31, %v2850_v38 }
 0x23f   : > { %v2705_v43 = vcombine.low %v2696_v35, %v2703_v37 }
 0x240   : > { %v2921_v50 = vcombine.low %v2845_v40, %v2852_v46 }
 0x241   : > { %v2719_v45 = vrot.slane %v2705_v43, %v4058_v33 }
 0x242   : > { %v2949_v51 = vrot.slane %v2921_v50, %v4058_v33 }
 0x243   : > { %v2720_v49 = vcombine.low %v2712_v44, %v2719_v45 }
 0x244   : > { %v2951_v52 = vcombine.low %v2942_v48, %v2949_v51 }
 0x245   : > { %2724 = vst [vmem:[%s4373_s21 + $0x8] sm:$0xff] %v2720_v49 }
 0x246   : > { %v2965_v54 = vrot.slane %v2951_v52, %v4058_v33 }
 0x248   : > { %v2966_v19 = vcombine.low %v2958_v53, %v2965_v54 }
 0x24a   : > { %2970 = vst [vmem:[%s4387_s25 + $0x8] sm:$0xff] %v2966_v19 }
 0x24b PF: > { %s15_s19 = sadd.s32 1, %s3559_s19   ;;  %s4475_s15 = smov %s3547_s16 }
 0x24c   : > { %p12_p10 = scmp.ge.s32.totalorder %s15_s19, 4   ;;  %s4476_s16 = smov %s3622_s23 }
 0x24d   : > { %s4477_s17 = smov %s3555_s18  ;;  %s4478_s18 = smov %s4480_s20 }
 0x24e   :  { %14 = sbr.rel (!%p12_p10) target bundleno = 3 (0x3), region = 113 }

// kernel: generator_forward.11
= control target key start
LH: loop header
LB: loop body
LE: loop exit
PB: predicated region body
PF: predicated region fallthrough
CT: control target
= control target key end

     0   :  { %s1675_s15 = smov 0   ;;  %s1677_s16 = smov 0   ;;  %s1826_s0 = inlined_call_operand.vmem [shape: bf16[4,32,1024], index: 0, kind: input, shape index: {}]   ;;  %s1827_s1 = inlined_call_operand.vmem [shape: bf16[4,1024,128], index: 1, kind: input, shape index: {}]   ;;  %s1828_s2 = inlined_call_operand.vmem [shape: bf16[4,32,128], index: 2, kind: output, shape index: {0}]   ;;  %s1829_s3 = inlined_call_operand.vmem [shape: f32[4,2,1,128], index: 3, kind: output, shape index: {1}]   ;;  %s1830_s4 = inlined_call_operand.vmem [shape: f32[4,2,1,128], index: 4, kind: output, shape index: {2}]  }
   0x1   :  { %s1679_s17 = smov 0   ;;  %s1681_s18 = smov 0  }
   0x2   :  { %s1683_s19 = smov 0  }
   0x3 LB: > { %s30_s20 = sadd.s32 1, %s1640_s17  ;;  %s34_s21 = sadd.s32 1, %s1644_s18  ;;  %s1648_s19 = sphi %s1683_s19, %s15_s19   ;;  %s1644_s18 = sphi %s1681_s18, %s1834_s18   ;;  %s1640_s17 = sphi %s1679_s17, %s1833_s17   ;;  %s1636_s16 = sphi %s1677_s16, %s1832_s16   ;;  %s1632_s15 = sphi %s1675_s15, %s1831_s15  }
   0x4   : > { %p32_p0 = scmp.ge.s32.totalorder %s30_s20, 2  ;;  %p1322_p1 = scmp.ge.s32.totalorder %s1648_s19, 1 }
   0x5   : > { %p221_p2 = scmp.lt.s32.totalorder %s1648_s19, 9 }
   0x6   : > { %s1836_s20 = smov (%p32_p0, %s30_s20), 0  ;;  %s1838_s21 = smov (!%p32_p0, %s34_s21), %s1644_s18 }
   0x7   : > { %p222_p3 = pnand %p1322_p1, %p221_p2  ;;  %p36_p4 = scmp.ge.s32.totalorder %s1838_s21, 4 }
   0x8   : > { %p288_p5 = scmp.lt.s32.totalorder (!%p222_p3), %s1636_s16, 3  ;;  %s1323_s26 = sshll.u32 (!%p222_p3), %s1632_s15, 1 }
   0x9   : > { %s1840_s21 = smov (%p36_p4, %s1838_s21), 0  ;;  %225 = sbr.rel (%p222_p3) target bundleno = 323 (0x143), region = 28 }
   0xa   : > { %p290_p6 = scmp.lt.s32.totalorder (!%p222_p3), %s1323_s26, 3  ;;  %p321_p7 = scmp.lt.s32.totalorder (!%p222_p3), %s1632_s15, 1 }
  0x10   : > { %s1842_s16 = smov (!%p288_p5, %s1636_s16), 3  ;;  %s1844_s26 = smov (!%p290_p6, %s1323_s26), 3 }
  0x11   : > { %s1410_s22 = sshll.u32 %s1842_s16, 9  ;;  %s1325_s27 = sshll.u32 %s1842_s16, 5 }
  0x12   : > { %s1713_s25 = scalar_lea.vmem %s1827_s1, %s1410_s22  ;;  %s1324_s28 = sshll.u32 %s1844_s26, 3 }
  0x13   : > { %v1546_v0 = vld [vmem:[%s1713_s25 + $0x40] sm:$0xff]   ;;  %v1550_v4 = vld [vmem:[%s1713_s25 + $0x48] sm:$0xff]   ;;  %v1554_v8 = vld [vmem:[%s1713_s25 + $0x50] sm:$0xff]   ;;  %s294_s29 = sadd.s32 %s1325_s27, %s1324_s28  ;;  %s1330_s8 = sshll.u32 %s1842_s16, 2 }
  0x14   : > { %v1547_v1 = vld [vmem:[%s1713_s25 + $0xc0] sm:$0xff]   ;;  %1418 = vmatprep.subr.bf16.mxu0 %v1546_v0  ;;  %v1551_v5 = vld [vmem:[%s1713_s25 + $0xc8] sm:$0xff]   ;;  %v1555_v9 = vld [vmem:[%s1713_s25 + $0xd0] sm:$0xff]   ;;  %s1326_s30 = sshll.u32 %s294_s29, 2  ;;  %s315_s9 = sadd.s32 %s1330_s8, %s1844_s26 }
  0x15   : > { %v1548_v2 = vld [vmem:[%s1713_s25] sm:$0xff]   ;;  %1440 = vmatprep.subr.bf16.mxu1 %v1547_v1  ;;  %v1552_v6 = vld [vmem:[%s1713_s25 + $0x8] sm:$0xff]   ;;  %v1556_v10 = vld [vmem:[%s1713_s25 + $0x10] sm:$0xff]   ;;  %s1753_s7 = scalar_lea.vmem %s1826_s0, %s1326_s30  ;;  %s1331_s10 = sshll.u32 %s315_s9, 2 }
  0x16   : > { %v1549_v3 = vld [vmem:[%s1713_s25 + $0x80] sm:$0xff]   ;;  %1419 = vmatpush3.bf16.msra.mxu0 %v1548_v2  ;;  %v1553_v7 = vld [vmem:[%s1713_s25 + $0x88] sm:$0xff]   ;;  %v1557_v11 = vld [vmem:[%s1713_s25 + $0x90] sm:$0xff]   ;;  %s317_s13 = scalar_lea.vmem %s1828_s2, %s1331_s10  ;;  %s1846_s15 = smov (!%p321_p7, %s1632_s15), 1 }
  0x17   : > { %1441 = vmatpush3.bf16.msra.mxu1 %v1549_v3  ;;  %1420 = vmatprep.subr.bf16.mxu0 %v1550_v4  ;;  %v1558_v12 = vld [vmem:[%s1713_s25 + $0x58] sm:$0xff]   ;;  %v1562_v16 = vld [vmem:[%s1713_s25 + $0x60] sm:$0xff]   ;;  %v1566_v20 = vld [vmem:[%s1713_s25 + $0x68] sm:$0xff]   ;;  %s1332_s14 = sshll.u32 %s1842_s16, 1 }
  0x18   : > { %1442 = vmatprep.subr.bf16.mxu1 %v1551_v5  ;;  %v1559_v13 = vld [vmem:[%s1713_s25 + $0xd8] sm:$0xff]   ;;  %v1563_v17 = vld [vmem:[%s1713_s25 + $0xe0] sm:$0xff]   ;;  %v1567_v21 = vld [vmem:[%s1713_s25 + $0xe8] sm:$0xff]   ;;  %s327_s22 = sadd.s32 %s1332_s14, %s1846_s15 }
  0x19   : > { %v1560_v14 = vld [vmem:[%s1713_s25 + $0x18] sm:$0xff]   ;;  %v1564_v18 = vld [vmem:[%s1713_s25 + $0x20] sm:$0xff]   ;;  %v1568_v22 = vld [vmem:[%s1713_s25 + $0x28] sm:$0xff]   ;;  %s338_s28 = scalar_lea.vmem %s1830_s4, %s327_s22 }
  0x1a   : > { %1421 = vmatpush3.bf16.msra.mxu0 %v1552_v6  ;;  %v1561_v15 = vld [vmem:[%s1713_s25 + $0x98] sm:$0xff]   ;;  %v1565_v19 = vld [vmem:[%s1713_s25 + $0xa0] sm:$0xff]   ;;  %v1569_v23 = vld [vmem:[%s1713_s25 + $0xa8] sm:$0xff]  }
  0x1b   : > { %1443 = vmatpush3.bf16.msra.mxu1 %v1553_v7  ;;  %1422 = vmatprep.subr.bf16.mxu0 %v1554_v8  ;;  %v1570_v24 = vld [vmem:[%s1713_s25 + $0x70] sm:$0xff]   ;;  %v1574_v28 = vld [vmem:[%s1713_s25 + $0x78] sm:$0xff]   ;;  %v340_v32 = vld [vmem:[%s1753_s7] sm:$0xff] }
  0x1c   : > { %1444 = vmatprep.subr.bf16.mxu1 %v1555_v9  ;;  %v1571_v25 = vld [vmem:[%s1713_s25 + $0xf0] sm:$0xff]   ;;  %v1575_v29 = vld [vmem:[%s1713_s25 + $0xf8] sm:$0xff]   ;;  %v344_v33 = vld [vmem:[%s1753_s7 + $0x20] sm:$0xff] }
  0x1d   : > { %v1572_v26 = vld [vmem:[%s1713_s25 + $0x30] sm:$0xff]   ;;  %v1576_v30 = vld [vmem:[%s1713_s25 + $0x38] sm:$0xff]   ;;  %v341_v34 = vld [vmem:[%s1753_s7 + $0x8] sm:$0xff]  ;;  %v1334_v35 = vcombine.low %v340_v32, %v344_v33  ;;  %v1335_v36 = vcombine.high %v340_v32, %v344_v33 }
  0x1e   : > { %1423 = vmatpush3.bf16.msra.mxu0 %v1556_v10  ;;  %v1573_v27 = vld [vmem:[%s1713_s25 + $0xb0] sm:$0xff]   ;;  %v1577_v31 = vld [vmem:[%s1713_s25 + $0xb8] sm:$0xff]   ;;  %v345_v37 = vld [vmem:[%s1753_s7 + $0x28] sm:$0xff] }
  0x1f   : > { %1445 = vmatpush3.bf16.msra.mxu1 %v1557_v11  ;;  %1424 = vmatprep.subr.bf16.mxu0 %v1558_v12  ;;  %v1336_v38 = vcombine.low %v341_v34, %v345_v37  ;;  %v1337_v39 = vcombine.high %v341_v34, %v345_v37  ;;  %v1578_v40 = vld [vmem:[%s1713_s25 + $0x140] sm:$0xff]   ;;  %v1582_v44 = vld [vmem:[%s1713_s25 + $0x148] sm:$0xff]   ;;  %v1586_v48 = vld [vmem:[%s1713_s25 + $0x150] sm:$0xff]  }
  0x20   : > { %1446 = vmatprep.subr.bf16.mxu1 %v1559_v13  ;;  %932 = vmatprep.mubr.bf16.mxu0 %v1335_v36  ;;  %v1579_v41 = vld [vmem:[%s1713_s25 + $0x1c0] sm:$0xff]   ;;  %v1583_v45 = vld [vmem:[%s1713_s25 + $0x1c8] sm:$0xff]   ;;  %v1587_v49 = vld [vmem:[%s1713_s25 + $0x1d0] sm:$0xff]  }
  0x21   : > { %973 = vmatprep.mubr.bf16.mxu1 %v1337_v39  ;;  %v1580_v42 = vld [vmem:[%s1713_s25 + $0x100] sm:$0xff]   ;;  %v1584_v46 = vld [vmem:[%s1713_s25 + $0x108] sm:$0xff]   ;;  %v1588_v50 = vld [vmem:[%s1713_s25 + $0x110] sm:$0xff]  }
  0x22   : > { %1425 = vmatpush3.bf16.msra.mxu0 %v1560_v14  ;;  %v1581_v43 = vld [vmem:[%s1713_s25 + $0x180] sm:$0xff]   ;;  %v1585_v47 = vld [vmem:[%s1713_s25 + $0x188] sm:$0xff]   ;;  %v1589_v51 = vld [vmem:[%s1713_s25 + $0x190] sm:$0xff]  }
  0x23   : > { %1447 = vmatpush3.bf16.msra.mxu1 %v1561_v15  ;;  %1426 = vmatprep.subr.bf16.mxu0 %v1562_v16  ;;  %v1590_v52 = vld [vmem:[%s1713_s25 + $0x158] sm:$0xff]   ;;  %v1594_v56 = vld [vmem:[%s1713_s25 + $0x160] sm:$0xff]   ;;  %v1598_v60 = vld [vmem:[%s1713_s25 + $0x168] sm:$0xff]  }
  0x24   : > { %1448 = vmatprep.subr.bf16.mxu1 %v1563_v17  ;;  %v1591_v53 = vld [vmem:[%s1713_s25 + $0x1d8] sm:$0xff]   ;;  %v1595_v57 = vld [vmem:[%s1713_s25 + $0x1e0] sm:$0xff]   ;;  %v1599_v61 = vld [vmem:[%s1713_s25 + $0x1e8] sm:$0xff]  }
  0x25   : > { %v1592_v54 = vld [vmem:[%s1713_s25 + $0x118] sm:$0xff]   ;;  %v1596_v58 = vld [vmem:[%s1713_s25 + $0x120] sm:$0xff]   ;;  %v1600_v62 = vld [vmem:[%s1713_s25 + $0x128] sm:$0xff]  }
  0x26   : > { %1427 = vmatpush3.bf16.msra.mxu0 %v1564_v18  ;;  %v1593_v55 = vld [vmem:[%s1713_s25 + $0x198] sm:$0xff]   ;;  %v1597_v59 = vld [vmem:[%s1713_s25 + $0x1a0] sm:$0xff]   ;;  %v1601_v63 = vld [vmem:[%s1713_s25 + $0x1a8] sm:$0xff]  }
  0x27   : > { %1449 = vmatpush3.bf16.msra.mxu1 %v1565_v19  ;;  %1428 = vmatprep.subr.bf16.mxu0 %v1566_v20  ;;  %v1602_v0 = vld [vmem:[%s1713_s25 + $0x170] sm:$0xff]   ;;  %v1606_v4 = vld [vmem:[%s1713_s25 + $0x178] sm:$0xff]  }
  0x28   : > { %1450 = vmatprep.subr.bf16.mxu1 %v1567_v21  ;;  %v1603_v1 = vld [vmem:[%s1713_s25 + $0x1f0] sm:$0xff]   ;;  %v1607_v5 = vld [vmem:[%s1713_s25 + $0x1f8] sm:$0xff]  }
  0x29   : > { %v1604_v2 = vld [vmem:[%s1713_s25 + $0x130] sm:$0xff]   ;;  %v1608_v6 = vld [vmem:[%s1713_s25 + $0x138] sm:$0xff]  }
  0x2a   : > { %1429 = vmatpush3.bf16.msra.mxu0 %v1568_v22  ;;  %v1605_v3 = vld [vmem:[%s1713_s25 + $0x1b0] sm:$0xff]   ;;  %v1609_v7 = vld [vmem:[%s1713_s25 + $0x1b8] sm:$0xff]   ;;  %s328_s25 = scalar_lea.vmem %s1829_s3, %s327_s22 }
  0x2b   : > { %1451 = vmatpush3.bf16.msra.mxu1 %v1569_v23  ;;  %1430 = vmatprep.subr.bf16.mxu0 %v1570_v24  ;;  %v342_v8 = vld [vmem:[%s1753_s7 + $0x10] sm:$0xff]  ;;  %v343_v12 = vld [vmem:[%s1753_s7 + $0x18] sm:$0xff] }
  0x2c   : > { %1452 = vmatprep.subr.bf16.mxu1 %v1571_v25  ;;  %v346_v9 = vld [vmem:[%s1753_s7 + $0x30] sm:$0xff]  ;;  %v347_v13 = vld [vmem:[%s1753_s7 + $0x38] sm:$0xff] }
  0x2d   : > { %v1338_v10 = vcombine.low %v342_v8, %v346_v9  ;;  %v1339_v11 = vcombine.high %v342_v8, %v346_v9  ;;  %v1340_v14 = vcombine.low %v343_v12, %v347_v13  ;;  %v1341_v15 = vcombine.high %v343_v12, %v347_v13 }
  0x2e   : > { %1431 = vmatpush3.bf16.msra.mxu0 %v1572_v26 }
  0x2f   : > { %1453 = vmatpush3.bf16.msra.mxu1 %v1573_v27  ;;  %1432 = vmatprep.subr.bf16.mxu0 %v1574_v28 }
  0x30   : > { %1454 = vmatprep.subr.bf16.mxu1 %v1575_v29 }
  0x32   : > { %1433 = vmatpush3.bf16.msra.mxu0 %v1576_v30 }
  0x33   : > { %1455 = vmatpush3.bf16.msra.mxu1 %v1577_v31  ;;  %1462 = vmatprep.subr.bf16.mxu0 %v1578_v40 }
  0x34   : > { %1484 = vmatprep.subr.bf16.mxu1 %v1579_v41 }
  0x35   : > { %933 = vmatmul.mubr.bf16.vlgmr.msra.gmra.mrb[0].mxu0 %v1334_v35 }
  0x36   : > { %974 = vmatmul.mubr.bf16.vlgmr.msra.gmra.mrb[0].mxu1 %v1336_v38  ;;  %1463 = vmatpush3.bf16.msra.mxu0 %v1580_v42 }
  0x37   : > { %1485 = vmatpush3.bf16.msra.mxu1 %v1581_v43  ;;  %1464 = vmatprep.subr.bf16.mxu0 %v1582_v44 }
  0x38   : > { %1486 = vmatprep.subr.bf16.mxu1 %v1583_v45  ;;  %1014 = vmatprep.mubr.bf16.mxu0 %v1339_v11 }
  0x39   : > { %1055 = vmatprep.mubr.bf16.mxu1 %v1341_v15 }
  0x3a   : > { %1465 = vmatpush3.bf16.msra.mxu0 %v1584_v46 }
  0x3b   : > { %1487 = vmatpush3.bf16.msra.mxu1 %v1585_v47  ;;  %1466 = vmatprep.subr.bf16.mxu0 %v1586_v48 }
  0x3c   : > { %1488 = vmatprep.subr.bf16.mxu1 %v1587_v49 }
  0x3e   : > { %1467 = vmatpush3.bf16.msra.mxu0 %v1588_v50 }
  0x3f   : > { %1489 = vmatpush3.bf16.msra.mxu1 %v1589_v51  ;;  %1468 = vmatprep.subr.bf16.mxu0 %v1590_v52 }
  0x40   : > { %1490 = vmatprep.subr.bf16.mxu1 %v1591_v53 }
  0x42   : > { %1469 = vmatpush3.bf16.msra.mxu0 %v1592_v54 }
  0x43   : > { %1491 = vmatpush3.bf16.msra.mxu1 %v1593_v55  ;;  %1470 = vmatprep.subr.bf16.mxu0 %v1594_v56 }
  0x44   : > { %1492 = vmatprep.subr.bf16.mxu1 %v1595_v57 }
  0x46   : > { %1471 = vmatpush3.bf16.msra.mxu0 %v1596_v58 }
  0x47   : > { %1493 = vmatpush3.bf16.msra.mxu1 %v1597_v59  ;;  %1472 = vmatprep.subr.bf16.mxu0 %v1598_v60 }
  0x48   : > { %1494 = vmatprep.subr.bf16.mxu1 %v1599_v61 }
  0x4a   : > { %1473 = vmatpush3.bf16.msra.mxu0 %v1600_v62 }
  0x4b   : > { %1495 = vmatpush3.bf16.msra.mxu1 %v1601_v63  ;;  %1474 = vmatprep.subr.bf16.mxu0 %v1602_v0 }
  0x4c   : > { %1496 = vmatprep.subr.bf16.mxu1 %v1603_v1 }
  0x4e   : > { %1475 = vmatpush3.bf16.msra.mxu0 %v1604_v2 }
  0x4f   : > { %1497 = vmatpush3.bf16.msra.mxu1 %v1605_v3  ;;  %1476 = vmatprep.subr.bf16.mxu0 %v1606_v4 }
  0x50   : > { %1498 = vmatprep.subr.bf16.mxu1 %v1607_v5 }
  0x52   : > { %1477 = vmatpush3.bf16.msra.mxu0 %v1608_v6 }
  0x53   : > { %1499 = vmatpush3.bf16.msra.mxu1 %v1609_v7 }
  0x55   : > { %1015 = vmatmul.mubr.bf16.vlgmr.msra.gmra.mrb[4].mxu0 %v1338_v10 }
  0x56   : > { %1056 = vmatmul.mubr.bf16.vlgmr.msra.gmra.mrb[4].mxu1 %v1340_v14 }
 0x108   : > { %v1434_v16 = vpop.f32.mrb[0].mxu0 }
 0x109   : > { %v1456_v17 = vpop.f32.mrb[0].mxu1  ;;  %v1435_v18 = vpop.f32.mrb[1].mxu0 }
 0x10a   : > { %v1436_v19 = vadd.f32 %v1435_v18, %v1434_v16  ;;  %v1457_v20 = vpop.f32.mrb[1].mxu1  ;;  %v1437_v21 = vpop.f32.mrb[2].mxu0 }
 0x10b   : > { %v1458_v22 = vadd.f32 %v1457_v20, %v1456_v17  ;;  %v1459_v23 = vpop.f32.mrb[2].mxu1  ;;  %v1438_v24 = vpop.f32.mrb[3].mxu0 }
 0x10c   : > { %v1439_v25 = vadd.f32 %v1438_v24, %v1437_v21  ;;  %v1460_v26 = vpop.f32.mrb[3].mxu1 }
 0x10d   : > { %v976_v27 = vadd.f32 %v1458_v22, %v1436_v19  ;;  %v1461_v28 = vadd.f32 %v1460_v26, %v1459_v23 }
 0x10f   : > { %v979_v29 = vadd.f32 %v1461_v28, %v1439_v25 }
 0x128   : > { %v1478_v30 = vpop.f32.mrb[4].mxu0 }
 0x129   : > { %v1500_v31 = vpop.f32.mrb[4].mxu1  ;;  %v1479_v32 = vpop.f32.mrb[5].mxu0 }
 0x12a   : > { %v1480_v33 = vadd.f32 %v1479_v32, %v1478_v30  ;;  %v1501_v34 = vpop.f32.mrb[5].mxu1  ;;  %v1481_v35 = vpop.f32.mrb[6].mxu0 }
 0x12b   : > { %v1502_v36 = vadd.f32 %v1501_v34, %v1500_v31  ;;  %v1503_v37 = vpop.f32.mrb[6].mxu1  ;;  %v1482_v38 = vpop.f32.mrb[7].mxu0 }
 0x12c   : > { %v1017_v39 = vadd.f32 %v1480_v33, %v976_v27  ;;  %v1483_v40 = vadd.f32 %v1482_v38, %v1481_v35  ;;  %v1504_v41 = vpop.f32.mrb[7].mxu1 }
 0x12d   : > { %v1505_v42 = vadd.f32 %v1504_v41, %v1503_v37 }
 0x12e   : > { %v1058_v43 = vadd.f32 %v1502_v36, %v1017_v39  ;;  %v1020_v44 = vadd.f32 %v1483_v40, %v979_v29 }
 0x130   : > { %v1061_v45 = vadd.f32 %v1505_v42, %v1020_v44  ;;  %v1082_v46 = vmul.f32 %v1058_v43, %v1058_v43 }
 0x132   : > { %v1416_v47 = vpack.c.bf16 %v1061_v45, %v1058_v43  ;;  %v1074_v48 = vadd.f32 %v1061_v45, %v1058_v43  ;;  %v1083_v49 = vmul.f32 %v1061_v45, %v1061_v45 }
 0x134   : > { %1417 = vst [vmem:[%s317_s13] sm:$0xff] %v1416_v47   ;;  %v1075_v50 = vrot.slane %v1074_v48, 4  ;;  %v1084_v51 = vadd.f32 %v1083_v49, %v1082_v46 }
 0x136   : > { %v1076_v52 = vadd.f32 %v1075_v50, %v1074_v48  ;;  %v1085_v53 = vrot.slane %v1084_v51, 4 }
 0x138   : > { %v1077_v54 = vrot.slane %v1076_v52, 2  ;;  %v1086_v55 = vadd.f32 %v1085_v53, %v1084_v51 }
 0x13a   : > { %v1078_v56 = vadd.f32 %v1077_v54, %v1076_v52  ;;  %v1087_v57 = vrot.slane %v1086_v55, 2 }
 0x13c   : > { %v1079_v58 = vrot.slane %v1078_v56, 1  ;;  %v1088_v59 = vadd.f32 %v1087_v57, %v1086_v55 }
 0x13e   : > { %v1080_v60 = vadd.f32 %v1079_v58, %v1078_v56  ;;  %v1089_v61 = vrot.slane %v1088_v59, 1 }
 0x140   : > { %1081 = vst [vmem:[%s328_s25] sm:$0x1] %v1080_v60  ;;  %v1090_v62 = vadd.f32 %v1089_v61, %v1088_v59 }
 0x142   : > { %1091 = vst [vmem:[%s338_s28] sm:$0x1] %v1090_v62 }
 0x143 PF: > { %s15_s19 = sadd.s32 1, %s1648_s19   ;;  %s1831_s15 = smov %s1640_s17 }
 0x144   : > { %p12_p8 = scmp.ge.s32.totalorder %s15_s19, 10   ;;  %s1832_s16 = smov %s1644_s18 }
 0x145   : > { %s1833_s17 = smov %s1836_s20  ;;  %s1834_s18 = smov %s1840_s21 }
 0x146   :  { %14 = sbr.rel (!%p12_p8) target bundleno = 3 (0x3), region = 85 }

// kernel: generator_forward.12
= control target key start
LH: loop header
LB: loop body
LE: loop exit
PB: predicated region body
PF: predicated region fallthrough
CT: control target
= control target key end

     0   :  { %s447_s12 = smov 0   ;;  %s477_s0 = inlined_call_operand.vmem [shape: bf16[128,128], index: 0, kind: input, shape index: {}]   ;;  %s478_s1 = inlined_call_operand.vmem [shape: f32[1,128], index: 1, kind: input, shape index: {}]   ;;  %s479_s2 = inlined_call_operand.vmem [shape: f32[1,128], index: 2, kind: input, shape index: {}]   ;;  %s480_s3 = inlined_call_operand.vmem [shape: bf16[128,128], index: 3, kind: output, shape index: {}]  }
   0x1 LB: > { %s340_s13 = sadd.s32 4294967295, %s425_s12   ;;  %p344_p0 = scmp.ge.s32.totalorder %s425_s12, 1  ;;  %s425_s12 = sphi %s447_s12, %s13_s12  }
   0x2   : > { %p138_p1 = scmp.lt.s32.totalorder %s425_s12, 3 }
   0x4   : > { %p139_p2 = pnand %p344_p0, %p138_p1 }
   0x5   : > { %s345_s14 = sshll.u32 (!%p139_p2), %s340_s13, 3  ;;  %v349_v0 = vld [vmem:[%s478_s1] ss:$0 sm:$0xff] (!%p139_p2) }
   0x6   : > { %142 = sbr.rel (%p139_p2) target bundleno = 34 (0x22), region = 32  ;;  %p163_p3 = scmp.lt.s32.totalorder (!%p139_p2), %s345_s14, 15  ;;  %v350_v13 = vld [vmem:[%s479_s2] ss:$0 sm:$0xff] (!%p139_p2) }
   0xd   : > { %s482_s14 = smov (!%p163_p3, %s345_s14), 15 }
   0xe   : > { %s346_s15 = sshll.u32 %s482_s14, 2 }
   0xf   : > { %s166_s18 = scalar_lea.vmem %s477_s0, %s346_s15  ;;  %s172_s25 = scalar_lea.vmem %s480_s3, %s346_s15 }
  0x10   : > { %v370_v1 = vld [vmem:[%s166_s18] sm:$0xff]   ;;  %v405_v2 = vld [vmem:[%s166_s18 + $0x8] sm:$0xff]   ;;  %v406_v3 = vld [vmem:[%s166_s18 + $0x10] sm:$0xff]  }
  0x11   : > { %v371_v4 = vunpack.c.l.bf16 %v370_v1  ;;  %v372_v5 = vunpack.c.h.bf16 %v370_v1  ;;  %v375_v6 = vunpack.c.l.bf16 %v405_v2  ;;  %v376_v7 = vunpack.c.h.bf16 %v405_v2  ;;  %v407_v8 = vld [vmem:[%s166_s18 + $0x18] sm:$0xff]  }
  0x12   : > { %v379_v9 = vunpack.c.l.bf16 %v406_v3  ;;  %v380_v10 = vunpack.c.h.bf16 %v406_v3  ;;  %v383_v11 = vunpack.c.l.bf16 %v407_v8  ;;  %v384_v12 = vunpack.c.h.bf16 %v407_v8 }
  0x13   : > { %v197_v14 = vmul.f32 %v371_v4, %v349_v0  ;;  %v198_v15 = vmul.f32 %v372_v5, %v349_v0  ;;  %v199_v16 = vmul.f32 %v375_v6, %v349_v0  ;;  %v200_v17 = vmul.f32 %v376_v7, %v349_v0 }
  0x14   : > { %v201_v18 = vmul.f32 %v379_v9, %v349_v0  ;;  %v202_v19 = vmul.f32 %v380_v10, %v349_v0  ;;  %v203_v20 = vmul.f32 %v383_v11, %v349_v0  ;;  %v204_v21 = vmul.f32 %v384_v12, %v349_v0 }
  0x15   : > { %v212_v22 = vadd.f32 %v350_v13, %v197_v14  ;;  %v213_v23 = vadd.f32 %v350_v13, %v198_v15  ;;  %v214_v24 = vadd.f32 %v350_v13, %v199_v16  ;;  %v215_v25 = vadd.f32 %v350_v13, %v200_v17 }
  0x16   : > { %v216_v26 = vadd.f32 %v350_v13, %v201_v18  ;;  %v217_v27 = vadd.f32 %v350_v13, %v202_v19  ;;  %v218_v28 = vadd.f32 %v350_v13, %v203_v20  ;;  %v219_v29 = vadd.f32 %v350_v13, %v204_v21 }
  0x17   : > { %vm220_vm0 = vcmp.ge.f32.partialorder %v212_v22, 0.0  ;;  %vm221_vm1 = vcmp.ge.f32.partialorder %v213_v23, 0.0  ;;  %v228_v30 = vmul.f32 0.2, %v212_v22  ;;  %v229_v31 = vmul.f32 0.2, %v213_v23 }
  0x18   : > { %vm222_vm2 = vcmp.ge.f32.partialorder %v214_v24, 0.0  ;;  %vm223_vm3 = vcmp.ge.f32.partialorder %v215_v25, 0.0  ;;  %v230_v32 = vmul.f32 0.2, %v214_v24  ;;  %v231_v33 = vmul.f32 0.2, %v215_v25 }
  0x19   : > { %v236_v34 = vsel %vm220_vm0, %v212_v22, %v228_v30  ;;  %v237_v35 = vsel %vm221_vm1, %v213_v23, %v229_v31  ;;  %vm224_vm4 = vcmp.ge.f32.partialorder %v216_v26, 0.0  ;;  %vm225_vm5 = vcmp.ge.f32.partialorder %v217_v27, 0.0 }
  0x1a   : > { %v388_v36 = vpack.c.bf16 %v237_v35, %v236_v34  ;;  %v238_v37 = vsel %vm222_vm2, %v214_v24, %v230_v32  ;;  %v239_v38 = vsel %vm223_vm3, %v215_v25, %v231_v33  ;;  %v232_v39 = vmul.f32 0.2, %v216_v26 }
  0x1b   : > { %v393_v40 = vpack.c.bf16 %v239_v38, %v238_v37  ;;  %v233_v41 = vmul.f32 0.2, %v217_v27  ;;  %vm226_vm6 = vcmp.ge.f32.partialorder %v218_v28, 0.0  ;;  %vm227_vm7 = vcmp.ge.f32.partialorder %v219_v29, 0.0 }
  0x1c   : > { %389 = vst [vmem:[%s172_s25] sm:$0xff] %v388_v36   ;;  %v240_v42 = vsel %vm224_vm4, %v216_v26, %v232_v39  ;;  %v234_v43 = vmul.f32 0.2, %v218_v28  ;;  %v235_v44 = vmul.f32 0.2, %v219_v29 }
  0x1d   : > { %408 = vst [vmem:[%s172_s25 + $0x8] sm:$0xff] %v393_v40   ;;  %v241_v45 = vsel %vm225_vm5, %v217_v27, %v233_v41 }
  0x1e   : > { %v398_v46 = vpack.c.bf16 %v241_v45, %v240_v42  ;;  %v242_v47 = vsel %vm226_vm6, %v218_v28, %v234_v43  ;;  %v243_v48 = vsel %vm227_vm7, %v219_v29, %v235_v44 }
  0x1f   : > { %v403_v49 = vpack.c.bf16 %v243_v48, %v242_v47 }
  0x20   : > { %409 = vst [vmem:[%s172_s25 + $0x10] sm:$0xff] %v398_v46  }
  0x21   : > { %410 = vst [vmem:[%s172_s25 + $0x18] sm:$0xff] %v403_v49  }
  0x22 PF: > { %s13_s12 = sadd.s32 1, %s425_s12  }
  0x23   : > { %p10_p4 = scmp.ge.s32.totalorder %s13_s12, 4  }
  0x25   :  { %12 = sbr.rel (!%p10_p4) target bundleno = 1 (0x1), region = 62 }

// kernel: generator_forward.13
= control target key start
LH: loop header
LB: loop body
LE: loop exit
PB: predicated region body
PF: predicated region fallthrough
CT: control target
= control target key end

     0   :  { %s1471_s15 = smov 0   ;;  %s1473_s16 = smov 0   ;;  %s1604_s0 = inlined_call_operand.vmem [shape: bf16[4,128,512], index: 0, kind: input, shape index: {}]   ;;  %s1605_s1 = inlined_call_operand.vmem [shape: bf16[4,512,128], index: 1, kind: input, shape index: {}]   ;;  %s1606_s2 = inlined_call_operand.vmem [shape: bf16[4,128,128], index: 2, kind: output, shape index: {0}]   ;;  %s1607_s3 = inlined_call_operand.vmem [shape: f32[4,2,1,128], index: 3, kind: output, shape index: {1}]   ;;  %s1608_s4 = inlined_call_operand.vmem [shape: f32[4,2,1,128], index: 4, kind: output, shape index: {2}]  }
   0x1   :  { %s1475_s17 = smov 0   ;;  %s1477_s18 = smov 0  }
   0x2   :  { %s1479_s19 = smov 0  }
   0x3 LB: > { %s30_s20 = sadd.s32 1, %s1436_s17  ;;  %s34_s21 = sadd.s32 1, %s1440_s18  ;;  %s1444_s19 = sphi %s1479_s19, %s15_s19   ;;  %s1440_s18 = sphi %s1477_s18, %s1612_s18   ;;  %s1436_s17 = sphi %s1475_s17, %s1611_s17   ;;  %s1432_s16 = sphi %s1473_s16, %s1610_s16   ;;  %s1428_s15 = sphi %s1471_s15, %s1609_s15  }
   0x4   : > { %p32_p0 = scmp.ge.s32.totalorder %s30_s20, 2  ;;  %p1128_p1 = scmp.ge.s32.totalorder %s1444_s19, 1 }
   0x5   : > { %p221_p2 = scmp.lt.s32.totalorder %s1444_s19, 9 }
   0x6   : > { %s1614_s20 = smov (%p32_p0, %s30_s20), 0  ;;  %s1616_s21 = smov (!%p32_p0, %s34_s21), %s1440_s18 }
   0x7   : > { %p222_p3 = pnand %p1128_p1, %p221_p2  ;;  %p36_p4 = scmp.ge.s32.totalorder %s1616_s21, 4 }
   0x8   : > { %p288_p5 = scmp.lt.s32.totalorder (!%p222_p3), %s1432_s16, 3  ;;  %s1129_s26 = sshll.u32 (!%p222_p3), %s1428_s15, 3 }
   0x9   : > { %s1618_s21 = smov (%p36_p4, %s1616_s21), 0  ;;  %225 = sbr.rel (%p222_p3) target bundleno = 314 (0x13a), region = 28 }
   0xa   : > { %p290_p6 = scmp.lt.s32.totalorder (!%p222_p3), %s1129_s26, 15  ;;  %p321_p7 = scmp.lt.s32.totalorder (!%p222_p3), %s1428_s15, 1 }
  0x10   : > { %s1620_s16 = smov (!%p288_p5, %s1432_s16), 3  ;;  %s1622_s26 = smov (!%p290_p6, %s1129_s26), 15 }
  0x11   : > { %s1198_s22 = sshll.u32 %s1620_s16, 8  ;;  %s1131_s27 = sshll.u32 %s1620_s16, 6 }
  0x12   : > { %s1509_s25 = scalar_lea.vmem %s1605_s1, %s1198_s22  ;;  %s1130_s28 = sshll.u32 %s1622_s26, 2 }
  0x13   : > { %v1350_v0 = vld [vmem:[%s1509_s25 + $0x40] sm:$0xff]   ;;  %v1354_v4 = vld [vmem:[%s1509_s25 + $0x48] sm:$0xff]   ;;  %v1358_v8 = vld [vmem:[%s1509_s25 + $0x50] sm:$0xff]   ;;  %s294_s29 = sadd.s32 %s1131_s27, %s1130_s28  ;;  %s1136_s8 = sshll.u32 %s1620_s16, 4 }
  0x14   : > { %v1351_v1 = vld [vmem:[%s1509_s25 + $0xc0] sm:$0xff]   ;;  %1230 = vmatprep.subr.bf16.mxu0 %v1350_v0  ;;  %v1355_v5 = vld [vmem:[%s1509_s25 + $0xc8] sm:$0xff]   ;;  %v1359_v9 = vld [vmem:[%s1509_s25 + $0xd0] sm:$0xff]   ;;  %s1132_s30 = sshll.u32 %s294_s29, 2  ;;  %s315_s9 = sadd.s32 %s1136_s8, %s1622_s26 }
  0x15   : > { %v1352_v2 = vld [vmem:[%s1509_s25] sm:$0xff]   ;;  %1270 = vmatprep.subr.bf16.mxu1 %v1351_v1  ;;  %v1356_v6 = vld [vmem:[%s1509_s25 + $0x8] sm:$0xff]   ;;  %v1360_v10 = vld [vmem:[%s1509_s25 + $0x10] sm:$0xff]   ;;  %s1549_s7 = scalar_lea.vmem %s1604_s0, %s1132_s30  ;;  %s1137_s10 = sshll.u32 %s315_s9, 2 }
  0x16   : > { %v1353_v3 = vld [vmem:[%s1509_s25 + $0x80] sm:$0xff]   ;;  %1231 = vmatpush3.bf16.msra.mxu0 %v1352_v2  ;;  %v1357_v7 = vld [vmem:[%s1509_s25 + $0x88] sm:$0xff]   ;;  %v1361_v11 = vld [vmem:[%s1509_s25 + $0x90] sm:$0xff]   ;;  %s1574_s13 = scalar_lea.vmem %s1606_s2, %s1137_s10  ;;  %s1624_s15 = smov (!%p321_p7, %s1428_s15), 1 }
  0x17   : > { %1271 = vmatpush3.bf16.msra.mxu1 %v1353_v3  ;;  %1232 = vmatprep.subr.bf16.mxu0 %v1354_v4  ;;  %v1362_v12 = vld [vmem:[%s1509_s25 + $0x58] sm:$0xff]   ;;  %v1366_v16 = vld [vmem:[%s1509_s25 + $0x60] sm:$0xff]   ;;  %v1370_v20 = vld [vmem:[%s1509_s25 + $0x68] sm:$0xff]   ;;  %s1138_s14 = sshll.u32 %s1620_s16, 1 }
  0x18   : > { %1272 = vmatprep.subr.bf16.mxu1 %v1355_v5  ;;  %v1363_v13 = vld [vmem:[%s1509_s25 + $0xd8] sm:$0xff]   ;;  %v1367_v17 = vld [vmem:[%s1509_s25 + $0xe0] sm:$0xff]   ;;  %v1371_v21 = vld [vmem:[%s1509_s25 + $0xe8] sm:$0xff]   ;;  %s327_s22 = sadd.s32 %s1138_s14, %s1624_s15 }
  0x19   : > { %v1364_v14 = vld [vmem:[%s1509_s25 + $0x18] sm:$0xff]   ;;  %v1368_v18 = vld [vmem:[%s1509_s25 + $0x20] sm:$0xff]   ;;  %v1372_v22 = vld [vmem:[%s1509_s25 + $0x28] sm:$0xff]   ;;  %s338_s28 = scalar_lea.vmem %s1608_s4, %s327_s22 }
  0x1a   : > { %1233 = vmatpush3.bf16.msra.mxu0 %v1356_v6  ;;  %v1365_v15 = vld [vmem:[%s1509_s25 + $0x98] sm:$0xff]   ;;  %v1369_v19 = vld [vmem:[%s1509_s25 + $0xa0] sm:$0xff]   ;;  %v1373_v23 = vld [vmem:[%s1509_s25 + $0xa8] sm:$0xff]  }
  0x1b   : > { %1273 = vmatpush3.bf16.msra.mxu1 %v1357_v7  ;;  %1234 = vmatprep.subr.bf16.mxu0 %v1358_v8  ;;  %v1374_v24 = vld [vmem:[%s1509_s25 + $0x70] sm:$0xff]   ;;  %v1378_v28 = vld [vmem:[%s1509_s25 + $0x78] sm:$0xff]  }
  0x1c   : > { %1274 = vmatprep.subr.bf16.mxu1 %v1359_v9  ;;  %v1375_v25 = vld [vmem:[%s1509_s25 + $0xf0] sm:$0xff]   ;;  %v1379_v29 = vld [vmem:[%s1509_s25 + $0xf8] sm:$0xff]  }
  0x1d   : > { %v1376_v26 = vld [vmem:[%s1509_s25 + $0x30] sm:$0xff]   ;;  %v1380_v30 = vld [vmem:[%s1509_s25 + $0x38] sm:$0xff]  }
  0x1e   : > { %1235 = vmatpush3.bf16.msra.mxu0 %v1360_v10  ;;  %v1377_v27 = vld [vmem:[%s1509_s25 + $0xb0] sm:$0xff]   ;;  %v1381_v31 = vld [vmem:[%s1509_s25 + $0xb8] sm:$0xff]   ;;  %s328_s25 = scalar_lea.vmem %s1607_s3, %s327_s22 }
  0x1f   : > { %1275 = vmatpush3.bf16.msra.mxu1 %v1361_v11  ;;  %1236 = vmatprep.subr.bf16.mxu0 %v1362_v12  ;;  %v1382_v32 = vld [vmem:[%s1549_s7] ss:$16 sps:$4 sm:$0xff]   ;;  %v1384_v33 = vld [vmem:[%s1549_s7 + $0x4] ss:$16 sps:$4 sm:$0xff]   ;;  %v1385_v34 = vld [vmem:[%s1549_s7 + $0x8] ss:$16 sps:$4 sm:$0xff]  }
  0x20   : > { %1276 = vmatprep.subr.bf16.mxu1 %v1363_v13  ;;  %v1387_v35 = vld [vmem:[%s1549_s7 + $0xc] ss:$16 sps:$4 sm:$0xff]   ;;  %724 = vmatprep.mubr.bf16.mxu0 %v1384_v33  ;;  %v1388_v36 = vld [vmem:[%s1549_s7 + $0x24] ss:$16 sps:$4 sm:$0xff]   ;;  %v1392_v38 = vld [vmem:[%s1549_s7 + $0x20] ss:$16 sps:$4 sm:$0xff]  }
  0x21   : > { %789 = vmatprep.mubr.bf16.mxu1 %v1387_v35  ;;  %v1390_v37 = vld [vmem:[%s1549_s7 + $0x2c] ss:$16 sps:$4 sm:$0xff]   ;;  %v1393_v39 = vld [vmem:[%s1549_s7 + $0x28] ss:$16 sps:$4 sm:$0xff]   ;;  %v1394_v40 = vld [vmem:[%s1549_s7 + $0x44] ss:$16 sps:$4 sm:$0xff]  }
  0x22   : > { %1237 = vmatpush3.bf16.msra.mxu0 %v1364_v14  ;;  %v1396_v41 = vld [vmem:[%s1549_s7 + $0x4c] ss:$16 sps:$4 sm:$0xff]   ;;  %v1398_v42 = vld [vmem:[%s1549_s7 + $0x40] ss:$16 sps:$4 sm:$0xff]   ;;  %v1399_v43 = vld [vmem:[%s1549_s7 + $0x48] ss:$16 sps:$4 sm:$0xff]  }
  0x23   : > { %1277 = vmatpush3.bf16.msra.mxu1 %v1365_v15  ;;  %1238 = vmatprep.subr.bf16.mxu0 %v1366_v16  ;;  %v1400_v44 = vld [vmem:[%s1549_s7 + $0x64] ss:$16 sps:$4 sm:$0xff]   ;;  %v1402_v45 = vld [vmem:[%s1549_s7 + $0x6c] ss:$16 sps:$4 sm:$0xff]   ;;  %v1404_v46 = vld [vmem:[%s1549_s7 + $0x60] ss:$16 sps:$4 sm:$0xff]  }
  0x24   : > { %1278 = vmatprep.subr.bf16.mxu1 %v1367_v17  ;;  %v1405_v47 = vld [vmem:[%s1549_s7 + $0x68] ss:$16 sps:$4 sm:$0xff]  }
  0x26   : > { %1239 = vmatpush3.bf16.msra.mxu0 %v1368_v18 }
  0x27   : > { %1279 = vmatpush3.bf16.msra.mxu1 %v1369_v19  ;;  %1240 = vmatprep.subr.bf16.mxu0 %v1370_v20 }
  0x28   : > { %1280 = vmatprep.subr.bf16.mxu1 %v1371_v21 }
  0x2a   : > { %1241 = vmatpush3.bf16.msra.mxu0 %v1372_v22 }
  0x2b   : > { %1281 = vmatpush3.bf16.msra.mxu1 %v1373_v23  ;;  %1242 = vmatprep.subr.bf16.mxu0 %v1374_v24 }
  0x2c   : > { %1282 = vmatprep.subr.bf16.mxu1 %v1375_v25 }
  0x2e   : > { %1243 = vmatpush3.bf16.msra.mxu0 %v1376_v26 }
  0x2f   : > { %1283 = vmatpush3.bf16.msra.mxu1 %v1377_v27  ;;  %1244 = vmatprep.subr.bf16.mxu0 %v1378_v28 }
  0x30   : > { %1284 = vmatprep.subr.bf16.mxu1 %v1379_v29 }
  0x32   : > { %1245 = vmatpush3.bf16.msra.mxu0 %v1380_v30 }
  0x33   : > { %1285 = vmatpush3.bf16.msra.mxu1 %v1381_v31 }
  0x35   : > { %725 = vmatmul.mubr.bf16.vlgmr.msra.gmra.mrb[0].mxu0 %v1382_v32 }
  0x36   : > { %790 = vmatmul.mubr.bf16.vlgmr.msra.gmra.mrb[0].mxu1 %v1385_v34  ;;  %732 = vmatprep.mubr.bf16.mxu0 %v1388_v36 }
  0x37   : > { %797 = vmatprep.mubr.bf16.mxu1 %v1390_v37 }
  0x3d   : > { %733 = vmatmul.mubr.bf16.gmra.mrb[4].mxu0 %v1392_v38 }
  0x3e   : > { %798 = vmatmul.mubr.bf16.gmra.mrb[4].mxu1 %v1393_v39  ;;  %740 = vmatprep.mubr.bf16.mxu0 %v1394_v40 }
  0x3f   : > { %805 = vmatprep.mubr.bf16.mxu1 %v1396_v41 }
  0x45   : > { %741 = vmatmul.mubr.bf16.gmra.mrb[8].mxu0 %v1398_v42 }
  0x46   : > { %806 = vmatmul.mubr.bf16.gmra.mrb[8].mxu1 %v1399_v43  ;;  %748 = vmatprep.mubr.bf16.mxu0 %v1400_v44 }
  0x47   : > { %813 = vmatprep.mubr.bf16.mxu1 %v1402_v45 }
  0x4d   : > { %749 = vmatmul.mubr.bf16.gmra.mrb[12].mxu0 %v1404_v46 }
  0x4e   : > { %814 = vmatmul.mubr.bf16.gmra.mrb[12].mxu1 %v1405_v47 }
 0x108   : > { %v1246_v48 = vpop.f32.mrb[0].mxu0 }
 0x109   : > { %v1286_v49 = vpop.f32.mrb[0].mxu1  ;;  %v1247_v50 = vpop.f32.mrb[1].mxu0 }
 0x10a   : > { %v1248_v51 = vadd.f32 %v1247_v50, %v1246_v48  ;;  %v1287_v52 = vpop.f32.mrb[1].mxu1  ;;  %v1249_v53 = vpop.f32.mrb[2].mxu0 }
 0x10b   : > { %v1288_v54 = vadd.f32 %v1287_v52, %v1286_v49  ;;  %v1289_v55 = vpop.f32.mrb[2].mxu1  ;;  %v1250_v56 = vpop.f32.mrb[3].mxu0 }
 0x10c   : > { %v1251_v57 = vadd.f32 %v1250_v56, %v1249_v53  ;;  %v1290_v58 = vpop.f32.mrb[3].mxu1 }
 0x10d   : > { %v792_v59 = vadd.f32 %v1288_v54, %v1248_v51  ;;  %v1291_v60 = vadd.f32 %v1290_v58, %v1289_v55 }
 0x10f   : > { %v795_v61 = vadd.f32 %v1291_v60, %v1251_v57  ;;  %v876_v63 = vmul.f32 %v792_v59, %v792_v59 }
 0x110   : > { %v1252_v62 = vpop.f32.mrb[4].mxu0 }
 0x111   : > { %v1210_v0 = vpack.c.bf16 %v795_v61, %v792_v59  ;;  %v862_v1 = vadd.f32 %v795_v61, %v792_v59  ;;  %v877_v2 = vmul.f32 %v795_v61, %v795_v61  ;;  %v1292_v3 = vpop.f32.mrb[4].mxu1  ;;  %v1253_v4 = vpop.f32.mrb[5].mxu0 }
 0x112   : > { %v1254_v5 = vadd.f32 %v1253_v4, %v1252_v62  ;;  %v1293_v6 = vpop.f32.mrb[5].mxu1  ;;  %v1255_v7 = vpop.f32.mrb[6].mxu0 }
 0x113   : > { %1211 = vst [vmem:[%s1574_s13] sm:$0xff] %v1210_v0   ;;  %v884_v8 = vadd.f32 %v877_v2, %v876_v63  ;;  %v1294_v9 = vadd.f32 %v1293_v6, %v1292_v3  ;;  %v1295_v10 = vpop.f32.mrb[6].mxu1  ;;  %v1256_v11 = vpop.f32.mrb[7].mxu0 }
 0x114   : > { %v1257_v12 = vadd.f32 %v1256_v11, %v1255_v7  ;;  %v1296_v13 = vpop.f32.mrb[7].mxu1 }
 0x115   : > { %v800_v14 = vadd.f32 %v1294_v9, %v1254_v5  ;;  %v1297_v15 = vadd.f32 %v1296_v13, %v1295_v10 }
 0x117   : > { %v863_v16 = vadd.f32 %v862_v1, %v800_v14  ;;  %v878_v17 = vmul.f32 %v800_v14, %v800_v14  ;;  %v803_v18 = vadd.f32 %v1297_v15, %v1257_v12 }
 0x118   : > { %v1258_v19 = vpop.f32.mrb[8].mxu0 }
 0x119   : > { %v885_v20 = vadd.f32 %v884_v8, %v878_v17  ;;  %v1215_v21 = vpack.c.bf16 %v803_v18, %v800_v14  ;;  %v864_v22 = vadd.f32 %v863_v16, %v803_v18  ;;  %v879_v23 = vmul.f32 %v803_v18, %v803_v18  ;;  %v1298_v24 = vpop.f32.mrb[8].mxu1  ;;  %v1259_v25 = vpop.f32.mrb[9].mxu0 }
 0x11a   : > { %v1260_v26 = vadd.f32 %v1259_v25, %v1258_v19  ;;  %v1299_v27 = vpop.f32.mrb[9].mxu1  ;;  %v1261_v28 = vpop.f32.mrb[10].mxu0 }
 0x11b   : > { %1227 = vst [vmem:[%s1574_s13 + $0x8] sm:$0xff] %v1215_v21   ;;  %v886_v29 = vadd.f32 %v885_v20, %v879_v23  ;;  %v1300_v30 = vadd.f32 %v1299_v27, %v1298_v24  ;;  %v1301_v31 = vpop.f32.mrb[10].mxu1  ;;  %v1262_v32 = vpop.f32.mrb[11].mxu0 }
 0x11c   : > { %v1263_v33 = vadd.f32 %v1262_v32, %v1261_v28  ;;  %v1302_v34 = vpop.f32.mrb[11].mxu1 }
 0x11d   : > { %v808_v35 = vadd.f32 %v1300_v30, %v1260_v26  ;;  %v1303_v36 = vadd.f32 %v1302_v34, %v1301_v31 }
 0x11f   : > { %v865_v37 = vadd.f32 %v864_v22, %v808_v35  ;;  %v880_v38 = vmul.f32 %v808_v35, %v808_v35  ;;  %v811_v39 = vadd.f32 %v1303_v36, %v1263_v33 }
 0x120   : > { %v1264_v40 = vpop.f32.mrb[12].mxu0 }
 0x121   : > { %v887_v41 = vadd.f32 %v886_v29, %v880_v38  ;;  %v1220_v42 = vpack.c.bf16 %v811_v39, %v808_v35  ;;  %v866_v43 = vadd.f32 %v865_v37, %v811_v39  ;;  %v881_v44 = vmul.f32 %v811_v39, %v811_v39  ;;  %v1304_v45 = vpop.f32.mrb[12].mxu1  ;;  %v1265_v46 = vpop.f32.mrb[13].mxu0 }
 0x122   : > { %v1266_v47 = vadd.f32 %v1265_v46, %v1264_v40  ;;  %v1305_v48 = vpop.f32.mrb[13].mxu1  ;;  %v1267_v49 = vpop.f32.mrb[14].mxu0 }
 0x123   : > { %1228 = vst [vmem:[%s1574_s13 + $0x10] sm:$0xff] %v1220_v42   ;;  %v888_v50 = vadd.f32 %v887_v41, %v881_v44  ;;  %v1306_v51 = vadd.f32 %v1305_v48, %v1304_v45  ;;  %v1307_v52 = vpop.f32.mrb[14].mxu1  ;;  %v1268_v53 = vpop.f32.mrb[15].mxu0 }
 0x124   : > { %v1269_v54 = vadd.f32 %v1268_v53, %v1267_v49  ;;  %v1308_v55 = vpop.f32.mrb[15].mxu1 }
 0x125   : > { %v816_v56 = vadd.f32 %v1306_v51, %v1266_v47  ;;  %v1309_v57 = vadd.f32 %v1308_v55, %v1307_v52 }
 0x127   : > { %v867_v58 = vadd.f32 %v866_v43, %v816_v56  ;;  %v882_v59 = vmul.f32 %v816_v56, %v816_v56  ;;  %v819_v60 = vadd.f32 %v1309_v57, %v1269_v54 }
 0x129   : > { %v889_v61 = vadd.f32 %v888_v50, %v882_v59  ;;  %v1225_v62 = vpack.c.bf16 %v819_v60, %v816_v56  ;;  %v868_v63 = vadd.f32 %v867_v58, %v819_v60  ;;  %v883_v0 = vmul.f32 %v819_v60, %v819_v60 }
 0x12b   : > { %1229 = vst [vmem:[%s1574_s13 + $0x18] sm:$0xff] %v1225_v62   ;;  %v869_v1 = vrot.slane %v868_v63, 4  ;;  %v890_v2 = vadd.f32 %v889_v61, %v883_v0 }
 0x12d   : > { %v870_v3 = vadd.f32 %v869_v1, %v868_v63  ;;  %v891_v4 = vrot.slane %v890_v2, 4 }
 0x12f   : > { %v871_v5 = vrot.slane %v870_v3, 2  ;;  %v892_v6 = vadd.f32 %v891_v4, %v890_v2 }
 0x131   : > { %v872_v7 = vadd.f32 %v871_v5, %v870_v3  ;;  %v893_v8 = vrot.slane %v892_v6, 2 }
 0x133   : > { %v873_v9 = vrot.slane %v872_v7, 1  ;;  %v894_v10 = vadd.f32 %v893_v8, %v892_v6 }
 0x135   : > { %v874_v11 = vadd.f32 %v873_v9, %v872_v7  ;;  %v895_v12 = vrot.slane %v894_v10, 1 }
 0x137   : > { %875 = vst [vmem:[%s328_s25] sm:$0x1] %v874_v11  ;;  %v896_v13 = vadd.f32 %v895_v12, %v894_v10 }
 0x139   : > { %897 = vst [vmem:[%s338_s28] sm:$0x1] %v896_v13 }
 0x13a PF: > { %s15_s19 = sadd.s32 1, %s1444_s19   ;;  %s1609_s15 = smov %s1436_s17 }
 0x13b   : > { %p12_p8 = scmp.ge.s32.totalorder %s15_s19, 10   ;;  %s1610_s16 = smov %s1440_s18 }
 0x13c   : > { %s1611_s17 = smov %s1614_s20  ;;  %s1612_s18 = smov %s1618_s21 }
 0x13d   :  { %14 = sbr.rel (!%p12_p8) target bundleno = 3 (0x3), region = 85 }

// kernel: generator_forward.14
= control target key start
LH: loop header
LB: loop body
LE: loop exit
PB: predicated region body
PF: predicated region fallthrough
CT: control target
= control target key end

     0   :  { %s915_s12 = smov 0   ;;  %s1050_s0 = inlined_call_operand.vmem [shape: bf16[512,128], index: 0, kind: input, shape index: {}]   ;;  %s1051_s1 = inlined_call_operand.vmem [shape: f32[1,128], index: 1, kind: input, shape index: {}]   ;;  %s1052_s2 = inlined_call_operand.vmem [shape: f32[1,128], index: 2, kind: input, shape index: {}]   ;;  %s1053_s3 = inlined_call_operand.vmem [shape: bf16[512,128], index: 3, kind: output, shape index: {}]  }
   0x1 LB: > { %s628_s13 = sadd.s32 4294967295, %s893_s12   ;;  %p632_p0 = scmp.ge.s32.totalorder %s893_s12, 1  ;;  %s893_s12 = sphi %s915_s12, %s13_s12  }
   0x2   : > { %p138_p1 = scmp.lt.s32.totalorder %s893_s12, 3 }
   0x4   : > { %p139_p2 = pnand %p632_p0, %p138_p1 }
   0x5   : > { %s633_s14 = sshll.u32 (!%p139_p2), %s628_s13, 5  ;;  %v936_v0 = vld [vmem:[%s1051_s1] ss:$0 sm:$0xff] (!%p139_p2) }
   0x6   : > { %142 = sbr.rel (%p139_p2) target bundleno = 76 (0x4c), region = 32  ;;  %p163_p3 = scmp.lt.s32.totalorder (!%p139_p2), %s633_s14, 63  ;;  %v945_v9 = vld [vmem:[%s1052_s2] ss:$0 sm:$0xff] (!%p139_p2) }
   0xd   : > { %s1055_s14 = smov (!%p163_p3, %s633_s14), 63 }
   0xe   : > { %s634_s15 = sshll.u32 %s1055_s14, 2 }
   0xf   : > { %s931_s18 = scalar_lea.vmem %s1050_s0, %s634_s15  ;;  %s968_s25 = scalar_lea.vmem %s1053_s3, %s634_s15 }
  0x10   : > { %v706_v1 = vld [vmem:[%s931_s18] sm:$0xff]   ;;  %v849_v2 = vld [vmem:[%s931_s18 + $0x8] sm:$0xff]   ;;  %v850_v3 = vld [vmem:[%s931_s18 + $0x10] sm:$0xff]  }
  0x11   : > { %v707_v4 = vunpack.c.l.bf16 %v706_v1  ;;  %v708_v5 = vunpack.c.h.bf16 %v706_v1  ;;  %v711_v6 = vunpack.c.l.bf16 %v849_v2  ;;  %v712_v7 = vunpack.c.h.bf16 %v849_v2  ;;  %v851_v8 = vld [vmem:[%s931_s18 + $0x18] sm:$0xff]   ;;  %v852_v36 = vld [vmem:[%s931_s18 + $0x20] sm:$0xff]   ;;  %v853_v41 = vld [vmem:[%s931_s18 + $0x28] sm:$0xff]  }
  0x12   : > { %v715_v10 = vunpack.c.l.bf16 %v850_v3  ;;  %v716_v11 = vunpack.c.h.bf16 %v850_v3  ;;  %v719_v12 = vunpack.c.l.bf16 %v851_v8  ;;  %v720_v13 = vunpack.c.h.bf16 %v851_v8  ;;  %v854_v52 = vld [vmem:[%s931_s18 + $0x30] sm:$0xff]   ;;  %v855_v53 = vld [vmem:[%s931_s18 + $0x38] sm:$0xff]  }
  0x13   : > { %v245_v14 = vmul.f32 %v707_v4, %v936_v0  ;;  %v246_v15 = vmul.f32 %v708_v5, %v936_v0  ;;  %v247_v16 = vmul.f32 %v711_v6, %v936_v0  ;;  %v248_v17 = vmul.f32 %v712_v7, %v936_v0 }
  0x14   : > { %v249_v18 = vmul.f32 %v715_v10, %v936_v0  ;;  %v250_v19 = vmul.f32 %v716_v11, %v936_v0  ;;  %v251_v20 = vmul.f32 %v719_v12, %v936_v0  ;;  %v252_v21 = vmul.f32 %v720_v13, %v936_v0 }
  0x15   : > { %v284_v22 = vadd.f32 %v945_v9, %v245_v14  ;;  %v285_v23 = vadd.f32 %v945_v9, %v246_v15  ;;  %v286_v24 = vadd.f32 %v945_v9, %v247_v16  ;;  %v287_v25 = vadd.f32 %v945_v9, %v248_v17 }
  0x16   : > { %v288_v26 = vadd.f32 %v945_v9, %v249_v18  ;;  %v289_v27 = vadd.f32 %v945_v9, %v250_v19  ;;  %v290_v28 = vadd.f32 %v945_v9, %v251_v20  ;;  %v291_v29 = vadd.f32 %v945_v9, %v252_v21  ;;  %v856_v20 = vld [vmem:[%s931_s18 + $0x40] sm:$0xff]  }
  0x17   : > { %vm316_vm0 = vcmp.ge.f32.partialorder %v284_v22, 0.0  ;;  %vm317_vm1 = vcmp.ge.f32.partialorder %v285_v23, 0.0  ;;  %v348_v30 = vmul.f32 0.2, %v284_v22  ;;  %v349_v31 = vmul.f32 0.2, %v285_v23 }
  0x18   : > { %vm318_vm2 = vcmp.ge.f32.partialorder %v286_v24, 0.0  ;;  %vm319_vm3 = vcmp.ge.f32.partialorder %v287_v25, 0.0  ;;  %v350_v32 = vmul.f32 0.2, %v286_v24  ;;  %v351_v33 = vmul.f32 0.2, %v287_v25 }
  0x19   : > { %v380_v34 = vsel %vm316_vm0, %v284_v22, %v348_v30  ;;  %v381_v35 = vsel %vm317_vm1, %v285_v23, %v349_v31  ;;  %vm320_vm4 = vcmp.ge.f32.partialorder %v288_v26, 0.0  ;;  %vm321_vm5 = vcmp.ge.f32.partialorder %v289_v27, 0.0 }
  0x1a   : > { %v772_v37 = vpack.c.bf16 %v381_v35, %v380_v34  ;;  %v382_v38 = vsel %vm318_vm2, %v286_v24, %v350_v32  ;;  %v383_v39 = vsel %vm319_vm3, %v287_v25, %v351_v33  ;;  %v352_v40 = vmul.f32 0.2, %v288_v26  ;;  %v857_v24 = vld [vmem:[%s931_s18 + $0x48] sm:$0xff]  }
  0x1b   : > { %v777_v42 = vpack.c.bf16 %v383_v39, %v382_v38  ;;  %v353_v43 = vmul.f32 0.2, %v289_v27  ;;  %vm322_vm6 = vcmp.ge.f32.partialorder %v290_v28, 0.0  ;;  %vm323_vm7 = vcmp.ge.f32.partialorder %v291_v29, 0.0 }
  0x1c   : > { %773 = vst [vmem:[%s968_s25] sm:$0xff] %v772_v37   ;;  %v384_v44 = vsel %vm320_vm4, %v288_v26, %v352_v40  ;;  %v354_v45 = vmul.f32 0.2, %v290_v28  ;;  %v355_v46 = vmul.f32 0.2, %v291_v29  ;;  %v723_v47 = vunpack.c.l.bf16 %v852_v36 }
  0x1d   : > { %864 = vst [vmem:[%s968_s25 + $0x8] sm:$0xff] %v777_v42   ;;  %v385_v48 = vsel %vm321_vm5, %v289_v27, %v353_v43  ;;  %v724_v49 = vunpack.c.h.bf16 %v852_v36  ;;  %v727_v50 = vunpack.c.l.bf16 %v853_v41  ;;  %v728_v51 = vunpack.c.h.bf16 %v853_v41  ;;  %v858_v36 = vld [vmem:[%s931_s18 + $0x50] sm:$0xff]  }
  0x1e   : > { %v782_v54 = vpack.c.bf16 %v385_v48, %v384_v44  ;;  %v386_v55 = vsel %vm322_vm6, %v290_v28, %v354_v45  ;;  %v387_v56 = vsel %vm323_vm7, %v291_v29, %v355_v46  ;;  %v253_v57 = vmul.f32 %v723_v47, %v936_v0 }
  0x1f   : > { %v787_v58 = vpack.c.bf16 %v387_v56, %v386_v55  ;;  %v254_v59 = vmul.f32 %v724_v49, %v936_v0  ;;  %v255_v60 = vmul.f32 %v727_v50, %v936_v0  ;;  %v256_v61 = vmul.f32 %v728_v51, %v936_v0  ;;  %v859_v55 = vld [vmem:[%s931_s18 + $0x58] sm:$0xff]  }
  0x20   : > { %865 = vst [vmem:[%s968_s25 + $0x10] sm:$0xff] %v782_v54   ;;  %v292_v62 = vadd.f32 %v945_v9, %v253_v57  ;;  %v731_v63 = vunpack.c.l.bf16 %v854_v52  ;;  %v732_v1 = vunpack.c.h.bf16 %v854_v52  ;;  %v735_v2 = vunpack.c.l.bf16 %v855_v53 }
  0x21   : > { %866 = vst [vmem:[%s968_s25 + $0x18] sm:$0xff] %v787_v58   ;;  %v293_v3 = vadd.f32 %v945_v9, %v254_v59  ;;  %v294_v4 = vadd.f32 %v945_v9, %v255_v60  ;;  %v295_v5 = vadd.f32 %v945_v9, %v256_v61  ;;  %v736_v6 = vunpack.c.h.bf16 %v855_v53 }
  0x22   : > { %vm324_vm8 = vcmp.ge.f32.partialorder %v292_v62, 0.0  ;;  %v356_v7 = vmul.f32 0.2, %v292_v62  ;;  %v257_v8 = vmul.f32 %v731_v63, %v936_v0  ;;  %v258_v10 = vmul.f32 %v732_v1, %v936_v0  ;;  %v860_v1 = vld [vmem:[%s931_s18 + $0x60] sm:$0xff]  }
  0x23   : > { %vm325_vm9 = vcmp.ge.f32.partialorder %v293_v3, 0.0  ;;  %v357_v11 = vmul.f32 0.2, %v293_v3  ;;  %vm326_vm10 = vcmp.ge.f32.partialorder %v294_v4, 0.0  ;;  %vm327_vm11 = vcmp.ge.f32.partialorder %v295_v5, 0.0 }
  0x24   : > { %v388_v12 = vsel %vm324_vm8, %v292_v62, %v356_v7  ;;  %v358_v13 = vmul.f32 0.2, %v294_v4  ;;  %v359_v14 = vmul.f32 0.2, %v295_v5  ;;  %v296_v15 = vadd.f32 %v945_v9, %v257_v8 }
  0x25   : > { %v389_v16 = vsel %vm325_vm9, %v293_v3, %v357_v11  ;;  %v297_v17 = vadd.f32 %v945_v9, %v258_v10  ;;  %v259_v18 = vmul.f32 %v735_v2, %v936_v0  ;;  %v260_v19 = vmul.f32 %v736_v6, %v936_v0  ;;  %v861_v6 = vld [vmem:[%s931_s18 + $0x68] sm:$0xff]  }
  0x26   : > { %v792_v21 = vpack.c.bf16 %v389_v16, %v388_v12  ;;  %v390_v22 = vsel %vm326_vm10, %v294_v4, %v358_v13  ;;  %v391_v23 = vsel %vm327_vm11, %v295_v5, %v359_v14  ;;  %vm328_vm12 = vcmp.ge.f32.partialorder %v296_v15, 0.0 }
  0x27   : > { %v797_v25 = vpack.c.bf16 %v391_v23, %v390_v22  ;;  %vm329_vm13 = vcmp.ge.f32.partialorder %v297_v17, 0.0  ;;  %v360_v26 = vmul.f32 0.2, %v296_v15  ;;  %v361_v27 = vmul.f32 0.2, %v297_v17  ;;  %v862_v22 = vld [vmem:[%s931_s18 + $0x70] sm:$0xff]  }
  0x28   : > { %867 = vst [vmem:[%s968_s25 + $0x20] sm:$0xff] %v792_v21   ;;  %v298_v28 = vadd.f32 %v945_v9, %v259_v18  ;;  %v299_v29 = vadd.f32 %v945_v9, %v260_v19  ;;  %v739_v30 = vunpack.c.l.bf16 %v856_v20  ;;  %v740_v31 = vunpack.c.h.bf16 %v856_v20 }
  0x29   : > { %868 = vst [vmem:[%s968_s25 + $0x28] sm:$0xff] %v797_v25   ;;  %v392_v32 = vsel %vm328_vm12, %v296_v15, %v360_v26  ;;  %v393_v33 = vsel %vm329_vm13, %v297_v17, %v361_v27  ;;  %v743_v34 = vunpack.c.l.bf16 %v857_v24  ;;  %v744_v35 = vunpack.c.h.bf16 %v857_v24 }
  0x2a   : > { %v802_v37 = vpack.c.bf16 %v393_v33, %v392_v32  ;;  %vm330_vm14 = vcmp.ge.f32.partialorder %v298_v28, 0.0  ;;  %vm331_vm15 = vcmp.ge.f32.partialorder %v299_v29, 0.0  ;;  %v362_v38 = vmul.f32 0.2, %v298_v28 }
  0x2b   : > { %v363_v39 = vmul.f32 0.2, %v299_v29  ;;  %v261_v40 = vmul.f32 %v739_v30, %v936_v0  ;;  %v262_v41 = vmul.f32 %v740_v31, %v936_v0  ;;  %v263_v42 = vmul.f32 %v743_v34, %v936_v0 }
  0x2c   : > { %869 = vst [vmem:[%s968_s25 + $0x30] sm:$0xff] %v802_v37   ;;  %v394_v43 = vsel %vm330_vm14, %v298_v28, %v362_v38  ;;  %v264_v44 = vmul.f32 %v744_v35, %v936_v0  ;;  %v747_v45 = vunpack.c.l.bf16 %v858_v36  ;;  %v748_v46 = vunpack.c.h.bf16 %v858_v36 }
  0x2d   : > { %v395_v47 = vsel %vm331_vm15, %v299_v29, %v363_v39  ;;  %v300_v48 = vadd.f32 %v945_v9, %v261_v40  ;;  %v301_v49 = vadd.f32 %v945_v9, %v262_v41  ;;  %v302_v50 = vadd.f32 %v945_v9, %v263_v42  ;;  %v863_v41 = vld [vmem:[%s931_s18 + $0x78] sm:$0xff]  }
  0x2e   : > { %v807_v51 = vpack.c.bf16 %v395_v47, %v394_v43  ;;  %v303_v52 = vadd.f32 %v945_v9, %v264_v44  ;;  %v265_v53 = vmul.f32 %v747_v45, %v936_v0  ;;  %v266_v54 = vmul.f32 %v748_v46, %v936_v0 }
  0x2f   : > { %vm332_vm0 = vcmp.ge.f32.partialorder %v300_v48, 0.0  ;;  %vm333_vm1 = vcmp.ge.f32.partialorder %v301_v49, 0.0  ;;  %v364_v56 = vmul.f32 0.2, %v300_v48  ;;  %v365_v57 = vmul.f32 0.2, %v301_v49 }
  0x30   : > { %870 = vst [vmem:[%s968_s25 + $0x38] sm:$0xff] %v807_v51   ;;  %vm334_vm2 = vcmp.ge.f32.partialorder %v302_v50, 0.0  ;;  %vm335_vm3 = vcmp.ge.f32.partialorder %v303_v52, 0.0  ;;  %v366_v58 = vmul.f32 0.2, %v302_v50  ;;  %v304_v62 = vadd.f32 %v945_v9, %v265_v53 }
  0x31   : > { %v367_v59 = vmul.f32 0.2, %v303_v52  ;;  %v396_v60 = vsel %vm332_vm0, %v300_v48, %v364_v56  ;;  %v397_v61 = vsel %vm333_vm1, %v301_v49, %v365_v57  ;;  %v305_v63 = vadd.f32 %v945_v9, %v266_v54 }
  0x32   : > { %v812_v2 = vpack.c.bf16 %v397_v61, %v396_v60  ;;  %v398_v3 = vsel %vm334_vm2, %v302_v50, %v366_v58  ;;  %v751_v5 = vunpack.c.l.bf16 %v859_v55  ;;  %vm336_vm4 = vcmp.ge.f32.partialorder %v304_v62, 0.0 }
  0x33   : > { %v399_v4 = vsel %vm335_vm3, %v303_v52, %v367_v59  ;;  %vm337_vm5 = vcmp.ge.f32.partialorder %v305_v63, 0.0  ;;  %v368_v8 = vmul.f32 0.2, %v304_v62  ;;  %v369_v10 = vmul.f32 0.2, %v305_v63 }
  0x34   : > { %v817_v7 = vpack.c.bf16 %v399_v4, %v398_v3  ;;  %871 = vst [vmem:[%s968_s25 + $0x40] sm:$0xff] %v812_v2   ;;  %v752_v11 = vunpack.c.h.bf16 %v859_v55  ;;  %v267_v12 = vmul.f32 %v751_v5, %v936_v0  ;;  %v755_v13 = vunpack.c.l.bf16 %v860_v1 }
  0x35   : > { %v400_v14 = vsel %vm336_vm4, %v304_v62, %v368_v8  ;;  %v756_v15 = vunpack.c.h.bf16 %v860_v1  ;;  %v759_v16 = vunpack.c.l.bf16 %v861_v6  ;;  %v760_v17 = vunpack.c.h.bf16 %v861_v6 }
  0x36   : > { %872 = vst [vmem:[%s968_s25 + $0x48] sm:$0xff] %v817_v7   ;;  %v401_v18 = vsel %vm337_vm5, %v305_v63, %v369_v10  ;;  %v268_v19 = vmul.f32 %v752_v11, %v936_v0  ;;  %v306_v20 = vadd.f32 %v945_v9, %v267_v12  ;;  %v269_v21 = vmul.f32 %v755_v13, %v936_v0 }
  0x37   : > { %v822_v23 = vpack.c.bf16 %v401_v18, %v400_v14  ;;  %v270_v24 = vmul.f32 %v756_v15, %v936_v0  ;;  %v271_v25 = vmul.f32 %v759_v16, %v936_v0  ;;  %v272_v26 = vmul.f32 %v760_v17, %v936_v0 }
  0x38   : > { %v307_v27 = vadd.f32 %v945_v9, %v268_v19  ;;  %vm338_vm6 = vcmp.ge.f32.partialorder %v306_v20, 0.0  ;;  %v370_v28 = vmul.f32 0.2, %v306_v20  ;;  %v308_v29 = vadd.f32 %v945_v9, %v269_v21 }
  0x39   : > { %873 = vst [vmem:[%s968_s25 + $0x50] sm:$0xff] %v822_v23   ;;  %v309_v30 = vadd.f32 %v945_v9, %v270_v24  ;;  %v310_v31 = vadd.f32 %v945_v9, %v271_v25  ;;  %v311_v32 = vadd.f32 %v945_v9, %v272_v26  ;;  %v763_v33 = vunpack.c.l.bf16 %v862_v22 }
  0x3a   : > { %vm339_vm7 = vcmp.ge.f32.partialorder %v307_v27, 0.0  ;;  %v371_v34 = vmul.f32 0.2, %v307_v27  ;;  %v402_v35 = vsel %vm338_vm6, %v306_v20, %v370_v28  ;;  %vm340_vm8 = vcmp.ge.f32.partialorder %v308_v29, 0.0 }
  0x3b   : > { %vm341_vm9 = vcmp.ge.f32.partialorder %v309_v30, 0.0  ;;  %v372_v36 = vmul.f32 0.2, %v308_v29  ;;  %v373_v37 = vmul.f32 0.2, %v309_v30  ;;  %vm342_vm10 = vcmp.ge.f32.partialorder %v310_v31, 0.0 }
  0x3c   : > { %v403_v38 = vsel %vm339_vm7, %v307_v27, %v371_v34  ;;  %vm343_vm11 = vcmp.ge.f32.partialorder %v311_v32, 0.0  ;;  %v374_v39 = vmul.f32 0.2, %v310_v31  ;;  %v375_v40 = vmul.f32 0.2, %v311_v32 }
  0x3d   : > { %v827_v42 = vpack.c.bf16 %v403_v38, %v402_v35  ;;  %v404_v43 = vsel %vm340_vm8, %v308_v29, %v372_v36  ;;  %v405_v44 = vsel %vm341_vm9, %v309_v30, %v373_v37  ;;  %v764_v45 = vunpack.c.h.bf16 %v862_v22 }
  0x3e   : > { %v832_v46 = vpack.c.bf16 %v405_v44, %v404_v43  ;;  %v406_v47 = vsel %vm342_vm10, %v310_v31, %v374_v39  ;;  %v407_v48 = vsel %vm343_vm11, %v311_v32, %v375_v40  ;;  %v273_v49 = vmul.f32 %v763_v33, %v936_v0 }
  0x3f   : > { %874 = vst [vmem:[%s968_s25 + $0x58] sm:$0xff] %v827_v42   ;;  %v837_v50 = vpack.c.bf16 %v407_v48, %v406_v47  ;;  %v274_v51 = vmul.f32 %v764_v45, %v936_v0  ;;  %v767_v52 = vunpack.c.l.bf16 %v863_v41  ;;  %v768_v53 = vunpack.c.h.bf16 %v863_v41 }
  0x40   : > { %875 = vst [vmem:[%s968_s25 + $0x60] sm:$0xff] %v832_v46   ;;  %v312_v54 = vadd.f32 %v945_v9, %v273_v49 }
  0x41   : > { %876 = vst [vmem:[%s968_s25 + $0x68] sm:$0xff] %v837_v50   ;;  %v313_v55 = vadd.f32 %v945_v9, %v274_v51  ;;  %v275_v56 = vmul.f32 %v767_v52, %v936_v0  ;;  %v276_v57 = vmul.f32 %v768_v53, %v936_v0 }
  0x42   : > { %vm344_vm12 = vcmp.ge.f32.partialorder %v312_v54, 0.0  ;;  %v376_v58 = vmul.f32 0.2, %v312_v54 }
  0x43   : > { %vm345_vm13 = vcmp.ge.f32.partialorder %v313_v55, 0.0  ;;  %v377_v59 = vmul.f32 0.2, %v313_v55  ;;  %v314_v60 = vadd.f32 %v945_v9, %v275_v56  ;;  %v315_v61 = vadd.f32 %v945_v9, %v276_v57 }
  0x44   : > { %v408_v62 = vsel %vm344_vm12, %v312_v54, %v376_v58 }
  0x45   : > { %v409_v63 = vsel %vm345_vm13, %v313_v55, %v377_v59  ;;  %vm346_vm14 = vcmp.ge.f32.partialorder %v314_v60, 0.0  ;;  %vm347_vm15 = vcmp.ge.f32.partialorder %v315_v61, 0.0  ;;  %v378_v1 = vmul.f32 0.2, %v314_v60 }
  0x46   : > { %v842_v2 = vpack.c.bf16 %v409_v63, %v408_v62  ;;  %v379_v3 = vmul.f32 0.2, %v315_v61 }
  0x47   : > { %v410_v4 = vsel %vm346_vm14, %v314_v60, %v378_v1 }
  0x48   : > { %877 = vst [vmem:[%s968_s25 + $0x70] sm:$0xff] %v842_v2   ;;  %v411_v5 = vsel %vm347_vm15, %v315_v61, %v379_v3 }
  0x49   : > { %v847_v0 = vpack.c.bf16 %v411_v5, %v410_v4 }
  0x4b   : > { %878 = vst [vmem:[%s968_s25 + $0x78] sm:$0xff] %v847_v0  }
  0x4c PF: > { %s13_s12 = sadd.s32 1, %s893_s12  }
  0x4d   : > { %p10_p4 = scmp.ge.s32.totalorder %s13_s12, 4  }
  0x4f   :  { %12 = sbr.rel (!%p10_p4) target bundleno = 1 (0x1), region = 62 }

// kernel: generator_forward.15
= control target key start
LH: loop header
LB: loop body
LE: loop exit
PB: predicated region body
PF: predicated region fallthrough
CT: control target
= control target key end

     0   :  { %s1838_s15 = smov 0   ;;  %s1840_s16 = smov 0   ;;  %s2066_s0 = inlined_call_operand.vmem [shape: bf16[4,512,256], index: 0, kind: input, shape index: {}]   ;;  %s2067_s1 = inlined_call_operand.vmem [shape: bf16[4,256,128], index: 1, kind: input, shape index: {}]   ;;  %s2068_s2 = inlined_call_operand.vmem [shape: bf16[4,512,128], index: 2, kind: output, shape index: {0}]   ;;  %s2069_s3 = inlined_call_operand.vmem [shape: f32[4,2,1,128], index: 3, kind: output, shape index: {1}]   ;;  %s2070_s4 = inlined_call_operand.vmem [shape: f32[4,2,1,128], index: 4, kind: output, shape index: {2}]  }
   0x1   :  { %s1842_s17 = smov 0   ;;  %s1844_s18 = smov 0  }
   0x2   :  { %s1846_s19 = smov 0  }
   0x3 LB: > { %s30_s20 = sadd.s32 1, %s1803_s17  ;;  %s34_s21 = sadd.s32 1, %s1807_s18  ;;  %s1811_s19 = sphi %s1846_s19, %s15_s19   ;;  %s1807_s18 = sphi %s1844_s18, %s2074_s18   ;;  %s1803_s17 = sphi %s1842_s17, %s2073_s17   ;;  %s1799_s16 = sphi %s1840_s16, %s2072_s16   ;;  %s1795_s15 = sphi %s1838_s15, %s2071_s15  }
   0x4   : > { %p32_p0 = scmp.ge.s32.totalorder %s30_s20, 2  ;;  %p1319_p1 = scmp.ge.s32.totalorder %s1811_s19, 1 }
   0x5   : > { %p221_p2 = scmp.lt.s32.totalorder %s1811_s19, 9 }
   0x6   : > { %s2076_s20 = smov (%p32_p0, %s30_s20), 0  ;;  %s2078_s21 = smov (!%p32_p0, %s34_s21), %s1807_s18 }
   0x7   : > { %p222_p3 = pnand %p1319_p1, %p221_p2  ;;  %p36_p4 = scmp.ge.s32.totalorder %s2078_s21, 4 }
   0x8   : > { %p288_p5 = scmp.lt.s32.totalorder (!%p222_p3), %s1799_s16, 3  ;;  %s1320_s22 = sshll.u32 (!%p222_p3), %s1795_s15, 5 }
   0x9   : > { %s2080_s21 = smov (%p36_p4, %s2078_s21), 0  ;;  %225 = sbr.rel (%p222_p3) target bundleno = 374 (0x176), region = 28 }
   0xa   : > { %p290_p6 = scmp.lt.s32.totalorder (!%p222_p3), %s1320_s22, 63  ;;  %p321_p7 = scmp.lt.s32.totalorder (!%p222_p3), %s1795_s15, 1 }
  0x10   : > { %s2082_s16 = smov (!%p288_p5, %s1799_s16), 3  ;;  %s2084_s22 = smov (!%p290_p6, %s1320_s22), 63 }
  0x11   : > { %s1322_s23 = sshll.u32 %s2082_s16, 7  ;;  %s1321_s27 = sshll.u32 %s2084_s22, 1 }
  0x12   : > { %s1877_s26 = scalar_lea.vmem %s2067_s1, %s1322_s23  ;;  %s294_s28 = sadd.s32 %s1322_s23, %s1321_s27 }
  0x13   : > { %v1709_v0 = vld [vmem:[%s1877_s26 + $0x40] sm:$0xff]   ;;  %v1711_v2 = vld [vmem:[%s1877_s26 + $0x48] sm:$0xff]   ;;  %v1713_v4 = vld [vmem:[%s1877_s26 + $0x50] sm:$0xff]   ;;  %s1323_s29 = sshll.u32 %s294_s28, 2  ;;  %s1327_s7 = sshll.u32 %s2082_s16, 6 }
  0x14   : > { %v1710_v1 = vld [vmem:[%s1877_s26] sm:$0xff]   ;;  %1541 = vmatprep.subr.bf16.mxu0 %v1709_v0  ;;  %1653 = vmatprep.subr.bf16.mxu1 %v1709_v0  ;;  %v1712_v3 = vld [vmem:[%s1877_s26 + $0x8] sm:$0xff]   ;;  %v1714_v5 = vld [vmem:[%s1877_s26 + $0x10] sm:$0xff]   ;;  %s1894_s6 = scalar_lea.vmem %s2066_s0, %s1323_s29  ;;  %s315_s8 = sadd.s32 %s1327_s7, %s2084_s22 }
  0x15   : > { %1542 = vmatpush3.bf16.msra.mxu0 %v1710_v1  ;;  %1661 = vmatpush3.bf16.msra.mxu1 %v1710_v1  ;;  %v1715_v6 = vld [vmem:[%s1877_s26 + $0x58] sm:$0xff]   ;;  %v1717_v8 = vld [vmem:[%s1877_s26 + $0x60] sm:$0xff]   ;;  %v1719_v10 = vld [vmem:[%s1877_s26 + $0x68] sm:$0xff]   ;;  %s1328_s9 = sshll.u32 %s315_s8, 2  ;;  %s2086_s15 = smov (!%p321_p7, %s1795_s15), 1 }
  0x16   : > { %1543 = vmatprep.subr.bf16.mxu0 %v1711_v2  ;;  %1654 = vmatprep.subr.bf16.mxu1 %v1711_v2  ;;  %v1716_v7 = vld [vmem:[%s1877_s26 + $0x18] sm:$0xff]   ;;  %v1718_v9 = vld [vmem:[%s1877_s26 + $0x20] sm:$0xff]   ;;  %v1720_v12 = vld [vmem:[%s1877_s26 + $0x28] sm:$0xff]   ;;  %s1942_s12 = scalar_lea.vmem %s2068_s2, %s1328_s9  ;;  %s1329_s13 = sshll.u32 %s2082_s16, 1 }
  0x17   : > { %v1727_v11 = vld [vmem:[%s1894_s6 + $0x4] ss:$8 sps:$4 sm:$0xff]   ;;  %v1721_v13 = vld [vmem:[%s1877_s26 + $0x70] sm:$0xff]   ;;  %v1723_v16 = vld [vmem:[%s1877_s26 + $0x78] sm:$0xff]   ;;  %s327_s14 = sadd.s32 %s1329_s13, %s2086_s15 }
  0x18   : > { %692 = vmatprep.mubr.bf16.mxu0 %v1727_v11  ;;  %v1739_v14 = vld [vmem:[%s1894_s6 + $0x84] ss:$8 sps:$4 sm:$0xff]   ;;  %v1722_v15 = vld [vmem:[%s1877_s26 + $0x30] sm:$0xff]   ;;  %v1724_v17 = vld [vmem:[%s1877_s26 + $0x38] sm:$0xff]   ;;  %s328_s24 = scalar_lea.vmem %s2069_s3, %s327_s14  ;;  %s338_s27 = scalar_lea.vmem %s2070_s4, %s327_s14 }
  0x19   : > { %1544 = vmatpush3.bf16.msra.mxu0 %v1712_v3  ;;  %1662 = vmatpush3.bf16.msra.mxu1 %v1712_v3  ;;  %v1725_v18 = vld [vmem:[%s1894_s6] ss:$8 sps:$4 sm:$0xff]   ;;  %v1728_v19 = vld [vmem:[%s1894_s6 + $0x14] ss:$8 sps:$4 sm:$0xff]   ;;  %v1730_v22 = vld [vmem:[%s1894_s6 + $0x10] ss:$8 sps:$4 sm:$0xff]  }
  0x1a   : > { %1545 = vmatprep.subr.bf16.mxu0 %v1713_v4  ;;  %1655 = vmatprep.subr.bf16.mxu1 %v1713_v4  ;;  %v1737_v20 = vld [vmem:[%s1894_s6 + $0x80] ss:$8 sps:$4 sm:$0xff]   ;;  %v1743_v21 = vld [vmem:[%s1894_s6 + $0x94] ss:$8 sps:$4 sm:$0xff]   ;;  %v1731_v23 = vld [vmem:[%s1894_s6 + $0x24] ss:$8 sps:$4 sm:$0xff]  }
  0x1b   : > { %756 = vmatprep.mubr.bf16.mxu1 %v1739_v14  ;;  %v1745_v24 = vld [vmem:[%s1894_s6 + $0x90] ss:$8 sps:$4 sm:$0xff]   ;;  %v1749_v25 = vld [vmem:[%s1894_s6 + $0xa4] ss:$8 sps:$4 sm:$0xff]   ;;  %v1733_v26 = vld [vmem:[%s1894_s6 + $0x20] ss:$8 sps:$4 sm:$0xff]  }
  0x1c   : > { %v1734_v27 = vld [vmem:[%s1894_s6 + $0x34] ss:$8 sps:$4 sm:$0xff]   ;;  %v1751_v28 = vld [vmem:[%s1894_s6 + $0xa0] ss:$8 sps:$4 sm:$0xff]   ;;  %v1736_v30 = vld [vmem:[%s1894_s6 + $0x30] ss:$8 sps:$4 sm:$0xff]  }
  0x1d   : > { %1546 = vmatpush3.bf16.msra.mxu0 %v1714_v5  ;;  %1663 = vmatpush3.bf16.msra.mxu1 %v1714_v5  ;;  %v1755_v29 = vld [vmem:[%s1894_s6 + $0xb4] ss:$8 sps:$4 sm:$0xff]   ;;  %v1740_v31 = vld [vmem:[%s1894_s6 + $0x44] ss:$8 sps:$4 sm:$0xff]   ;;  %v1757_v32 = vld [vmem:[%s1894_s6 + $0xb0] ss:$8 sps:$4 sm:$0xff]  }
  0x1e   : > { %1547 = vmatprep.subr.bf16.mxu0 %v1715_v6  ;;  %1656 = vmatprep.subr.bf16.mxu1 %v1715_v6  ;;  %v1761_v33 = vld [vmem:[%s1894_s6 + $0xc4] ss:$8 sps:$4 sm:$0xff]   ;;  %v1742_v34 = vld [vmem:[%s1894_s6 + $0x40] ss:$8 sps:$4 sm:$0xff]   ;;  %v1746_v35 = vld [vmem:[%s1894_s6 + $0x54] ss:$8 sps:$4 sm:$0xff]  }
  0x1f   : > { %v1763_v36 = vld [vmem:[%s1894_s6 + $0xc0] ss:$8 sps:$4 sm:$0xff]   ;;  %v1764_v37 = vld [vmem:[%s1894_s6 + $0xd4] ss:$8 sps:$4 sm:$0xff]   ;;  %v1748_v38 = vld [vmem:[%s1894_s6 + $0x50] ss:$8 sps:$4 sm:$0xff]  }
  0x20   : > { %v1752_v39 = vld [vmem:[%s1894_s6 + $0x64] ss:$8 sps:$4 sm:$0xff]   ;;  %v1766_v40 = vld [vmem:[%s1894_s6 + $0xd0] ss:$8 sps:$4 sm:$0xff]   ;;  %v1754_v42 = vld [vmem:[%s1894_s6 + $0x60] ss:$8 sps:$4 sm:$0xff]  }
  0x21   : > { %1548 = vmatpush3.bf16.msra.mxu0 %v1716_v7  ;;  %1664 = vmatpush3.bf16.msra.mxu1 %v1716_v7  ;;  %v1767_v41 = vld [vmem:[%s1894_s6 + $0xe4] ss:$8 sps:$4 sm:$0xff]   ;;  %v1758_v43 = vld [vmem:[%s1894_s6 + $0x74] ss:$8 sps:$4 sm:$0xff]   ;;  %v1769_v44 = vld [vmem:[%s1894_s6 + $0xe0] ss:$8 sps:$4 sm:$0xff]  }
  0x22   : > { %1549 = vmatprep.subr.bf16.mxu0 %v1717_v8  ;;  %1657 = vmatprep.subr.bf16.mxu1 %v1717_v8  ;;  %v1770_v45 = vld [vmem:[%s1894_s6 + $0xf4] ss:$8 sps:$4 sm:$0xff]   ;;  %v1760_v46 = vld [vmem:[%s1894_s6 + $0x70] ss:$8 sps:$4 sm:$0xff]  }
  0x23   : > { %v1772_v47 = vld [vmem:[%s1894_s6 + $0xf0] ss:$8 sps:$4 sm:$0xff]  }
  0x25   : > { %1550 = vmatpush3.bf16.msra.mxu0 %v1718_v9  ;;  %1665 = vmatpush3.bf16.msra.mxu1 %v1718_v9 }
  0x26   : > { %1551 = vmatprep.subr.bf16.mxu0 %v1719_v10  ;;  %1658 = vmatprep.subr.bf16.mxu1 %v1719_v10 }
  0x29   : > { %1552 = vmatpush3.bf16.msra.mxu0 %v1720_v12  ;;  %1666 = vmatpush3.bf16.msra.mxu1 %v1720_v12 }
  0x2a   : > { %1553 = vmatprep.subr.bf16.mxu0 %v1721_v13  ;;  %1659 = vmatprep.subr.bf16.mxu1 %v1721_v13 }
  0x2d   : > { %1554 = vmatpush3.bf16.msra.mxu0 %v1722_v15  ;;  %1667 = vmatpush3.bf16.msra.mxu1 %v1722_v15 }
  0x2e   : > { %1555 = vmatprep.subr.bf16.mxu0 %v1723_v16  ;;  %1660 = vmatprep.subr.bf16.mxu1 %v1723_v16 }
  0x31   : > { %1556 = vmatpush3.bf16.msra.mxu0 %v1724_v17  ;;  %1668 = vmatpush3.bf16.msra.mxu1 %v1724_v17 }
  0x34   : > { %693 = vmatmul.mubr.bf16.vlgmr.msra.gmra.mrb[0].mxu0 %v1725_v18  ;;  %757 = vmatmul.mubr.bf16.vlgmr.msra.gmra.mrb[0].mxu1 %v1737_v20 }
  0x35   : > { %700 = vmatprep.mubr.bf16.mxu0 %v1728_v19  ;;  %764 = vmatprep.mubr.bf16.mxu1 %v1743_v21 }
  0x3c   : > { %701 = vmatmul.mubr.bf16.gmra.mrb[4].mxu0 %v1730_v22  ;;  %765 = vmatmul.mubr.bf16.gmra.mrb[4].mxu1 %v1745_v24 }
  0x3d   : > { %708 = vmatprep.mubr.bf16.mxu0 %v1731_v23  ;;  %772 = vmatprep.mubr.bf16.mxu1 %v1749_v25 }
  0x44   : > { %709 = vmatmul.mubr.bf16.gmra.mrb[8].mxu0 %v1733_v26  ;;  %773 = vmatmul.mubr.bf16.gmra.mrb[8].mxu1 %v1751_v28 }
  0x45   : > { %716 = vmatprep.mubr.bf16.mxu0 %v1734_v27  ;;  %780 = vmatprep.mubr.bf16.mxu1 %v1755_v29 }
  0x4c   : > { %717 = vmatmul.mubr.bf16.gmra.mrb[12].mxu0 %v1736_v30  ;;  %781 = vmatmul.mubr.bf16.gmra.mrb[12].mxu1 %v1757_v32 }
  0x4d   : > { %724 = vmatprep.mubr.bf16.mxu0 %v1740_v31  ;;  %788 = vmatprep.mubr.bf16.mxu1 %v1761_v33 }
  0x54   : > { %725 = vmatmul.mubr.bf16.gmra.mrb[16].mxu0 %v1742_v34  ;;  %789 = vmatmul.mubr.bf16.gmra.mrb[16].mxu1 %v1763_v36 }
  0x55   : > { %732 = vmatprep.mubr.bf16.mxu0 %v1746_v35  ;;  %796 = vmatprep.mubr.bf16.mxu1 %v1764_v37 }
  0x5c   : > { %733 = vmatmul.mubr.bf16.gmra.mrb[20].mxu0 %v1748_v38  ;;  %797 = vmatmul.mubr.bf16.gmra.mrb[20].mxu1 %v1766_v40 }
  0x5d   : > { %740 = vmatprep.mubr.bf16.mxu0 %v1752_v39  ;;  %804 = vmatprep.mubr.bf16.mxu1 %v1767_v41 }
  0x64   : > { %741 = vmatmul.mubr.bf16.gmra.mrb[24].mxu0 %v1754_v42  ;;  %805 = vmatmul.mubr.bf16.gmra.mrb[24].mxu1 %v1769_v44 }
  0x65   : > { %748 = vmatprep.mubr.bf16.mxu0 %v1758_v43  ;;  %812 = vmatprep.mubr.bf16.mxu1 %v1770_v45 }
  0x6c   : > { %749 = vmatmul.mubr.bf16.gmra.mrb[28].mxu0 %v1760_v46  ;;  %813 = vmatmul.mubr.bf16.gmra.mrb[28].mxu1 %v1772_v47 }
 0x107   : > { %v1557_v48 = vpop.f32.mrb[0].mxu0  ;;  %v1605_v50 = vpop.f32.mrb[0].mxu1 }
 0x108   : > { %v1558_v49 = vpop.f32.mrb[1].mxu0  ;;  %v1606_v53 = vpop.f32.mrb[1].mxu1 }
 0x109   : > { %v1559_v51 = vadd.f32 %v1558_v49, %v1557_v48  ;;  %v1560_v52 = vpop.f32.mrb[2].mxu0  ;;  %v1937_v55 = vadd.f32 %v1606_v53, %v1605_v50  ;;  %v1608_v56 = vpop.f32.mrb[2].mxu1 }
 0x10a   : > { %v1561_v54 = vpop.f32.mrb[3].mxu0  ;;  %v1609_v58 = vpop.f32.mrb[3].mxu1 }
 0x10b   : > { %v1562_v57 = vadd.f32 %v1561_v54, %v1560_v52  ;;  %v1944_v59 = vadd.f32 %v1609_v58, %v1608_v56  ;;  %v1019_v60 = vmul.f32 %v1559_v51, %v1559_v51 }
 0x10d   : > { %v1449_v61 = vpack.c.bf16 %v1562_v57, %v1559_v51  ;;  %v981_v62 = vadd.f32 %v1562_v57, %v1559_v51  ;;  %v1020_v63 = vmul.f32 %v1562_v57, %v1562_v57  ;;  %v1489_v0 = vpack.c.bf16 %v1944_v59, %v1937_v55 }
 0x10f   : > { %1450 = vst [vmem:[%s1942_s12] sm:$0xff] %v1449_v61   ;;  %v1051_v1 = vadd.f32 %v1020_v63, %v1019_v60  ;;  %v1563_v2 = vpop.f32.mrb[4].mxu0  ;;  %1533 = vst [vmem:[%s1942_s12 + $0x40] sm:$0xff] %v1489_v0   ;;  %v1611_v4 = vpop.f32.mrb[4].mxu1 }
 0x110   : > { %v1564_v3 = vpop.f32.mrb[5].mxu0  ;;  %v1612_v7 = vpop.f32.mrb[5].mxu1 }
 0x111   : > { %v1565_v5 = vadd.f32 %v1564_v3, %v1563_v2  ;;  %v1566_v6 = vpop.f32.mrb[6].mxu0  ;;  %v1950_v9 = vadd.f32 %v1612_v7, %v1611_v4  ;;  %v1614_v10 = vpop.f32.mrb[6].mxu1 }
 0x112   : > { %v1567_v8 = vpop.f32.mrb[7].mxu0  ;;  %v1615_v14 = vpop.f32.mrb[7].mxu1 }
 0x113   : > { %v982_v11 = vadd.f32 %v1565_v5, %v981_v62  ;;  %v1021_v12 = vmul.f32 %v1565_v5, %v1565_v5  ;;  %v1568_v13 = vadd.f32 %v1567_v8, %v1566_v6  ;;  %v1952_v15 = vadd.f32 %v1615_v14, %v1614_v10 }
 0x115   : > { %v1052_v16 = vadd.f32 %v1051_v1, %v1021_v12  ;;  %v1454_v17 = vpack.c.bf16 %v1568_v13, %v1565_v5  ;;  %v983_v18 = vadd.f32 %v1568_v13, %v982_v11  ;;  %v1022_v19 = vmul.f32 %v1568_v13, %v1568_v13 }
 0x116   : > { %v1494_v20 = vpack.c.bf16 %v1952_v15, %v1950_v9 }
 0x117   : > { %1526 = vst [vmem:[%s1942_s12 + $0x8] sm:$0xff] %v1454_v17   ;;  %v1053_v21 = vadd.f32 %v1052_v16, %v1022_v19  ;;  %v1569_v22 = vpop.f32.mrb[8].mxu0  ;;  %v1617_v24 = vpop.f32.mrb[8].mxu1 }
 0x118   : > { %v1570_v23 = vpop.f32.mrb[9].mxu0  ;;  %1534 = vst [vmem:[%s1942_s12 + $0x48] sm:$0xff] %v1494_v20   ;;  %v1618_v27 = vpop.f32.mrb[9].mxu1 }
 0x119   : > { %v1571_v25 = vadd.f32 %v1570_v23, %v1569_v22  ;;  %v1572_v26 = vpop.f32.mrb[10].mxu0  ;;  %v1958_v29 = vadd.f32 %v1618_v27, %v1617_v24  ;;  %v1620_v30 = vpop.f32.mrb[10].mxu1 }
 0x11a   : > { %v1573_v28 = vpop.f32.mrb[11].mxu0  ;;  %v1621_v34 = vpop.f32.mrb[11].mxu1 }
 0x11b   : > { %v984_v31 = vadd.f32 %v1571_v25, %v983_v18  ;;  %v1023_v32 = vmul.f32 %v1571_v25, %v1571_v25  ;;  %v1574_v33 = vadd.f32 %v1573_v28, %v1572_v26  ;;  %v1960_v35 = vadd.f32 %v1621_v34, %v1620_v30 }
 0x11d   : > { %v1054_v36 = vadd.f32 %v1053_v21, %v1023_v32  ;;  %v1459_v37 = vpack.c.bf16 %v1574_v33, %v1571_v25  ;;  %v985_v38 = vadd.f32 %v1574_v33, %v984_v31  ;;  %v1024_v39 = vmul.f32 %v1574_v33, %v1574_v33 }
 0x11e   : > { %v1499_v40 = vpack.c.bf16 %v1960_v35, %v1958_v29 }
 0x11f   : > { %1527 = vst [vmem:[%s1942_s12 + $0x10] sm:$0xff] %v1459_v37   ;;  %v1055_v41 = vadd.f32 %v1054_v36, %v1024_v39  ;;  %v1575_v42 = vpop.f32.mrb[12].mxu0  ;;  %v1623_v44 = vpop.f32.mrb[12].mxu1 }
 0x120   : > { %v1576_v43 = vpop.f32.mrb[13].mxu0  ;;  %1535 = vst [vmem:[%s1942_s12 + $0x50] sm:$0xff] %v1499_v40   ;;  %v1624_v47 = vpop.f32.mrb[13].mxu1 }
 0x121   : > { %v1577_v45 = vadd.f32 %v1576_v43, %v1575_v42  ;;  %v1578_v46 = vpop.f32.mrb[14].mxu0  ;;  %v1966_v49 = vadd.f32 %v1624_v47, %v1623_v44  ;;  %v1626_v50 = vpop.f32.mrb[14].mxu1 }
 0x122   : > { %v1579_v48 = vpop.f32.mrb[15].mxu0  ;;  %v1627_v54 = vpop.f32.mrb[15].mxu1 }
 0x123   : > { %v986_v51 = vadd.f32 %v1577_v45, %v985_v38  ;;  %v1025_v52 = vmul.f32 %v1577_v45, %v1577_v45  ;;  %v1580_v53 = vadd.f32 %v1579_v48, %v1578_v46  ;;  %v1968_v56 = vadd.f32 %v1627_v54, %v1626_v50 }
 0x125   : > { %v1056_v57 = vadd.f32 %v1055_v41, %v1025_v52  ;;  %v1464_v58 = vpack.c.bf16 %v1580_v53, %v1577_v45  ;;  %v987_v60 = vadd.f32 %v1580_v53, %v986_v51  ;;  %v1026_v61 = vmul.f32 %v1580_v53, %v1580_v53 }
 0x126   : > { %v1504_v62 = vpack.c.bf16 %v1968_v56, %v1966_v49 }
 0x127   : > { %1528 = vst [vmem:[%s1942_s12 + $0x18] sm:$0xff] %v1464_v58   ;;  %v1057_v63 = vadd.f32 %v1056_v57, %v1026_v61  ;;  %v1581_v0 = vpop.f32.mrb[16].mxu0  ;;  %v1629_v2 = vpop.f32.mrb[16].mxu1 }
 0x128   : > { %v1582_v1 = vpop.f32.mrb[17].mxu0  ;;  %1536 = vst [vmem:[%s1942_s12 + $0x58] sm:$0xff] %v1504_v62   ;;  %v1630_v5 = vpop.f32.mrb[17].mxu1 }
 0x129   : > { %v1583_v3 = vadd.f32 %v1582_v1, %v1581_v0  ;;  %v1584_v4 = vpop.f32.mrb[18].mxu0  ;;  %v1974_v7 = vadd.f32 %v1630_v5, %v1629_v2  ;;  %v1632_v8 = vpop.f32.mrb[18].mxu1 }
 0x12a   : > { %v1585_v6 = vpop.f32.mrb[19].mxu0  ;;  %v1633_v13 = vpop.f32.mrb[19].mxu1 }
 0x12b   : > { %v988_v10 = vadd.f32 %v1583_v3, %v987_v60  ;;  %v1027_v11 = vmul.f32 %v1583_v3, %v1583_v3  ;;  %v1586_v12 = vadd.f32 %v1585_v6, %v1584_v4  ;;  %v1976_v14 = vadd.f32 %v1633_v13, %v1632_v8 }
 0x12d   : > { %v1058_v16 = vadd.f32 %v1057_v63, %v1027_v11  ;;  %v1469_v17 = vpack.c.bf16 %v1586_v12, %v1583_v3  ;;  %v989_v18 = vadd.f32 %v1586_v12, %v988_v10  ;;  %v1028_v19 = vmul.f32 %v1586_v12, %v1586_v12 }
 0x12e   : > { %v1509_v20 = vpack.c.bf16 %v1976_v14, %v1974_v7 }
 0x12f   : > { %1529 = vst [vmem:[%s1942_s12 + $0x20] sm:$0xff] %v1469_v17   ;;  %v1059_v21 = vadd.f32 %v1058_v16, %v1028_v19  ;;  %v1587_v22 = vpop.f32.mrb[20].mxu0  ;;  %v1635_v24 = vpop.f32.mrb[20].mxu1 }
 0x130   : > { %v1588_v23 = vpop.f32.mrb[21].mxu0  ;;  %1537 = vst [vmem:[%s1942_s12 + $0x60] sm:$0xff] %v1509_v20   ;;  %v1636_v27 = vpop.f32.mrb[21].mxu1 }
 0x131   : > { %v1589_v25 = vadd.f32 %v1588_v23, %v1587_v22  ;;  %v1590_v26 = vpop.f32.mrb[22].mxu0  ;;  %v1982_v30 = vadd.f32 %v1636_v27, %v1635_v24  ;;  %v1638_v31 = vpop.f32.mrb[22].mxu1  ;;  %v1035_v27 = vmul.f32 %v1937_v55, %v1937_v55 }
 0x132   : > { %v1591_v28 = vpop.f32.mrb[23].mxu0  ;;  %v1639_v36 = vpop.f32.mrb[23].mxu1 }
 0x133   : > { %v990_v32 = vadd.f32 %v1589_v25, %v989_v18  ;;  %v1029_v33 = vmul.f32 %v1589_v25, %v1589_v25  ;;  %v1592_v34 = vadd.f32 %v1591_v28, %v1590_v26  ;;  %v1984_v37 = vadd.f32 %v1639_v36, %v1638_v31 }
 0x134   : > { %v1037_v36 = vmul.f32 %v1950_v9, %v1950_v9 }
 0x135   : > { %v1060_v38 = vadd.f32 %v1059_v21, %v1029_v33  ;;  %v1474_v39 = vpack.c.bf16 %v1592_v34, %v1589_v25  ;;  %v991_v40 = vadd.f32 %v1592_v34, %v990_v32  ;;  %v1030_v41 = vmul.f32 %v1592_v34, %v1592_v34 }
 0x136   : > { %v1514_v42 = vpack.c.bf16 %v1984_v37, %v1982_v30  ;;  %v1036_v32 = vmul.f32 %v1944_v59, %v1944_v59 }
 0x137   : > { %1530 = vst [vmem:[%s1942_s12 + $0x28] sm:$0xff] %v1474_v39   ;;  %v1061_v43 = vadd.f32 %v1060_v38, %v1030_v41  ;;  %v1593_v44 = vpop.f32.mrb[24].mxu0  ;;  %v1641_v46 = vpop.f32.mrb[24].mxu1 }
 0x138   : > { %v1594_v45 = vpop.f32.mrb[25].mxu0  ;;  %1538 = vst [vmem:[%s1942_s12 + $0x68] sm:$0xff] %v1514_v42   ;;  %v1642_v50 = vpop.f32.mrb[25].mxu1  ;;  %v1039_v42 = vmul.f32 %v1958_v29, %v1958_v29 }
 0x139   : > { %v1595_v47 = vadd.f32 %v1594_v45, %v1593_v44  ;;  %v1596_v48 = vpop.f32.mrb[26].mxu0  ;;  %v1990_v52 = vadd.f32 %v1642_v50, %v1641_v46  ;;  %v1644_v53 = vpop.f32.mrb[26].mxu1 }
 0x13a   : > { %v1597_v51 = vpop.f32.mrb[27].mxu0  ;;  %v1645_v60 = vpop.f32.mrb[27].mxu1 }
 0x13b   : > { %v992_v54 = vadd.f32 %v1595_v47, %v991_v40  ;;  %v1031_v57 = vmul.f32 %v1595_v47, %v1595_v47  ;;  %v1598_v58 = vadd.f32 %v1597_v51, %v1596_v48  ;;  %v1992_v61 = vadd.f32 %v1645_v60, %v1644_v53 }
 0x13c   : > { %v1038_v40 = vmul.f32 %v1952_v15, %v1952_v15  ;;  %v1043_v53 = vmul.f32 %v1974_v7, %v1974_v7 }
 0x13d   : > { %v1062_v62 = vadd.f32 %v1061_v43, %v1031_v57  ;;  %v1479_v63 = vpack.c.bf16 %v1598_v58, %v1595_v47  ;;  %v993_v0 = vadd.f32 %v1598_v58, %v992_v54  ;;  %v1032_v1 = vmul.f32 %v1598_v58, %v1598_v58 }
 0x13e   : > { %v1519_v2 = vpack.c.bf16 %v1992_v61, %v1990_v52  ;;  %v1044_v58 = vmul.f32 %v1976_v14, %v1976_v14 }
 0x13f   : > { %1531 = vst [vmem:[%s1942_s12 + $0x30] sm:$0xff] %v1479_v63   ;;  %v1063_v3 = vadd.f32 %v1062_v62, %v1032_v1  ;;  %v1599_v4 = vpop.f32.mrb[28].mxu0  ;;  %v1647_v6 = vpop.f32.mrb[28].mxu1 }
 0x140   : > { %v1600_v5 = vpop.f32.mrb[29].mxu0  ;;  %1539 = vst [vmem:[%s1942_s12 + $0x70] sm:$0xff] %v1519_v2   ;;  %v1648_v11 = vpop.f32.mrb[29].mxu1 }
 0x141   : > { %v1601_v8 = vadd.f32 %v1600_v5, %v1599_v4  ;;  %v1602_v10 = vpop.f32.mrb[30].mxu0  ;;  %v1649_v13 = vadd.f32 %v1648_v11, %v1647_v6  ;;  %v1650_v16 = vpop.f32.mrb[30].mxu1 }
 0x142   : > { %v1603_v12 = vpop.f32.mrb[31].mxu0  ;;  %v1651_v20 = vpop.f32.mrb[31].mxu1 }
 0x143   : > { %v994_v17 = vadd.f32 %v1601_v8, %v993_v0  ;;  %v1033_v18 = vmul.f32 %v1601_v8, %v1601_v8  ;;  %v1604_v19 = vadd.f32 %v1603_v12, %v1602_v10  ;;  %v1652_v21 = vadd.f32 %v1651_v20, %v1650_v16 }
 0x144   : > { %v1049_v4 = vmul.f32 %v1649_v13, %v1649_v13 }
 0x145   : > { %v1064_v22 = vadd.f32 %v1063_v3, %v1033_v18  ;;  %v1484_v23 = vpack.c.bf16 %v1604_v19, %v1601_v8  ;;  %v995_v24 = vadd.f32 %v1604_v19, %v994_v17  ;;  %v1034_v25 = vmul.f32 %v1604_v19, %v1604_v19 }
 0x146   : > { %v1524_v26 = vpack.c.bf16 %v1652_v21, %v1649_v13  ;;  %v1050_v10 = vmul.f32 %v1652_v21, %v1652_v21 }
 0x147   : > { %1532 = vst [vmem:[%s1942_s12 + $0x38] sm:$0xff] %v1484_v23   ;;  %v996_v28 = vadd.f32 %v1937_v55, %v995_v24  ;;  %v1065_v31 = vadd.f32 %v1064_v22, %v1034_v25 }
 0x148   : > { %1540 = vst [vmem:[%s1942_s12 + $0x78] sm:$0xff] %v1524_v26  }
 0x149   : > { %v997_v33 = vadd.f32 %v1944_v59, %v996_v28  ;;  %v1066_v34 = vadd.f32 %v1065_v31, %v1035_v27  ;;  %v1040_v59 = vmul.f32 %v1960_v35, %v1960_v35 }
 0x14b   : > { %v998_v38 = vadd.f32 %v1950_v9, %v997_v33  ;;  %v1067_v39 = vadd.f32 %v1066_v34, %v1036_v32  ;;  %v1041_v9 = vmul.f32 %v1966_v49, %v1966_v49 }
 0x14d   : > { %v999_v41 = vadd.f32 %v1952_v15, %v998_v38  ;;  %v1068_v55 = vadd.f32 %v1067_v39, %v1037_v36  ;;  %v1042_v15 = vmul.f32 %v1968_v56, %v1968_v56 }
 0x14f   : > { %v1069_v43 = vadd.f32 %v1068_v55, %v1038_v40  ;;  %v1000_v44 = vadd.f32 %v1958_v29, %v999_v41 }
 0x151   : > { %v1001_v45 = vadd.f32 %v1960_v35, %v1000_v44  ;;  %v1070_v46 = vadd.f32 %v1069_v43, %v1039_v42 }
 0x153   : > { %v1002_v47 = vadd.f32 %v1966_v49, %v1001_v45  ;;  %v1071_v48 = vadd.f32 %v1070_v46, %v1040_v59 }
 0x155   : > { %v1003_v50 = vadd.f32 %v1968_v56, %v1002_v47  ;;  %v1072_v51 = vadd.f32 %v1071_v48, %v1041_v9  ;;  %v1045_v56 = vmul.f32 %v1982_v30, %v1982_v30 }
 0x157   : > { %v1004_v29 = vadd.f32 %v1974_v7, %v1003_v50  ;;  %v1073_v54 = vadd.f32 %v1072_v51, %v1042_v15  ;;  %v1046_v7 = vmul.f32 %v1984_v37, %v1984_v37 }
 0x159   : > { %v1074_v35 = vadd.f32 %v1073_v54, %v1043_v53  ;;  %v1005_v57 = vadd.f32 %v1976_v14, %v1004_v29  ;;  %v1047_v14 = vmul.f32 %v1990_v52, %v1990_v52 }
 0x15b   : > { %v1075_v49 = vadd.f32 %v1074_v35, %v1044_v58  ;;  %v1006_v60 = vadd.f32 %v1982_v30, %v1005_v57  ;;  %v1048_v30 = vmul.f32 %v1992_v61, %v1992_v61 }
 0x15d   : > { %v1076_v62 = vadd.f32 %v1075_v49, %v1045_v56  ;;  %v1007_v63 = vadd.f32 %v1984_v37, %v1006_v60 }
 0x15f   : > { %v1077_v0 = vadd.f32 %v1076_v62, %v1046_v7  ;;  %v1008_v1 = vadd.f32 %v1990_v52, %v1007_v63 }
 0x161   : > { %v1078_v2 = vadd.f32 %v1077_v0, %v1047_v14  ;;  %v1009_v3 = vadd.f32 %v1992_v61, %v1008_v1 }
 0x163   : > { %v1079_v5 = vadd.f32 %v1078_v2, %v1048_v30  ;;  %v1010_v6 = vadd.f32 %v1649_v13, %v1009_v3 }
 0x165   : > { %v1080_v8 = vadd.f32 %v1079_v5, %v1049_v4  ;;  %v1011_v37 = vadd.f32 %v1652_v21, %v1010_v6 }
 0x167   : > { %v1012_v11 = vrot.slane %v1011_v37, 4  ;;  %v1081_v12 = vadd.f32 %v1080_v8, %v1050_v10 }
 0x169   : > { %v1013_v16 = vadd.f32 %v1012_v11, %v1011_v37  ;;  %v1082_v17 = vrot.slane %v1081_v12, 4 }
 0x16b   : > { %v1014_v52 = vrot.slane %v1013_v16, 2  ;;  %v1083_v18 = vadd.f32 %v1082_v17, %v1081_v12 }
 0x16d   : > { %v1015_v19 = vadd.f32 %v1014_v52, %v1013_v16  ;;  %v1084_v20 = vrot.slane %v1083_v18, 2 }
 0x16f   : > { %v1016_v22 = vrot.slane %v1015_v19, 1  ;;  %v1085_v61 = vadd.f32 %v1084_v20, %v1083_v18 }
 0x171   : > { %v1017_v13 = vadd.f32 %v1016_v22, %v1015_v19  ;;  %v1086_v23 = vrot.slane %v1085_v61, 1 }
 0x173   : > { %1018 = vst [vmem:[%s328_s24] sm:$0x1] %v1017_v13  ;;  %v1087_v21 = vadd.f32 %v1086_v23, %v1085_v61 }
 0x175   : > { %1088 = vst [vmem:[%s338_s27] sm:$0x1] %v1087_v21 }
 0x176 PF: > { %s15_s19 = sadd.s32 1, %s1811_s19   ;;  %s2071_s15 = smov %s1803_s17 }
 0x177   : > { %p12_p8 = scmp.ge.s32.totalorder %s15_s19, 10   ;;  %s2072_s16 = smov %s1807_s18 }
 0x178   : > { %s2073_s17 = smov %s2076_s20  ;;  %s2074_s18 = smov %s2080_s21 }
 0x179   :  { %14 = sbr.rel (!%p12_p8) target bundleno = 3 (0x3), region = 85 }

// kernel: generator_forward.16
= control target key start
LH: loop header
LB: loop body
LE: loop exit
PB: predicated region body
PF: predicated region fallthrough
CT: control target
= control target key end

     0   :  { %s2789_s12 = smov 0   ;;  %s3222_s0 = inlined_call_operand.vmem [shape: bf16[2048,128], index: 0, kind: input, shape index: {}]   ;;  %s3223_s1 = inlined_call_operand.vmem [shape: f32[1,128], index: 1, kind: input, shape index: {}]   ;;  %s3224_s2 = inlined_call_operand.vmem [shape: f32[1,128], index: 2, kind: input, shape index: {}]   ;;  %s3225_s3 = inlined_call_operand.vmem [shape: bf16[2048,128], index: 3, kind: output, shape index: {}]  }
   0x1 LB: > { %s1780_s13 = sadd.s32 4294967295, %s2767_s12   ;;  %p1784_p0 = scmp.ge.s32.totalorder %s2767_s12, 1  ;;  %s2767_s12 = sphi %s2789_s12, %s13_s12  }
   0x2   : > { %p138_p1 = scmp.lt.s32.totalorder %s2767_s12, 3 }
   0x4   : > { %p139_p2 = pnand %p1784_p0, %p138_p1 }
   0x5   : > { %s1785_s14 = sshll.u32 (!%p139_p2), %s1780_s13, 7  ;;  %v2810_v0 = vld [vmem:[%s3223_s1] ss:$0 sm:$0xff] (!%p139_p2) }
   0x6   : > { %142 = sbr.rel (%p139_p2) target bundleno = 229 (0xe5), region = 32  ;;  %p163_p3 = scmp.lt.s32.totalorder (!%p139_p2), %s1785_s14, 255  ;;  %v2819_v9 = vld [vmem:[%s3224_s2] ss:$0 sm:$0xff] (!%p139_p2) }
   0xd   : > { %s3227_s14 = smov (!%p163_p3, %s1785_s14), 255 }
   0xe   : > { %s1786_s15 = sshll.u32 %s3227_s14, 2 }
   0xf   : > { %s2805_s18 = scalar_lea.vmem %s3222_s0, %s1786_s15  ;;  %s2842_s25 = scalar_lea.vmem %s3225_s3, %s1786_s15 }
  0x10   : > { %v2050_v1 = vld [vmem:[%s2805_s18] sm:$0xff]   ;;  %v2625_v2 = vld [vmem:[%s2805_s18 + $0x8] sm:$0xff]   ;;  %v2626_v3 = vld [vmem:[%s2805_s18 + $0x10] sm:$0xff]  }
  0x11   : > { %v2051_v4 = vunpack.c.l.bf16 %v2050_v1  ;;  %v2052_v5 = vunpack.c.h.bf16 %v2050_v1  ;;  %v2055_v6 = vunpack.c.l.bf16 %v2625_v2  ;;  %v2056_v7 = vunpack.c.h.bf16 %v2625_v2  ;;  %v2627_v8 = vld [vmem:[%s2805_s18 + $0x18] sm:$0xff]   ;;  %v2628_v36 = vld [vmem:[%s2805_s18 + $0x20] sm:$0xff]   ;;  %v2629_v41 = vld [vmem:[%s2805_s18 + $0x28] sm:$0xff]  }
  0x12   : > { %v2059_v10 = vunpack.c.l.bf16 %v2626_v3  ;;  %v2060_v11 = vunpack.c.h.bf16 %v2626_v3  ;;  %v2063_v12 = vunpack.c.l.bf16 %v2627_v8  ;;  %v2064_v13 = vunpack.c.h.bf16 %v2627_v8  ;;  %v2630_v52 = vld [vmem:[%s2805_s18 + $0x30] sm:$0xff]   ;;  %v2631_v53 = vld [vmem:[%s2805_s18 + $0x38] sm:$0xff]  }
  0x13   : > { %v437_v14 = vmul.f32 %v2051_v4, %v2810_v0  ;;  %v438_v15 = vmul.f32 %v2052_v5, %v2810_v0  ;;  %v439_v16 = vmul.f32 %v2055_v6, %v2810_v0  ;;  %v440_v17 = vmul.f32 %v2056_v7, %v2810_v0 }
  0x14   : > { %v441_v18 = vmul.f32 %v2059_v10, %v2810_v0  ;;  %v442_v19 = vmul.f32 %v2060_v11, %v2810_v0  ;;  %v443_v20 = vmul.f32 %v2063_v12, %v2810_v0  ;;  %v444_v21 = vmul.f32 %v2064_v13, %v2810_v0 }
  0x15   : > { %v572_v22 = vadd.f32 %v2819_v9, %v437_v14  ;;  %v573_v23 = vadd.f32 %v2819_v9, %v438_v15  ;;  %v574_v24 = vadd.f32 %v2819_v9, %v439_v16  ;;  %v575_v25 = vadd.f32 %v2819_v9, %v440_v17 }
  0x16   : > { %v576_v26 = vadd.f32 %v2819_v9, %v441_v18  ;;  %v577_v27 = vadd.f32 %v2819_v9, %v442_v19  ;;  %v578_v28 = vadd.f32 %v2819_v9, %v443_v20  ;;  %v579_v29 = vadd.f32 %v2819_v9, %v444_v21  ;;  %v2632_v20 = vld [vmem:[%s2805_s18 + $0x40] sm:$0xff]  }
  0x17   : > { %vm700_vm0 = vcmp.ge.f32.partialorder %v572_v22, 0.0  ;;  %vm701_vm1 = vcmp.ge.f32.partialorder %v573_v23, 0.0  ;;  %v828_v30 = vmul.f32 0.2, %v572_v22  ;;  %v829_v31 = vmul.f32 0.2, %v573_v23 }
  0x18   : > { %vm702_vm2 = vcmp.ge.f32.partialorder %v574_v24, 0.0  ;;  %vm703_vm3 = vcmp.ge.f32.partialorder %v575_v25, 0.0  ;;  %v830_v32 = vmul.f32 0.2, %v574_v24  ;;  %v831_v33 = vmul.f32 0.2, %v575_v25 }
  0x19   : > { %v956_v34 = vsel %vm700_vm0, %v572_v22, %v828_v30  ;;  %v957_v35 = vsel %vm701_vm1, %v573_v23, %v829_v31  ;;  %vm704_vm4 = vcmp.ge.f32.partialorder %v576_v26, 0.0  ;;  %vm705_vm5 = vcmp.ge.f32.partialorder %v577_v27, 0.0 }
  0x1a   : > { %v2308_v37 = vpack.c.bf16 %v957_v35, %v956_v34  ;;  %v958_v38 = vsel %vm702_vm2, %v574_v24, %v830_v32  ;;  %v959_v39 = vsel %vm703_vm3, %v575_v25, %v831_v33  ;;  %v832_v40 = vmul.f32 0.2, %v576_v26  ;;  %v2633_v24 = vld [vmem:[%s2805_s18 + $0x48] sm:$0xff]  }
  0x1b   : > { %v2313_v42 = vpack.c.bf16 %v959_v39, %v958_v38  ;;  %v833_v43 = vmul.f32 0.2, %v577_v27  ;;  %vm706_vm6 = vcmp.ge.f32.partialorder %v578_v28, 0.0  ;;  %vm707_vm7 = vcmp.ge.f32.partialorder %v579_v29, 0.0 }
  0x1c   : > { %2309 = vst [vmem:[%s2842_s25] sm:$0xff] %v2308_v37   ;;  %v960_v44 = vsel %vm704_vm4, %v576_v26, %v832_v40  ;;  %v834_v45 = vmul.f32 0.2, %v578_v28  ;;  %v835_v46 = vmul.f32 0.2, %v579_v29  ;;  %v2067_v47 = vunpack.c.l.bf16 %v2628_v36 }
  0x1d   : > { %2688 = vst [vmem:[%s2842_s25 + $0x8] sm:$0xff] %v2313_v42   ;;  %v961_v48 = vsel %vm705_vm5, %v577_v27, %v833_v43  ;;  %v2068_v49 = vunpack.c.h.bf16 %v2628_v36  ;;  %v2071_v50 = vunpack.c.l.bf16 %v2629_v41  ;;  %v2072_v51 = vunpack.c.h.bf16 %v2629_v41  ;;  %v2634_v36 = vld [vmem:[%s2805_s18 + $0x50] sm:$0xff]  }
  0x1e   : > { %v2318_v54 = vpack.c.bf16 %v961_v48, %v960_v44  ;;  %v962_v55 = vsel %vm706_vm6, %v578_v28, %v834_v45  ;;  %v963_v56 = vsel %vm707_vm7, %v579_v29, %v835_v46  ;;  %v445_v57 = vmul.f32 %v2067_v47, %v2810_v0 }
  0x1f   : > { %v2323_v58 = vpack.c.bf16 %v963_v56, %v962_v55  ;;  %v446_v59 = vmul.f32 %v2068_v49, %v2810_v0  ;;  %v447_v60 = vmul.f32 %v2071_v50, %v2810_v0  ;;  %v448_v61 = vmul.f32 %v2072_v51, %v2810_v0  ;;  %v2635_v55 = vld [vmem:[%s2805_s18 + $0x58] sm:$0xff]  }
  0x20   : > { %2689 = vst [vmem:[%s2842_s25 + $0x10] sm:$0xff] %v2318_v54   ;;  %v580_v62 = vadd.f32 %v2819_v9, %v445_v57  ;;  %v2075_v63 = vunpack.c.l.bf16 %v2630_v52  ;;  %v2076_v1 = vunpack.c.h.bf16 %v2630_v52  ;;  %v2079_v2 = vunpack.c.l.bf16 %v2631_v53 }
  0x21   : > { %2690 = vst [vmem:[%s2842_s25 + $0x18] sm:$0xff] %v2323_v58   ;;  %v581_v3 = vadd.f32 %v2819_v9, %v446_v59  ;;  %v582_v4 = vadd.f32 %v2819_v9, %v447_v60  ;;  %v583_v5 = vadd.f32 %v2819_v9, %v448_v61  ;;  %v2080_v6 = vunpack.c.h.bf16 %v2631_v53 }
  0x22   : > { %vm708_vm8 = vcmp.ge.f32.partialorder %v580_v62, 0.0  ;;  %v836_v7 = vmul.f32 0.2, %v580_v62  ;;  %v449_v8 = vmul.f32 %v2075_v63, %v2810_v0  ;;  %v450_v10 = vmul.f32 %v2076_v1, %v2810_v0  ;;  %v2636_v1 = vld [vmem:[%s2805_s18 + $0x60] sm:$0xff]  }
  0x23   : > { %vm709_vm9 = vcmp.ge.f32.partialorder %v581_v3, 0.0  ;;  %v837_v11 = vmul.f32 0.2, %v581_v3  ;;  %vm710_vm10 = vcmp.ge.f32.partialorder %v582_v4, 0.0  ;;  %vm711_vm11 = vcmp.ge.f32.partialorder %v583_v5, 0.0 }
  0x24   : > { %v964_v12 = vsel %vm708_vm8, %v580_v62, %v836_v7  ;;  %v838_v13 = vmul.f32 0.2, %v582_v4  ;;  %v839_v14 = vmul.f32 0.2, %v583_v5  ;;  %v584_v15 = vadd.f32 %v2819_v9, %v449_v8 }
  0x25   : > { %v965_v16 = vsel %vm709_vm9, %v581_v3, %v837_v11  ;;  %v585_v17 = vadd.f32 %v2819_v9, %v450_v10  ;;  %v451_v18 = vmul.f32 %v2079_v2, %v2810_v0  ;;  %v452_v19 = vmul.f32 %v2080_v6, %v2810_v0  ;;  %v2637_v6 = vld [vmem:[%s2805_s18 + $0x68] sm:$0xff]  }
  0x26   : > { %v2328_v21 = vpack.c.bf16 %v965_v16, %v964_v12  ;;  %v966_v22 = vsel %vm710_vm10, %v582_v4, %v838_v13  ;;  %v967_v23 = vsel %vm711_vm11, %v583_v5, %v839_v14  ;;  %vm712_vm12 = vcmp.ge.f32.partialorder %v584_v15, 0.0 }
  0x27   : > { %v2333_v25 = vpack.c.bf16 %v967_v23, %v966_v22  ;;  %vm713_vm13 = vcmp.ge.f32.partialorder %v585_v17, 0.0  ;;  %v840_v26 = vmul.f32 0.2, %v584_v15  ;;  %v841_v27 = vmul.f32 0.2, %v585_v17  ;;  %v2638_v22 = vld [vmem:[%s2805_s18 + $0x70] sm:$0xff]  }
  0x28   : > { %2691 = vst [vmem:[%s2842_s25 + $0x20] sm:$0xff] %v2328_v21   ;;  %v586_v28 = vadd.f32 %v2819_v9, %v451_v18  ;;  %v587_v29 = vadd.f32 %v2819_v9, %v452_v19  ;;  %v2083_v30 = vunpack.c.l.bf16 %v2632_v20  ;;  %v2084_v31 = vunpack.c.h.bf16 %v2632_v20 }
  0x29   : > { %2692 = vst [vmem:[%s2842_s25 + $0x28] sm:$0xff] %v2333_v25   ;;  %v968_v32 = vsel %vm712_vm12, %v584_v15, %v840_v26  ;;  %v969_v33 = vsel %vm713_vm13, %v585_v17, %v841_v27  ;;  %v2087_v34 = vunpack.c.l.bf16 %v2633_v24  ;;  %v2088_v35 = vunpack.c.h.bf16 %v2633_v24 }
  0x2a   : > { %v2338_v37 = vpack.c.bf16 %v969_v33, %v968_v32  ;;  %vm714_vm14 = vcmp.ge.f32.partialorder %v586_v28, 0.0  ;;  %vm715_vm15 = vcmp.ge.f32.partialorder %v587_v29, 0.0  ;;  %v842_v38 = vmul.f32 0.2, %v586_v28 }
  0x2b   : > { %v843_v39 = vmul.f32 0.2, %v587_v29  ;;  %v453_v40 = vmul.f32 %v2083_v30, %v2810_v0  ;;  %v454_v41 = vmul.f32 %v2084_v31, %v2810_v0  ;;  %v455_v42 = vmul.f32 %v2087_v34, %v2810_v0 }
  0x2c   : > { %2693 = vst [vmem:[%s2842_s25 + $0x30] sm:$0xff] %v2338_v37   ;;  %v970_v43 = vsel %vm714_vm14, %v586_v28, %v842_v38  ;;  %v456_v44 = vmul.f32 %v2088_v35, %v2810_v0  ;;  %v2091_v45 = vunpack.c.l.bf16 %v2634_v36  ;;  %v2092_v46 = vunpack.c.h.bf16 %v2634_v36 }
  0x2d   : > { %v971_v47 = vsel %vm715_vm15, %v587_v29, %v843_v39  ;;  %v588_v48 = vadd.f32 %v2819_v9, %v453_v40  ;;  %v589_v49 = vadd.f32 %v2819_v9, %v454_v41  ;;  %v590_v50 = vadd.f32 %v2819_v9, %v455_v42  ;;  %v2639_v41 = vld [vmem:[%s2805_s18 + $0x78] sm:$0xff]  }
  0x2e   : > { %v2343_v51 = vpack.c.bf16 %v971_v47, %v970_v43  ;;  %v591_v52 = vadd.f32 %v2819_v9, %v456_v44  ;;  %v457_v53 = vmul.f32 %v2091_v45, %v2810_v0  ;;  %v458_v54 = vmul.f32 %v2092_v46, %v2810_v0  ;;  %v2640_v46 = vld [vmem:[%s2805_s18 + $0x80] sm:$0xff]   ;;  %v2641_v47 = vld [vmem:[%s2805_s18 + $0x88] sm:$0xff]  }
  0x2f   : > { %vm716_vm0 = vcmp.ge.f32.partialorder %v588_v48, 0.0  ;;  %vm717_vm1 = vcmp.ge.f32.partialorder %v589_v49, 0.0  ;;  %v844_v56 = vmul.f32 0.2, %v588_v48  ;;  %v845_v57 = vmul.f32 0.2, %v589_v49 }
  0x30   : > { %2694 = vst [vmem:[%s2842_s25 + $0x38] sm:$0xff] %v2343_v51   ;;  %vm718_vm2 = vcmp.ge.f32.partialorder %v590_v50, 0.0  ;;  %vm719_vm3 = vcmp.ge.f32.partialorder %v591_v52, 0.0  ;;  %v846_v58 = vmul.f32 0.2, %v590_v50  ;;  %v592_v62 = vadd.f32 %v2819_v9, %v457_v53 }
  0x31   : > { %v847_v59 = vmul.f32 0.2, %v591_v52  ;;  %v972_v60 = vsel %vm716_vm0, %v588_v48, %v844_v56  ;;  %v973_v61 = vsel %vm717_vm1, %v589_v49, %v845_v57  ;;  %v593_v63 = vadd.f32 %v2819_v9, %v458_v54 }
  0x32   : > { %v2348_v2 = vpack.c.bf16 %v973_v61, %v972_v60  ;;  %v974_v3 = vsel %vm718_vm2, %v590_v50, %v846_v58  ;;  %v2095_v5 = vunpack.c.l.bf16 %v2635_v55  ;;  %vm720_vm4 = vcmp.ge.f32.partialorder %v592_v62, 0.0 }
  0x33   : > { %v975_v4 = vsel %vm719_vm3, %v591_v52, %v847_v59  ;;  %vm721_vm5 = vcmp.ge.f32.partialorder %v593_v63, 0.0  ;;  %v848_v8 = vmul.f32 0.2, %v592_v62  ;;  %v849_v10 = vmul.f32 0.2, %v593_v63 }
  0x34   : > { %v2353_v7 = vpack.c.bf16 %v975_v4, %v974_v3  ;;  %2695 = vst [vmem:[%s2842_s25 + $0x40] sm:$0xff] %v2348_v2   ;;  %v2096_v11 = vunpack.c.h.bf16 %v2635_v55  ;;  %v459_v12 = vmul.f32 %v2095_v5, %v2810_v0  ;;  %v2099_v13 = vunpack.c.l.bf16 %v2636_v1 }
  0x35   : > { %v976_v14 = vsel %vm720_vm4, %v592_v62, %v848_v8  ;;  %v2100_v15 = vunpack.c.h.bf16 %v2636_v1  ;;  %v2103_v16 = vunpack.c.l.bf16 %v2637_v6  ;;  %v2104_v17 = vunpack.c.h.bf16 %v2637_v6 }
  0x36   : > { %2696 = vst [vmem:[%s2842_s25 + $0x48] sm:$0xff] %v2353_v7   ;;  %v977_v18 = vsel %vm721_vm5, %v593_v63, %v849_v10  ;;  %v460_v19 = vmul.f32 %v2096_v11, %v2810_v0  ;;  %v594_v20 = vadd.f32 %v2819_v9, %v459_v12  ;;  %v461_v21 = vmul.f32 %v2099_v13, %v2810_v0 }
  0x37   : > { %v2358_v23 = vpack.c.bf16 %v977_v18, %v976_v14  ;;  %v462_v24 = vmul.f32 %v2100_v15, %v2810_v0  ;;  %v463_v25 = vmul.f32 %v2103_v16, %v2810_v0  ;;  %v464_v26 = vmul.f32 %v2104_v17, %v2810_v0  ;;  %v2642_v14 = vld [vmem:[%s2805_s18 + $0x90] sm:$0xff]  }
  0x38   : > { %v595_v27 = vadd.f32 %v2819_v9, %v460_v19  ;;  %vm722_vm6 = vcmp.ge.f32.partialorder %v594_v20, 0.0  ;;  %v850_v28 = vmul.f32 0.2, %v594_v20  ;;  %v596_v29 = vadd.f32 %v2819_v9, %v461_v21 }
  0x39   : > { %2697 = vst [vmem:[%s2842_s25 + $0x50] sm:$0xff] %v2358_v23   ;;  %v597_v30 = vadd.f32 %v2819_v9, %v462_v24  ;;  %v598_v31 = vadd.f32 %v2819_v9, %v463_v25  ;;  %v599_v32 = vadd.f32 %v2819_v9, %v464_v26  ;;  %v2107_v33 = vunpack.c.l.bf16 %v2638_v22  ;;  %v2643_v25 = vld [vmem:[%s2805_s18 + $0x98] sm:$0xff]  }
  0x3a   : > { %vm723_vm7 = vcmp.ge.f32.partialorder %v595_v27, 0.0  ;;  %v851_v34 = vmul.f32 0.2, %v595_v27  ;;  %v978_v35 = vsel %vm722_vm6, %v594_v20, %v850_v28  ;;  %vm724_vm8 = vcmp.ge.f32.partialorder %v596_v29, 0.0 }
  0x3b   : > { %vm725_vm9 = vcmp.ge.f32.partialorder %v597_v30, 0.0  ;;  %v852_v36 = vmul.f32 0.2, %v596_v29  ;;  %v853_v37 = vmul.f32 0.2, %v597_v30  ;;  %vm726_vm10 = vcmp.ge.f32.partialorder %v598_v31, 0.0 }
  0x3c   : > { %v979_v38 = vsel %vm723_vm7, %v595_v27, %v851_v34  ;;  %vm727_vm11 = vcmp.ge.f32.partialorder %v599_v32, 0.0  ;;  %v854_v39 = vmul.f32 0.2, %v598_v31  ;;  %v855_v40 = vmul.f32 0.2, %v599_v32 }
  0x3d   : > { %v2363_v42 = vpack.c.bf16 %v979_v38, %v978_v35  ;;  %v980_v43 = vsel %vm724_vm8, %v596_v29, %v852_v36  ;;  %v981_v44 = vsel %vm725_vm9, %v597_v30, %v853_v37  ;;  %v2108_v45 = vunpack.c.h.bf16 %v2638_v22  ;;  %v2644_v30 = vld [vmem:[%s2805_s18 + $0xa0] sm:$0xff]  }
  0x3e   : > { %v2368_v48 = vpack.c.bf16 %v981_v44, %v980_v43  ;;  %v982_v49 = vsel %vm726_vm10, %v598_v31, %v854_v39  ;;  %v983_v50 = vsel %vm727_vm11, %v599_v32, %v855_v40  ;;  %v465_v51 = vmul.f32 %v2107_v33, %v2810_v0 }
  0x3f   : > { %2698 = vst [vmem:[%s2842_s25 + $0x58] sm:$0xff] %v2363_v42   ;;  %v2373_v52 = vpack.c.bf16 %v983_v50, %v982_v49  ;;  %v466_v53 = vmul.f32 %v2108_v45, %v2810_v0  ;;  %v2111_v54 = vunpack.c.l.bf16 %v2639_v41  ;;  %v2112_v55 = vunpack.c.h.bf16 %v2639_v41  ;;  %v2645_v45 = vld [vmem:[%s2805_s18 + $0xa8] sm:$0xff]  }
  0x40   : > { %2699 = vst [vmem:[%s2842_s25 + $0x60] sm:$0xff] %v2368_v48   ;;  %v600_v56 = vadd.f32 %v2819_v9, %v465_v51  ;;  %v2115_v57 = vunpack.c.l.bf16 %v2640_v46  ;;  %v2116_v58 = vunpack.c.h.bf16 %v2640_v46  ;;  %v2119_v59 = vunpack.c.l.bf16 %v2641_v47 }
  0x41   : > { %2700 = vst [vmem:[%s2842_s25 + $0x68] sm:$0xff] %v2373_v52   ;;  %v601_v60 = vadd.f32 %v2819_v9, %v466_v53  ;;  %v467_v61 = vmul.f32 %v2111_v54, %v2810_v0  ;;  %v468_v62 = vmul.f32 %v2112_v55, %v2810_v0  ;;  %v2120_v63 = vunpack.c.h.bf16 %v2641_v47 }
  0x42   : > { %vm728_vm12 = vcmp.ge.f32.partialorder %v600_v56, 0.0  ;;  %v856_v1 = vmul.f32 0.2, %v600_v56  ;;  %v469_v2 = vmul.f32 %v2115_v57, %v2810_v0  ;;  %v470_v3 = vmul.f32 %v2116_v58, %v2810_v0 }
  0x43   : > { %vm729_vm13 = vcmp.ge.f32.partialorder %v601_v60, 0.0  ;;  %v857_v4 = vmul.f32 0.2, %v601_v60  ;;  %v602_v5 = vadd.f32 %v2819_v9, %v467_v61  ;;  %v603_v6 = vadd.f32 %v2819_v9, %v468_v62  ;;  %v2646_v62 = vld [vmem:[%s2805_s18 + $0xb0] sm:$0xff]  }
  0x44   : > { %v984_v7 = vsel %vm728_vm12, %v600_v56, %v856_v1  ;;  %v604_v8 = vadd.f32 %v2819_v9, %v469_v2  ;;  %v605_v10 = vadd.f32 %v2819_v9, %v470_v3  ;;  %v471_v11 = vmul.f32 %v2119_v59, %v2810_v0  ;;  %v2647_v3 = vld [vmem:[%s2805_s18 + $0xb8] sm:$0xff]  }
  0x45   : > { %v985_v12 = vsel %vm729_vm13, %v601_v60, %v857_v4  ;;  %vm730_vm14 = vcmp.ge.f32.partialorder %v602_v5, 0.0  ;;  %vm731_vm15 = vcmp.ge.f32.partialorder %v603_v6, 0.0  ;;  %v858_v13 = vmul.f32 0.2, %v602_v5 }
  0x46   : > { %v2378_v15 = vpack.c.bf16 %v985_v12, %v984_v7  ;;  %v859_v16 = vmul.f32 0.2, %v603_v6  ;;  %vm732_vm0 = vcmp.ge.f32.partialorder %v604_v8, 0.0  ;;  %vm733_vm1 = vcmp.ge.f32.partialorder %v605_v10, 0.0 }
  0x47   : > { %v986_v17 = vsel %vm730_vm14, %v602_v5, %v858_v13  ;;  %v860_v18 = vmul.f32 0.2, %v604_v8  ;;  %v861_v19 = vmul.f32 0.2, %v605_v10  ;;  %v472_v20 = vmul.f32 %v2120_v63, %v2810_v0 }
  0x48   : > { %2701 = vst [vmem:[%s2842_s25 + $0x70] sm:$0xff] %v2378_v15   ;;  %v987_v21 = vsel %vm731_vm15, %v603_v6, %v859_v16  ;;  %v606_v22 = vadd.f32 %v2819_v9, %v471_v11  ;;  %v2123_v23 = vunpack.c.l.bf16 %v2642_v14  ;;  %v2124_v24 = vunpack.c.h.bf16 %v2642_v14 }
  0x49   : > { %v2383_v26 = vpack.c.bf16 %v987_v21, %v986_v17  ;;  %v988_v27 = vsel %vm732_vm0, %v604_v8, %v860_v18  ;;  %v989_v28 = vsel %vm733_vm1, %v605_v10, %v861_v19  ;;  %v607_v29 = vadd.f32 %v2819_v9, %v472_v20  ;;  %v2648_v20 = vld [vmem:[%s2805_s18 + $0xc0] sm:$0xff]  }
  0x4a   : > { %v2388_v31 = vpack.c.bf16 %v989_v28, %v988_v27  ;;  %vm734_vm2 = vcmp.ge.f32.partialorder %v606_v22, 0.0  ;;  %v862_v32 = vmul.f32 0.2, %v606_v22  ;;  %v473_v33 = vmul.f32 %v2123_v23, %v2810_v0 }
  0x4b   : > { %2702 = vst [vmem:[%s2842_s25 + $0x78] sm:$0xff] %v2383_v26   ;;  %vm735_vm3 = vcmp.ge.f32.partialorder %v607_v29, 0.0  ;;  %v863_v34 = vmul.f32 0.2, %v607_v29  ;;  %v474_v35 = vmul.f32 %v2124_v24, %v2810_v0  ;;  %v2127_v36 = vunpack.c.l.bf16 %v2643_v25 }
  0x4c   : > { %2703 = vst [vmem:[%s2842_s25 + $0x80] sm:$0xff] %v2388_v31   ;;  %v990_v37 = vsel %vm734_vm2, %v606_v22, %v862_v32  ;;  %v608_v38 = vadd.f32 %v2819_v9, %v473_v33  ;;  %v2128_v39 = vunpack.c.h.bf16 %v2643_v25  ;;  %v2131_v40 = vunpack.c.l.bf16 %v2644_v30 }
  0x4d   : > { %v991_v41 = vsel %vm735_vm3, %v607_v29, %v863_v34  ;;  %v609_v42 = vadd.f32 %v2819_v9, %v474_v35  ;;  %v475_v43 = vmul.f32 %v2127_v36, %v2810_v0  ;;  %v2132_v44 = vunpack.c.h.bf16 %v2644_v30  ;;  %v2649_v34 = vld [vmem:[%s2805_s18 + $0xc8] sm:$0xff]  }
  0x4e   : > { %v2393_v46 = vpack.c.bf16 %v991_v41, %v990_v37  ;;  %vm736_vm4 = vcmp.ge.f32.partialorder %v608_v38, 0.0  ;;  %v864_v47 = vmul.f32 0.2, %v608_v38  ;;  %v476_v48 = vmul.f32 %v2128_v39, %v2810_v0 }
  0x4f   : > { %vm737_vm5 = vcmp.ge.f32.partialorder %v609_v42, 0.0  ;;  %v865_v49 = vmul.f32 0.2, %v609_v42  ;;  %v610_v50 = vadd.f32 %v2819_v9, %v475_v43  ;;  %v477_v51 = vmul.f32 %v2131_v40, %v2810_v0 }
  0x50   : > { %2704 = vst [vmem:[%s2842_s25 + $0x88] sm:$0xff] %v2393_v46   ;;  %v992_v52 = vsel %vm736_vm4, %v608_v38, %v864_v47  ;;  %v611_v53 = vadd.f32 %v2819_v9, %v476_v48  ;;  %v478_v54 = vmul.f32 %v2132_v44, %v2810_v0  ;;  %v2135_v55 = vunpack.c.l.bf16 %v2645_v45  ;;  %v2650_v44 = vld [vmem:[%s2805_s18 + $0xd0] sm:$0xff]  }
  0x51   : > { %v993_v56 = vsel %vm737_vm5, %v609_v42, %v865_v49  ;;  %vm738_vm6 = vcmp.ge.f32.partialorder %v610_v50, 0.0  ;;  %v866_v57 = vmul.f32 0.2, %v610_v50  ;;  %v612_v58 = vadd.f32 %v2819_v9, %v477_v51 }
  0x52   : > { %v2398_v59 = vpack.c.bf16 %v993_v56, %v992_v52  ;;  %vm739_vm7 = vcmp.ge.f32.partialorder %v611_v53, 0.0  ;;  %v867_v60 = vmul.f32 0.2, %v611_v53  ;;  %v613_v61 = vadd.f32 %v2819_v9, %v478_v54 }
  0x53   : > { %v994_v63 = vsel %vm738_vm6, %v610_v50, %v866_v57  ;;  %vm740_vm8 = vcmp.ge.f32.partialorder %v612_v58, 0.0  ;;  %v868_v1 = vmul.f32 0.2, %v612_v58  ;;  %v2136_v2 = vunpack.c.h.bf16 %v2645_v45  ;;  %v2651_v45 = vld [vmem:[%s2805_s18 + $0xd8] sm:$0xff]  }
  0x54   : > { %2705 = vst [vmem:[%s2842_s25 + $0x90] sm:$0xff] %v2398_v59   ;;  %v995_v4 = vsel %vm739_vm7, %v611_v53, %v867_v60  ;;  %vm741_vm9 = vcmp.ge.f32.partialorder %v613_v61, 0.0  ;;  %v869_v5 = vmul.f32 0.2, %v613_v61  ;;  %v479_v6 = vmul.f32 %v2135_v55, %v2810_v0 }
  0x55   : > { %v2403_v7 = vpack.c.bf16 %v995_v4, %v994_v63  ;;  %v996_v8 = vsel %vm740_vm8, %v612_v58, %v868_v1  ;;  %v480_v10 = vmul.f32 %v2136_v2, %v2810_v0  ;;  %v2139_v11 = vunpack.c.l.bf16 %v2646_v62 }
  0x56   : > { %v997_v12 = vsel %vm741_vm9, %v613_v61, %v869_v5  ;;  %v614_v13 = vadd.f32 %v2819_v9, %v479_v6  ;;  %v2140_v14 = vunpack.c.h.bf16 %v2646_v62  ;;  %v2143_v15 = vunpack.c.l.bf16 %v2647_v3 }
  0x57   : > { %2706 = vst [vmem:[%s2842_s25 + $0x98] sm:$0xff] %v2403_v7   ;;  %v2408_v16 = vpack.c.bf16 %v997_v12, %v996_v8  ;;  %v615_v17 = vadd.f32 %v2819_v9, %v480_v10  ;;  %v481_v18 = vmul.f32 %v2139_v11, %v2810_v0  ;;  %v2144_v19 = vunpack.c.h.bf16 %v2647_v3  ;;  %v2652_v12 = vld [vmem:[%s2805_s18 + $0xe0] sm:$0xff]  }
  0x58   : > { %vm742_vm10 = vcmp.ge.f32.partialorder %v614_v13, 0.0  ;;  %v870_v21 = vmul.f32 0.2, %v614_v13  ;;  %v482_v22 = vmul.f32 %v2140_v14, %v2810_v0  ;;  %v483_v23 = vmul.f32 %v2143_v15, %v2810_v0 }
  0x59   : > { %2707 = vst [vmem:[%s2842_s25 + $0xa0] sm:$0xff] %v2408_v16   ;;  %vm743_vm11 = vcmp.ge.f32.partialorder %v615_v17, 0.0  ;;  %v871_v24 = vmul.f32 0.2, %v615_v17  ;;  %v616_v25 = vadd.f32 %v2819_v9, %v481_v18  ;;  %v484_v26 = vmul.f32 %v2144_v19, %v2810_v0  ;;  %v2653_v16 = vld [vmem:[%s2805_s18 + $0xe8] sm:$0xff]  }
  0x5a   : > { %v998_v27 = vsel %vm742_vm10, %v614_v13, %v870_v21  ;;  %v617_v28 = vadd.f32 %v2819_v9, %v482_v22  ;;  %v618_v29 = vadd.f32 %v2819_v9, %v483_v23  ;;  %v2147_v30 = vunpack.c.l.bf16 %v2648_v20 }
  0x5b   : > { %v999_v31 = vsel %vm743_vm11, %v615_v17, %v871_v24  ;;  %vm744_vm12 = vcmp.ge.f32.partialorder %v616_v25, 0.0  ;;  %v872_v32 = vmul.f32 0.2, %v616_v25  ;;  %v619_v33 = vadd.f32 %v2819_v9, %v484_v26 }
  0x5c   : > { %v2413_v35 = vpack.c.bf16 %v999_v31, %v998_v27  ;;  %vm745_vm13 = vcmp.ge.f32.partialorder %v617_v28, 0.0  ;;  %v873_v36 = vmul.f32 0.2, %v617_v28  ;;  %vm746_vm14 = vcmp.ge.f32.partialorder %v618_v29, 0.0 }
  0x5d   : > { %v1000_v37 = vsel %vm744_vm12, %v616_v25, %v872_v32  ;;  %vm747_vm15 = vcmp.ge.f32.partialorder %v619_v33, 0.0  ;;  %v874_v38 = vmul.f32 0.2, %v618_v29  ;;  %v875_v39 = vmul.f32 0.2, %v619_v33 }
  0x5e   : > { %2708 = vst [vmem:[%s2842_s25 + $0xa8] sm:$0xff] %v2413_v35   ;;  %v1001_v40 = vsel %vm745_vm13, %v617_v28, %v873_v36  ;;  %v2148_v41 = vunpack.c.h.bf16 %v2648_v20  ;;  %v485_v42 = vmul.f32 %v2147_v30, %v2810_v0  ;;  %v2151_v43 = vunpack.c.l.bf16 %v2649_v34  ;;  %v2654_v28 = vld [vmem:[%s2805_s18 + $0xf0] sm:$0xff]  }
  0x5f   : > { %v2418_v46 = vpack.c.bf16 %v1001_v40, %v1000_v37  ;;  %v1002_v47 = vsel %vm746_vm14, %v618_v29, %v874_v38  ;;  %v1003_v48 = vsel %vm747_vm15, %v619_v33, %v875_v39  ;;  %v2152_v49 = vunpack.c.h.bf16 %v2649_v34 }
  0x60   : > { %v2423_v50 = vpack.c.bf16 %v1003_v48, %v1002_v47  ;;  %v486_v51 = vmul.f32 %v2148_v41, %v2810_v0  ;;  %v620_v52 = vadd.f32 %v2819_v9, %v485_v42  ;;  %v487_v53 = vmul.f32 %v2151_v43, %v2810_v0  ;;  %v2655_v47 = vld [vmem:[%s2805_s18 + $0xf8] sm:$0xff]  }
  0x61   : > { %2709 = vst [vmem:[%s2842_s25 + $0xb0] sm:$0xff] %v2418_v46   ;;  %v488_v54 = vmul.f32 %v2152_v49, %v2810_v0  ;;  %v2155_v55 = vunpack.c.l.bf16 %v2650_v44  ;;  %v2156_v56 = vunpack.c.h.bf16 %v2650_v44  ;;  %v2159_v57 = vunpack.c.l.bf16 %v2651_v45 }
  0x62   : > { %2710 = vst [vmem:[%s2842_s25 + $0xb8] sm:$0xff] %v2423_v50   ;;  %v621_v58 = vadd.f32 %v2819_v9, %v486_v51  ;;  %vm748_vm0 = vcmp.ge.f32.partialorder %v620_v52, 0.0  ;;  %v876_v59 = vmul.f32 0.2, %v620_v52  ;;  %v622_v60 = vadd.f32 %v2819_v9, %v487_v53 }
  0x63   : > { %v623_v61 = vadd.f32 %v2819_v9, %v488_v54  ;;  %v489_v62 = vmul.f32 %v2155_v55, %v2810_v0  ;;  %v490_v63 = vmul.f32 %v2156_v56, %v2810_v0  ;;  %v2160_v1 = vunpack.c.h.bf16 %v2651_v45  ;;  %v2656_v56 = vld [vmem:[%s2805_s18 + $0x100] sm:$0xff]  }
  0x64   : > { %vm749_vm1 = vcmp.ge.f32.partialorder %v621_v58, 0.0  ;;  %v877_v2 = vmul.f32 0.2, %v621_v58  ;;  %v1004_v3 = vsel %vm748_vm0, %v620_v52, %v876_v59  ;;  %vm750_vm2 = vcmp.ge.f32.partialorder %v622_v60, 0.0 }
  0x65   : > { %vm751_vm3 = vcmp.ge.f32.partialorder %v623_v61, 0.0  ;;  %v878_v4 = vmul.f32 0.2, %v622_v60  ;;  %v879_v5 = vmul.f32 0.2, %v623_v61  ;;  %v624_v6 = vadd.f32 %v2819_v9, %v489_v62 }
  0x66   : > { %v1005_v7 = vsel %vm749_vm1, %v621_v58, %v877_v2  ;;  %v625_v8 = vadd.f32 %v2819_v9, %v490_v63  ;;  %v491_v10 = vmul.f32 %v2159_v57, %v2810_v0  ;;  %v492_v11 = vmul.f32 %v2160_v1, %v2810_v0 }
  0x67   : > { %v2428_v13 = vpack.c.bf16 %v1005_v7, %v1004_v3  ;;  %v1006_v14 = vsel %vm750_vm2, %v622_v60, %v878_v4  ;;  %v1007_v15 = vsel %vm751_vm3, %v623_v61, %v879_v5  ;;  %vm752_vm4 = vcmp.ge.f32.partialorder %v624_v6, 0.0  ;;  %v2657_v61 = vld [vmem:[%s2805_s18 + $0x108] sm:$0xff]  }
  0x68   : > { %v2433_v17 = vpack.c.bf16 %v1007_v15, %v1006_v14  ;;  %vm753_vm5 = vcmp.ge.f32.partialorder %v625_v8, 0.0  ;;  %v880_v18 = vmul.f32 0.2, %v624_v6  ;;  %v881_v19 = vmul.f32 0.2, %v625_v8  ;;  %v2658_v14 = vld [vmem:[%s2805_s18 + $0x110] sm:$0xff]  }
  0x69   : > { %2711 = vst [vmem:[%s2842_s25 + $0xc0] sm:$0xff] %v2428_v13   ;;  %v626_v20 = vadd.f32 %v2819_v9, %v491_v10  ;;  %v627_v21 = vadd.f32 %v2819_v9, %v492_v11  ;;  %v2163_v22 = vunpack.c.l.bf16 %v2652_v12  ;;  %v2164_v23 = vunpack.c.h.bf16 %v2652_v12 }
  0x6a   : > { %2712 = vst [vmem:[%s2842_s25 + $0xc8] sm:$0xff] %v2433_v17   ;;  %v1008_v24 = vsel %vm752_vm4, %v624_v6, %v880_v18  ;;  %v1009_v25 = vsel %vm753_vm5, %v625_v8, %v881_v19  ;;  %v2167_v26 = vunpack.c.l.bf16 %v2653_v16  ;;  %v2168_v27 = vunpack.c.h.bf16 %v2653_v16 }
  0x6b   : > { %v2438_v29 = vpack.c.bf16 %v1009_v25, %v1008_v24  ;;  %vm754_vm6 = vcmp.ge.f32.partialorder %v626_v20, 0.0  ;;  %vm755_vm7 = vcmp.ge.f32.partialorder %v627_v21, 0.0  ;;  %v882_v30 = vmul.f32 0.2, %v626_v20 }
  0x6c   : > { %v883_v31 = vmul.f32 0.2, %v627_v21  ;;  %v493_v32 = vmul.f32 %v2163_v22, %v2810_v0  ;;  %v494_v33 = vmul.f32 %v2164_v23, %v2810_v0  ;;  %v495_v34 = vmul.f32 %v2167_v26, %v2810_v0 }
  0x6d   : > { %2713 = vst [vmem:[%s2842_s25 + $0xd0] sm:$0xff] %v2438_v29   ;;  %v1010_v35 = vsel %vm754_vm6, %v626_v20, %v882_v30  ;;  %v496_v36 = vmul.f32 %v2168_v27, %v2810_v0  ;;  %v2171_v37 = vunpack.c.l.bf16 %v2654_v28  ;;  %v2172_v38 = vunpack.c.h.bf16 %v2654_v28 }
  0x6e   : > { %v1011_v39 = vsel %vm755_vm7, %v627_v21, %v883_v31  ;;  %v628_v40 = vadd.f32 %v2819_v9, %v493_v32  ;;  %v629_v41 = vadd.f32 %v2819_v9, %v494_v33  ;;  %v630_v42 = vadd.f32 %v2819_v9, %v495_v34  ;;  %v2659_v32 = vld [vmem:[%s2805_s18 + $0x118] sm:$0xff]  }
  0x6f   : > { %v2443_v43 = vpack.c.bf16 %v1011_v39, %v1010_v35  ;;  %v631_v44 = vadd.f32 %v2819_v9, %v496_v36  ;;  %v497_v45 = vmul.f32 %v2171_v37, %v2810_v0  ;;  %v498_v46 = vmul.f32 %v2172_v38, %v2810_v0  ;;  %v2660_v36 = vld [vmem:[%s2805_s18 + $0x120] sm:$0xff]   ;;  %v2661_v37 = vld [vmem:[%s2805_s18 + $0x128] sm:$0xff]  }
  0x70   : > { %vm756_vm8 = vcmp.ge.f32.partialorder %v628_v40, 0.0  ;;  %vm757_vm9 = vcmp.ge.f32.partialorder %v629_v41, 0.0  ;;  %v884_v48 = vmul.f32 0.2, %v628_v40  ;;  %v885_v49 = vmul.f32 0.2, %v629_v41 }
  0x71   : > { %2714 = vst [vmem:[%s2842_s25 + $0xd8] sm:$0xff] %v2443_v43   ;;  %vm758_vm10 = vcmp.ge.f32.partialorder %v630_v42, 0.0  ;;  %vm759_vm11 = vcmp.ge.f32.partialorder %v631_v44, 0.0  ;;  %v886_v50 = vmul.f32 0.2, %v630_v42  ;;  %v632_v54 = vadd.f32 %v2819_v9, %v497_v45 }
  0x72   : > { %v887_v51 = vmul.f32 0.2, %v631_v44  ;;  %v1012_v52 = vsel %vm756_vm8, %v628_v40, %v884_v48  ;;  %v1013_v53 = vsel %vm757_vm9, %v629_v41, %v885_v49  ;;  %v633_v55 = vadd.f32 %v2819_v9, %v498_v46  ;;  %v3033_v41 = vld [vmem:[%s3223_s1] ss:$0 sm:$0xff] }
  0x73   : > { %v2448_v57 = vpack.c.bf16 %v1013_v53, %v1012_v52  ;;  %v1014_v58 = vsel %vm758_vm10, %v630_v42, %v886_v50  ;;  %v2175_v60 = vunpack.c.l.bf16 %v2655_v47  ;;  %vm760_vm12 = vcmp.ge.f32.partialorder %v632_v54, 0.0 }
  0x74   : > { %v1015_v59 = vsel %vm759_vm11, %v631_v44, %v887_v51  ;;  %vm761_vm13 = vcmp.ge.f32.partialorder %v633_v55, 0.0  ;;  %v888_v63 = vmul.f32 0.2, %v632_v54  ;;  %v889_v1 = vmul.f32 0.2, %v633_v55 }
  0x75   : > { %v2453_v62 = vpack.c.bf16 %v1015_v59, %v1014_v58  ;;  %2715 = vst [vmem:[%s2842_s25 + $0xe0] sm:$0xff] %v2448_v57   ;;  %v2176_v2 = vunpack.c.h.bf16 %v2655_v47  ;;  %v499_v3 = vmul.f32 %v2175_v60, %v2810_v0  ;;  %v2179_v4 = vunpack.c.l.bf16 %v2656_v56  ;;  %v3042_v47 = vld [vmem:[%s3224_s2] ss:$0 sm:$0xff] }
  0x76   : > { %v1016_v5 = vsel %vm760_vm12, %v632_v54, %v888_v63  ;;  %v2180_v6 = vunpack.c.h.bf16 %v2656_v56  ;;  %v2183_v7 = vunpack.c.l.bf16 %v2657_v61  ;;  %v2184_v8 = vunpack.c.h.bf16 %v2657_v61 }
  0x77   : > { %2716 = vst [vmem:[%s2842_s25 + $0xe8] sm:$0xff] %v2453_v62   ;;  %v1017_v10 = vsel %vm761_vm13, %v633_v55, %v889_v1  ;;  %v500_v11 = vmul.f32 %v2176_v2, %v2810_v0  ;;  %v634_v12 = vadd.f32 %v2819_v9, %v499_v3  ;;  %v501_v13 = vmul.f32 %v2179_v4, %v2810_v0 }
  0x78   : > { %v2458_v15 = vpack.c.bf16 %v1017_v10, %v1016_v5  ;;  %v502_v16 = vmul.f32 %v2180_v6, %v2810_v0  ;;  %v503_v17 = vmul.f32 %v2183_v7, %v2810_v0  ;;  %v504_v18 = vmul.f32 %v2184_v8, %v2810_v0  ;;  %v2662_v5 = vld [vmem:[%s2805_s18 + $0x130] sm:$0xff]  }
  0x79   : > { %v635_v19 = vadd.f32 %v2819_v9, %v500_v11  ;;  %vm762_vm14 = vcmp.ge.f32.partialorder %v634_v12, 0.0  ;;  %v890_v20 = vmul.f32 0.2, %v634_v12  ;;  %v636_v21 = vadd.f32 %v2819_v9, %v501_v13 }
  0x7a   : > { %2717 = vst [vmem:[%s2842_s25 + $0xf0] sm:$0xff] %v2458_v15   ;;  %v637_v22 = vadd.f32 %v2819_v9, %v502_v16  ;;  %v638_v23 = vadd.f32 %v2819_v9, %v503_v17  ;;  %v639_v24 = vadd.f32 %v2819_v9, %v504_v18  ;;  %v2187_v25 = vunpack.c.l.bf16 %v2658_v14  ;;  %v2663_v17 = vld [vmem:[%s2805_s18 + $0x138] sm:$0xff]  }
  0x7b   : > { %vm763_vm15 = vcmp.ge.f32.partialorder %v635_v19, 0.0  ;;  %v891_v26 = vmul.f32 0.2, %v635_v19  ;;  %v1018_v27 = vsel %vm762_vm14, %v634_v12, %v890_v20  ;;  %vm764_vm0 = vcmp.ge.f32.partialorder %v636_v21, 0.0 }
  0x7c   : > { %vm765_vm1 = vcmp.ge.f32.partialorder %v637_v22, 0.0  ;;  %v892_v0 = vmul.f32 0.2, %v636_v21  ;;  %v893_v28 = vmul.f32 0.2, %v637_v22  ;;  %vm766_vm2 = vcmp.ge.f32.partialorder %v638_v23, 0.0 }
  0x7d   : > { %v1019_v29 = vsel %vm763_vm15, %v635_v19, %v891_v26  ;;  %vm767_vm3 = vcmp.ge.f32.partialorder %v639_v24, 0.0  ;;  %v894_v30 = vmul.f32 0.2, %v638_v23  ;;  %v895_v31 = vmul.f32 0.2, %v639_v24 }
  0x7e   : > { %v2463_v33 = vpack.c.bf16 %v1019_v29, %v1018_v27  ;;  %v1020_v9 = vsel %vm764_vm0, %v636_v21, %v892_v0  ;;  %v1021_v34 = vsel %vm765_vm1, %v637_v22, %v893_v28  ;;  %v2188_v35 = vunpack.c.h.bf16 %v2658_v14  ;;  %v2664_v22 = vld [vmem:[%s2805_s18 + $0x140] sm:$0xff]  }
  0x7f   : > { %v2468_v38 = vpack.c.bf16 %v1021_v34, %v1020_v9  ;;  %v1022_v39 = vsel %vm766_vm2, %v638_v23, %v894_v30  ;;  %v1023_v40 = vsel %vm767_vm3, %v639_v24, %v895_v31  ;;  %v505_v42 = vmul.f32 %v3033_v41, %v2187_v25 }
  0x80   : > { %2718 = vst [vmem:[%s2842_s25 + $0xf8] sm:$0xff] %v2463_v33   ;;  %v2473_v43 = vpack.c.bf16 %v1023_v40, %v1022_v39  ;;  %v506_v44 = vmul.f32 %v3033_v41, %v2188_v35  ;;  %v2191_v45 = vunpack.c.l.bf16 %v2659_v32  ;;  %v2192_v46 = vunpack.c.h.bf16 %v2659_v32  ;;  %v2665_v35 = vld [vmem:[%s2805_s18 + $0x148] sm:$0xff]  }
  0x81   : > { %2719 = vst [vmem:[%s2842_s25 + $0x100] sm:$0xff] %v2468_v38   ;;  %v640_v48 = vadd.f32 %v3042_v47, %v505_v42  ;;  %v2195_v49 = vunpack.c.l.bf16 %v2660_v36  ;;  %v2196_v50 = vunpack.c.h.bf16 %v2660_v36  ;;  %v2199_v51 = vunpack.c.l.bf16 %v2661_v37 }
  0x82   : > { %2720 = vst [vmem:[%s2842_s25 + $0x108] sm:$0xff] %v2473_v43   ;;  %v641_v52 = vadd.f32 %v3042_v47, %v506_v44  ;;  %v507_v53 = vmul.f32 %v3033_v41, %v2191_v45  ;;  %v508_v54 = vmul.f32 %v3033_v41, %v2192_v46  ;;  %v2200_v55 = vunpack.c.h.bf16 %v2661_v37 }
  0x83   : > { %vm768_vm4 = vcmp.ge.f32.partialorder %v640_v48, 0.0  ;;  %v896_v56 = vmul.f32 0.2, %v640_v48  ;;  %v509_v57 = vmul.f32 %v3033_v41, %v2195_v49  ;;  %v510_v58 = vmul.f32 %v3033_v41, %v2196_v50 }
  0x84   : > { %vm769_vm5 = vcmp.ge.f32.partialorder %v641_v52, 0.0  ;;  %v897_v59 = vmul.f32 0.2, %v641_v52  ;;  %v642_v60 = vadd.f32 %v3042_v47, %v507_v53  ;;  %v643_v61 = vadd.f32 %v3042_v47, %v508_v54  ;;  %v2666_v54 = vld [vmem:[%s2805_s18 + $0x150] sm:$0xff]  }
  0x85   : > { %v1024_v62 = vsel %vm768_vm4, %v640_v48, %v896_v56  ;;  %v644_v63 = vadd.f32 %v3042_v47, %v509_v57  ;;  %v645_v1 = vadd.f32 %v3042_v47, %v510_v58  ;;  %v511_v2 = vmul.f32 %v3033_v41, %v2199_v51  ;;  %v2667_v58 = vld [vmem:[%s2805_s18 + $0x158] sm:$0xff]  }
  0x86   : > { %v1025_v3 = vsel %vm769_vm5, %v641_v52, %v897_v59  ;;  %vm770_vm6 = vcmp.ge.f32.partialorder %v642_v60, 0.0  ;;  %vm771_vm7 = vcmp.ge.f32.partialorder %v643_v61, 0.0  ;;  %v898_v4 = vmul.f32 0.2, %v642_v60 }
  0x87   : > { %v2478_v6 = vpack.c.bf16 %v1025_v3, %v1024_v62  ;;  %v899_v7 = vmul.f32 0.2, %v643_v61  ;;  %vm772_vm8 = vcmp.ge.f32.partialorder %v644_v63, 0.0  ;;  %vm773_vm9 = vcmp.ge.f32.partialorder %v645_v1, 0.0 }
  0x88   : > { %v1026_v8 = vsel %vm770_vm6, %v642_v60, %v898_v4  ;;  %v900_v10 = vmul.f32 0.2, %v644_v63  ;;  %v901_v11 = vmul.f32 0.2, %v645_v1  ;;  %v512_v12 = vmul.f32 %v3033_v41, %v2200_v55 }
  0x89   : > { %2721 = vst [vmem:[%s2842_s25 + $0x110] sm:$0xff] %v2478_v6   ;;  %v1027_v13 = vsel %vm771_vm7, %v643_v61, %v899_v7  ;;  %v646_v14 = vadd.f32 %v3042_v47, %v511_v2  ;;  %v2203_v15 = vunpack.c.l.bf16 %v2662_v5  ;;  %v2204_v16 = vunpack.c.h.bf16 %v2662_v5 }
  0x8a   : > { %v2483_v18 = vpack.c.bf16 %v1027_v13, %v1026_v8  ;;  %v1028_v19 = vsel %vm772_vm8, %v644_v63, %v900_v10  ;;  %v1029_v20 = vsel %vm773_vm9, %v645_v1, %v901_v11  ;;  %v647_v21 = vadd.f32 %v3042_v47, %v512_v12  ;;  %v2668_v12 = vld [vmem:[%s2805_s18 + $0x160] sm:$0xff]  }
  0x8b   : > { %v2488_v23 = vpack.c.bf16 %v1029_v20, %v1028_v19  ;;  %vm774_vm10 = vcmp.ge.f32.partialorder %v646_v14, 0.0  ;;  %v902_v24 = vmul.f32 0.2, %v646_v14  ;;  %v513_v25 = vmul.f32 %v3033_v41, %v2203_v15 }
  0x8c   : > { %2722 = vst [vmem:[%s2842_s25 + $0x118] sm:$0xff] %v2483_v18   ;;  %vm775_vm11 = vcmp.ge.f32.partialorder %v647_v21, 0.0  ;;  %v903_v26 = vmul.f32 0.2, %v647_v21  ;;  %v514_v27 = vmul.f32 %v3033_v41, %v2204_v16  ;;  %v2207_v0 = vunpack.c.l.bf16 %v2663_v17 }
  0x8d   : > { %2723 = vst [vmem:[%s2842_s25 + $0x120] sm:$0xff] %v2488_v23   ;;  %v1030_v28 = vsel %vm774_vm10, %v646_v14, %v902_v24  ;;  %v648_v29 = vadd.f32 %v3042_v47, %v513_v25  ;;  %v2208_v30 = vunpack.c.h.bf16 %v2663_v17  ;;  %v2211_v31 = vunpack.c.l.bf16 %v2664_v22 }
  0x8e   : > { %v1031_v32 = vsel %vm775_vm11, %v647_v21, %v903_v26  ;;  %v649_v33 = vadd.f32 %v3042_v47, %v514_v27  ;;  %v515_v9 = vmul.f32 %v3033_v41, %v2207_v0  ;;  %v2212_v34 = vunpack.c.h.bf16 %v2664_v22  ;;  %v2669_v26 = vld [vmem:[%s2805_s18 + $0x168] sm:$0xff]  }
  0x8f   : > { %v2493_v36 = vpack.c.bf16 %v1031_v32, %v1030_v28  ;;  %vm776_vm12 = vcmp.ge.f32.partialorder %v648_v29, 0.0  ;;  %v904_v37 = vmul.f32 0.2, %v648_v29  ;;  %v516_v38 = vmul.f32 %v3033_v41, %v2208_v30 }
  0x90   : > { %vm777_vm13 = vcmp.ge.f32.partialorder %v649_v33, 0.0  ;;  %v905_v39 = vmul.f32 0.2, %v649_v33  ;;  %v650_v40 = vadd.f32 %v3042_v47, %v515_v9  ;;  %v517_v42 = vmul.f32 %v3033_v41, %v2211_v31 }
  0x91   : > { %2724 = vst [vmem:[%s2842_s25 + $0x128] sm:$0xff] %v2493_v36   ;;  %v1032_v43 = vsel %vm776_vm12, %v648_v29, %v904_v37  ;;  %v651_v44 = vadd.f32 %v3042_v47, %v516_v38  ;;  %v518_v45 = vmul.f32 %v3033_v41, %v2212_v34  ;;  %v2215_v46 = vunpack.c.l.bf16 %v2665_v35  ;;  %v2670_v34 = vld [vmem:[%s2805_s18 + $0x170] sm:$0xff]  }
  0x92   : > { %v1033_v48 = vsel %vm777_vm13, %v649_v33, %v905_v39  ;;  %vm778_vm14 = vcmp.ge.f32.partialorder %v650_v40, 0.0  ;;  %v906_v49 = vmul.f32 0.2, %v650_v40  ;;  %v652_v50 = vadd.f32 %v3042_v47, %v517_v42 }
  0x93   : > { %v2498_v51 = vpack.c.bf16 %v1033_v48, %v1032_v43  ;;  %vm779_vm15 = vcmp.ge.f32.partialorder %v651_v44, 0.0  ;;  %v907_v52 = vmul.f32 0.2, %v651_v44  ;;  %v653_v53 = vadd.f32 %v3042_v47, %v518_v45 }
  0x94   : > { %v1034_v55 = vsel %vm778_vm14, %v650_v40, %v906_v49  ;;  %vm780_vm0 = vcmp.ge.f32.partialorder %v652_v50, 0.0  ;;  %v908_v56 = vmul.f32 0.2, %v652_v50  ;;  %v2216_v57 = vunpack.c.h.bf16 %v2665_v35  ;;  %v2671_v35 = vld [vmem:[%s2805_s18 + $0x178] sm:$0xff]  }
  0x95   : > { %2725 = vst [vmem:[%s2842_s25 + $0x130] sm:$0xff] %v2498_v51   ;;  %v1035_v59 = vsel %vm779_vm15, %v651_v44, %v907_v52  ;;  %vm781_vm1 = vcmp.ge.f32.partialorder %v653_v53, 0.0  ;;  %v909_v60 = vmul.f32 0.2, %v653_v53  ;;  %v519_v61 = vmul.f32 %v3033_v41, %v2215_v46 }
  0x96   : > { %v2503_v62 = vpack.c.bf16 %v1035_v59, %v1034_v55  ;;  %v1036_v63 = vsel %vm780_vm0, %v652_v50, %v908_v56  ;;  %v520_v1 = vmul.f32 %v3033_v41, %v2216_v57  ;;  %v2219_v2 = vunpack.c.l.bf16 %v2666_v54 }
  0x97   : > { %v1037_v3 = vsel %vm781_vm1, %v653_v53, %v909_v60  ;;  %v654_v4 = vadd.f32 %v3042_v47, %v519_v61  ;;  %v2220_v5 = vunpack.c.h.bf16 %v2666_v54  ;;  %v2223_v6 = vunpack.c.l.bf16 %v2667_v58 }
  0x98   : > { %2726 = vst [vmem:[%s2842_s25 + $0x138] sm:$0xff] %v2503_v62   ;;  %v2508_v7 = vpack.c.bf16 %v1037_v3, %v1036_v63  ;;  %v655_v8 = vadd.f32 %v3042_v47, %v520_v1  ;;  %v521_v10 = vmul.f32 %v3033_v41, %v2219_v2  ;;  %v2224_v11 = vunpack.c.h.bf16 %v2667_v58  ;;  %v2672_v3 = vld [vmem:[%s2805_s18 + $0x180] sm:$0xff]  }
  0x99   : > { %vm782_vm2 = vcmp.ge.f32.partialorder %v654_v4, 0.0  ;;  %v910_v13 = vmul.f32 0.2, %v654_v4  ;;  %v522_v14 = vmul.f32 %v3033_v41, %v2220_v5  ;;  %v523_v15 = vmul.f32 %v3033_v41, %v2223_v6 }
  0x9a   : > { %2727 = vst [vmem:[%s2842_s25 + $0x140] sm:$0xff] %v2508_v7   ;;  %vm783_vm3 = vcmp.ge.f32.partialorder %v655_v8, 0.0  ;;  %v911_v16 = vmul.f32 0.2, %v655_v8  ;;  %v656_v17 = vadd.f32 %v3042_v47, %v521_v10  ;;  %v524_v18 = vmul.f32 %v3033_v41, %v2224_v11  ;;  %v2673_v7 = vld [vmem:[%s2805_s18 + $0x188] sm:$0xff]  }
  0x9b   : > { %v1038_v19 = vsel %vm782_vm2, %v654_v4, %v910_v13  ;;  %v657_v20 = vadd.f32 %v3042_v47, %v522_v14  ;;  %v658_v21 = vadd.f32 %v3042_v47, %v523_v15  ;;  %v2227_v22 = vunpack.c.l.bf16 %v2668_v12 }
  0x9c   : > { %v1039_v23 = vsel %vm783_vm3, %v655_v8, %v911_v16  ;;  %vm784_vm4 = vcmp.ge.f32.partialorder %v656_v17, 0.0  ;;  %v912_v24 = vmul.f32 0.2, %v656_v17  ;;  %v659_v25 = vadd.f32 %v3042_v47, %v524_v18 }
  0x9d   : > { %v2513_v27 = vpack.c.bf16 %v1039_v23, %v1038_v19  ;;  %vm785_vm5 = vcmp.ge.f32.partialorder %v657_v20, 0.0  ;;  %v913_v0 = vmul.f32 0.2, %v657_v20  ;;  %vm786_vm6 = vcmp.ge.f32.partialorder %v658_v21, 0.0 }
  0x9e   : > { %v1040_v28 = vsel %vm784_vm4, %v656_v17, %v912_v24  ;;  %vm787_vm7 = vcmp.ge.f32.partialorder %v659_v25, 0.0  ;;  %v914_v29 = vmul.f32 0.2, %v658_v21  ;;  %v915_v30 = vmul.f32 0.2, %v659_v25 }
  0x9f   : > { %2728 = vst [vmem:[%s2842_s25 + $0x148] sm:$0xff] %v2513_v27   ;;  %v1041_v31 = vsel %vm785_vm5, %v657_v20, %v913_v0  ;;  %v2228_v32 = vunpack.c.h.bf16 %v2668_v12  ;;  %v525_v33 = vmul.f32 %v3033_v41, %v2227_v22  ;;  %v2231_v9 = vunpack.c.l.bf16 %v2669_v26  ;;  %v2674_v20 = vld [vmem:[%s2805_s18 + $0x190] sm:$0xff]  }
  0xa0   : > { %v2518_v36 = vpack.c.bf16 %v1041_v31, %v1040_v28  ;;  %v1042_v37 = vsel %vm786_vm6, %v658_v21, %v914_v29  ;;  %v1043_v38 = vsel %vm787_vm7, %v659_v25, %v915_v30  ;;  %v2232_v39 = vunpack.c.h.bf16 %v2669_v26 }
  0xa1   : > { %v2523_v40 = vpack.c.bf16 %v1043_v38, %v1042_v37  ;;  %v526_v42 = vmul.f32 %v3033_v41, %v2228_v32  ;;  %v660_v43 = vadd.f32 %v3042_v47, %v525_v33  ;;  %v527_v44 = vmul.f32 %v3033_v41, %v2231_v9  ;;  %v2675_v37 = vld [vmem:[%s2805_s18 + $0x198] sm:$0xff]  }
  0xa2   : > { %2729 = vst [vmem:[%s2842_s25 + $0x150] sm:$0xff] %v2518_v36   ;;  %v528_v45 = vmul.f32 %v3033_v41, %v2232_v39  ;;  %v2235_v46 = vunpack.c.l.bf16 %v2670_v34  ;;  %v2236_v48 = vunpack.c.h.bf16 %v2670_v34  ;;  %v2239_v49 = vunpack.c.l.bf16 %v2671_v35 }
  0xa3   : > { %2730 = vst [vmem:[%s2842_s25 + $0x158] sm:$0xff] %v2523_v40   ;;  %v661_v50 = vadd.f32 %v3042_v47, %v526_v42  ;;  %vm788_vm8 = vcmp.ge.f32.partialorder %v660_v43, 0.0  ;;  %v916_v51 = vmul.f32 0.2, %v660_v43  ;;  %v662_v52 = vadd.f32 %v3042_v47, %v527_v44 }
  0xa4   : > { %v663_v53 = vadd.f32 %v3042_v47, %v528_v45  ;;  %v529_v54 = vmul.f32 %v3033_v41, %v2235_v46  ;;  %v530_v55 = vmul.f32 %v3033_v41, %v2236_v48  ;;  %v2240_v56 = vunpack.c.h.bf16 %v2671_v35  ;;  %v2676_v48 = vld [vmem:[%s2805_s18 + $0x1a0] sm:$0xff]  }
  0xa5   : > { %vm789_vm9 = vcmp.ge.f32.partialorder %v661_v50, 0.0  ;;  %v917_v57 = vmul.f32 0.2, %v661_v50  ;;  %v1044_v58 = vsel %vm788_vm8, %v660_v43, %v916_v51  ;;  %vm790_vm10 = vcmp.ge.f32.partialorder %v662_v52, 0.0 }
  0xa6   : > { %vm791_vm11 = vcmp.ge.f32.partialorder %v663_v53, 0.0  ;;  %v918_v59 = vmul.f32 0.2, %v662_v52  ;;  %v919_v60 = vmul.f32 0.2, %v663_v53  ;;  %v664_v61 = vadd.f32 %v3042_v47, %v529_v54 }
  0xa7   : > { %v1045_v62 = vsel %vm789_vm9, %v661_v50, %v917_v57  ;;  %v665_v63 = vadd.f32 %v3042_v47, %v530_v55  ;;  %v531_v1 = vmul.f32 %v3033_v41, %v2239_v49  ;;  %v532_v2 = vmul.f32 %v3033_v41, %v2240_v56 }
  0xa8   : > { %v2528_v4 = vpack.c.bf16 %v1045_v62, %v1044_v58  ;;  %v1046_v5 = vsel %vm790_vm10, %v662_v52, %v918_v59  ;;  %v1047_v6 = vsel %vm791_vm11, %v663_v53, %v919_v60  ;;  %vm792_vm12 = vcmp.ge.f32.partialorder %v664_v61, 0.0  ;;  %v2677_v53 = vld [vmem:[%s2805_s18 + $0x1a8] sm:$0xff]  }
  0xa9   : > { %v2533_v8 = vpack.c.bf16 %v1047_v6, %v1046_v5  ;;  %vm793_vm13 = vcmp.ge.f32.partialorder %v665_v63, 0.0  ;;  %v920_v10 = vmul.f32 0.2, %v664_v61  ;;  %v921_v11 = vmul.f32 0.2, %v665_v63  ;;  %v2678_v5 = vld [vmem:[%s2805_s18 + $0x1b0] sm:$0xff]  }
  0xaa   : > { %2731 = vst [vmem:[%s2842_s25 + $0x160] sm:$0xff] %v2528_v4   ;;  %v666_v12 = vadd.f32 %v3042_v47, %v531_v1  ;;  %v667_v13 = vadd.f32 %v3042_v47, %v532_v2  ;;  %v2243_v14 = vunpack.c.l.bf16 %v2672_v3  ;;  %v2244_v15 = vunpack.c.h.bf16 %v2672_v3 }
  0xab   : > { %2732 = vst [vmem:[%s2842_s25 + $0x168] sm:$0xff] %v2533_v8   ;;  %v1048_v16 = vsel %vm792_vm12, %v664_v61, %v920_v10  ;;  %v1049_v17 = vsel %vm793_vm13, %v665_v63, %v921_v11  ;;  %v2247_v18 = vunpack.c.l.bf16 %v2673_v7  ;;  %v2248_v19 = vunpack.c.h.bf16 %v2673_v7 }
  0xac   : > { %v2538_v21 = vpack.c.bf16 %v1049_v17, %v1048_v16  ;;  %vm794_vm14 = vcmp.ge.f32.partialorder %v666_v12, 0.0  ;;  %vm795_vm15 = vcmp.ge.f32.partialorder %v667_v13, 0.0  ;;  %v922_v22 = vmul.f32 0.2, %v666_v12 }
  0xad   : > { %v923_v23 = vmul.f32 0.2, %v667_v13  ;;  %v533_v24 = vmul.f32 %v3033_v41, %v2243_v14  ;;  %v534_v25 = vmul.f32 %v3033_v41, %v2244_v15  ;;  %v535_v26 = vmul.f32 %v3033_v41, %v2247_v18 }
  0xae   : > { %2733 = vst [vmem:[%s2842_s25 + $0x170] sm:$0xff] %v2538_v21   ;;  %v1050_v27 = vsel %vm794_vm14, %v666_v12, %v922_v22  ;;  %v536_v0 = vmul.f32 %v3033_v41, %v2248_v19  ;;  %v2251_v28 = vunpack.c.l.bf16 %v2674_v20  ;;  %v2252_v29 = vunpack.c.h.bf16 %v2674_v20 }
  0xaf   : > { %v1051_v30 = vsel %vm795_vm15, %v667_v13, %v923_v23  ;;  %v668_v31 = vadd.f32 %v3042_v47, %v533_v24  ;;  %v669_v32 = vadd.f32 %v3042_v47, %v534_v25  ;;  %v670_v33 = vadd.f32 %v3042_v47, %v535_v26  ;;  %v2679_v25 = vld [vmem:[%s2805_s18 + $0x1b8] sm:$0xff]  }
  0xb0   : > { %v2543_v9 = vpack.c.bf16 %v1051_v30, %v1050_v27  ;;  %v671_v34 = vadd.f32 %v3042_v47, %v536_v0  ;;  %v537_v35 = vmul.f32 %v3033_v41, %v2251_v28  ;;  %v538_v36 = vmul.f32 %v3033_v41, %v2252_v29  ;;  %v2680_v29 = vld [vmem:[%s2805_s18 + $0x1c0] sm:$0xff]   ;;  %v2681_v30 = vld [vmem:[%s2805_s18 + $0x1c8] sm:$0xff]  }
  0xb1   : > { %vm796_vm0 = vcmp.ge.f32.partialorder %v668_v31, 0.0  ;;  %vm797_vm1 = vcmp.ge.f32.partialorder %v669_v32, 0.0  ;;  %v924_v38 = vmul.f32 0.2, %v668_v31  ;;  %v925_v39 = vmul.f32 0.2, %v669_v32 }
  0xb2   : > { %2734 = vst [vmem:[%s2842_s25 + $0x178] sm:$0xff] %v2543_v9   ;;  %vm798_vm2 = vcmp.ge.f32.partialorder %v670_v33, 0.0  ;;  %vm799_vm3 = vcmp.ge.f32.partialorder %v671_v34, 0.0  ;;  %v926_v40 = vmul.f32 0.2, %v670_v33  ;;  %v672_v45 = vadd.f32 %v3042_v47, %v537_v35 }
  0xb3   : > { %v927_v42 = vmul.f32 0.2, %v671_v34  ;;  %v1052_v43 = vsel %vm796_vm0, %v668_v31, %v924_v38  ;;  %v1053_v44 = vsel %vm797_vm1, %v669_v32, %v925_v39  ;;  %v673_v46 = vadd.f32 %v3042_v47, %v538_v36 }
  0xb4   : > { %v2548_v49 = vpack.c.bf16 %v1053_v44, %v1052_v43  ;;  %v1054_v50 = vsel %vm798_vm2, %v670_v33, %v926_v40  ;;  %v2255_v52 = vunpack.c.l.bf16 %v2675_v37  ;;  %vm800_vm4 = vcmp.ge.f32.partialorder %v672_v45, 0.0 }
  0xb5   : > { %v1055_v51 = vsel %vm799_vm3, %v671_v34, %v927_v42  ;;  %vm801_vm5 = vcmp.ge.f32.partialorder %v673_v46, 0.0  ;;  %v928_v55 = vmul.f32 0.2, %v672_v45  ;;  %v929_v56 = vmul.f32 0.2, %v673_v46 }
  0xb6   : > { %v2553_v54 = vpack.c.bf16 %v1055_v51, %v1054_v50  ;;  %2735 = vst [vmem:[%s2842_s25 + $0x180] sm:$0xff] %v2548_v49   ;;  %v2256_v57 = vunpack.c.h.bf16 %v2675_v37  ;;  %v539_v58 = vmul.f32 %v3033_v41, %v2255_v52  ;;  %v2259_v59 = vunpack.c.l.bf16 %v2676_v48 }
  0xb7   : > { %v1056_v60 = vsel %vm800_vm4, %v672_v45, %v928_v55  ;;  %v2260_v61 = vunpack.c.h.bf16 %v2676_v48  ;;  %v2263_v62 = vunpack.c.l.bf16 %v2677_v53  ;;  %v2264_v63 = vunpack.c.h.bf16 %v2677_v53 }
  0xb8   : > { %2736 = vst [vmem:[%s2842_s25 + $0x188] sm:$0xff] %v2553_v54   ;;  %v1057_v1 = vsel %vm801_vm5, %v673_v46, %v929_v56  ;;  %v540_v2 = vmul.f32 %v3033_v41, %v2256_v57  ;;  %v674_v3 = vadd.f32 %v3042_v47, %v539_v58  ;;  %v541_v4 = vmul.f32 %v3033_v41, %v2259_v59 }
  0xb9   : > { %v2558_v6 = vpack.c.bf16 %v1057_v1, %v1056_v60  ;;  %v542_v7 = vmul.f32 %v3033_v41, %v2260_v61  ;;  %v543_v8 = vmul.f32 %v3033_v41, %v2263_v62  ;;  %v544_v10 = vmul.f32 %v3033_v41, %v2264_v63  ;;  %v2682_v60 = vld [vmem:[%s2805_s18 + $0x1d0] sm:$0xff]  }
  0xba   : > { %v675_v11 = vadd.f32 %v3042_v47, %v540_v2  ;;  %vm802_vm6 = vcmp.ge.f32.partialorder %v674_v3, 0.0  ;;  %v930_v12 = vmul.f32 0.2, %v674_v3  ;;  %v676_v13 = vadd.f32 %v3042_v47, %v541_v4 }
  0xbb   : > { %2737 = vst [vmem:[%s2842_s25 + $0x190] sm:$0xff] %v2558_v6   ;;  %v677_v14 = vadd.f32 %v3042_v47, %v542_v7  ;;  %v678_v15 = vadd.f32 %v3042_v47, %v543_v8  ;;  %v679_v16 = vadd.f32 %v3042_v47, %v544_v10  ;;  %v2267_v17 = vunpack.c.l.bf16 %v2678_v5  ;;  %v2683_v8 = vld [vmem:[%s2805_s18 + $0x1d8] sm:$0xff]  }
  0xbc   : > { %vm803_vm7 = vcmp.ge.f32.partialorder %v675_v11, 0.0  ;;  %v931_v18 = vmul.f32 0.2, %v675_v11  ;;  %v1058_v19 = vsel %vm802_vm6, %v674_v3, %v930_v12  ;;  %vm804_vm8 = vcmp.ge.f32.partialorder %v676_v13, 0.0 }
  0xbd   : > { %vm805_vm9 = vcmp.ge.f32.partialorder %v677_v14, 0.0  ;;  %v932_v20 = vmul.f32 0.2, %v676_v13  ;;  %v933_v21 = vmul.f32 0.2, %v677_v14  ;;  %vm806_vm10 = vcmp.ge.f32.partialorder %v678_v15, 0.0 }
  0xbe   : > { %v1059_v22 = vsel %vm803_vm7, %v675_v11, %v931_v18  ;;  %vm807_vm11 = vcmp.ge.f32.partialorder %v679_v16, 0.0  ;;  %v934_v23 = vmul.f32 0.2, %v678_v15  ;;  %v935_v24 = vmul.f32 0.2, %v679_v16 }
  0xbf   : > { %v2563_v26 = vpack.c.bf16 %v1059_v22, %v1058_v19  ;;  %v1060_v27 = vsel %vm804_vm8, %v676_v13, %v932_v20  ;;  %v1061_v0 = vsel %vm805_vm9, %v677_v14, %v933_v21  ;;  %v2268_v28 = vunpack.c.h.bf16 %v2678_v5  ;;  %v2684_v14 = vld [vmem:[%s2805_s18 + $0x1e0] sm:$0xff]  }
  0xc0   : > { %v2568_v31 = vpack.c.bf16 %v1061_v0, %v1060_v27  ;;  %v1062_v32 = vsel %vm806_vm10, %v678_v15, %v934_v23  ;;  %v1063_v33 = vsel %vm807_vm11, %v679_v16, %v935_v24  ;;  %v545_v9 = vmul.f32 %v3033_v41, %v2267_v17 }
  0xc1   : > { %2738 = vst [vmem:[%s2842_s25 + $0x198] sm:$0xff] %v2563_v26   ;;  %v2573_v34 = vpack.c.bf16 %v1063_v33, %v1062_v32  ;;  %v546_v35 = vmul.f32 %v3033_v41, %v2268_v28  ;;  %v2271_v36 = vunpack.c.l.bf16 %v2679_v25  ;;  %v2272_v37 = vunpack.c.h.bf16 %v2679_v25  ;;  %v2685_v28 = vld [vmem:[%s2805_s18 + $0x1e8] sm:$0xff]  }
  0xc2   : > { %2739 = vst [vmem:[%s2842_s25 + $0x1a0] sm:$0xff] %v2568_v31   ;;  %v680_v38 = vadd.f32 %v3042_v47, %v545_v9  ;;  %v2275_v39 = vunpack.c.l.bf16 %v2680_v29  ;;  %v2276_v40 = vunpack.c.h.bf16 %v2680_v29  ;;  %v2279_v42 = vunpack.c.l.bf16 %v2681_v30 }
  0xc3   : > { %2740 = vst [vmem:[%s2842_s25 + $0x1a8] sm:$0xff] %v2573_v34   ;;  %v681_v43 = vadd.f32 %v3042_v47, %v546_v35  ;;  %v547_v44 = vmul.f32 %v3033_v41, %v2271_v36  ;;  %v548_v45 = vmul.f32 %v3033_v41, %v2272_v37  ;;  %v2280_v46 = vunpack.c.h.bf16 %v2681_v30 }
  0xc4   : > { %vm808_vm12 = vcmp.ge.f32.partialorder %v680_v38, 0.0  ;;  %v936_v48 = vmul.f32 0.2, %v680_v38  ;;  %v549_v49 = vmul.f32 %v3033_v41, %v2275_v39  ;;  %v550_v50 = vmul.f32 %v3033_v41, %v2276_v40 }
  0xc5   : > { %vm809_vm13 = vcmp.ge.f32.partialorder %v681_v43, 0.0  ;;  %v937_v51 = vmul.f32 0.2, %v681_v43  ;;  %v682_v52 = vadd.f32 %v3042_v47, %v547_v44  ;;  %v683_v53 = vadd.f32 %v3042_v47, %v548_v45  ;;  %v2686_v45 = vld [vmem:[%s2805_s18 + $0x1f0] sm:$0xff]  }
  0xc6   : > { %v1064_v54 = vsel %vm808_vm12, %v680_v38, %v936_v48  ;;  %v684_v55 = vadd.f32 %v3042_v47, %v549_v49  ;;  %v685_v56 = vadd.f32 %v3042_v47, %v550_v50  ;;  %v551_v57 = vmul.f32 %v3033_v41, %v2279_v42  ;;  %v2687_v50 = vld [vmem:[%s2805_s18 + $0x1f8] sm:$0xff]  }
  0xc7   : > { %v1065_v58 = vsel %vm809_vm13, %v681_v43, %v937_v51  ;;  %vm810_vm14 = vcmp.ge.f32.partialorder %v682_v52, 0.0  ;;  %vm811_vm15 = vcmp.ge.f32.partialorder %v683_v53, 0.0  ;;  %v938_v59 = vmul.f32 0.2, %v682_v52 }
  0xc8   : > { %v2578_v61 = vpack.c.bf16 %v1065_v58, %v1064_v54  ;;  %v939_v62 = vmul.f32 0.2, %v683_v53  ;;  %vm812_vm0 = vcmp.ge.f32.partialorder %v684_v55, 0.0  ;;  %vm813_vm1 = vcmp.ge.f32.partialorder %v685_v56, 0.0 }
  0xc9   : > { %v1066_v63 = vsel %vm810_vm14, %v682_v52, %v938_v59  ;;  %v940_v1 = vmul.f32 0.2, %v684_v55  ;;  %v941_v2 = vmul.f32 0.2, %v685_v56  ;;  %v552_v3 = vmul.f32 %v3033_v41, %v2280_v46 }
  0xca   : > { %2741 = vst [vmem:[%s2842_s25 + $0x1b0] sm:$0xff] %v2578_v61   ;;  %v1067_v4 = vsel %vm811_vm15, %v683_v53, %v939_v62  ;;  %v686_v5 = vadd.f32 %v3042_v47, %v551_v57  ;;  %v2283_v6 = vunpack.c.l.bf16 %v2682_v60  ;;  %v2284_v7 = vunpack.c.h.bf16 %v2682_v60 }
  0xcb   : > { %v2583_v10 = vpack.c.bf16 %v1067_v4, %v1066_v63  ;;  %v1068_v11 = vsel %vm812_vm0, %v684_v55, %v940_v1  ;;  %v1069_v12 = vsel %vm813_vm1, %v685_v56, %v941_v2  ;;  %v687_v13 = vadd.f32 %v3042_v47, %v552_v3 }
  0xcc   : > { %v2588_v15 = vpack.c.bf16 %v1069_v12, %v1068_v11  ;;  %vm814_vm2 = vcmp.ge.f32.partialorder %v686_v5, 0.0  ;;  %v942_v16 = vmul.f32 0.2, %v686_v5  ;;  %v553_v17 = vmul.f32 %v3033_v41, %v2283_v6 }
  0xcd   : > { %2742 = vst [vmem:[%s2842_s25 + $0x1b8] sm:$0xff] %v2583_v10   ;;  %vm815_vm3 = vcmp.ge.f32.partialorder %v687_v13, 0.0  ;;  %v943_v18 = vmul.f32 0.2, %v687_v13  ;;  %v554_v19 = vmul.f32 %v3033_v41, %v2284_v7  ;;  %v2287_v20 = vunpack.c.l.bf16 %v2683_v8 }
  0xce   : > { %2743 = vst [vmem:[%s2842_s25 + $0x1c0] sm:$0xff] %v2588_v15   ;;  %v1070_v21 = vsel %vm814_vm2, %v686_v5, %v942_v16  ;;  %v688_v22 = vadd.f32 %v3042_v47, %v553_v17  ;;  %v2288_v23 = vunpack.c.h.bf16 %v2683_v8  ;;  %v2291_v24 = vunpack.c.l.bf16 %v2684_v14 }
  0xcf   : > { %v1071_v25 = vsel %vm815_vm3, %v687_v13, %v943_v18  ;;  %v689_v26 = vadd.f32 %v3042_v47, %v554_v19  ;;  %v555_v27 = vmul.f32 %v3033_v41, %v2287_v20  ;;  %v2292_v0 = vunpack.c.h.bf16 %v2684_v14 }
  0xd0   : > { %v2593_v29 = vpack.c.bf16 %v1071_v25, %v1070_v21  ;;  %vm816_vm4 = vcmp.ge.f32.partialorder %v688_v22, 0.0  ;;  %v944_v30 = vmul.f32 0.2, %v688_v22  ;;  %v556_v31 = vmul.f32 %v3033_v41, %v2288_v23 }
  0xd1   : > { %vm817_vm5 = vcmp.ge.f32.partialorder %v689_v26, 0.0  ;;  %v945_v32 = vmul.f32 0.2, %v689_v26  ;;  %v690_v33 = vadd.f32 %v3042_v47, %v555_v27  ;;  %v557_v9 = vmul.f32 %v3033_v41, %v2291_v24 }
  0xd2   : > { %2744 = vst [vmem:[%s2842_s25 + $0x1c8] sm:$0xff] %v2593_v29   ;;  %v1072_v34 = vsel %vm816_vm4, %v688_v22, %v944_v30  ;;  %v691_v35 = vadd.f32 %v3042_v47, %v556_v31  ;;  %v558_v36 = vmul.f32 %v3033_v41, %v2292_v0  ;;  %v2295_v37 = vunpack.c.l.bf16 %v2685_v28 }
  0xd3   : > { %v1073_v38 = vsel %vm817_vm5, %v689_v26, %v945_v32  ;;  %vm818_vm6 = vcmp.ge.f32.partialorder %v690_v33, 0.0  ;;  %v946_v39 = vmul.f32 0.2, %v690_v33  ;;  %v692_v40 = vadd.f32 %v3042_v47, %v557_v9 }
  0xd4   : > { %v2598_v42 = vpack.c.bf16 %v1073_v38, %v1072_v34  ;;  %vm819_vm7 = vcmp.ge.f32.partialorder %v691_v35, 0.0  ;;  %v947_v43 = vmul.f32 0.2, %v691_v35  ;;  %v693_v44 = vadd.f32 %v3042_v47, %v558_v36 }
  0xd5   : > { %v1074_v46 = vsel %vm818_vm6, %v690_v33, %v946_v39  ;;  %vm820_vm8 = vcmp.ge.f32.partialorder %v692_v40, 0.0  ;;  %v948_v48 = vmul.f32 0.2, %v692_v40  ;;  %v2296_v49 = vunpack.c.h.bf16 %v2685_v28 }
  0xd6   : > { %2745 = vst [vmem:[%s2842_s25 + $0x1d0] sm:$0xff] %v2598_v42   ;;  %v1075_v51 = vsel %vm819_vm7, %v691_v35, %v947_v43  ;;  %vm821_vm9 = vcmp.ge.f32.partialorder %v693_v44, 0.0  ;;  %v949_v52 = vmul.f32 0.2, %v693_v44  ;;  %v559_v53 = vmul.f32 %v3033_v41, %v2295_v37 }
  0xd7   : > { %v2603_v54 = vpack.c.bf16 %v1075_v51, %v1074_v46  ;;  %v1076_v55 = vsel %vm820_vm8, %v692_v40, %v948_v48  ;;  %v560_v56 = vmul.f32 %v3033_v41, %v2296_v49  ;;  %v2299_v57 = vunpack.c.l.bf16 %v2686_v45 }
  0xd8   : > { %v1077_v58 = vsel %vm821_vm9, %v693_v44, %v949_v52  ;;  %v694_v59 = vadd.f32 %v3042_v47, %v559_v53  ;;  %v2300_v60 = vunpack.c.h.bf16 %v2686_v45  ;;  %v2303_v61 = vunpack.c.l.bf16 %v2687_v50 }
  0xd9   : > { %2746 = vst [vmem:[%s2842_s25 + $0x1d8] sm:$0xff] %v2603_v54   ;;  %v2608_v62 = vpack.c.bf16 %v1077_v58, %v1076_v55  ;;  %v695_v63 = vadd.f32 %v3042_v47, %v560_v56  ;;  %v561_v1 = vmul.f32 %v3033_v41, %v2299_v57  ;;  %v2304_v2 = vunpack.c.h.bf16 %v2687_v50 }
  0xda   : > { %vm822_vm10 = vcmp.ge.f32.partialorder %v694_v59, 0.0  ;;  %v950_v3 = vmul.f32 0.2, %v694_v59  ;;  %v562_v4 = vmul.f32 %v3033_v41, %v2300_v60  ;;  %v563_v5 = vmul.f32 %v3033_v41, %v2303_v61 }
  0xdb   : > { %2747 = vst [vmem:[%s2842_s25 + $0x1e0] sm:$0xff] %v2608_v62   ;;  %vm823_vm11 = vcmp.ge.f32.partialorder %v695_v63, 0.0  ;;  %v951_v6 = vmul.f32 0.2, %v695_v63  ;;  %v696_v7 = vadd.f32 %v3042_v47, %v561_v1  ;;  %v564_v8 = vmul.f32 %v3033_v41, %v2304_v2 }
  0xdc   : > { %v1078_v10 = vsel %vm822_vm10, %v694_v59, %v950_v3  ;;  %v697_v11 = vadd.f32 %v3042_v47, %v562_v4  ;;  %v698_v12 = vadd.f32 %v3042_v47, %v563_v5 }
  0xdd   : > { %v1079_v13 = vsel %vm823_vm11, %v695_v63, %v951_v6  ;;  %vm824_vm12 = vcmp.ge.f32.partialorder %v696_v7, 0.0  ;;  %v952_v14 = vmul.f32 0.2, %v696_v7  ;;  %v699_v15 = vadd.f32 %v3042_v47, %v564_v8 }
  0xde   : > { %v2613_v16 = vpack.c.bf16 %v1079_v13, %v1078_v10  ;;  %vm825_vm13 = vcmp.ge.f32.partialorder %v697_v11, 0.0  ;;  %v953_v17 = vmul.f32 0.2, %v697_v11  ;;  %vm826_vm14 = vcmp.ge.f32.partialorder %v698_v12, 0.0 }
  0xdf   : > { %v1080_v18 = vsel %vm824_vm12, %v696_v7, %v952_v14  ;;  %vm827_vm15 = vcmp.ge.f32.partialorder %v699_v15, 0.0  ;;  %v954_v41 = vmul.f32 0.2, %v698_v12  ;;  %v955_v19 = vmul.f32 0.2, %v699_v15 }
  0xe0   : > { %2748 = vst [vmem:[%s2842_s25 + $0x1e8] sm:$0xff] %v2613_v16   ;;  %v1081_v20 = vsel %vm825_vm13, %v697_v11, %v953_v17 }
  0xe1   : > { %v2618_v21 = vpack.c.bf16 %v1081_v20, %v1080_v18  ;;  %v1082_v22 = vsel %vm826_vm14, %v698_v12, %v954_v41  ;;  %v1083_v23 = vsel %vm827_vm15, %v699_v15, %v955_v19 }
  0xe2   : > { %v2623_v24 = vpack.c.bf16 %v1083_v23, %v1082_v22 }
  0xe3   : > { %2749 = vst [vmem:[%s2842_s25 + $0x1f0] sm:$0xff] %v2618_v21  }
  0xe4   : > { %2750 = vst [vmem:[%s2842_s25 + $0x1f8] sm:$0xff] %v2623_v24  }
  0xe5 PF: > { %s13_s12 = sadd.s32 1, %s2767_s12  }
  0xe6   : > { %p10_p4 = scmp.ge.s32.totalorder %s13_s12, 4  }
  0xe8   :  { %12 = sbr.rel (!%p10_p4) target bundleno = 1 (0x1), region = 62 }

// kernel: generator_forward.17
= control target key start
LH: loop header
LB: loop body
LE: loop exit
PB: predicated region body
PF: predicated region fallthrough
CT: control target
= control target key end

     0   :  { %s3690_s12 = smov 0   ;;  %s3692_s13 = smov 0   ;;  %s4031_s0 = inlined_call_operand.vmem [shape: bf16[4,2048,128], index: 0, kind: input, shape index: {}]   ;;  %s4032_s1 = inlined_call_operand.vmem [shape: bf16[4,128,128], index: 1, kind: input, shape index: {}]   ;;  %s4033_s2 = inlined_call_operand.vmem [shape: f32[1,128], index: 2, kind: input, shape index: {}]   ;;  %s4034_s3 = inlined_call_operand.vmem [shape: bf16[4,2048,128], index: 3, kind: output, shape index: {}]  }
   0x1   :  { %s3694_s14 = smov 0   ;;  %s3696_s15 = smov 0  }
   0x2   :  { %s3698_s16 = smov 0  }
   0x3 LB: > { %s28_s17 = sadd.s32 1, %s3660_s14  ;;  %s32_s18 = sadd.s32 1, %s3664_s15  ;;  %s3668_s16 = sphi %s3698_s16, %s13_s16   ;;  %s3664_s15 = sphi %s3696_s15, %s4038_s15   ;;  %s3660_s14 = sphi %s3694_s14, %s4037_s14   ;;  %s3656_s13 = sphi %s3692_s13, %s4036_s13   ;;  %s3652_s12 = sphi %s3690_s12, %s4035_s12  }
   0x4   : > { %p30_p0 = scmp.ge.s32.totalorder %s28_s17, 2  ;;  %p2305_p1 = scmp.ge.s32.totalorder %s3668_s16, 1 }
   0x5   : > { %p190_p2 = scmp.lt.s32.totalorder %s3668_s16, 9 }
   0x6   : > { %s4040_s17 = smov (%p30_p0, %s28_s17), 0  ;;  %s4042_s18 = smov (!%p30_p0, %s32_s18), %s3664_s15 }
   0x7   : > { %p191_p3 = pnand %p2305_p1, %p190_p2  ;;  %p34_p4 = scmp.ge.s32.totalorder %s4042_s18, 4 }
   0x8   : > { %s2306_s19 = sshll.u32 (!%p191_p3), %s3652_s12, 7  ;;  %p237_p5 = scmp.lt.s32.totalorder (!%p191_p3), %s3656_s13, 3 }
   0x9   : > { %s4044_s18 = smov (%p34_p4, %s4042_s18), 0  ;;  %194 = sbr.rel (%p191_p3) target bundleno = 410 (0x19a), region = 32 }
   0xa   : > { %p239_p6 = scmp.lt.s32.totalorder (!%p191_p3), %s2306_s19, 255 }
  0x10   : > { %s4046_s13 = smov (!%p237_p5, %s3656_s13), 3  ;;  %s4048_s19 = smov (!%p239_p6, %s2306_s19), 255 }
  0x11   : > { %s2307_s20 = sshll.u32 %s4046_s13, 8  ;;  %s2517_s21 = sshll.u32 %s4046_s13, 6 }
  0x12   : > { %s3720_s22 = sadd.s32 %s2307_s20, %s4048_s19  ;;  %s3725_s25 = scalar_lea.vmem %s4032_s1, %s2517_s21 }
  0x13   : > { %v3301_v0 = vld [vmem:[%s3725_s25] sm:$0xff]   ;;  %v3302_v1 = vld [vmem:[%s3725_s25 + $0x8] sm:$0xff]   ;;  %s2308_s26 = sshll.u32 %s3720_s22, 2  ;;  %v3303_v2 = vld [vmem:[%s3725_s25 + $0x10] sm:$0xff]  }
  0x14   : > { %3101 = vmatprep.subr.bf16.mxu0 %v3301_v0  ;;  %3245 = vmatprep.subr.bf16.mxu1 %v3301_v0  ;;  %s3736_s29 = scalar_lea.vmem %s4031_s0, %s2308_s26  ;;  %v3304_v3 = vld [vmem:[%s3725_s25 + $0x18] sm:$0xff]   ;;  %v3305_v6 = vld [vmem:[%s3725_s25 + $0x20] sm:$0xff]   ;;  %v3306_v7 = vld [vmem:[%s3725_s25 + $0x28] sm:$0xff]   ;;  %s3833_s7 = scalar_lea.vmem %s4034_s3, %s2308_s26 }
  0x15   : > { %3102 = vmatpush3.bf16.msra.mxu0 %v3301_v0  ;;  %3253 = vmatpush3.bf16.msra.mxu1 %v3301_v0  ;;  %v3309_v4 = vld [vmem:[%s3736_s29] sm:$0xff]   ;;  %v3307_v8 = vld [vmem:[%s3725_s25 + $0x30] sm:$0xff]   ;;  %v3308_v9 = vld [vmem:[%s3725_s25 + $0x38] sm:$0xff]  }
  0x16   : > { %3103 = vmatprep.subr.bf16.mxu0 %v3302_v1  ;;  %3246 = vmatprep.subr.bf16.mxu1 %v3302_v1  ;;  %v3310_v5 = vld [vmem:[%s3736_s29 + $0x100] sm:$0xff]   ;;  %v3311_v10 = vld [vmem:[%s3736_s29 + $0x8] sm:$0xff]   ;;  %v3313_v12 = vld [vmem:[%s3736_s29 + $0x10] sm:$0xff]  }
  0x17   : > { %3117 = vmatprep.mubr.bf16.mxu0 %v3309_v4  ;;  %3181 = vmatprep.mubr.bf16.mxu1 %v3310_v5  ;;  %v3312_v11 = vld [vmem:[%s3736_s29 + $0x108] sm:$0xff]   ;;  %v3314_v13 = vld [vmem:[%s3736_s29 + $0x110] sm:$0xff]   ;;  %v3315_v14 = vld [vmem:[%s3736_s29 + $0x18] sm:$0xff]  }
  0x18   : > { %v3316_v15 = vld [vmem:[%s3736_s29 + $0x118] sm:$0xff]   ;;  %v3317_v16 = vld [vmem:[%s3736_s29 + $0x20] sm:$0xff]   ;;  %v3319_v18 = vld [vmem:[%s3736_s29 + $0x28] sm:$0xff]  }
  0x19   : > { %3104 = vmatpush3.bf16.msra.mxu0 %v3302_v1  ;;  %3254 = vmatpush3.bf16.msra.mxu1 %v3302_v1  ;;  %v3318_v17 = vld [vmem:[%s3736_s29 + $0x120] sm:$0xff]   ;;  %v3320_v19 = vld [vmem:[%s3736_s29 + $0x128] sm:$0xff]   ;;  %v3321_v20 = vld [vmem:[%s3736_s29 + $0x30] sm:$0xff]  }
  0x1a   : > { %3105 = vmatprep.subr.bf16.mxu0 %v3303_v2  ;;  %3247 = vmatprep.subr.bf16.mxu1 %v3303_v2  ;;  %v3322_v21 = vld [vmem:[%s3736_s29 + $0x130] sm:$0xff]   ;;  %v3323_v22 = vld [vmem:[%s3736_s29 + $0x38] sm:$0xff]   ;;  %v3325_v24 = vld [vmem:[%s3736_s29 + $0x40] sm:$0xff]  }
  0x1b   : > { %v3324_v23 = vld [vmem:[%s3736_s29 + $0x138] sm:$0xff]   ;;  %v3326_v25 = vld [vmem:[%s3736_s29 + $0x140] sm:$0xff]   ;;  %v3327_v26 = vld [vmem:[%s3736_s29 + $0x48] sm:$0xff]  }
  0x1c   : > { %v3328_v27 = vld [vmem:[%s3736_s29 + $0x148] sm:$0xff]   ;;  %v3329_v28 = vld [vmem:[%s3736_s29 + $0x50] sm:$0xff]   ;;  %v3331_v30 = vld [vmem:[%s3736_s29 + $0x58] sm:$0xff]  }
  0x1d   : > { %3106 = vmatpush3.bf16.msra.mxu0 %v3303_v2  ;;  %3255 = vmatpush3.bf16.msra.mxu1 %v3303_v2  ;;  %v3330_v29 = vld [vmem:[%s3736_s29 + $0x150] sm:$0xff]   ;;  %v3332_v31 = vld [vmem:[%s3736_s29 + $0x158] sm:$0xff]   ;;  %v3333_v32 = vld [vmem:[%s3736_s29 + $0x60] sm:$0xff]  }
  0x1e   : > { %3107 = vmatprep.subr.bf16.mxu0 %v3304_v3  ;;  %3248 = vmatprep.subr.bf16.mxu1 %v3304_v3  ;;  %v3334_v33 = vld [vmem:[%s3736_s29 + $0x160] sm:$0xff]   ;;  %v3335_v34 = vld [vmem:[%s3736_s29 + $0x68] sm:$0xff]   ;;  %v3337_v36 = vld [vmem:[%s3736_s29 + $0x70] sm:$0xff]  }
  0x1f   : > { %v3336_v35 = vld [vmem:[%s3736_s29 + $0x168] sm:$0xff]   ;;  %v3338_v37 = vld [vmem:[%s3736_s29 + $0x170] sm:$0xff]   ;;  %v3339_v38 = vld [vmem:[%s3736_s29 + $0x78] sm:$0xff]  }
  0x20   : > { %v3340_v39 = vld [vmem:[%s3736_s29 + $0x178] sm:$0xff]   ;;  %v3341_v40 = vld [vmem:[%s3736_s29 + $0x80] sm:$0xff]   ;;  %v3343_v42 = vld [vmem:[%s3736_s29 + $0x88] sm:$0xff]  }
  0x21   : > { %3108 = vmatpush3.bf16.msra.mxu0 %v3304_v3  ;;  %3256 = vmatpush3.bf16.msra.mxu1 %v3304_v3  ;;  %v3342_v41 = vld [vmem:[%s3736_s29 + $0x180] sm:$0xff]   ;;  %v3344_v43 = vld [vmem:[%s3736_s29 + $0x188] sm:$0xff]   ;;  %v3345_v44 = vld [vmem:[%s3736_s29 + $0x90] sm:$0xff]  }
  0x22   : > { %3109 = vmatprep.subr.bf16.mxu0 %v3305_v6  ;;  %3249 = vmatprep.subr.bf16.mxu1 %v3305_v6  ;;  %v3346_v45 = vld [vmem:[%s3736_s29 + $0x190] sm:$0xff]   ;;  %v3347_v46 = vld [vmem:[%s3736_s29 + $0x98] sm:$0xff]   ;;  %v3349_v48 = vld [vmem:[%s3736_s29 + $0xa0] sm:$0xff]  }
  0x23   : > { %v3348_v47 = vld [vmem:[%s3736_s29 + $0x198] sm:$0xff]   ;;  %v3350_v49 = vld [vmem:[%s3736_s29 + $0x1a0] sm:$0xff]   ;;  %v3351_v50 = vld [vmem:[%s3736_s29 + $0xa8] sm:$0xff]  }
  0x24   : > { %v3352_v51 = vld [vmem:[%s3736_s29 + $0x1a8] sm:$0xff]   ;;  %v3353_v52 = vld [vmem:[%s3736_s29 + $0xb0] sm:$0xff]   ;;  %v3355_v54 = vld [vmem:[%s3736_s29 + $0xb8] sm:$0xff]  }
  0x25   : > { %3110 = vmatpush3.bf16.msra.mxu0 %v3305_v6  ;;  %3257 = vmatpush3.bf16.msra.mxu1 %v3305_v6  ;;  %v3354_v53 = vld [vmem:[%s3736_s29 + $0x1b0] sm:$0xff]   ;;  %v3356_v55 = vld [vmem:[%s3736_s29 + $0x1b8] sm:$0xff]   ;;  %v3357_v56 = vld [vmem:[%s3736_s29 + $0xc0] sm:$0xff]  }
  0x26   : > { %3111 = vmatprep.subr.bf16.mxu0 %v3306_v7  ;;  %3250 = vmatprep.subr.bf16.mxu1 %v3306_v7  ;;  %v3358_v57 = vld [vmem:[%s3736_s29 + $0x1c0] sm:$0xff]   ;;  %v3359_v58 = vld [vmem:[%s3736_s29 + $0xc8] sm:$0xff]   ;;  %v3361_v60 = vld [vmem:[%s3736_s29 + $0xd0] sm:$0xff]  }
  0x27   : > { %v3360_v59 = vld [vmem:[%s3736_s29 + $0x1c8] sm:$0xff]   ;;  %v3362_v61 = vld [vmem:[%s3736_s29 + $0x1d0] sm:$0xff]   ;;  %v3363_v62 = vld [vmem:[%s3736_s29 + $0xd8] sm:$0xff]  }
  0x28   : > { %v3364_v63 = vld [vmem:[%s3736_s29 + $0x1d8] sm:$0xff]   ;;  %v3365_v0 = vld [vmem:[%s3736_s29 + $0xe0] sm:$0xff]   ;;  %v3367_v2 = vld [vmem:[%s3736_s29 + $0xe8] sm:$0xff]  }
  0x29   : > { %3112 = vmatpush3.bf16.msra.mxu0 %v3306_v7  ;;  %3258 = vmatpush3.bf16.msra.mxu1 %v3306_v7  ;;  %v3366_v1 = vld [vmem:[%s3736_s29 + $0x1e0] sm:$0xff]   ;;  %v3368_v3 = vld [vmem:[%s3736_s29 + $0x1e8] sm:$0xff]   ;;  %v3369_v4 = vld [vmem:[%s3736_s29 + $0xf0] sm:$0xff]  }
  0x2a   : > { %3113 = vmatprep.subr.bf16.mxu0 %v3307_v8  ;;  %3251 = vmatprep.subr.bf16.mxu1 %v3307_v8  ;;  %v3370_v5 = vld [vmem:[%s3736_s29 + $0x1f0] sm:$0xff]   ;;  %v3371_v6 = vld [vmem:[%s3736_s29 + $0xf8] sm:$0xff]  }
  0x2b   : > { %v3372_v7 = vld [vmem:[%s3736_s29 + $0x1f8] sm:$0xff]  }
  0x2d   : > { %3114 = vmatpush3.bf16.msra.mxu0 %v3307_v8  ;;  %3259 = vmatpush3.bf16.msra.mxu1 %v3307_v8  ;;  %v3810_v8 = vld [vmem:[%s4033_s2] ss:$0 sm:$0xff] }
  0x2e   : > { %3115 = vmatprep.subr.bf16.mxu0 %v3308_v9  ;;  %3252 = vmatprep.subr.bf16.mxu1 %v3308_v9 }
  0x31   : > { %3116 = vmatpush3.bf16.msra.mxu0 %v3308_v9  ;;  %3260 = vmatpush3.bf16.msra.mxu1 %v3308_v9 }
  0x34   : > { %3118 = vmatmul.mubr.bf16.vlgmr.msra.gmra.mrb[0].mxu0 %v3311_v10  ;;  %3182 = vmatmul.mubr.bf16.vlgmr.msra.gmra.mrb[0].mxu1 %v3312_v11 }
  0x35   : > { %3121 = vmatprep.mubr.bf16.mxu0 %v3313_v12  ;;  %3185 = vmatprep.mubr.bf16.mxu1 %v3314_v13 }
  0x3c   : > { %3122 = vmatmul.mubr.bf16.gmra.mrb[4].mxu0 %v3315_v14  ;;  %3186 = vmatmul.mubr.bf16.gmra.mrb[4].mxu1 %v3316_v15 }
  0x3d   : > { %3125 = vmatprep.mubr.bf16.mxu0 %v3317_v16  ;;  %3189 = vmatprep.mubr.bf16.mxu1 %v3318_v17 }
  0x44   : > { %3126 = vmatmul.mubr.bf16.gmra.mrb[8].mxu0 %v3319_v18  ;;  %3190 = vmatmul.mubr.bf16.gmra.mrb[8].mxu1 %v3320_v19 }
  0x45   : > { %3129 = vmatprep.mubr.bf16.mxu0 %v3321_v20  ;;  %3193 = vmatprep.mubr.bf16.mxu1 %v3322_v21 }
  0x4c   : > { %3130 = vmatmul.mubr.bf16.gmra.mrb[12].mxu0 %v3323_v22  ;;  %3194 = vmatmul.mubr.bf16.gmra.mrb[12].mxu1 %v3324_v23 }
  0x4d   : > { %3133 = vmatprep.mubr.bf16.mxu0 %v3325_v24  ;;  %3197 = vmatprep.mubr.bf16.mxu1 %v3326_v25 }
  0x54   : > { %3134 = vmatmul.mubr.bf16.gmra.mrb[16].mxu0 %v3327_v26  ;;  %3198 = vmatmul.mubr.bf16.gmra.mrb[16].mxu1 %v3328_v27 }
  0x55   : > { %3137 = vmatprep.mubr.bf16.mxu0 %v3329_v28  ;;  %3201 = vmatprep.mubr.bf16.mxu1 %v3330_v29 }
  0x5c   : > { %3138 = vmatmul.mubr.bf16.gmra.mrb[20].mxu0 %v3331_v30  ;;  %3202 = vmatmul.mubr.bf16.gmra.mrb[20].mxu1 %v3332_v31 }
  0x5d   : > { %3141 = vmatprep.mubr.bf16.mxu0 %v3333_v32  ;;  %3205 = vmatprep.mubr.bf16.mxu1 %v3334_v33 }
  0x64   : > { %3142 = vmatmul.mubr.bf16.gmra.mrb[24].mxu0 %v3335_v34  ;;  %3206 = vmatmul.mubr.bf16.gmra.mrb[24].mxu1 %v3336_v35 }
  0x65   : > { %3145 = vmatprep.mubr.bf16.mxu0 %v3337_v36  ;;  %3209 = vmatprep.mubr.bf16.mxu1 %v3338_v37 }
  0x6c   : > { %3146 = vmatmul.mubr.bf16.gmra.mrb[28].mxu0 %v3339_v38  ;;  %3210 = vmatmul.mubr.bf16.gmra.mrb[28].mxu1 %v3340_v39 }
  0x6d   : > { %3149 = vmatprep.mubr.bf16.mxu0 %v3341_v40  ;;  %3213 = vmatprep.mubr.bf16.mxu1 %v3342_v41 }
  0x74   : > { %3150 = vmatmul.mubr.bf16.gmra.mrb[32].mxu0 %v3343_v42  ;;  %3214 = vmatmul.mubr.bf16.gmra.mrb[32].mxu1 %v3344_v43 }
  0x75   : > { %3153 = vmatprep.mubr.bf16.mxu0 %v3345_v44  ;;  %3217 = vmatprep.mubr.bf16.mxu1 %v3346_v45 }
  0x7c   : > { %3154 = vmatmul.mubr.bf16.gmra.mrb[36].mxu0 %v3347_v46  ;;  %3218 = vmatmul.mubr.bf16.gmra.mrb[36].mxu1 %v3348_v47 }
  0x7d   : > { %3157 = vmatprep.mubr.bf16.mxu0 %v3349_v48  ;;  %3221 = vmatprep.mubr.bf16.mxu1 %v3350_v49 }
  0x84   : > { %3158 = vmatmul.mubr.bf16.gmra.mrb[40].mxu0 %v3351_v50  ;;  %3222 = vmatmul.mubr.bf16.gmra.mrb[40].mxu1 %v3352_v51 }
  0x85   : > { %3161 = vmatprep.mubr.bf16.mxu0 %v3353_v52  ;;  %3225 = vmatprep.mubr.bf16.mxu1 %v3354_v53 }
  0x8c   : > { %3162 = vmatmul.mubr.bf16.gmra.mrb[44].mxu0 %v3355_v54  ;;  %3226 = vmatmul.mubr.bf16.gmra.mrb[44].mxu1 %v3356_v55 }
  0x8d   : > { %3165 = vmatprep.mubr.bf16.mxu0 %v3357_v56  ;;  %3229 = vmatprep.mubr.bf16.mxu1 %v3358_v57 }
  0x94   : > { %3166 = vmatmul.mubr.bf16.gmra.mrb[48].mxu0 %v3359_v58  ;;  %3230 = vmatmul.mubr.bf16.gmra.mrb[48].mxu1 %v3360_v59 }
  0x95   : > { %3169 = vmatprep.mubr.bf16.mxu0 %v3361_v60  ;;  %3233 = vmatprep.mubr.bf16.mxu1 %v3362_v61 }
  0x9c   : > { %3170 = vmatmul.mubr.bf16.gmra.mrb[52].mxu0 %v3363_v62  ;;  %3234 = vmatmul.mubr.bf16.gmra.mrb[52].mxu1 %v3364_v63 }
  0x9d   : > { %3173 = vmatprep.mubr.bf16.mxu0 %v3365_v0  ;;  %3237 = vmatprep.mubr.bf16.mxu1 %v3366_v1 }
  0xa4   : > { %3174 = vmatmul.mubr.bf16.gmra.mrb[56].mxu0 %v3367_v2  ;;  %3238 = vmatmul.mubr.bf16.gmra.mrb[56].mxu1 %v3368_v3 }
  0xa5   : > { %3177 = vmatprep.mubr.bf16.mxu0 %v3369_v4  ;;  %3241 = vmatprep.mubr.bf16.mxu1 %v3370_v5 }
  0xac   : > { %3178 = vmatmul.mubr.bf16.gmra.mrb[60].mxu0 %v3371_v6  ;;  %3242 = vmatmul.mubr.bf16.gmra.mrb[60].mxu1 %v3372_v7 }
 0x107   : > { %v3119_v9 = vpop.f32.mrb[0].mxu0  ;;  %v3183_v10 = vpop.f32.mrb[0].mxu1 }
 0x108   : > { %v897_v11 = vadd.f32 %v3119_v9, %v3810_v8  ;;  %v1153_v12 = vadd.f32 %v3183_v10, %v3810_v8  ;;  %v888_v13 = vpop.f32.mrb[1].mxu0  ;;  %v1144_v14 = vpop.f32.mrb[1].mxu1 }
 0x109   : > { %v889_v15 = vadd.f32 %v3810_v8, %v888_v13  ;;  %v1145_v16 = vadd.f32 %v3810_v8, %v1144_v14  ;;  %v3120_v17 = vpop.f32.mrb[2].mxu0  ;;  %v3184_v18 = vpop.f32.mrb[2].mxu1 }
 0x10a   : > { %3373 = vtanh.f32 %v897_v11  ;;  %v900_v19 = vadd.f32 %v3120_v17, %v3810_v8  ;;  %v891_v20 = vpop.f32.mrb[3].mxu0  ;;  %v1147_v21 = vpop.f32.mrb[3].mxu1  ;;  %v1156_v22 = vadd.f32 %v3184_v18, %v3810_v8 }
 0x10b   : > { %3375 = vtanh.f32 %v1153_v12  ;;  %v892_v23 = vadd.f32 %v3810_v8, %v891_v20  ;;  %v1148_v24 = vadd.f32 %v3810_v8, %v1147_v21 }
 0x10c   : > { %3377 = vtanh.f32 %v889_v15 }
 0x10d   : > { %3379 = vtanh.f32 %v1145_v16 }
 0x10e   : > { %3381 = vtanh.f32 %v900_v19 }
 0x10f   : > { %3383 = vtanh.f32 %v1156_v22  ;;  %v3123_v25 = vpop.f32.mrb[4].mxu0  ;;  %v3187_v26 = vpop.f32.mrb[4].mxu1 }
 0x110   : > { %3385 = vtanh.f32 %v892_v23  ;;  %v913_v27 = vadd.f32 %v3123_v25, %v3810_v8  ;;  %v1169_v28 = vadd.f32 %v3187_v26, %v3810_v8  ;;  %v904_v29 = vpop.f32.mrb[5].mxu0  ;;  %v1160_v30 = vpop.f32.mrb[5].mxu1 }
 0x111   : > { %3387 = vtanh.f32 %v1148_v24  ;;  %v905_v31 = vadd.f32 %v3810_v8, %v904_v29  ;;  %v1161_v32 = vadd.f32 %v3810_v8, %v1160_v30  ;;  %v3124_v33 = vpop.f32.mrb[6].mxu0  ;;  %v3188_v34 = vpop.f32.mrb[6].mxu1 }
 0x112   : > { %3389 = vtanh.f32 %v913_v27  ;;  %v916_v35 = vadd.f32 %v3124_v33, %v3810_v8  ;;  %v907_v36 = vpop.f32.mrb[7].mxu0  ;;  %v1163_v37 = vpop.f32.mrb[7].mxu1  ;;  %v1172_v38 = vadd.f32 %v3188_v34, %v3810_v8 }
 0x113   : > { %3391 = vtanh.f32 %v1169_v28  ;;  %v908_v40 = vadd.f32 %v3810_v8, %v907_v36  ;;  %v1164_v42 = vadd.f32 %v3810_v8, %v1163_v37 }
 0x114   : > { %v3374_v39 = vpop.eup %3373  ;;  %3393 = vtanh.f32 %v905_v31 }
 0x115   : > { %v3376_v41 = vpop.eup %3375  ;;  %3395 = vtanh.f32 %v1161_v32 }
 0x116   : > { %v3378_v43 = vpop.eup %3377  ;;  %3397 = vtanh.f32 %v916_v35 }
 0x117   : > { %v3380_v44 = vpop.eup %3379  ;;  %3399 = vtanh.f32 %v1172_v38  ;;  %v3127_v45 = vpop.f32.mrb[8].mxu0 }
 0x118   : > { %v3191_v46 = vpop.f32.mrb[8].mxu1  ;;  %v3382_v47 = vpop.eup %3381  ;;  %3401 = vtanh.f32 %v908_v40  ;;  %v929_v48 = vadd.f32 %v3127_v45, %v3810_v8 }
 0x119   : > { %v1185_v49 = vadd.f32 %v3191_v46, %v3810_v8  ;;  %v920_v50 = vpop.f32.mrb[9].mxu0  ;;  %v1176_v51 = vpop.f32.mrb[9].mxu1  ;;  %v2654_v53 = vpack.c.bf16 %v3382_v47, %v3374_v39  ;;  %3403 = vtanh.f32 %v1164_v42 }
 0x11a   : > { %v3384_v52 = vpop.eup %3383  ;;  %v921_v54 = vadd.f32 %v3810_v8, %v920_v50  ;;  %v1177_v55 = vadd.f32 %v3810_v8, %v1176_v51  ;;  %v3128_v56 = vpop.f32.mrb[10].mxu0  ;;  %3405 = vtanh.f32 %v929_v48 }
 0x11b   : > { %v3192_v57 = vpop.f32.mrb[10].mxu1  ;;  %v3386_v58 = vpop.eup %3385  ;;  %v2814_v59 = vpack.c.bf16 %v3384_v52, %v3376_v41  ;;  %v932_v60 = vadd.f32 %v3128_v56, %v3810_v8  ;;  %2966 = vst [vmem:[%s3833_s7 + $0x8] sm:$0xff] %v2654_v53   ;;  %3407 = vtanh.f32 %v1185_v49 }
 0x11c   : > { %v923_v61 = vpop.f32.mrb[11].mxu0  ;;  %v1179_v62 = vpop.f32.mrb[11].mxu1  ;;  %v2649_v0 = vpack.c.bf16 %v3386_v58, %v3378_v43  ;;  %v1188_v1 = vadd.f32 %v3192_v57, %v3810_v8  ;;  %3409 = vtanh.f32 %v921_v54 }
 0x11d   : > { %v3388_v63 = vpop.eup %3387  ;;  %2998 = vst [vmem:[%s3833_s7 + $0x108] sm:$0xff] %v2814_v59   ;;  %v924_v4 = vadd.f32 %v3810_v8, %v923_v61  ;;  %3411 = vtanh.f32 %v1177_v55  ;;  %v1180_v6 = vadd.f32 %v3810_v8, %v1179_v62 }
 0x11e   : > { %v3390_v2 = vpop.eup %3389  ;;  %v2809_v3 = vpack.c.bf16 %v3388_v63, %v3380_v44  ;;  %2650 = vst [vmem:[%s3833_s7] sm:$0xff] %v2649_v0   ;;  %3413 = vtanh.f32 %v932_v60 }
 0x11f   : > { %v3392_v5 = vpop.eup %3391  ;;  %3415 = vtanh.f32 %v1188_v1  ;;  %v3131_v10 = vpop.f32.mrb[12].mxu0 }
 0x120   : > { %v3394_v7 = vpop.eup %3393  ;;  %2997 = vst [vmem:[%s3833_s7 + $0x100] sm:$0xff] %v2809_v3   ;;  %v3195_v11 = vpop.f32.mrb[12].mxu1  ;;  %3417 = vtanh.f32 %v924_v4  ;;  %v945_v13 = vadd.f32 %v3131_v10, %v3810_v8 }
 0x121   : > { %v3396_v9 = vpop.eup %3395  ;;  %v1201_v14 = vadd.f32 %v3195_v11, %v3810_v8  ;;  %v936_v15 = vpop.f32.mrb[13].mxu0  ;;  %3419 = vtanh.f32 %v1180_v6 }
 0x122   : > { %v3398_v12 = vpop.eup %3397  ;;  %v1192_v16 = vpop.f32.mrb[13].mxu1  ;;  %v937_v19 = vadd.f32 %v3810_v8, %v936_v15  ;;  %3421 = vtanh.f32 %v945_v13 }
 0x123   : > { %v3400_v17 = vpop.eup %3399  ;;  %v2664_v18 = vpack.c.bf16 %v3398_v12, %v3390_v2  ;;  %v1193_v20 = vadd.f32 %v3810_v8, %v1192_v16  ;;  %v3132_v21 = vpop.f32.mrb[14].mxu0  ;;  %3423 = vtanh.f32 %v1201_v14 }
 0x124   : > { %v3196_v22 = vpop.f32.mrb[14].mxu1  ;;  %v3402_v23 = vpop.eup %3401  ;;  %v2824_v24 = vpack.c.bf16 %v3400_v17, %v3392_v5  ;;  %v948_v25 = vadd.f32 %v3132_v21, %v3810_v8  ;;  %3425 = vtanh.f32 %v937_v19 }
 0x125   : > { %v939_v26 = vpop.f32.mrb[15].mxu0  ;;  %v1195_v27 = vpop.f32.mrb[15].mxu1  ;;  %2968 = vst [vmem:[%s3833_s7 + $0x18] sm:$0xff] %v2664_v18   ;;  %v2659_v29 = vpack.c.bf16 %v3402_v23, %v3394_v7  ;;  %v1204_v30 = vadd.f32 %v3196_v22, %v3810_v8  ;;  %3427 = vtanh.f32 %v1193_v20 }
 0x126   : > { %v3404_v28 = vpop.eup %3403  ;;  %3000 = vst [vmem:[%s3833_s7 + $0x118] sm:$0xff] %v2824_v24   ;;  %v940_v33 = vadd.f32 %v3810_v8, %v939_v26  ;;  %v1196_v35 = vadd.f32 %v3810_v8, %v1195_v27  ;;  %3429 = vtanh.f32 %v948_v25 }
 0x127   : > { %v3406_v31 = vpop.eup %3405  ;;  %v2819_v32 = vpack.c.bf16 %v3404_v28, %v3396_v9  ;;  %2967 = vst [vmem:[%s3833_s7 + $0x10] sm:$0xff] %v2659_v29   ;;  %3431 = vtanh.f32 %v1204_v30  ;;  %v3135_v38 = vpop.f32.mrb[16].mxu0 }
 0x128   : > { %v3408_v34 = vpop.eup %3407  ;;  %v3199_v39 = vpop.f32.mrb[16].mxu1  ;;  %3433 = vtanh.f32 %v940_v33  ;;  %v961_v41 = vadd.f32 %v3135_v38, %v3810_v8 }
 0x129   : > { %v3410_v36 = vpop.eup %3409  ;;  %2999 = vst [vmem:[%s3833_s7 + $0x110] sm:$0xff] %v2819_v32   ;;  %v1217_v42 = vadd.f32 %v3199_v39, %v3810_v8  ;;  %v952_v43 = vpop.f32.mrb[17].mxu0  ;;  %3435 = vtanh.f32 %v1196_v35 }
 0x12a   : > { %v3412_v37 = vpop.eup %3411  ;;  %v1208_v44 = vpop.f32.mrb[17].mxu1  ;;  %v953_v47 = vadd.f32 %v3810_v8, %v952_v43  ;;  %3437 = vtanh.f32 %v961_v41 }
 0x12b   : > { %v3414_v40 = vpop.eup %3413  ;;  %v1209_v48 = vadd.f32 %v3810_v8, %v1208_v44  ;;  %v3136_v49 = vpop.f32.mrb[18].mxu0  ;;  %3439 = vtanh.f32 %v1217_v42 }
 0x12c   : > { %v3416_v45 = vpop.eup %3415  ;;  %v2674_v46 = vpack.c.bf16 %v3414_v40, %v3406_v31  ;;  %v3200_v50 = vpop.f32.mrb[18].mxu1  ;;  %v964_v53 = vadd.f32 %v3136_v49, %v3810_v8  ;;  %3441 = vtanh.f32 %v953_v47 }
 0x12d   : > { %v3418_v51 = vpop.eup %3417  ;;  %v2834_v52 = vpack.c.bf16 %v3416_v45, %v3408_v34  ;;  %v955_v54 = vpop.f32.mrb[19].mxu0  ;;  %v1220_v58 = vadd.f32 %v3200_v50, %v3810_v8  ;;  %3443 = vtanh.f32 %v1209_v48 }
 0x12e   : > { %v1211_v55 = vpop.f32.mrb[19].mxu1  ;;  %v3420_v56 = vpop.eup %3419  ;;  %2970 = vst [vmem:[%s3833_s7 + $0x28] sm:$0xff] %v2674_v46   ;;  %v2669_v57 = vpack.c.bf16 %v3418_v51, %v3410_v36  ;;  %v956_v61 = vadd.f32 %v3810_v8, %v955_v54  ;;  %3445 = vtanh.f32 %v964_v53 }
 0x12f   : > { %v3422_v59 = vpop.eup %3421  ;;  %3002 = vst [vmem:[%s3833_s7 + $0x128] sm:$0xff] %v2834_v52   ;;  %v2829_v60 = vpack.c.bf16 %v3420_v56, %v3412_v37  ;;  %v1212_v63 = vadd.f32 %v3810_v8, %v1211_v55  ;;  %3447 = vtanh.f32 %v1220_v58  ;;  %v3139_v2 = vpop.f32.mrb[20].mxu0 }
 0x130   : > { %v3424_v62 = vpop.eup %3423  ;;  %2969 = vst [vmem:[%s3833_s7 + $0x20] sm:$0xff] %v2669_v57   ;;  %v3203_v3 = vpop.f32.mrb[20].mxu1  ;;  %3449 = vtanh.f32 %v956_v61  ;;  %v977_v5 = vadd.f32 %v3139_v2, %v3810_v8 }
 0x131   : > { %v3426_v0 = vpop.eup %3425  ;;  %3001 = vst [vmem:[%s3833_s7 + $0x120] sm:$0xff] %v2829_v60   ;;  %v1233_v6 = vadd.f32 %v3203_v3, %v3810_v8  ;;  %v968_v7 = vpop.f32.mrb[21].mxu0  ;;  %3451 = vtanh.f32 %v1212_v63 }
 0x132   : > { %v3428_v1 = vpop.eup %3427  ;;  %v1224_v9 = vpop.f32.mrb[21].mxu1  ;;  %v969_v12 = vadd.f32 %v3810_v8, %v968_v7  ;;  %3453 = vtanh.f32 %v977_v5 }
 0x133   : > { %v3430_v4 = vpop.eup %3429  ;;  %v1225_v13 = vadd.f32 %v3810_v8, %v1224_v9  ;;  %v3140_v14 = vpop.f32.mrb[22].mxu0  ;;  %3455 = vtanh.f32 %v1233_v6 }
 0x134   : > { %v3432_v10 = vpop.eup %3431  ;;  %v2684_v11 = vpack.c.bf16 %v3430_v4, %v3422_v59  ;;  %v3204_v15 = vpop.f32.mrb[22].mxu1  ;;  %v980_v18 = vadd.f32 %v3140_v14, %v3810_v8  ;;  %3457 = vtanh.f32 %v969_v12 }
 0x135   : > { %v3434_v16 = vpop.eup %3433  ;;  %v2844_v17 = vpack.c.bf16 %v3432_v10, %v3424_v62  ;;  %v971_v19 = vpop.f32.mrb[23].mxu0  ;;  %v1236_v23 = vadd.f32 %v3204_v15, %v3810_v8  ;;  %3459 = vtanh.f32 %v1225_v13 }
 0x136   : > { %v1227_v20 = vpop.f32.mrb[23].mxu1  ;;  %v3436_v21 = vpop.eup %3435  ;;  %2972 = vst [vmem:[%s3833_s7 + $0x38] sm:$0xff] %v2684_v11   ;;  %v2679_v22 = vpack.c.bf16 %v3434_v16, %v3426_v0  ;;  %v972_v26 = vadd.f32 %v3810_v8, %v971_v19  ;;  %3461 = vtanh.f32 %v980_v18 }
 0x137   : > { %v3438_v24 = vpop.eup %3437  ;;  %3004 = vst [vmem:[%s3833_s7 + $0x138] sm:$0xff] %v2844_v17   ;;  %v2839_v25 = vpack.c.bf16 %v3436_v21, %v3428_v1  ;;  %v1228_v28 = vadd.f32 %v3810_v8, %v1227_v20  ;;  %3463 = vtanh.f32 %v1236_v23  ;;  %v3143_v31 = vpop.f32.mrb[24].mxu0 }
 0x138   : > { %v3440_v27 = vpop.eup %3439  ;;  %2971 = vst [vmem:[%s3833_s7 + $0x30] sm:$0xff] %v2679_v22   ;;  %v3207_v32 = vpop.f32.mrb[24].mxu1  ;;  %3465 = vtanh.f32 %v972_v26  ;;  %v993_v34 = vadd.f32 %v3143_v31, %v3810_v8 }
 0x139   : > { %v3442_v29 = vpop.eup %3441  ;;  %3003 = vst [vmem:[%s3833_s7 + $0x130] sm:$0xff] %v2839_v25   ;;  %v1249_v35 = vadd.f32 %v3207_v32, %v3810_v8  ;;  %v984_v36 = vpop.f32.mrb[25].mxu0  ;;  %3467 = vtanh.f32 %v1228_v28 }
 0x13a   : > { %v3444_v30 = vpop.eup %3443  ;;  %v1240_v37 = vpop.f32.mrb[25].mxu1  ;;  %v985_v40 = vadd.f32 %v3810_v8, %v984_v36  ;;  %3469 = vtanh.f32 %v993_v34 }
 0x13b   : > { %v3446_v33 = vpop.eup %3445  ;;  %v1241_v41 = vadd.f32 %v3810_v8, %v1240_v37  ;;  %v3144_v42 = vpop.f32.mrb[26].mxu0  ;;  %3471 = vtanh.f32 %v1249_v35 }
 0x13c   : > { %v3448_v38 = vpop.eup %3447  ;;  %v2694_v39 = vpack.c.bf16 %v3446_v33, %v3438_v24  ;;  %v3208_v43 = vpop.f32.mrb[26].mxu1  ;;  %v996_v46 = vadd.f32 %v3144_v42, %v3810_v8  ;;  %3473 = vtanh.f32 %v985_v40 }
 0x13d   : > { %v3450_v44 = vpop.eup %3449  ;;  %v2854_v45 = vpack.c.bf16 %v3448_v38, %v3440_v27  ;;  %v987_v47 = vpop.f32.mrb[27].mxu0  ;;  %v1252_v51 = vadd.f32 %v3208_v43, %v3810_v8  ;;  %3475 = vtanh.f32 %v1241_v41 }
 0x13e   : > { %v1243_v48 = vpop.f32.mrb[27].mxu1  ;;  %v3452_v49 = vpop.eup %3451  ;;  %2974 = vst [vmem:[%s3833_s7 + $0x48] sm:$0xff] %v2694_v39   ;;  %v2689_v50 = vpack.c.bf16 %v3450_v44, %v3442_v29  ;;  %v988_v54 = vadd.f32 %v3810_v8, %v987_v47  ;;  %3477 = vtanh.f32 %v996_v46 }
 0x13f   : > { %v3454_v52 = vpop.eup %3453  ;;  %3006 = vst [vmem:[%s3833_s7 + $0x148] sm:$0xff] %v2854_v45   ;;  %v2849_v53 = vpack.c.bf16 %v3452_v49, %v3444_v30  ;;  %v1244_v56 = vadd.f32 %v3810_v8, %v1243_v48  ;;  %3479 = vtanh.f32 %v1252_v51  ;;  %v3147_v59 = vpop.f32.mrb[28].mxu0 }
 0x140   : > { %v3456_v55 = vpop.eup %3455  ;;  %2973 = vst [vmem:[%s3833_s7 + $0x40] sm:$0xff] %v2689_v50   ;;  %v3211_v60 = vpop.f32.mrb[28].mxu1  ;;  %3481 = vtanh.f32 %v988_v54  ;;  %v1009_v62 = vadd.f32 %v3147_v59, %v3810_v8 }
 0x141   : > { %v3458_v57 = vpop.eup %3457  ;;  %3005 = vst [vmem:[%s3833_s7 + $0x140] sm:$0xff] %v2849_v53   ;;  %v1265_v63 = vadd.f32 %v3211_v60, %v3810_v8  ;;  %v1000_v0 = vpop.f32.mrb[29].mxu0  ;;  %3483 = vtanh.f32 %v1244_v56 }
 0x142   : > { %v3460_v58 = vpop.eup %3459  ;;  %v1256_v1 = vpop.f32.mrb[29].mxu1  ;;  %v1001_v4 = vadd.f32 %v3810_v8, %v1000_v0  ;;  %3485 = vtanh.f32 %v1009_v62 }
 0x143   : > { %v3462_v61 = vpop.eup %3461  ;;  %v1257_v5 = vadd.f32 %v3810_v8, %v1256_v1  ;;  %v3148_v6 = vpop.f32.mrb[30].mxu0  ;;  %3487 = vtanh.f32 %v1265_v63 }
 0x144   : > { %v3464_v2 = vpop.eup %3463  ;;  %v2704_v3 = vpack.c.bf16 %v3462_v61, %v3454_v52  ;;  %v3212_v7 = vpop.f32.mrb[30].mxu1  ;;  %v1012_v11 = vadd.f32 %v3148_v6, %v3810_v8  ;;  %3489 = vtanh.f32 %v1001_v4 }
 0x145   : > { %v3466_v9 = vpop.eup %3465  ;;  %v2864_v10 = vpack.c.bf16 %v3464_v2, %v3456_v55  ;;  %v1003_v12 = vpop.f32.mrb[31].mxu0  ;;  %v1268_v16 = vadd.f32 %v3212_v7, %v3810_v8  ;;  %3491 = vtanh.f32 %v1257_v5 }
 0x146   : > { %v1259_v13 = vpop.f32.mrb[31].mxu1  ;;  %v3468_v14 = vpop.eup %3467  ;;  %2976 = vst [vmem:[%s3833_s7 + $0x58] sm:$0xff] %v2704_v3   ;;  %v2699_v15 = vpack.c.bf16 %v3466_v9, %v3458_v57  ;;  %v1004_v19 = vadd.f32 %v3810_v8, %v1003_v12  ;;  %3493 = vtanh.f32 %v1012_v11 }
 0x147   : > { %v3470_v17 = vpop.eup %3469  ;;  %3008 = vst [vmem:[%s3833_s7 + $0x158] sm:$0xff] %v2864_v10   ;;  %v2859_v18 = vpack.c.bf16 %v3468_v14, %v3460_v58  ;;  %v1260_v21 = vadd.f32 %v3810_v8, %v1259_v13  ;;  %3495 = vtanh.f32 %v1268_v16  ;;  %v3151_v24 = vpop.f32.mrb[32].mxu0 }
 0x148   : > { %v3472_v20 = vpop.eup %3471  ;;  %2975 = vst [vmem:[%s3833_s7 + $0x50] sm:$0xff] %v2699_v15   ;;  %v3215_v25 = vpop.f32.mrb[32].mxu1  ;;  %3497 = vtanh.f32 %v1004_v19  ;;  %v1025_v27 = vadd.f32 %v3151_v24, %v3810_v8 }
 0x149   : > { %v3474_v22 = vpop.eup %3473  ;;  %3007 = vst [vmem:[%s3833_s7 + $0x150] sm:$0xff] %v2859_v18   ;;  %v1281_v28 = vadd.f32 %v3215_v25, %v3810_v8  ;;  %v1016_v29 = vpop.f32.mrb[33].mxu0  ;;  %3499 = vtanh.f32 %v1260_v21 }
 0x14a   : > { %v3476_v23 = vpop.eup %3475  ;;  %v1272_v30 = vpop.f32.mrb[33].mxu1  ;;  %v1017_v33 = vadd.f32 %v3810_v8, %v1016_v29  ;;  %3501 = vtanh.f32 %v1025_v27 }
 0x14b   : > { %v3478_v26 = vpop.eup %3477  ;;  %v1273_v34 = vadd.f32 %v3810_v8, %v1272_v30  ;;  %v3152_v35 = vpop.f32.mrb[34].mxu0  ;;  %3503 = vtanh.f32 %v1281_v28 }
 0x14c   : > { %v3480_v31 = vpop.eup %3479  ;;  %v2714_v32 = vpack.c.bf16 %v3478_v26, %v3470_v17  ;;  %v3216_v36 = vpop.f32.mrb[34].mxu1  ;;  %v1028_v39 = vadd.f32 %v3152_v35, %v3810_v8  ;;  %3505 = vtanh.f32 %v1017_v33 }
 0x14d   : > { %v3482_v37 = vpop.eup %3481  ;;  %v2874_v38 = vpack.c.bf16 %v3480_v31, %v3472_v20  ;;  %v1019_v40 = vpop.f32.mrb[35].mxu0  ;;  %v1284_v44 = vadd.f32 %v3216_v36, %v3810_v8  ;;  %3507 = vtanh.f32 %v1273_v34 }
 0x14e   : > { %v1275_v41 = vpop.f32.mrb[35].mxu1  ;;  %v3484_v42 = vpop.eup %3483  ;;  %2978 = vst [vmem:[%s3833_s7 + $0x68] sm:$0xff] %v2714_v32   ;;  %v2709_v43 = vpack.c.bf16 %v3482_v37, %v3474_v22  ;;  %v1020_v47 = vadd.f32 %v3810_v8, %v1019_v40  ;;  %3509 = vtanh.f32 %v1028_v39 }
 0x14f   : > { %v3486_v45 = vpop.eup %3485  ;;  %3010 = vst [vmem:[%s3833_s7 + $0x168] sm:$0xff] %v2874_v38   ;;  %v2869_v46 = vpack.c.bf16 %v3484_v42, %v3476_v23  ;;  %v1276_v49 = vadd.f32 %v3810_v8, %v1275_v41  ;;  %3511 = vtanh.f32 %v1284_v44  ;;  %v3155_v52 = vpop.f32.mrb[36].mxu0 }
 0x150   : > { %v3488_v48 = vpop.eup %3487  ;;  %2977 = vst [vmem:[%s3833_s7 + $0x60] sm:$0xff] %v2709_v43   ;;  %v3219_v53 = vpop.f32.mrb[36].mxu1  ;;  %3513 = vtanh.f32 %v1020_v47  ;;  %v1041_v55 = vadd.f32 %v3155_v52, %v3810_v8 }
 0x151   : > { %v3490_v50 = vpop.eup %3489  ;;  %3009 = vst [vmem:[%s3833_s7 + $0x160] sm:$0xff] %v2869_v46   ;;  %v1297_v56 = vadd.f32 %v3219_v53, %v3810_v8  ;;  %v1032_v57 = vpop.f32.mrb[37].mxu0  ;;  %3515 = vtanh.f32 %v1276_v49 }
 0x152   : > { %v3492_v51 = vpop.eup %3491  ;;  %v1288_v58 = vpop.f32.mrb[37].mxu1  ;;  %v1033_v61 = vadd.f32 %v3810_v8, %v1032_v57  ;;  %3517 = vtanh.f32 %v1041_v55 }
 0x153   : > { %v3494_v54 = vpop.eup %3493  ;;  %v1289_v62 = vadd.f32 %v3810_v8, %v1288_v58  ;;  %v3156_v63 = vpop.f32.mrb[38].mxu0  ;;  %3519 = vtanh.f32 %v1297_v56 }
 0x154   : > { %v3496_v59 = vpop.eup %3495  ;;  %v2724_v60 = vpack.c.bf16 %v3494_v54, %v3486_v45  ;;  %v3220_v0 = vpop.f32.mrb[38].mxu1  ;;  %v1044_v3 = vadd.f32 %v3156_v63, %v3810_v8  ;;  %3521 = vtanh.f32 %v1033_v61 }
 0x155   : > { %v3498_v1 = vpop.eup %3497  ;;  %v2884_v2 = vpack.c.bf16 %v3496_v59, %v3488_v48  ;;  %v1035_v4 = vpop.f32.mrb[39].mxu0  ;;  %v1300_v9 = vadd.f32 %v3220_v0, %v3810_v8  ;;  %3523 = vtanh.f32 %v1289_v62 }
 0x156   : > { %v1291_v5 = vpop.f32.mrb[39].mxu1  ;;  %v3500_v6 = vpop.eup %3499  ;;  %2980 = vst [vmem:[%s3833_s7 + $0x78] sm:$0xff] %v2724_v60   ;;  %v2719_v7 = vpack.c.bf16 %v3498_v1, %v3490_v50  ;;  %v1036_v12 = vadd.f32 %v3810_v8, %v1035_v4  ;;  %3525 = vtanh.f32 %v1044_v3 }
 0x157   : > { %v3502_v10 = vpop.eup %3501  ;;  %3012 = vst [vmem:[%s3833_s7 + $0x178] sm:$0xff] %v2884_v2   ;;  %v2879_v11 = vpack.c.bf16 %v3500_v6, %v3492_v51  ;;  %v1292_v14 = vadd.f32 %v3810_v8, %v1291_v5  ;;  %3527 = vtanh.f32 %v1300_v9  ;;  %v3159_v17 = vpop.f32.mrb[40].mxu0 }
 0x158   : > { %v3504_v13 = vpop.eup %3503  ;;  %2979 = vst [vmem:[%s3833_s7 + $0x70] sm:$0xff] %v2719_v7   ;;  %v3223_v18 = vpop.f32.mrb[40].mxu1  ;;  %3529 = vtanh.f32 %v1036_v12  ;;  %v1057_v20 = vadd.f32 %v3159_v17, %v3810_v8 }
 0x159   : > { %v3506_v15 = vpop.eup %3505  ;;  %3011 = vst [vmem:[%s3833_s7 + $0x170] sm:$0xff] %v2879_v11   ;;  %v1313_v21 = vadd.f32 %v3223_v18, %v3810_v8  ;;  %v1048_v22 = vpop.f32.mrb[41].mxu0  ;;  %3531 = vtanh.f32 %v1292_v14 }
 0x15a   : > { %v3508_v16 = vpop.eup %3507  ;;  %v1304_v23 = vpop.f32.mrb[41].mxu1  ;;  %v1049_v26 = vadd.f32 %v3810_v8, %v1048_v22  ;;  %3533 = vtanh.f32 %v1057_v20 }
 0x15b   : > { %v3510_v19 = vpop.eup %3509  ;;  %v1305_v27 = vadd.f32 %v3810_v8, %v1304_v23  ;;  %v3160_v28 = vpop.f32.mrb[42].mxu0  ;;  %3535 = vtanh.f32 %v1313_v21 }
 0x15c   : > { %v3512_v24 = vpop.eup %3511  ;;  %v2734_v25 = vpack.c.bf16 %v3510_v19, %v3502_v10  ;;  %v3224_v29 = vpop.f32.mrb[42].mxu1  ;;  %v1060_v32 = vadd.f32 %v3160_v28, %v3810_v8  ;;  %3537 = vtanh.f32 %v1049_v26 }
 0x15d   : > { %v3514_v30 = vpop.eup %3513  ;;  %v2894_v31 = vpack.c.bf16 %v3512_v24, %v3504_v13  ;;  %v1051_v33 = vpop.f32.mrb[43].mxu0  ;;  %v1316_v37 = vadd.f32 %v3224_v29, %v3810_v8  ;;  %3539 = vtanh.f32 %v1305_v27 }
 0x15e   : > { %v1307_v34 = vpop.f32.mrb[43].mxu1  ;;  %v3516_v35 = vpop.eup %3515  ;;  %2982 = vst [vmem:[%s3833_s7 + $0x88] sm:$0xff] %v2734_v25   ;;  %v2729_v36 = vpack.c.bf16 %v3514_v30, %v3506_v15  ;;  %v1052_v40 = vadd.f32 %v3810_v8, %v1051_v33  ;;  %3541 = vtanh.f32 %v1060_v32 }
 0x15f   : > { %v3518_v38 = vpop.eup %3517  ;;  %3014 = vst [vmem:[%s3833_s7 + $0x188] sm:$0xff] %v2894_v31   ;;  %v2889_v39 = vpack.c.bf16 %v3516_v35, %v3508_v16  ;;  %v1308_v42 = vadd.f32 %v3810_v8, %v1307_v34  ;;  %3543 = vtanh.f32 %v1316_v37  ;;  %v3163_v45 = vpop.f32.mrb[44].mxu0 }
 0x160   : > { %v3520_v41 = vpop.eup %3519  ;;  %2981 = vst [vmem:[%s3833_s7 + $0x80] sm:$0xff] %v2729_v36   ;;  %v3227_v46 = vpop.f32.mrb[44].mxu1  ;;  %3545 = vtanh.f32 %v1052_v40  ;;  %v1073_v48 = vadd.f32 %v3163_v45, %v3810_v8 }
 0x161   : > { %v3522_v43 = vpop.eup %3521  ;;  %3013 = vst [vmem:[%s3833_s7 + $0x180] sm:$0xff] %v2889_v39   ;;  %v1329_v49 = vadd.f32 %v3227_v46, %v3810_v8  ;;  %v1064_v50 = vpop.f32.mrb[45].mxu0  ;;  %3547 = vtanh.f32 %v1308_v42 }
 0x162   : > { %v3524_v44 = vpop.eup %3523  ;;  %v1320_v51 = vpop.f32.mrb[45].mxu1  ;;  %v1065_v54 = vadd.f32 %v3810_v8, %v1064_v50  ;;  %3549 = vtanh.f32 %v1073_v48 }
 0x163   : > { %v3526_v47 = vpop.eup %3525  ;;  %v1321_v55 = vadd.f32 %v3810_v8, %v1320_v51  ;;  %v3164_v56 = vpop.f32.mrb[46].mxu0  ;;  %3551 = vtanh.f32 %v1329_v49 }
 0x164   : > { %v3528_v52 = vpop.eup %3527  ;;  %v2744_v53 = vpack.c.bf16 %v3526_v47, %v3518_v38  ;;  %v3228_v57 = vpop.f32.mrb[46].mxu1  ;;  %v1076_v60 = vadd.f32 %v3164_v56, %v3810_v8  ;;  %3553 = vtanh.f32 %v1065_v54 }
 0x165   : > { %v3530_v58 = vpop.eup %3529  ;;  %v2904_v59 = vpack.c.bf16 %v3528_v52, %v3520_v41  ;;  %v1067_v61 = vpop.f32.mrb[47].mxu0  ;;  %v1332_v1 = vadd.f32 %v3228_v57, %v3810_v8  ;;  %3555 = vtanh.f32 %v1321_v55 }
 0x166   : > { %v1323_v62 = vpop.f32.mrb[47].mxu1  ;;  %v3532_v63 = vpop.eup %3531  ;;  %2984 = vst [vmem:[%s3833_s7 + $0x98] sm:$0xff] %v2744_v53   ;;  %v2739_v0 = vpack.c.bf16 %v3530_v58, %v3522_v43  ;;  %v1068_v4 = vadd.f32 %v3810_v8, %v1067_v61  ;;  %3557 = vtanh.f32 %v1076_v60  ;;  %v3976_v58 = vld [vmem:[%s4033_s2] ss:$0 sm:$0xff] }
 0x167   : > { %v3534_v2 = vpop.eup %3533  ;;  %3016 = vst [vmem:[%s3833_s7 + $0x198] sm:$0xff] %v2904_v59   ;;  %v2899_v3 = vpack.c.bf16 %v3532_v63, %v3524_v44  ;;  %v1324_v6 = vadd.f32 %v3810_v8, %v1323_v62  ;;  %3559 = vtanh.f32 %v1332_v1  ;;  %v3167_v10 = vpop.f32.mrb[48].mxu0 }
 0x168   : > { %v3536_v5 = vpop.eup %3535  ;;  %2983 = vst [vmem:[%s3833_s7 + $0x90] sm:$0xff] %v2739_v0   ;;  %v3231_v11 = vpop.f32.mrb[48].mxu1  ;;  %3561 = vtanh.f32 %v1068_v4  ;;  %v1089_v13 = vadd.f32 %v3167_v10, %v3810_v8 }
 0x169   : > { %v3538_v7 = vpop.eup %3537  ;;  %3015 = vst [vmem:[%s3833_s7 + $0x190] sm:$0xff] %v2899_v3   ;;  %v1345_v14 = vadd.f32 %v3231_v11, %v3810_v8  ;;  %v1080_v15 = vpop.f32.mrb[49].mxu0  ;;  %3563 = vtanh.f32 %v1324_v6 }
 0x16a   : > { %v3540_v9 = vpop.eup %3539  ;;  %v1336_v16 = vpop.f32.mrb[49].mxu1  ;;  %v1081_v19 = vadd.f32 %v3810_v8, %v1080_v15  ;;  %3565 = vtanh.f32 %v1089_v13 }
 0x16b   : > { %v3542_v12 = vpop.eup %3541  ;;  %v1337_v20 = vadd.f32 %v3810_v8, %v1336_v16  ;;  %v3168_v21 = vpop.f32.mrb[50].mxu0  ;;  %3567 = vtanh.f32 %v1345_v14 }
 0x16c   : > { %v3544_v17 = vpop.eup %3543  ;;  %v2754_v18 = vpack.c.bf16 %v3542_v12, %v3534_v2  ;;  %v3232_v22 = vpop.f32.mrb[50].mxu1  ;;  %v1092_v25 = vadd.f32 %v3168_v21, %v3810_v8  ;;  %3569 = vtanh.f32 %v1081_v19 }
 0x16d   : > { %v3546_v23 = vpop.eup %3545  ;;  %v2914_v24 = vpack.c.bf16 %v3544_v17, %v3536_v5  ;;  %v1083_v26 = vpop.f32.mrb[51].mxu0  ;;  %v1348_v30 = vadd.f32 %v3232_v22, %v3810_v8  ;;  %3571 = vtanh.f32 %v1337_v20 }
 0x16e   : > { %v1339_v27 = vpop.f32.mrb[51].mxu1  ;;  %v3548_v28 = vpop.eup %3547  ;;  %2986 = vst [vmem:[%s3833_s7 + $0xa8] sm:$0xff] %v2754_v18   ;;  %v2749_v29 = vpack.c.bf16 %v3546_v23, %v3538_v7  ;;  %v1084_v33 = vadd.f32 %v3810_v8, %v1083_v26  ;;  %3573 = vtanh.f32 %v1092_v25 }
 0x16f   : > { %v3550_v31 = vpop.eup %3549  ;;  %3018 = vst [vmem:[%s3833_s7 + $0x1a8] sm:$0xff] %v2914_v24   ;;  %v2909_v32 = vpack.c.bf16 %v3548_v28, %v3540_v9  ;;  %v1340_v35 = vadd.f32 %v3810_v8, %v1339_v27  ;;  %3575 = vtanh.f32 %v1348_v30  ;;  %v3171_v38 = vpop.f32.mrb[52].mxu0 }
 0x170   : > { %v3552_v34 = vpop.eup %3551  ;;  %2985 = vst [vmem:[%s3833_s7 + $0xa0] sm:$0xff] %v2749_v29   ;;  %v3235_v39 = vpop.f32.mrb[52].mxu1  ;;  %3577 = vtanh.f32 %v1084_v33  ;;  %v1105_v41 = vadd.f32 %v3171_v38, %v3810_v8 }
 0x171   : > { %v3554_v36 = vpop.eup %3553  ;;  %3017 = vst [vmem:[%s3833_s7 + $0x1a0] sm:$0xff] %v2909_v32   ;;  %v1361_v42 = vadd.f32 %v3235_v39, %v3810_v8  ;;  %v1096_v43 = vpop.f32.mrb[53].mxu0  ;;  %3579 = vtanh.f32 %v1340_v35 }
 0x172   : > { %v3556_v37 = vpop.eup %3555  ;;  %v1352_v44 = vpop.f32.mrb[53].mxu1  ;;  %v1097_v47 = vadd.f32 %v3810_v8, %v1096_v43  ;;  %3581 = vtanh.f32 %v1105_v41 }
 0x173   : > { %v3558_v40 = vpop.eup %3557  ;;  %v1353_v48 = vadd.f32 %v3810_v8, %v1352_v44  ;;  %v3172_v49 = vpop.f32.mrb[54].mxu0  ;;  %3583 = vtanh.f32 %v1361_v42 }
 0x174   : > { %v3560_v45 = vpop.eup %3559  ;;  %v2764_v46 = vpack.c.bf16 %v3558_v40, %v3550_v31  ;;  %v3236_v50 = vpop.f32.mrb[54].mxu1  ;;  %v1108_v53 = vadd.f32 %v3172_v49, %v3810_v8  ;;  %3585 = vtanh.f32 %v1097_v47 }
 0x175   : > { %v3562_v51 = vpop.eup %3561  ;;  %v2924_v52 = vpack.c.bf16 %v3560_v45, %v3552_v34  ;;  %v1099_v54 = vpop.f32.mrb[55].mxu0  ;;  %v1364_v59 = vadd.f32 %v3976_v58, %v3236_v50  ;;  %3587 = vtanh.f32 %v1353_v48 }
 0x176   : > { %v1355_v55 = vpop.f32.mrb[55].mxu1  ;;  %v3564_v56 = vpop.eup %3563  ;;  %2988 = vst [vmem:[%s3833_s7 + $0xb8] sm:$0xff] %v2764_v46   ;;  %v2759_v57 = vpack.c.bf16 %v3562_v51, %v3554_v36  ;;  %v1100_v8 = vadd.f32 %v3976_v58, %v1099_v54  ;;  %3589 = vtanh.f32 %v1108_v53 }
 0x177   : > { %v3566_v60 = vpop.eup %3565  ;;  %3020 = vst [vmem:[%s3833_s7 + $0x1b8] sm:$0xff] %v2924_v52   ;;  %v2919_v61 = vpack.c.bf16 %v3564_v56, %v3556_v37  ;;  %v1356_v63 = vadd.f32 %v3976_v58, %v1355_v55  ;;  %3591 = vtanh.f32 %v1364_v59  ;;  %v3175_v2 = vpop.f32.mrb[56].mxu0 }
 0x178   : > { %v3568_v62 = vpop.eup %3567  ;;  %2987 = vst [vmem:[%s3833_s7 + $0xb0] sm:$0xff] %v2759_v57   ;;  %v3239_v3 = vpop.f32.mrb[56].mxu1  ;;  %3593 = vtanh.f32 %v1100_v8  ;;  %v1121_v5 = vadd.f32 %v3976_v58, %v3175_v2 }
 0x179   : > { %v3570_v0 = vpop.eup %3569  ;;  %3019 = vst [vmem:[%s3833_s7 + $0x1b0] sm:$0xff] %v2919_v61   ;;  %v1377_v6 = vadd.f32 %v3976_v58, %v3239_v3  ;;  %v1112_v7 = vpop.f32.mrb[57].mxu0  ;;  %3595 = vtanh.f32 %v1356_v63 }
 0x17a   : > { %v3572_v1 = vpop.eup %3571  ;;  %v1368_v9 = vpop.f32.mrb[57].mxu1  ;;  %v1113_v12 = vadd.f32 %v3976_v58, %v1112_v7  ;;  %3597 = vtanh.f32 %v1121_v5 }
 0x17b   : > { %v3574_v4 = vpop.eup %3573  ;;  %v1369_v13 = vadd.f32 %v3976_v58, %v1368_v9  ;;  %v3176_v14 = vpop.f32.mrb[58].mxu0  ;;  %3599 = vtanh.f32 %v1377_v6 }
 0x17c   : > { %v3576_v10 = vpop.eup %3575  ;;  %v2774_v11 = vpack.c.bf16 %v3574_v4, %v3566_v60  ;;  %v3240_v15 = vpop.f32.mrb[58].mxu1  ;;  %v1124_v18 = vadd.f32 %v3976_v58, %v3176_v14  ;;  %3601 = vtanh.f32 %v1113_v12 }
 0x17d   : > { %v3578_v16 = vpop.eup %3577  ;;  %v2934_v17 = vpack.c.bf16 %v3576_v10, %v3568_v62  ;;  %v1115_v19 = vpop.f32.mrb[59].mxu0  ;;  %v1380_v23 = vadd.f32 %v3976_v58, %v3240_v15  ;;  %3603 = vtanh.f32 %v1369_v13 }
 0x17e   : > { %v1371_v20 = vpop.f32.mrb[59].mxu1  ;;  %v3580_v21 = vpop.eup %3579  ;;  %2990 = vst [vmem:[%s3833_s7 + $0xc8] sm:$0xff] %v2774_v11   ;;  %v2769_v22 = vpack.c.bf16 %v3578_v16, %v3570_v0  ;;  %v1116_v26 = vadd.f32 %v3976_v58, %v1115_v19  ;;  %3605 = vtanh.f32 %v1124_v18 }
 0x17f   : > { %v3582_v24 = vpop.eup %3581  ;;  %3022 = vst [vmem:[%s3833_s7 + $0x1c8] sm:$0xff] %v2934_v17   ;;  %v2929_v25 = vpack.c.bf16 %v3580_v21, %v3572_v1  ;;  %v1372_v28 = vadd.f32 %v3976_v58, %v1371_v20  ;;  %3607 = vtanh.f32 %v1380_v23  ;;  %v3179_v31 = vpop.f32.mrb[60].mxu0 }
 0x180   : > { %v3584_v27 = vpop.eup %3583  ;;  %2989 = vst [vmem:[%s3833_s7 + $0xc0] sm:$0xff] %v2769_v22   ;;  %v3243_v32 = vpop.f32.mrb[60].mxu1  ;;  %3609 = vtanh.f32 %v1116_v26  ;;  %v1137_v34 = vadd.f32 %v3976_v58, %v3179_v31 }
 0x181   : > { %v3586_v29 = vpop.eup %3585  ;;  %3021 = vst [vmem:[%s3833_s7 + $0x1c0] sm:$0xff] %v2929_v25   ;;  %v1393_v35 = vadd.f32 %v3976_v58, %v3243_v32  ;;  %v1128_v36 = vpop.f32.mrb[61].mxu0  ;;  %3611 = vtanh.f32 %v1372_v28 }
 0x182   : > { %v3588_v30 = vpop.eup %3587  ;;  %v1384_v37 = vpop.f32.mrb[61].mxu1  ;;  %v1129_v40 = vadd.f32 %v3976_v58, %v1128_v36  ;;  %3613 = vtanh.f32 %v1137_v34 }
 0x183   : > { %v3590_v33 = vpop.eup %3589  ;;  %v1385_v41 = vadd.f32 %v3976_v58, %v1384_v37  ;;  %v3180_v42 = vpop.f32.mrb[62].mxu0  ;;  %3615 = vtanh.f32 %v1393_v35 }
 0x184   : > { %v3592_v38 = vpop.eup %3591  ;;  %v2784_v39 = vpack.c.bf16 %v3590_v33, %v3582_v24  ;;  %v3244_v43 = vpop.f32.mrb[62].mxu1  ;;  %v1140_v46 = vadd.f32 %v3976_v58, %v3180_v42  ;;  %3617 = vtanh.f32 %v1129_v40 }
 0x185   : > { %v3594_v44 = vpop.eup %3593  ;;  %v2944_v45 = vpack.c.bf16 %v3592_v38, %v3584_v27  ;;  %v1131_v47 = vpop.f32.mrb[63].mxu0  ;;  %v1396_v51 = vadd.f32 %v3976_v58, %v3244_v43  ;;  %3619 = vtanh.f32 %v1385_v41 }
 0x186   : > { %v1387_v48 = vpop.f32.mrb[63].mxu1  ;;  %v3596_v49 = vpop.eup %3595  ;;  %2992 = vst [vmem:[%s3833_s7 + $0xd8] sm:$0xff] %v2784_v39   ;;  %v2779_v50 = vpack.c.bf16 %v3594_v44, %v3586_v29  ;;  %v1132_v54 = vadd.f32 %v3976_v58, %v1131_v47  ;;  %3621 = vtanh.f32 %v1140_v46 }
 0x187   : > { %v3598_v52 = vpop.eup %3597  ;;  %3024 = vst [vmem:[%s3833_s7 + $0x1d8] sm:$0xff] %v2944_v45   ;;  %v2939_v53 = vpack.c.bf16 %v3596_v49, %v3588_v30  ;;  %v1388_v56 = vadd.f32 %v3976_v58, %v1387_v48  ;;  %3623 = vtanh.f32 %v1396_v51 }
 0x188   : > { %v3600_v55 = vpop.eup %3599  ;;  %2991 = vst [vmem:[%s3833_s7 + $0xd0] sm:$0xff] %v2779_v50   ;;  %3625 = vtanh.f32 %v1132_v54 }
 0x189   : > { %v3602_v57 = vpop.eup %3601  ;;  %3023 = vst [vmem:[%s3833_s7 + $0x1d0] sm:$0xff] %v2939_v53   ;;  %3627 = vtanh.f32 %v1388_v56 }
 0x18a   : > { %v3604_v59 = vpop.eup %3603 }
 0x18b   : > { %v3606_v60 = vpop.eup %3605 }
 0x18c   : > { %v3608_v61 = vpop.eup %3607  ;;  %v2794_v8 = vpack.c.bf16 %v3606_v60, %v3598_v52 }
 0x18d   : > { %v3610_v62 = vpop.eup %3609  ;;  %v2954_v63 = vpack.c.bf16 %v3608_v61, %v3600_v55 }
 0x18e   : > { %v3612_v0 = vpop.eup %3611  ;;  %2994 = vst [vmem:[%s3833_s7 + $0xe8] sm:$0xff] %v2794_v8   ;;  %v2789_v1 = vpack.c.bf16 %v3610_v62, %v3602_v57 }
 0x18f   : > { %v3614_v58 = vpop.eup %3613  ;;  %3026 = vst [vmem:[%s3833_s7 + $0x1e8] sm:$0xff] %v2954_v63   ;;  %v2949_v2 = vpack.c.bf16 %v3612_v0, %v3604_v59 }
 0x190   : > { %v3616_v3 = vpop.eup %3615  ;;  %2993 = vst [vmem:[%s3833_s7 + $0xe0] sm:$0xff] %v2789_v1  }
 0x191   : > { %v3618_v4 = vpop.eup %3617  ;;  %3025 = vst [vmem:[%s3833_s7 + $0x1e0] sm:$0xff] %v2949_v2  }
 0x192   : > { %v3620_v5 = vpop.eup %3619 }
 0x193   : > { %v3622_v6 = vpop.eup %3621 }
 0x194   : > { %v3624_v7 = vpop.eup %3623  ;;  %v2804_v9 = vpack.c.bf16 %v3622_v6, %v3614_v58 }
 0x195   : > { %v3626_v10 = vpop.eup %3625  ;;  %v2964_v11 = vpack.c.bf16 %v3624_v7, %v3616_v3 }
 0x196   : > { %v3628_v12 = vpop.eup %3627  ;;  %2996 = vst [vmem:[%s3833_s7 + $0xf8] sm:$0xff] %v2804_v9   ;;  %v2799_v13 = vpack.c.bf16 %v3626_v10, %v3618_v4 }
 0x197   : > { %3028 = vst [vmem:[%s3833_s7 + $0x1f8] sm:$0xff] %v2964_v11   ;;  %v2959_v14 = vpack.c.bf16 %v3628_v12, %v3620_v5 }
 0x198   : > { %2995 = vst [vmem:[%s3833_s7 + $0xf0] sm:$0xff] %v2799_v13  }
 0x199   : > { %3027 = vst [vmem:[%s3833_s7 + $0x1f0] sm:$0xff] %v2959_v14  }
 0x19a PF: > { %s13_s16 = sadd.s32 1, %s3668_s16   ;;  %s4035_s12 = smov %s3660_s14 }
 0x19b   : > { %p10_p7 = scmp.ge.s32.totalorder %s13_s16, 10   ;;  %s4036_s13 = smov %s3664_s15 }
 0x19c   : > { %s4037_s14 = smov %s4040_s17  ;;  %s4038_s15 = smov %s4044_s18 }
 0x19d   :  { %12 = sbr.rel (!%p10_p7) target bundleno = 3 (0x3), region = 68 }

</bundles_post_ra>
